<compile_context>
chip_gen: v7x
topology: tpu7x:2x2x1
jax: 0.10.0
libtpu: 0.0.40
codegen_flags: <defaults>
</compile_context>

<pallas_src>
import functools

import numpy as np
import jax
import jax.numpy as jnp
from jax import lax
from jax.experimental import pallas as pl
from jax.experimental.pallas import tpu as pltpu

_BIG = 1e30          # finite "infinity" sentinel for the DTW table
_PB = 128            # pairs per grid block -> one lane-dense (1, 128) output store


# --------------------------- in-kernel helpers --------------------------------
def _acf_rows(z, n):
    """autocorr(): lag 1..5 rows; each latent column normalized by max |acf|.

    z: (n, dz, PB) with the pair axis on lanes.  Returns five (1, dz, PB) rows.
    (No eps in the denominator, matching the PyTorch reference.)
    """
    mean = jnp.sum(z, axis=0, keepdims=True) * (1.0 / n)
    zc = z - mean
    rows = [jnp.sum(zc[: n - lag] * zc[lag:], axis=0, keepdims=True)
            for lag in range(1, 6)]
    denom = jnp.abs(rows[0])
    for r in rows[1:]:
        denom = jnp.maximum(denom, jnp.abs(r))
    inv = 1.0 / denom                      # hoisted: one divide per sequence
    return [r * inv for r in rows]


# ------------------------------- kernel ---------------------------------------
def _cost_kernel(x_i_ref, x_j_ref, z_i_ref, z_j_ref, out_ref, *, w, n):
    f32 = jnp.float32
    x_i = x_i_ref[...].astype(f32)         # (n, dx, PB)
    x_j = x_j_ref[...].astype(f32)
    z_i = z_i_ref[...].astype(f32)         # (n, dz, PB)
    z_j = z_j_ref[...].astype(f32)
    pb = x_i_ref.shape[2]

    # ---- "same sample" short-circuit as a per-pair masked select -------------
    eq_x = jnp.min(jnp.min(jnp.where(x_i == x_j, 1.0, 0.0),
                           axis=1, keepdims=True), axis=0, keepdims=True)
    eq_z = jnp.min(jnp.min(jnp.where(z_i == z_j, 1.0, 0.0),
                           axis=1, keepdims=True), axis=0, keepdims=True)
    same = eq_x * eq_z                                     # (1, 1, PB)

    # ---- d_time: DTW over the normalized pairwise distance matrix ------------
    inv_i = 1.0 / (jnp.sqrt(jnp.sum(x_i * x_i, axis=1, keepdims=True)) + 1e-8)
    inv_j = 1.0 / (jnp.sqrt(jnp.sum(x_j * x_j, axis=1, keepdims=True)) + 1e-8)
    xi_n = x_i * inv_i
    xj_n = x_j * inv_j

    # Direct-difference cdist (no MXU, better precision than the gram trick).
    # c2[a, b, p] = ||xi_n[b, :, p] - xj_n[a, :, p]||^2 : a transposed cost
    # matrix, which leaves the DTW distance unchanged (n == m, symmetric DP).
    jj = lax.broadcasted_iota(jnp.int32, (n, n, pb), 1)    # sublane (j) index
    c2 = jnp.zeros((n, n, pb), f32)
    for i in range(n):
        diff = xi_n[i:i + 1] - xj_n                        # (n, dx, PB)
        d2 = jnp.sum(diff * diff, axis=1, keepdims=True)   # (n, 1, PB)
        c2 = jnp.where(jj == i, d2, c2)
    dmat = jnp.sqrt(c2)
    dmax = jnp.max(jnp.max(dmat, axis=1, keepdims=True), axis=0, keepdims=True)
    dmat = dmat * (1.0 / (dmax + 1e-8))                    # (n, n, PB)

    # DTW as 2n-1 relaxation sweeps: after sweep k every cell on anti-diagonals
    # <= k-1 holds its final DP value, so no per-diagonal masks are needed.
    # Shifts: leading-axis concat (i-1) and sublane roll (j-1) -- MXU stays idle.
    big_row = jnp.full((1, n, pb), _BIG, f32)
    origin = jnp.concatenate(
        [jnp.where(jj[:1] == 0, 0.0, _BIG),
         jnp.full((n - 1, n, pb), _BIG, f32)], axis=0)     # 0 only at (0, 0, :)

    def _sweep(_, r):
        up = jnp.concatenate([big_row, r[:-1]], axis=0)                     # R[i-1, j]
        left = jnp.where(jj == 0, _BIG, pltpu.roll(r, shift=1, axis=1))     # R[i, j-1]
        upleft = jnp.concatenate([big_row, left[:-1]], axis=0)              # R[i-1, j-1]
        return dmat + jnp.minimum(jnp.minimum(up, left),
                                  jnp.minimum(upleft, origin))

    r = jnp.full((n, n, pb), _BIG, f32)
    n_sweeps = 2 * n - 1
    if n_sweeps <= 24:                  # small n: full unroll (LLO sees the chain)
        for _ in range(n_sweeps):
            r = _sweep(None, r)
    else:                               # large n: bound code size / vreg pressure
        r = lax.fori_loop(0, n_sweeps, _sweep, r)
    d_time = jnp.abs(r[n - 1:n, n - 1:n, :])               # (1, 1, PB)

    # ---- d_latent -------------------------------------------------------------
    dz_ij = z_i - z_j
    d_latent = jnp.sqrt(jnp.sum(jnp.sum(dz_ij * dz_ij, axis=1, keepdims=True),
                                axis=0, keepdims=True)) * (1.0 / n)

    # ---- d_acf ----------------------------------------------------------------
    acf_i = _acf_rows(z_i, n)
    acf_j = _acf_rows(z_j, n)
    d_acf = jnp.zeros((1, 1, pb), f32)
    for ai, aj in zip(acf_i, acf_j):
        d_acf = d_acf + jnp.sum(jnp.abs(ai - aj), axis=1, keepdims=True)

    total = w[0] * d_time + w[1] * d_latent + w[2] * d_acf
    # single dense (1, PB) lane store per block
    out_ref[...] = jnp.where(same > 0.5, 0.0, total)[0]


# ------------------------------- wrappers --------------------------------------
def time_aware_cost_batch(x_i, x_j, z_i, z_j, w=(0.4, 0.4, 0.2)):
    """Batched TimeAwareCost: inputs (B, seq, feat) -> costs (B,)."""
    x_i, x_j, z_i, z_j = (jnp.asarray(a, jnp.float32) for a in (x_i, x_j, z_i, z_j))
    B, n, dx = x_i.shape
    _, _, dz = z_i.shape
    assert x_j.shape == (B, n, dx) and z_i.shape == (B, n, dz) and z_j.shape == (B, n, dz)
    assert n >= 6, "autocorr uses lags 1..5, need seq_len >= 6"

    bp = pl.cdiv(B, _PB) * _PB
    if bp != B:
        # zero padding is safe: padded pairs hit the identical-sample mask -> 0,
        # and they are sliced off below anyway.
        pad = ((0, bp - B), (0, 0), (0, 0))
        x_i, x_j, z_i, z_j = (jnp.pad(a, pad) for a in (x_i, x_j, z_i, z_j))

    # pair axis -> lanes (layout plumbing outside the kernel)
    xt_i, xt_j = (jnp.transpose(a, (1, 2, 0)) for a in (x_i, x_j))
    zt_i, zt_j = (jnp.transpose(a, (1, 2, 0)) for a in (z_i, z_j))

    kernel = functools.partial(_cost_kernel, w=tuple(float(v) for v in w), n=n)
    out = pl.pallas_call(
        kernel,
        out_shape=jax.ShapeDtypeStruct((1, bp), jnp.float32),
        grid=(bp // _PB,),
        in_specs=[
            pl.BlockSpec((n, dx, _PB), lambda g: (0, 0, g)),
            pl.BlockSpec((n, dx, _PB), lambda g: (0, 0, g)),
            pl.BlockSpec((n, dz, _PB), lambda g: (0, 0, g)),
            pl.BlockSpec((n, dz, _PB), lambda g: (0, 0, g)),
        ],
        out_specs=pl.BlockSpec((1, _PB), lambda g: (0, g)),
        compiler_params=pltpu.CompilerParams(
            dimension_semantics=("parallel",)),   # split pair blocks across TCs (v7x)
    )(xt_i, xt_j, zt_i, zt_j)
    return out[0, :B]


def time_aware_cost(x_i, x_j, z_i, z_j, w=(0.4, 0.4, 0.2)):
    """Single-pair API matching the PyTorch module's forward signature."""
    return time_aware_cost_batch(x_i[None], x_j[None], z_i[None], z_j[None], w)[0]


# -------------------------- pure numpy reference --------------------------------
def _reference(x_i, x_j, z_i, z_j, w=(0.4, 0.4, 0.2)):
    x_i, x_j, z_i, z_j = (np.asarray(a, np.float64) for a in (x_i, x_j, z_i, z_j))
    if np.array_equal(x_i, x_j) and np.array_equal(z_i, z_j):
        return 0.0

    def soft_dtw(x, y):
        xn = x / (np.linalg.norm(x, axis=1, keepdims=True) + 1e-8)
        yn = y / (np.linalg.norm(y, axis=1, keepdims=True) + 1e-8)
        D = np.sqrt(((xn[:, None, :] - yn[None, :, :]) ** 2).sum(-1))
        D = D / (D.max() + 1e-8)
        n, m = D.shape
        R = np.full((n + 1, m + 1), np.inf)
        R[0, 0] = 0.0
        for i in range(1, n + 1):
            for j in range(1, m + 1):
                R[i, j] = D[i - 1, j - 1] + min(R[i - 1, j], R[i, j - 1], R[i - 1, j - 1])
        return abs(R[-1, -1])

    def autocorr(z):
        zc = z - z.mean(axis=0)
        acf = np.stack([(zc[:-lag] * zc[lag:]).sum(axis=0) for lag in range(1, 6)])
        return acf / np.abs(acf).max(axis=0)

    d_time = soft_dtw(x_i, x_j)
    d_latent = np.linalg.norm(z_i - z_j) / z_i.shape[0]
    d_acf = np.abs(autocorr(z_i) - autocorr(z_j)).sum()
    return w[0] * d_time + w[1] * d_latent + w[2] * d_acf


if __name__ == "__main__":
    # module only carries weights w1=0.4, w2=0.4, w3=0.2 (no learned params)
    key = jax.random.PRNGKey(0)
    k1, k2, k3, k4 = jax.random.split(key, 4)
    B, seq_len, input_dim, latent_dim = 256, 8, 16, 32
    x_i = jax.random.normal(k1, (B, seq_len, input_dim), jnp.float32)
    x_j = jax.random.normal(k2, (B, seq_len, input_dim), jnp.float32)
    z_i = jax.random.normal(k3, (B, seq_len, latent_dim), jnp.float32)
    z_j = jax.random.normal(k4, (B, seq_len, latent_dim), jnp.float32)
    # last pair is identical -> the same-sample mask must give exactly 0
    x_j = x_j.at[B - 1].set(x_i[B - 1])
    z_j = z_j.at[B - 1].set(z_i[B - 1])

    costs = jax.block_until_ready(time_aware_cost_batch(x_i, x_j, z_i, z_j))
    assert costs.shape == (B,)

    xin, xjn, zin, zjn = (np.asarray(a) for a in (x_i, x_j, z_i, z_j))
    for b in list(range(0, B, 37)) + [B - 1]:
        ref = _reference(xin[b], xjn[b], zin[b], zjn[b])
        np.testing.assert_allclose(float(costs[b]), float(ref), rtol=2e-3, atol=2e-3)
    assert abs(float(costs[B - 1])) < 1e-6

    # single-pair wrapper (module-style forward) agrees with the batched path
    c0 = jax.block_until_ready(time_aware_cost(x_i[0], x_j[0], z_i[0], z_j[0]))
    np.testing.assert_allclose(float(c0), float(costs[0]), rtol=1e-5, atol=1e-5)

    print("KERNEL_OK")
</pallas_src>

<mosaic_0001>
module attributes {stable_mosaic.version = 11 : i64} {
  func.func @_cost_kernel(%arg0: i32, %arg1: memref<8x16x128xf32, #tpu.memory_space<vmem>>, %arg2: memref<8x16x128xf32, #tpu.memory_space<vmem>>, %arg3: memref<8x32x128xf32, #tpu.memory_space<vmem>>, %arg4: memref<8x32x128xf32, #tpu.memory_space<vmem>>, %arg5: memref<1x128xf32, #tpu.memory_space<vmem>>) attributes {dimension_semantics = [#tpu.dimension_semantics<parallel>], iteration_bounds = array<i64: 2>, scalar_prefetch = 0 : i64, scratch_operands = 0 : i64, tpu.core_type = #tpu.core_type<tc>, window_params = [{transform_indices = @transform_0, window_bounds = array<i64: 8, 16, 128>}, {transform_indices = @transform_1, window_bounds = array<i64: 8, 16, 128>}, {transform_indices = @transform_2, window_bounds = array<i64: 8, 32, 128>}, {transform_indices = @transform_3, window_bounds = array<i64: 8, 32, 128>}, {transform_indices = @transform_4, window_bounds = array<i64: 1, 128>}]} {
    %c0 = arith.constant 0 : index
    %c0_0 = arith.constant 0 : index
    %c0_1 = arith.constant 0 : index
    %0 = vector.load %arg1[%c0, %c0_0, %c0_1] : memref<8x16x128xf32, #tpu.memory_space<vmem>>, vector<8x16x128xf32>
    %c0_2 = arith.constant 0 : index
    %c0_3 = arith.constant 0 : index
    %c0_4 = arith.constant 0 : index
    %1 = vector.load %arg2[%c0_2, %c0_3, %c0_4] : memref<8x16x128xf32, #tpu.memory_space<vmem>>, vector<8x16x128xf32>
    %c0_5 = arith.constant 0 : index
    %c0_6 = arith.constant 0 : index
    %c0_7 = arith.constant 0 : index
    %2 = vector.load %arg3[%c0_5, %c0_6, %c0_7] : memref<8x32x128xf32, #tpu.memory_space<vmem>>, vector<8x32x128xf32>
    %c0_8 = arith.constant 0 : index
    %c0_9 = arith.constant 0 : index
    %c0_10 = arith.constant 0 : index
    %3 = vector.load %arg4[%c0_8, %c0_9, %c0_10] : memref<8x32x128xf32, #tpu.memory_space<vmem>>, vector<8x32x128xf32>
    %4 = arith.cmpf oeq, %0, %1 : vector<8x16x128xf32>
    %cst = arith.constant 1.000000e+00 : f32
    %cst_11 = arith.constant 0.000000e+00 : f32
    %5 = vector.broadcast %cst : f32 to vector<8x16x128xf32>
    %6 = vector.broadcast %cst_11 : f32 to vector<8x16x128xf32>
    %7 = arith.select %4, %5, %6 : vector<8x16x128xi1>, vector<8x16x128xf32>
    %cst_12 = arith.constant dense<0x7F800000> : vector<8x128xf32>
    %8 = vector.multi_reduction <minimumf>, %7, %cst_12 [1] : vector<8x16x128xf32> to vector<8x128xf32>
    %9 = vector.shape_cast %8 : vector<8x128xf32> to vector<8x1x128xf32>
    %cst_13 = arith.constant dense<0x7F800000> : vector<1x128xf32>
    %10 = vector.multi_reduction <minimumf>, %9, %cst_13 [0] : vector<8x1x128xf32> to vector<1x128xf32>
    %11 = vector.shape_cast %10 : vector<1x128xf32> to vector<1x1x128xf32>
    %12 = arith.cmpf oeq, %2, %3 : vector<8x32x128xf32>
    %cst_14 = arith.constant 1.000000e+00 : f32
    %cst_15 = arith.constant 0.000000e+00 : f32
    %13 = vector.broadcast %cst_14 : f32 to vector<8x32x128xf32>
    %14 = vector.broadcast %cst_15 : f32 to vector<8x32x128xf32>
    %15 = arith.select %12, %13, %14 : vector<8x32x128xi1>, vector<8x32x128xf32>
    %cst_16 = arith.constant dense<0x7F800000> : vector<8x128xf32>
    %16 = vector.multi_reduction <minimumf>, %15, %cst_16 [1] : vector<8x32x128xf32> to vector<8x128xf32>
    %17 = vector.shape_cast %16 : vector<8x128xf32> to vector<8x1x128xf32>
    %cst_17 = arith.constant dense<0x7F800000> : vector<1x128xf32>
    %18 = vector.multi_reduction <minimumf>, %17, %cst_17 [0] : vector<8x1x128xf32> to vector<1x128xf32>
    %19 = vector.shape_cast %18 : vector<1x128xf32> to vector<1x1x128xf32>
    %20 = arith.mulf %11, %19 : vector<1x1x128xf32>
    %21 = arith.mulf %0, %0 : vector<8x16x128xf32>
    %cst_18 = arith.constant dense<0.000000e+00> : vector<8x128xf32>
    %22 = vector.multi_reduction <add>, %21, %cst_18 [1] : vector<8x16x128xf32> to vector<8x128xf32>
    %23 = vector.shape_cast %22 : vector<8x128xf32> to vector<8x1x128xf32>
    %24 = math.sqrt %23 : vector<8x1x128xf32>
    %cst_19 = arith.constant 9.99999993E-9 : f32
    %25 = vector.broadcast %cst_19 : f32 to vector<8x1x128xf32>
    %26 = arith.addf %24, %25 : vector<8x1x128xf32>
    %cst_20 = arith.constant 1.000000e+00 : f32
    %27 = vector.broadcast %cst_20 : f32 to vector<8x1x128xf32>
    %28 = arith.divf %27, %26 : vector<8x1x128xf32>
    %29 = arith.mulf %1, %1 : vector<8x16x128xf32>
    %cst_21 = arith.constant dense<0.000000e+00> : vector<8x128xf32>
    %30 = vector.multi_reduction <add>, %29, %cst_21 [1] : vector<8x16x128xf32> to vector<8x128xf32>
    %31 = vector.shape_cast %30 : vector<8x128xf32> to vector<8x1x128xf32>
    %32 = math.sqrt %31 : vector<8x1x128xf32>
    %cst_22 = arith.constant 9.99999993E-9 : f32
    %33 = vector.broadcast %cst_22 : f32 to vector<8x1x128xf32>
    %34 = arith.addf %32, %33 : vector<8x1x128xf32>
    %cst_23 = arith.constant 1.000000e+00 : f32
    %35 = vector.broadcast %cst_23 : f32 to vector<8x1x128xf32>
    %36 = arith.divf %35, %34 : vector<8x1x128xf32>
    %37 = vector.broadcast %28 : vector<8x1x128xf32> to vector<8x16x128xf32>
    %38 = arith.mulf %0, %37 : vector<8x16x128xf32>
    %39 = vector.broadcast %36 : vector<8x1x128xf32> to vector<8x16x128xf32>
    %40 = arith.mulf %1, %39 : vector<8x16x128xf32>
    %41 = tpu.iota {dimensions = array<i32: 1>} : vector<8x8x128xi32>
    %cst_24 = arith.constant 0.000000e+00 : f32
    %42 = vector.broadcast %cst_24 : f32 to vector<8x8x128xf32>
    %43 = vector.extract_strided_slice %38 {offsets = [0, 0, 0], sizes = [1, 16, 128], strides = [1, 1, 1]} : vector<8x16x128xf32> to vector<1x16x128xf32>
    %44 = vector.broadcast %43 : vector<1x16x128xf32> to vector<8x16x128xf32>
    %45 = arith.subf %44, %40 : vector<8x16x128xf32>
    %46 = arith.mulf %45, %45 : vector<8x16x128xf32>
    %cst_25 = arith.constant dense<0.000000e+00> : vector<8x128xf32>
    %47 = vector.multi_reduction <add>, %46, %cst_25 [1] : vector<8x16x128xf32> to vector<8x128xf32>
    %48 = vector.shape_cast %47 : vector<8x128xf32> to vector<8x1x128xf32>
    %c0_i32 = arith.constant 0 : i32
    %49 = vector.broadcast %c0_i32 : i32 to vector<8x8x128xi32>
    %50 = arith.cmpi eq, %41, %49 : vector<8x8x128xi32>
    %51 = vector.shape_cast %48 : vector<8x1x128xf32> to vector<8x1x128xf32>
    %52 = vector.broadcast %51 : vector<8x1x128xf32> to vector<8x8x128xf32>
    %53 = arith.select %50, %52, %42 : vector<8x8x128xi1>, vector<8x8x128xf32>
    %54 = vector.extract_strided_slice %38 {offsets = [1, 0, 0], sizes = [1, 16, 128], strides = [1, 1, 1]} : vector<8x16x128xf32> to vector<1x16x128xf32>
    %55 = vector.broadcast %54 : vector<1x16x128xf32> to vector<8x16x128xf32>
    %56 = arith.subf %55, %40 : vector<8x16x128xf32>
    %57 = arith.mulf %56, %56 : vector<8x16x128xf32>
    %cst_26 = arith.constant dense<0.000000e+00> : vector<8x128xf32>
    %58 = vector.multi_reduction <add>, %57, %cst_26 [1] : vector<8x16x128xf32> to vector<8x128xf32>
    %59 = vector.shape_cast %58 : vector<8x128xf32> to vector<8x1x128xf32>
    %c1_i32 = arith.constant 1 : i32
    %60 = vector.broadcast %c1_i32 : i32 to vector<8x8x128xi32>
    %61 = arith.cmpi eq, %41, %60 : vector<8x8x128xi32>
    %62 = vector.shape_cast %59 : vector<8x1x128xf32> to vector<8x1x128xf32>
    %63 = vector.broadcast %62 : vector<8x1x128xf32> to vector<8x8x128xf32>
    %64 = arith.select %61, %63, %53 : vector<8x8x128xi1>, vector<8x8x128xf32>
    %65 = vector.extract_strided_slice %38 {offsets = [2, 0, 0], sizes = [1, 16, 128], strides = [1, 1, 1]} : vector<8x16x128xf32> to vector<1x16x128xf32>
    %66 = vector.broadcast %65 : vector<1x16x128xf32> to vector<8x16x128xf32>
    %67 = arith.subf %66, %40 : vector<8x16x128xf32>
    %68 = arith.mulf %67, %67 : vector<8x16x128xf32>
    %cst_27 = arith.constant dense<0.000000e+00> : vector<8x128xf32>
    %69 = vector.multi_reduction <add>, %68, %cst_27 [1] : vector<8x16x128xf32> to vector<8x128xf32>
    %70 = vector.shape_cast %69 : vector<8x128xf32> to vector<8x1x128xf32>
    %c2_i32 = arith.constant 2 : i32
    %71 = vector.broadcast %c2_i32 : i32 to vector<8x8x128xi32>
    %72 = arith.cmpi eq, %41, %71 : vector<8x8x128xi32>
    %73 = vector.shape_cast %70 : vector<8x1x128xf32> to vector<8x1x128xf32>
    %74 = vector.broadcast %73 : vector<8x1x128xf32> to vector<8x8x128xf32>
    %75 = arith.select %72, %74, %64 : vector<8x8x128xi1>, vector<8x8x128xf32>
    %76 = vector.extract_strided_slice %38 {offsets = [3, 0, 0], sizes = [1, 16, 128], strides = [1, 1, 1]} : vector<8x16x128xf32> to vector<1x16x128xf32>
    %77 = vector.broadcast %76 : vector<1x16x128xf32> to vector<8x16x128xf32>
    %78 = arith.subf %77, %40 : vector<8x16x128xf32>
    %79 = arith.mulf %78, %78 : vector<8x16x128xf32>
    %cst_28 = arith.constant dense<0.000000e+00> : vector<8x128xf32>
    %80 = vector.multi_reduction <add>, %79, %cst_28 [1] : vector<8x16x128xf32> to vector<8x128xf32>
    %81 = vector.shape_cast %80 : vector<8x128xf32> to vector<8x1x128xf32>
    %c3_i32 = arith.constant 3 : i32
    %82 = vector.broadcast %c3_i32 : i32 to vector<8x8x128xi32>
    %83 = arith.cmpi eq, %41, %82 : vector<8x8x128xi32>
    %84 = vector.shape_cast %81 : vector<8x1x128xf32> to vector<8x1x128xf32>
    %85 = vector.broadcast %84 : vector<8x1x128xf32> to vector<8x8x128xf32>
    %86 = arith.select %83, %85, %75 : vector<8x8x128xi1>, vector<8x8x128xf32>
    %87 = vector.extract_strided_slice %38 {offsets = [4, 0, 0], sizes = [1, 16, 128], strides = [1, 1, 1]} : vector<8x16x128xf32> to vector<1x16x128xf32>
    %88 = vector.broadcast %87 : vector<1x16x128xf32> to vector<8x16x128xf32>
    %89 = arith.subf %88, %40 : vector<8x16x128xf32>
    %90 = arith.mulf %89, %89 : vector<8x16x128xf32>
    %cst_29 = arith.constant dense<0.000000e+00> : vector<8x128xf32>
    %91 = vector.multi_reduction <add>, %90, %cst_29 [1] : vector<8x16x128xf32> to vector<8x128xf32>
    %92 = vector.shape_cast %91 : vector<8x128xf32> to vector<8x1x128xf32>
    %c4_i32 = arith.constant 4 : i32
    %93 = vector.broadcast %c4_i32 : i32 to vector<8x8x128xi32>
    %94 = arith.cmpi eq, %41, %93 : vector<8x8x128xi32>
    %95 = vector.shape_cast %92 : vector<8x1x128xf32> to vector<8x1x128xf32>
    %96 = vector.broadcast %95 : vector<8x1x128xf32> to vector<8x8x128xf32>
    %97 = arith.select %94, %96, %86 : vector<8x8x128xi1>, vector<8x8x128xf32>
    %98 = vector.extract_strided_slice %38 {offsets = [5, 0, 0], sizes = [1, 16, 128], strides = [1, 1, 1]} : vector<8x16x128xf32> to vector<1x16x128xf32>
    %99 = vector.broadcast %98 : vector<1x16x128xf32> to vector<8x16x128xf32>
    %100 = arith.subf %99, %40 : vector<8x16x128xf32>
    %101 = arith.mulf %100, %100 : vector<8x16x128xf32>
    %cst_30 = arith.constant dense<0.000000e+00> : vector<8x128xf32>
    %102 = vector.multi_reduction <add>, %101, %cst_30 [1] : vector<8x16x128xf32> to vector<8x128xf32>
    %103 = vector.shape_cast %102 : vector<8x128xf32> to vector<8x1x128xf32>
    %c5_i32 = arith.constant 5 : i32
    %104 = vector.broadcast %c5_i32 : i32 to vector<8x8x128xi32>
    %105 = arith.cmpi eq, %41, %104 : vector<8x8x128xi32>
    %106 = vector.shape_cast %103 : vector<8x1x128xf32> to vector<8x1x128xf32>
    %107 = vector.broadcast %106 : vector<8x1x128xf32> to vector<8x8x128xf32>
    %108 = arith.select %105, %107, %97 : vector<8x8x128xi1>, vector<8x8x128xf32>
    %109 = vector.extract_strided_slice %38 {offsets = [6, 0, 0], sizes = [1, 16, 128], strides = [1, 1, 1]} : vector<8x16x128xf32> to vector<1x16x128xf32>
    %110 = vector.broadcast %109 : vector<1x16x128xf32> to vector<8x16x128xf32>
    %111 = arith.subf %110, %40 : vector<8x16x128xf32>
    %112 = arith.mulf %111, %111 : vector<8x16x128xf32>
    %cst_31 = arith.constant dense<0.000000e+00> : vector<8x128xf32>
    %113 = vector.multi_reduction <add>, %112, %cst_31 [1] : vector<8x16x128xf32> to vector<8x128xf32>
    %114 = vector.shape_cast %113 : vector<8x128xf32> to vector<8x1x128xf32>
    %c6_i32 = arith.constant 6 : i32
    %115 = vector.broadcast %c6_i32 : i32 to vector<8x8x128xi32>
    %116 = arith.cmpi eq, %41, %115 : vector<8x8x128xi32>
    %117 = vector.shape_cast %114 : vector<8x1x128xf32> to vector<8x1x128xf32>
    %118 = vector.broadcast %117 : vector<8x1x128xf32> to vector<8x8x128xf32>
    %119 = arith.select %116, %118, %108 : vector<8x8x128xi1>, vector<8x8x128xf32>
    %120 = vector.extract_strided_slice %38 {offsets = [7, 0, 0], sizes = [1, 16, 128], strides = [1, 1, 1]} : vector<8x16x128xf32> to vector<1x16x128xf32>
    %121 = vector.broadcast %120 : vector<1x16x128xf32> to vector<8x16x128xf32>
    %122 = arith.subf %121, %40 : vector<8x16x128xf32>
    %123 = arith.mulf %122, %122 : vector<8x16x128xf32>
    %cst_32 = arith.constant dense<0.000000e+00> : vector<8x128xf32>
    %124 = vector.multi_reduction <add>, %123, %cst_32 [1] : vector<8x16x128xf32> to vector<8x128xf32>
    %125 = vector.shape_cast %124 : vector<8x128xf32> to vector<8x1x128xf32>
    %c7_i32 = arith.constant 7 : i32
    %126 = vector.broadcast %c7_i32 : i32 to vector<8x8x128xi32>
    %127 = arith.cmpi eq, %41, %126 : vector<8x8x128xi32>
    %128 = vector.shape_cast %125 : vector<8x1x128xf32> to vector<8x1x128xf32>
    %129 = vector.broadcast %128 : vector<8x1x128xf32> to vector<8x8x128xf32>
    %130 = arith.select %127, %129, %119 : vector<8x8x128xi1>, vector<8x8x128xf32>
    %131 = math.sqrt %130 : vector<8x8x128xf32>
    %cst_33 = arith.constant dense<0xFF800000> : vector<8x128xf32>
    %132 = vector.multi_reduction <maximumf>, %131, %cst_33 [1] : vector<8x8x128xf32> to vector<8x128xf32>
    %133 = vector.shape_cast %132 : vector<8x128xf32> to vector<8x1x128xf32>
    %cst_34 = arith.constant dense<0xFF800000> : vector<1x128xf32>
    %134 = vector.multi_reduction <maximumf>, %133, %cst_34 [0] : vector<8x1x128xf32> to vector<1x128xf32>
    %135 = vector.shape_cast %134 : vector<1x128xf32> to vector<1x1x128xf32>
    %cst_35 = arith.constant 9.99999993E-9 : f32
    %136 = vector.broadcast %cst_35 : f32 to vector<1x1x128xf32>
    %137 = arith.addf %135, %136 : vector<1x1x128xf32>
    %cst_36 = arith.constant 1.000000e+00 : f32
    %138 = vector.broadcast %cst_36 : f32 to vector<1x1x128xf32>
    %139 = arith.divf %138, %137 : vector<1x1x128xf32>
    %140 = vector.broadcast %139 : vector<1x1x128xf32> to vector<8x8x128xf32>
    %141 = arith.mulf %131, %140 : vector<8x8x128xf32>
    %cst_37 = arith.constant 1.000000e+30 : f32
    %142 = vector.broadcast %cst_37 : f32 to vector<1x8x128xf32>
    %143 = vector.extract_strided_slice %41 {offsets = [0, 0, 0], sizes = [1, 8, 128], strides = [1, 1, 1]} : vector<8x8x128xi32> to vector<1x8x128xi32>
    %c0_i32_38 = arith.constant 0 : i32
    %144 = vector.broadcast %c0_i32_38 : i32 to vector<1x8x128xi32>
    %145 = arith.cmpi eq, %143, %144 : vector<1x8x128xi32>
    %cst_39 = arith.constant 0.000000e+00 : f32
    %cst_40 = arith.constant 1.000000e+30 : f32
    %146 = vector.broadcast %cst_39 : f32 to vector<1x8x128xf32>
    %147 = vector.broadcast %cst_40 : f32 to vector<1x8x128xf32>
    %148 = arith.select %145, %146, %147 : vector<1x8x128xi1>, vector<1x8x128xf32>
    %cst_41 = arith.constant 1.000000e+30 : f32
    %149 = vector.broadcast %cst_41 : f32 to vector<7x8x128xf32>
    %150 = tpu.concatenate %148, %149 in 0 : vector<1x8x128xf32>, vector<7x8x128xf32> -> vector<8x8x128xf32>
    %cst_42 = arith.constant 1.000000e+30 : f32
    %151 = vector.broadcast %cst_42 : f32 to vector<8x8x128xf32>
    %152 = vector.extract_strided_slice %151 {offsets = [0, 0, 0], sizes = [7, 8, 128], strides = [1, 1, 1]} : vector<8x8x128xf32> to vector<7x8x128xf32>
    %153 = tpu.concatenate %142, %152 in 0 : vector<1x8x128xf32>, vector<7x8x128xf32> -> vector<8x8x128xf32>
    %c0_i32_43 = arith.constant 0 : i32
    %154 = vector.broadcast %c0_i32_43 : i32 to vector<8x8x128xi32>
    %155 = arith.cmpi eq, %41, %154 : vector<8x8x128xi32>
    %c1_i32_44 = arith.constant 1 : i32
    %156 = tpu.dynamic_rotate %151 by %c1_i32_44 dim 1 : vector<8x8x128xf32>, i32 -> vector<8x8x128xf32>
    %cst_45 = arith.constant 1.000000e+30 : f32
    %157 = vector.broadcast %cst_45 : f32 to vector<8x8x128xf32>
    %158 = arith.select %155, %157, %156 : vector<8x8x128xi1>, vector<8x8x128xf32>
    %159 = vector.extract_strided_slice %158 {offsets = [0, 0, 0], sizes = [7, 8, 128], strides = [1, 1, 1]} : vector<8x8x128xf32> to vector<7x8x128xf32>
    %160 = tpu.concatenate %142, %159 in 0 : vector<1x8x128xf32>, vector<7x8x128xf32> -> vector<8x8x128xf32>
    %161 = arith.minimumf %153, %158 : vector<8x8x128xf32>
    %162 = arith.minimumf %160, %150 : vector<8x8x128xf32>
    %163 = arith.minimumf %161, %162 : vector<8x8x128xf32>
    %164 = arith.addf %141, %163 : vector<8x8x128xf32>
    %165 = vector.extract_strided_slice %164 {offsets = [0, 0, 0], sizes = [7, 8, 128], strides = [1, 1, 1]} : vector<8x8x128xf32> to vector<7x8x128xf32>
    %166 = tpu.concatenate %142, %165 in 0 : vector<1x8x128xf32>, vector<7x8x128xf32> -> vector<8x8x128xf32>
    %c0_i32_46 = arith.constant 0 : i32
    %167 = vector.broadcast %c0_i32_46 : i32 to vector<8x8x128xi32>
    %168 = arith.cmpi eq, %41, %167 : vector<8x8x128xi32>
    %c1_i32_47 = arith.constant 1 : i32
    %169 = tpu.dynamic_rotate %164 by %c1_i32_47 dim 1 : vector<8x8x128xf32>, i32 -> vector<8x8x128xf32>
    %cst_48 = arith.constant 1.000000e+30 : f32
    %170 = vector.broadcast %cst_48 : f32 to vector<8x8x128xf32>
    %171 = arith.select %168, %170, %169 : vector<8x8x128xi1>, vector<8x8x128xf32>
    %172 = vector.extract_strided_slice %171 {offsets = [0, 0, 0], sizes = [7, 8, 128], strides = [1, 1, 1]} : vector<8x8x128xf32> to vector<7x8x128xf32>
    %173 = tpu.concatenate %142, %172 in 0 : vector<1x8x128xf32>, vector<7x8x128xf32> -> vector<8x8x128xf32>
    %174 = arith.minimumf %166, %171 : vector<8x8x128xf32>
    %175 = arith.minimumf %173, %150 : vector<8x8x128xf32>
    %176 = arith.minimumf %174, %175 : vector<8x8x128xf32>
    %177 = arith.addf %141, %176 : vector<8x8x128xf32>
    %178 = vector.extract_strided_slice %177 {offsets = [0, 0, 0], sizes = [7, 8, 128], strides = [1, 1, 1]} : vector<8x8x128xf32> to vector<7x8x128xf32>
    %179 = tpu.concatenate %142, %178 in 0 : vector<1x8x128xf32>, vector<7x8x128xf32> -> vector<8x8x128xf32>
    %c0_i32_49 = arith.constant 0 : i32
    %180 = vector.broadcast %c0_i32_49 : i32 to vector<8x8x128xi32>
    %181 = arith.cmpi eq, %41, %180 : vector<8x8x128xi32>
    %c1_i32_50 = arith.constant 1 : i32
    %182 = tpu.dynamic_rotate %177 by %c1_i32_50 dim 1 : vector<8x8x128xf32>, i32 -> vector<8x8x128xf32>
    %cst_51 = arith.constant 1.000000e+30 : f32
    %183 = vector.broadcast %cst_51 : f32 to vector<8x8x128xf32>
    %184 = arith.select %181, %183, %182 : vector<8x8x128xi1>, vector<8x8x128xf32>
    %185 = vector.extract_strided_slice %184 {offsets = [0, 0, 0], sizes = [7, 8, 128], strides = [1, 1, 1]} : vector<8x8x128xf32> to vector<7x8x128xf32>
    %186 = tpu.concatenate %142, %185 in 0 : vector<1x8x128xf32>, vector<7x8x128xf32> -> vector<8x8x128xf32>
    %187 = arith.minimumf %179, %184 : vector<8x8x128xf32>
    %188 = arith.minimumf %186, %150 : vector<8x8x128xf32>
    %189 = arith.minimumf %187, %188 : vector<8x8x128xf32>
    %190 = arith.addf %141, %189 : vector<8x8x128xf32>
    %191 = vector.extract_strided_slice %190 {offsets = [0, 0, 0], sizes = [7, 8, 128], strides = [1, 1, 1]} : vector<8x8x128xf32> to vector<7x8x128xf32>
    %192 = tpu.concatenate %142, %191 in 0 : vector<1x8x128xf32>, vector<7x8x128xf32> -> vector<8x8x128xf32>
    %c0_i32_52 = arith.constant 0 : i32
    %193 = vector.broadcast %c0_i32_52 : i32 to vector<8x8x128xi32>
    %194 = arith.cmpi eq, %41, %193 : vector<8x8x128xi32>
    %c1_i32_53 = arith.constant 1 : i32
    %195 = tpu.dynamic_rotate %190 by %c1_i32_53 dim 1 : vector<8x8x128xf32>, i32 -> vector<8x8x128xf32>
    %cst_54 = arith.constant 1.000000e+30 : f32
    %196 = vector.broadcast %cst_54 : f32 to vector<8x8x128xf32>
    %197 = arith.select %194, %196, %195 : vector<8x8x128xi1>, vector<8x8x128xf32>
    %198 = vector.extract_strided_slice %197 {offsets = [0, 0, 0], sizes = [7, 8, 128], strides = [1, 1, 1]} : vector<8x8x128xf32> to vector<7x8x128xf32>
    %199 = tpu.concatenate %142, %198 in 0 : vector<1x8x128xf32>, vector<7x8x128xf32> -> vector<8x8x128xf32>
    %200 = arith.minimumf %192, %197 : vector<8x8x128xf32>
    %201 = arith.minimumf %199, %150 : vector<8x8x128xf32>
    %202 = arith.minimumf %200, %201 : vector<8x8x128xf32>
    %203 = arith.addf %141, %202 : vector<8x8x128xf32>
    %204 = vector.extract_strided_slice %203 {offsets = [0, 0, 0], sizes = [7, 8, 128], strides = [1, 1, 1]} : vector<8x8x128xf32> to vector<7x8x128xf32>
    %205 = tpu.concatenate %142, %204 in 0 : vector<1x8x128xf32>, vector<7x8x128xf32> -> vector<8x8x128xf32>
    %c0_i32_55 = arith.constant 0 : i32
    %206 = vector.broadcast %c0_i32_55 : i32 to vector<8x8x128xi32>
    %207 = arith.cmpi eq, %41, %206 : vector<8x8x128xi32>
    %c1_i32_56 = arith.constant 1 : i32
    %208 = tpu.dynamic_rotate %203 by %c1_i32_56 dim 1 : vector<8x8x128xf32>, i32 -> vector<8x8x128xf32>
    %cst_57 = arith.constant 1.000000e+30 : f32
    %209 = vector.broadcast %cst_57 : f32 to vector<8x8x128xf32>
    %210 = arith.select %207, %209, %208 : vector<8x8x128xi1>, vector<8x8x128xf32>
    %211 = vector.extract_strided_slice %210 {offsets = [0, 0, 0], sizes = [7, 8, 128], strides = [1, 1, 1]} : vector<8x8x128xf32> to vector<7x8x128xf32>
    %212 = tpu.concatenate %142, %211 in 0 : vector<1x8x128xf32>, vector<7x8x128xf32> -> vector<8x8x128xf32>
    %213 = arith.minimumf %205, %210 : vector<8x8x128xf32>
    %214 = arith.minimumf %212, %150 : vector<8x8x128xf32>
    %215 = arith.minimumf %213, %214 : vector<8x8x128xf32>
    %216 = arith.addf %141, %215 : vector<8x8x128xf32>
    %217 = vector.extract_strided_slice %216 {offsets = [0, 0, 0], sizes = [7, 8, 128], strides = [1, 1, 1]} : vector<8x8x128xf32> to vector<7x8x128xf32>
    %218 = tpu.concatenate %142, %217 in 0 : vector<1x8x128xf32>, vector<7x8x128xf32> -> vector<8x8x128xf32>
    %c0_i32_58 = arith.constant 0 : i32
    %219 = vector.broadcast %c0_i32_58 : i32 to vector<8x8x128xi32>
    %220 = arith.cmpi eq, %41, %219 : vector<8x8x128xi32>
    %c1_i32_59 = arith.constant 1 : i32
    %221 = tpu.dynamic_rotate %216 by %c1_i32_59 dim 1 : vector<8x8x128xf32>, i32 -> vector<8x8x128xf32>
    %cst_60 = arith.constant 1.000000e+30 : f32
    %222 = vector.broadcast %cst_60 : f32 to vector<8x8x128xf32>
    %223 = arith.select %220, %222, %221 : vector<8x8x128xi1>, vector<8x8x128xf32>
    %224 = vector.extract_strided_slice %223 {offsets = [0, 0, 0], sizes = [7, 8, 128], strides = [1, 1, 1]} : vector<8x8x128xf32> to vector<7x8x128xf32>
    %225 = tpu.concatenate %142, %224 in 0 : vector<1x8x128xf32>, vector<7x8x128xf32> -> vector<8x8x128xf32>
    %226 = arith.minimumf %218, %223 : vector<8x8x128xf32>
    %227 = arith.minimumf %225, %150 : vector<8x8x128xf32>
    %228 = arith.minimumf %226, %227 : vector<8x8x128xf32>
    %229 = arith.addf %141, %228 : vector<8x8x128xf32>
    %230 = vector.extract_strided_slice %229 {offsets = [0, 0, 0], sizes = [7, 8, 128], strides = [1, 1, 1]} : vector<8x8x128xf32> to vector<7x8x128xf32>
    %231 = tpu.concatenate %142, %230 in 0 : vector<1x8x128xf32>, vector<7x8x128xf32> -> vector<8x8x128xf32>
    %c0_i32_61 = arith.constant 0 : i32
    %232 = vector.broadcast %c0_i32_61 : i32 to vector<8x8x128xi32>
    %233 = arith.cmpi eq, %41, %232 : vector<8x8x128xi32>
    %c1_i32_62 = arith.constant 1 : i32
    %234 = tpu.dynamic_rotate %229 by %c1_i32_62 dim 1 : vector<8x8x128xf32>, i32 -> vector<8x8x128xf32>
    %cst_63 = arith.constant 1.000000e+30 : f32
    %235 = vector.broadcast %cst_63 : f32 to vector<8x8x128xf32>
    %236 = arith.select %233, %235, %234 : vector<8x8x128xi1>, vector<8x8x128xf32>
    %237 = vector.extract_strided_slice %236 {offsets = [0, 0, 0], sizes = [7, 8, 128], strides = [1, 1, 1]} : vector<8x8x128xf32> to vector<7x8x128xf32>
    %238 = tpu.concatenate %142, %237 in 0 : vector<1x8x128xf32>, vector<7x8x128xf32> -> vector<8x8x128xf32>
    %239 = arith.minimumf %231, %236 : vector<8x8x128xf32>
    %240 = arith.minimumf %238, %150 : vector<8x8x128xf32>
    %241 = arith.minimumf %239, %240 : vector<8x8x128xf32>
    %242 = arith.addf %141, %241 : vector<8x8x128xf32>
    %243 = vector.extract_strided_slice %242 {offsets = [0, 0, 0], sizes = [7, 8, 128], strides = [1, 1, 1]} : vector<8x8x128xf32> to vector<7x8x128xf32>
    %244 = tpu.concatenate %142, %243 in 0 : vector<1x8x128xf32>, vector<7x8x128xf32> -> vector<8x8x128xf32>
    %c0_i32_64 = arith.constant 0 : i32
    %245 = vector.broadcast %c0_i32_64 : i32 to vector<8x8x128xi32>
    %246 = arith.cmpi eq, %41, %245 : vector<8x8x128xi32>
    %c1_i32_65 = arith.constant 1 : i32
    %247 = tpu.dynamic_rotate %242 by %c1_i32_65 dim 1 : vector<8x8x128xf32>, i32 -> vector<8x8x128xf32>
    %cst_66 = arith.constant 1.000000e+30 : f32
    %248 = vector.broadcast %cst_66 : f32 to vector<8x8x128xf32>
    %249 = arith.select %246, %248, %247 : vector<8x8x128xi1>, vector<8x8x128xf32>
    %250 = vector.extract_strided_slice %249 {offsets = [0, 0, 0], sizes = [7, 8, 128], strides = [1, 1, 1]} : vector<8x8x128xf32> to vector<7x8x128xf32>
    %251 = tpu.concatenate %142, %250 in 0 : vector<1x8x128xf32>, vector<7x8x128xf32> -> vector<8x8x128xf32>
    %252 = arith.minimumf %244, %249 : vector<8x8x128xf32>
    %253 = arith.minimumf %251, %150 : vector<8x8x128xf32>
    %254 = arith.minimumf %252, %253 : vector<8x8x128xf32>
    %255 = arith.addf %141, %254 : vector<8x8x128xf32>
    %256 = vector.extract_strided_slice %255 {offsets = [0, 0, 0], sizes = [7, 8, 128], strides = [1, 1, 1]} : vector<8x8x128xf32> to vector<7x8x128xf32>
    %257 = tpu.concatenate %142, %256 in 0 : vector<1x8x128xf32>, vector<7x8x128xf32> -> vector<8x8x128xf32>
    %c0_i32_67 = arith.constant 0 : i32
    %258 = vector.broadcast %c0_i32_67 : i32 to vector<8x8x128xi32>
    %259 = arith.cmpi eq, %41, %258 : vector<8x8x128xi32>
    %c1_i32_68 = arith.constant 1 : i32
    %260 = tpu.dynamic_rotate %255 by %c1_i32_68 dim 1 : vector<8x8x128xf32>, i32 -> vector<8x8x128xf32>
    %cst_69 = arith.constant 1.000000e+30 : f32
    %261 = vector.broadcast %cst_69 : f32 to vector<8x8x128xf32>
    %262 = arith.select %259, %261, %260 : vector<8x8x128xi1>, vector<8x8x128xf32>
    %263 = vector.extract_strided_slice %262 {offsets = [0, 0, 0], sizes = [7, 8, 128], strides = [1, 1, 1]} : vector<8x8x128xf32> to vector<7x8x128xf32>
    %264 = tpu.concatenate %142, %263 in 0 : vector<1x8x128xf32>, vector<7x8x128xf32> -> vector<8x8x128xf32>
    %265 = arith.minimumf %257, %262 : vector<8x8x128xf32>
    %266 = arith.minimumf %264, %150 : vector<8x8x128xf32>
    %267 = arith.minimumf %265, %266 : vector<8x8x128xf32>
    %268 = arith.addf %141, %267 : vector<8x8x128xf32>
    %269 = vector.extract_strided_slice %268 {offsets = [0, 0, 0], sizes = [7, 8, 128], strides = [1, 1, 1]} : vector<8x8x128xf32> to vector<7x8x128xf32>
    %270 = tpu.concatenate %142, %269 in 0 : vector<1x8x128xf32>, vector<7x8x128xf32> -> vector<8x8x128xf32>
    %c0_i32_70 = arith.constant 0 : i32
    %271 = vector.broadcast %c0_i32_70 : i32 to vector<8x8x128xi32>
    %272 = arith.cmpi eq, %41, %271 : vector<8x8x128xi32>
    %c1_i32_71 = arith.constant 1 : i32
    %273 = tpu.dynamic_rotate %268 by %c1_i32_71 dim 1 : vector<8x8x128xf32>, i32 -> vector<8x8x128xf32>
    %cst_72 = arith.constant 1.000000e+30 : f32
    %274 = vector.broadcast %cst_72 : f32 to vector<8x8x128xf32>
    %275 = arith.select %272, %274, %273 : vector<8x8x128xi1>, vector<8x8x128xf32>
    %276 = vector.extract_strided_slice %275 {offsets = [0, 0, 0], sizes = [7, 8, 128], strides = [1, 1, 1]} : vector<8x8x128xf32> to vector<7x8x128xf32>
    %277 = tpu.concatenate %142, %276 in 0 : vector<1x8x128xf32>, vector<7x8x128xf32> -> vector<8x8x128xf32>
    %278 = arith.minimumf %270, %275 : vector<8x8x128xf32>
    %279 = arith.minimumf %277, %150 : vector<8x8x128xf32>
    %280 = arith.minimumf %278, %279 : vector<8x8x128xf32>
    %281 = arith.addf %141, %280 : vector<8x8x128xf32>
    %282 = vector.extract_strided_slice %281 {offsets = [0, 0, 0], sizes = [7, 8, 128], strides = [1, 1, 1]} : vector<8x8x128xf32> to vector<7x8x128xf32>
    %283 = tpu.concatenate %142, %282 in 0 : vector<1x8x128xf32>, vector<7x8x128xf32> -> vector<8x8x128xf32>
    %c0_i32_73 = arith.constant 0 : i32
    %284 = vector.broadcast %c0_i32_73 : i32 to vector<8x8x128xi32>
    %285 = arith.cmpi eq, %41, %284 : vector<8x8x128xi32>
    %c1_i32_74 = arith.constant 1 : i32
    %286 = tpu.dynamic_rotate %281 by %c1_i32_74 dim 1 : vector<8x8x128xf32>, i32 -> vector<8x8x128xf32>
    %cst_75 = arith.constant 1.000000e+30 : f32
    %287 = vector.broadcast %cst_75 : f32 to vector<8x8x128xf32>
    %288 = arith.select %285, %287, %286 : vector<8x8x128xi1>, vector<8x8x128xf32>
    %289 = vector.extract_strided_slice %288 {offsets = [0, 0, 0], sizes = [7, 8, 128], strides = [1, 1, 1]} : vector<8x8x128xf32> to vector<7x8x128xf32>
    %290 = tpu.concatenate %142, %289 in 0 : vector<1x8x128xf32>, vector<7x8x128xf32> -> vector<8x8x128xf32>
    %291 = arith.minimumf %283, %288 : vector<8x8x128xf32>
    %292 = arith.minimumf %290, %150 : vector<8x8x128xf32>
    %293 = arith.minimumf %291, %292 : vector<8x8x128xf32>
    %294 = arith.addf %141, %293 : vector<8x8x128xf32>
    %295 = vector.extract_strided_slice %294 {offsets = [0, 0, 0], sizes = [7, 8, 128], strides = [1, 1, 1]} : vector<8x8x128xf32> to vector<7x8x128xf32>
    %296 = tpu.concatenate %142, %295 in 0 : vector<1x8x128xf32>, vector<7x8x128xf32> -> vector<8x8x128xf32>
    %c0_i32_76 = arith.constant 0 : i32
    %297 = vector.broadcast %c0_i32_76 : i32 to vector<8x8x128xi32>
    %298 = arith.cmpi eq, %41, %297 : vector<8x8x128xi32>
    %c1_i32_77 = arith.constant 1 : i32
    %299 = tpu.dynamic_rotate %294 by %c1_i32_77 dim 1 : vector<8x8x128xf32>, i32 -> vector<8x8x128xf32>
    %cst_78 = arith.constant 1.000000e+30 : f32
    %300 = vector.broadcast %cst_78 : f32 to vector<8x8x128xf32>
    %301 = arith.select %298, %300, %299 : vector<8x8x128xi1>, vector<8x8x128xf32>
    %302 = vector.extract_strided_slice %301 {offsets = [0, 0, 0], sizes = [7, 8, 128], strides = [1, 1, 1]} : vector<8x8x128xf32> to vector<7x8x128xf32>
    %303 = tpu.concatenate %142, %302 in 0 : vector<1x8x128xf32>, vector<7x8x128xf32> -> vector<8x8x128xf32>
    %304 = arith.minimumf %296, %301 : vector<8x8x128xf32>
    %305 = arith.minimumf %303, %150 : vector<8x8x128xf32>
    %306 = arith.minimumf %304, %305 : vector<8x8x128xf32>
    %307 = arith.addf %141, %306 : vector<8x8x128xf32>
    %308 = vector.extract_strided_slice %307 {offsets = [0, 0, 0], sizes = [7, 8, 128], strides = [1, 1, 1]} : vector<8x8x128xf32> to vector<7x8x128xf32>
    %309 = tpu.concatenate %142, %308 in 0 : vector<1x8x128xf32>, vector<7x8x128xf32> -> vector<8x8x128xf32>
    %c0_i32_79 = arith.constant 0 : i32
    %310 = vector.broadcast %c0_i32_79 : i32 to vector<8x8x128xi32>
    %311 = arith.cmpi eq, %41, %310 : vector<8x8x128xi32>
    %c1_i32_80 = arith.constant 1 : i32
    %312 = tpu.dynamic_rotate %307 by %c1_i32_80 dim 1 : vector<8x8x128xf32>, i32 -> vector<8x8x128xf32>
    %cst_81 = arith.constant 1.000000e+30 : f32
    %313 = vector.broadcast %cst_81 : f32 to vector<8x8x128xf32>
    %314 = arith.select %311, %313, %312 : vector<8x8x128xi1>, vector<8x8x128xf32>
    %315 = vector.extract_strided_slice %314 {offsets = [0, 0, 0], sizes = [7, 8, 128], strides = [1, 1, 1]} : vector<8x8x128xf32> to vector<7x8x128xf32>
    %316 = tpu.concatenate %142, %315 in 0 : vector<1x8x128xf32>, vector<7x8x128xf32> -> vector<8x8x128xf32>
    %317 = arith.minimumf %309, %314 : vector<8x8x128xf32>
    %318 = arith.minimumf %316, %150 : vector<8x8x128xf32>
    %319 = arith.minimumf %317, %318 : vector<8x8x128xf32>
    %320 = arith.addf %141, %319 : vector<8x8x128xf32>
    %321 = vector.extract_strided_slice %320 {offsets = [0, 0, 0], sizes = [7, 8, 128], strides = [1, 1, 1]} : vector<8x8x128xf32> to vector<7x8x128xf32>
    %322 = tpu.concatenate %142, %321 in 0 : vector<1x8x128xf32>, vector<7x8x128xf32> -> vector<8x8x128xf32>
    %c0_i32_82 = arith.constant 0 : i32
    %323 = vector.broadcast %c0_i32_82 : i32 to vector<8x8x128xi32>
    %324 = arith.cmpi eq, %41, %323 : vector<8x8x128xi32>
    %c1_i32_83 = arith.constant 1 : i32
    %325 = tpu.dynamic_rotate %320 by %c1_i32_83 dim 1 : vector<8x8x128xf32>, i32 -> vector<8x8x128xf32>
    %cst_84 = arith.constant 1.000000e+30 : f32
    %326 = vector.broadcast %cst_84 : f32 to vector<8x8x128xf32>
    %327 = arith.select %324, %326, %325 : vector<8x8x128xi1>, vector<8x8x128xf32>
    %328 = vector.extract_strided_slice %327 {offsets = [0, 0, 0], sizes = [7, 8, 128], strides = [1, 1, 1]} : vector<8x8x128xf32> to vector<7x8x128xf32>
    %329 = tpu.concatenate %142, %328 in 0 : vector<1x8x128xf32>, vector<7x8x128xf32> -> vector<8x8x128xf32>
    %330 = arith.minimumf %322, %327 : vector<8x8x128xf32>
    %331 = arith.minimumf %329, %150 : vector<8x8x128xf32>
    %332 = arith.minimumf %330, %331 : vector<8x8x128xf32>
    %333 = arith.addf %141, %332 : vector<8x8x128xf32>
    %334 = vector.extract_strided_slice %333 {offsets = [0, 0, 0], sizes = [7, 8, 128], strides = [1, 1, 1]} : vector<8x8x128xf32> to vector<7x8x128xf32>
    %335 = tpu.concatenate %142, %334 in 0 : vector<1x8x128xf32>, vector<7x8x128xf32> -> vector<8x8x128xf32>
    %c0_i32_85 = arith.constant 0 : i32
    %336 = vector.broadcast %c0_i32_85 : i32 to vector<8x8x128xi32>
    %337 = arith.cmpi eq, %41, %336 : vector<8x8x128xi32>
    %c1_i32_86 = arith.constant 1 : i32
    %338 = tpu.dynamic_rotate %333 by %c1_i32_86 dim 1 : vector<8x8x128xf32>, i32 -> vector<8x8x128xf32>
    %cst_87 = arith.constant 1.000000e+30 : f32
    %339 = vector.broadcast %cst_87 : f32 to vector<8x8x128xf32>
    %340 = arith.select %337, %339, %338 : vector<8x8x128xi1>, vector<8x8x128xf32>
    %341 = vector.extract_strided_slice %340 {offsets = [0, 0, 0], sizes = [7, 8, 128], strides = [1, 1, 1]} : vector<8x8x128xf32> to vector<7x8x128xf32>
    %342 = tpu.concatenate %142, %341 in 0 : vector<1x8x128xf32>, vector<7x8x128xf32> -> vector<8x8x128xf32>
    %343 = arith.minimumf %335, %340 : vector<8x8x128xf32>
    %344 = arith.minimumf %342, %150 : vector<8x8x128xf32>
    %345 = arith.minimumf %343, %344 : vector<8x8x128xf32>
    %346 = arith.addf %141, %345 : vector<8x8x128xf32>
    %347 = vector.extract_strided_slice %346 {offsets = [7, 7, 0], sizes = [1, 1, 128], strides = [1, 1, 1]} : vector<8x8x128xf32> to vector<1x1x128xf32>
    %348 = math.absf %347 : vector<1x1x128xf32>
    %349 = arith.subf %2, %3 : vector<8x32x128xf32>
    %350 = arith.mulf %349, %349 : vector<8x32x128xf32>
    %cst_88 = arith.constant dense<0.000000e+00> : vector<8x128xf32>
    %351 = vector.multi_reduction <add>, %350, %cst_88 [1] : vector<8x32x128xf32> to vector<8x128xf32>
    %352 = vector.shape_cast %351 : vector<8x128xf32> to vector<8x1x128xf32>
    %cst_89 = arith.constant dense<0.000000e+00> : vector<1x128xf32>
    %353 = vector.multi_reduction <add>, %352, %cst_89 [0] : vector<8x1x128xf32> to vector<1x128xf32>
    %354 = vector.shape_cast %353 : vector<1x128xf32> to vector<1x1x128xf32>
    %355 = math.sqrt %354 : vector<1x1x128xf32>
    %cst_90 = arith.constant 1.250000e-01 : f32
    %356 = vector.broadcast %cst_90 : f32 to vector<1x1x128xf32>
    %357 = arith.mulf %355, %356 : vector<1x1x128xf32>
    %cst_91 = arith.constant dense<0.000000e+00> : vector<32x128xf32>
    %358 = vector.multi_reduction <add>, %2, %cst_91 [0] : vector<8x32x128xf32> to vector<32x128xf32>
    %359 = vector.shape_cast %358 : vector<32x128xf32> to vector<1x32x128xf32>
    %cst_92 = arith.constant 1.250000e-01 : f32
    %360 = vector.broadcast %cst_92 : f32 to vector<1x32x128xf32>
    %361 = arith.mulf %359, %360 : vector<1x32x128xf32>
    %362 = vector.broadcast %361 : vector<1x32x128xf32> to vector<8x32x128xf32>
    %363 = arith.subf %2, %362 : vector<8x32x128xf32>
    %364 = vector.extract_strided_slice %363 {offsets = [0, 0, 0], sizes = [7, 32, 128], strides = [1, 1, 1]} : vector<8x32x128xf32> to vector<7x32x128xf32>
    %365 = vector.extract_strided_slice %363 {offsets = [1, 0, 0], sizes = [7, 32, 128], strides = [1, 1, 1]} : vector<8x32x128xf32> to vector<7x32x128xf32>
    %366 = arith.mulf %364, %365 : vector<7x32x128xf32>
    %cst_93 = arith.constant dense<0.000000e+00> : vector<32x128xf32>
    %367 = vector.multi_reduction <add>, %366, %cst_93 [0] : vector<7x32x128xf32> to vector<32x128xf32>
    %368 = vector.shape_cast %367 : vector<32x128xf32> to vector<1x32x128xf32>
    %369 = vector.extract_strided_slice %363 {offsets = [0, 0, 0], sizes = [6, 32, 128], strides = [1, 1, 1]} : vector<8x32x128xf32> to vector<6x32x128xf32>
    %370 = vector.extract_strided_slice %363 {offsets = [2, 0, 0], sizes = [6, 32, 128], strides = [1, 1, 1]} : vector<8x32x128xf32> to vector<6x32x128xf32>
    %371 = arith.mulf %369, %370 : vector<6x32x128xf32>
    %cst_94 = arith.constant dense<0.000000e+00> : vector<32x128xf32>
    %372 = vector.multi_reduction <add>, %371, %cst_94 [0] : vector<6x32x128xf32> to vector<32x128xf32>
    %373 = vector.shape_cast %372 : vector<32x128xf32> to vector<1x32x128xf32>
    %374 = vector.extract_strided_slice %363 {offsets = [0, 0, 0], sizes = [5, 32, 128], strides = [1, 1, 1]} : vector<8x32x128xf32> to vector<5x32x128xf32>
    %375 = vector.extract_strided_slice %363 {offsets = [3, 0, 0], sizes = [5, 32, 128], strides = [1, 1, 1]} : vector<8x32x128xf32> to vector<5x32x128xf32>
    %376 = arith.mulf %374, %375 : vector<5x32x128xf32>
    %cst_95 = arith.constant dense<0.000000e+00> : vector<32x128xf32>
    %377 = vector.multi_reduction <add>, %376, %cst_95 [0] : vector<5x32x128xf32> to vector<32x128xf32>
    %378 = vector.shape_cast %377 : vector<32x128xf32> to vector<1x32x128xf32>
    %379 = vector.extract_strided_slice %363 {offsets = [0, 0, 0], sizes = [4, 32, 128], strides = [1, 1, 1]} : vector<8x32x128xf32> to vector<4x32x128xf32>
    %380 = vector.extract_strided_slice %363 {offsets = [4, 0, 0], sizes = [4, 32, 128], strides = [1, 1, 1]} : vector<8x32x128xf32> to vector<4x32x128xf32>
    %381 = arith.mulf %379, %380 : vector<4x32x128xf32>
    %cst_96 = arith.constant dense<0.000000e+00> : vector<32x128xf32>
    %382 = vector.multi_reduction <add>, %381, %cst_96 [0] : vector<4x32x128xf32> to vector<32x128xf32>
    %383 = vector.shape_cast %382 : vector<32x128xf32> to vector<1x32x128xf32>
    %384 = vector.extract_strided_slice %363 {offsets = [0, 0, 0], sizes = [3, 32, 128], strides = [1, 1, 1]} : vector<8x32x128xf32> to vector<3x32x128xf32>
    %385 = vector.extract_strided_slice %363 {offsets = [5, 0, 0], sizes = [3, 32, 128], strides = [1, 1, 1]} : vector<8x32x128xf32> to vector<3x32x128xf32>
    %386 = arith.mulf %384, %385 : vector<3x32x128xf32>
    %cst_97 = arith.constant dense<0.000000e+00> : vector<32x128xf32>
    %387 = vector.multi_reduction <add>, %386, %cst_97 [0] : vector<3x32x128xf32> to vector<32x128xf32>
    %388 = vector.shape_cast %387 : vector<32x128xf32> to vector<1x32x128xf32>
    %389 = math.absf %368 : vector<1x32x128xf32>
    %390 = math.absf %373 : vector<1x32x128xf32>
    %391 = arith.maximumf %389, %390 : vector<1x32x128xf32>
    %392 = math.absf %378 : vector<1x32x128xf32>
    %393 = arith.maximumf %391, %392 : vector<1x32x128xf32>
    %394 = math.absf %383 : vector<1x32x128xf32>
    %395 = arith.maximumf %393, %394 : vector<1x32x128xf32>
    %396 = math.absf %388 : vector<1x32x128xf32>
    %397 = arith.maximumf %395, %396 : vector<1x32x128xf32>
    %cst_98 = arith.constant 1.000000e+00 : f32
    %398 = vector.broadcast %cst_98 : f32 to vector<1x32x128xf32>
    %399 = arith.divf %398, %397 : vector<1x32x128xf32>
    %400 = arith.mulf %368, %399 : vector<1x32x128xf32>
    %401 = arith.mulf %373, %399 : vector<1x32x128xf32>
    %402 = arith.mulf %378, %399 : vector<1x32x128xf32>
    %403 = arith.mulf %383, %399 : vector<1x32x128xf32>
    %404 = arith.mulf %388, %399 : vector<1x32x128xf32>
    %cst_99 = arith.constant dense<0.000000e+00> : vector<32x128xf32>
    %405 = vector.multi_reduction <add>, %3, %cst_99 [0] : vector<8x32x128xf32> to vector<32x128xf32>
    %406 = vector.shape_cast %405 : vector<32x128xf32> to vector<1x32x128xf32>
    %cst_100 = arith.constant 1.250000e-01 : f32
    %407 = vector.broadcast %cst_100 : f32 to vector<1x32x128xf32>
    %408 = arith.mulf %406, %407 : vector<1x32x128xf32>
    %409 = vector.broadcast %408 : vector<1x32x128xf32> to vector<8x32x128xf32>
    %410 = arith.subf %3, %409 : vector<8x32x128xf32>
    %411 = vector.extract_strided_slice %410 {offsets = [0, 0, 0], sizes = [7, 32, 128], strides = [1, 1, 1]} : vector<8x32x128xf32> to vector<7x32x128xf32>
    %412 = vector.extract_strided_slice %410 {offsets = [1, 0, 0], sizes = [7, 32, 128], strides = [1, 1, 1]} : vector<8x32x128xf32> to vector<7x32x128xf32>
    %413 = arith.mulf %411, %412 : vector<7x32x128xf32>
    %cst_101 = arith.constant dense<0.000000e+00> : vector<32x128xf32>
    %414 = vector.multi_reduction <add>, %413, %cst_101 [0] : vector<7x32x128xf32> to vector<32x128xf32>
    %415 = vector.shape_cast %414 : vector<32x128xf32> to vector<1x32x128xf32>
    %416 = vector.extract_strided_slice %410 {offsets = [0, 0, 0], sizes = [6, 32, 128], strides = [1, 1, 1]} : vector<8x32x128xf32> to vector<6x32x128xf32>
    %417 = vector.extract_strided_slice %410 {offsets = [2, 0, 0], sizes = [6, 32, 128], strides = [1, 1, 1]} : vector<8x32x128xf32> to vector<6x32x128xf32>
    %418 = arith.mulf %416, %417 : vector<6x32x128xf32>
    %cst_102 = arith.constant dense<0.000000e+00> : vector<32x128xf32>
    %419 = vector.multi_reduction <add>, %418, %cst_102 [0] : vector<6x32x128xf32> to vector<32x128xf32>
    %420 = vector.shape_cast %419 : vector<32x128xf32> to vector<1x32x128xf32>
    %421 = vector.extract_strided_slice %410 {offsets = [0, 0, 0], sizes = [5, 32, 128], strides = [1, 1, 1]} : vector<8x32x128xf32> to vector<5x32x128xf32>
    %422 = vector.extract_strided_slice %410 {offsets = [3, 0, 0], sizes = [5, 32, 128], strides = [1, 1, 1]} : vector<8x32x128xf32> to vector<5x32x128xf32>
    %423 = arith.mulf %421, %422 : vector<5x32x128xf32>
    %cst_103 = arith.constant dense<0.000000e+00> : vector<32x128xf32>
    %424 = vector.multi_reduction <add>, %423, %cst_103 [0] : vector<5x32x128xf32> to vector<32x128xf32>
    %425 = vector.shape_cast %424 : vector<32x128xf32> to vector<1x32x128xf32>
    %426 = vector.extract_strided_slice %410 {offsets = [0, 0, 0], sizes = [4, 32, 128], strides = [1, 1, 1]} : vector<8x32x128xf32> to vector<4x32x128xf32>
    %427 = vector.extract_strided_slice %410 {offsets = [4, 0, 0], sizes = [4, 32, 128], strides = [1, 1, 1]} : vector<8x32x128xf32> to vector<4x32x128xf32>
    %428 = arith.mulf %426, %427 : vector<4x32x128xf32>
    %cst_104 = arith.constant dense<0.000000e+00> : vector<32x128xf32>
    %429 = vector.multi_reduction <add>, %428, %cst_104 [0] : vector<4x32x128xf32> to vector<32x128xf32>
    %430 = vector.shape_cast %429 : vector<32x128xf32> to vector<1x32x128xf32>
    %431 = vector.extract_strided_slice %410 {offsets = [0, 0, 0], sizes = [3, 32, 128], strides = [1, 1, 1]} : vector<8x32x128xf32> to vector<3x32x128xf32>
    %432 = vector.extract_strided_slice %410 {offsets = [5, 0, 0], sizes = [3, 32, 128], strides = [1, 1, 1]} : vector<8x32x128xf32> to vector<3x32x128xf32>
    %433 = arith.mulf %431, %432 : vector<3x32x128xf32>
    %cst_105 = arith.constant dense<0.000000e+00> : vector<32x128xf32>
    %434 = vector.multi_reduction <add>, %433, %cst_105 [0] : vector<3x32x128xf32> to vector<32x128xf32>
    %435 = vector.shape_cast %434 : vector<32x128xf32> to vector<1x32x128xf32>
    %436 = math.absf %415 : vector<1x32x128xf32>
    %437 = math.absf %420 : vector<1x32x128xf32>
    %438 = arith.maximumf %436, %437 : vector<1x32x128xf32>
    %439 = math.absf %425 : vector<1x32x128xf32>
    %440 = arith.maximumf %438, %439 : vector<1x32x128xf32>
    %441 = math.absf %430 : vector<1x32x128xf32>
    %442 = arith.maximumf %440, %441 : vector<1x32x128xf32>
    %443 = math.absf %435 : vector<1x32x128xf32>
    %444 = arith.maximumf %442, %443 : vector<1x32x128xf32>
    %cst_106 = arith.constant 1.000000e+00 : f32
    %445 = vector.broadcast %cst_106 : f32 to vector<1x32x128xf32>
    %446 = arith.divf %445, %444 : vector<1x32x128xf32>
    %447 = arith.mulf %415, %446 : vector<1x32x128xf32>
    %448 = arith.mulf %420, %446 : vector<1x32x128xf32>
    %449 = arith.mulf %425, %446 : vector<1x32x128xf32>
    %450 = arith.mulf %430, %446 : vector<1x32x128xf32>
    %451 = arith.mulf %435, %446 : vector<1x32x128xf32>
    %cst_107 = arith.constant 0.000000e+00 : f32
    %452 = vector.broadcast %cst_107 : f32 to vector<1x1x128xf32>
    %453 = arith.subf %400, %447 : vector<1x32x128xf32>
    %454 = math.absf %453 : vector<1x32x128xf32>
    %cst_108 = arith.constant dense<0.000000e+00> : vector<1x128xf32>
    %455 = vector.multi_reduction <add>, %454, %cst_108 [1] : vector<1x32x128xf32> to vector<1x128xf32>
    %456 = vector.shape_cast %455 : vector<1x128xf32> to vector<1x1x128xf32>
    %457 = arith.addf %452, %456 : vector<1x1x128xf32>
    %458 = arith.subf %401, %448 : vector<1x32x128xf32>
    %459 = math.absf %458 : vector<1x32x128xf32>
    %cst_109 = arith.constant dense<0.000000e+00> : vector<1x128xf32>
    %460 = vector.multi_reduction <add>, %459, %cst_109 [1] : vector<1x32x128xf32> to vector<1x128xf32>
    %461 = vector.shape_cast %460 : vector<1x128xf32> to vector<1x1x128xf32>
    %462 = arith.addf %457, %461 : vector<1x1x128xf32>
    %463 = arith.subf %402, %449 : vector<1x32x128xf32>
    %464 = math.absf %463 : vector<1x32x128xf32>
    %cst_110 = arith.constant dense<0.000000e+00> : vector<1x128xf32>
    %465 = vector.multi_reduction <add>, %464, %cst_110 [1] : vector<1x32x128xf32> to vector<1x128xf32>
    %466 = vector.shape_cast %465 : vector<1x128xf32> to vector<1x1x128xf32>
    %467 = arith.addf %462, %466 : vector<1x1x128xf32>
    %468 = arith.subf %403, %450 : vector<1x32x128xf32>
    %469 = math.absf %468 : vector<1x32x128xf32>
    %cst_111 = arith.constant dense<0.000000e+00> : vector<1x128xf32>
    %470 = vector.multi_reduction <add>, %469, %cst_111 [1] : vector<1x32x128xf32> to vector<1x128xf32>
    %471 = vector.shape_cast %470 : vector<1x128xf32> to vector<1x1x128xf32>
    %472 = arith.addf %467, %471 : vector<1x1x128xf32>
    %473 = arith.subf %404, %451 : vector<1x32x128xf32>
    %474 = math.absf %473 : vector<1x32x128xf32>
    %cst_112 = arith.constant dense<0.000000e+00> : vector<1x128xf32>
    %475 = vector.multi_reduction <add>, %474, %cst_112 [1] : vector<1x32x128xf32> to vector<1x128xf32>
    %476 = vector.shape_cast %475 : vector<1x128xf32> to vector<1x1x128xf32>
    %477 = arith.addf %472, %476 : vector<1x1x128xf32>
    %cst_113 = arith.constant 4.000000e-01 : f32
    %478 = vector.broadcast %cst_113 : f32 to vector<1x1x128xf32>
    %479 = arith.mulf %478, %348 : vector<1x1x128xf32>
    %cst_114 = arith.constant 4.000000e-01 : f32
    %480 = vector.broadcast %cst_114 : f32 to vector<1x1x128xf32>
    %481 = arith.mulf %480, %357 : vector<1x1x128xf32>
    %482 = arith.addf %479, %481 : vector<1x1x128xf32>
    %cst_115 = arith.constant 2.000000e-01 : f32
    %483 = vector.broadcast %cst_115 : f32 to vector<1x1x128xf32>
    %484 = arith.mulf %483, %477 : vector<1x1x128xf32>
    %485 = arith.addf %482, %484 : vector<1x1x128xf32>
    %cst_116 = arith.constant 5.000000e-01 : f32
    %486 = vector.broadcast %cst_116 : f32 to vector<1x1x128xf32>
    %487 = arith.cmpf ogt, %20, %486 : vector<1x1x128xf32>
    %cst_117 = arith.constant 0.000000e+00 : f32
    %488 = vector.broadcast %cst_117 : f32 to vector<1x1x128xf32>
    %489 = arith.select %487, %488, %485 : vector<1x1x128xi1>, vector<1x1x128xf32>
    %490 = vector.shape_cast %489 : vector<1x1x128xf32> to vector<1x128xf32>
    %c0_118 = arith.constant 0 : index
    %c0_119 = arith.constant 0 : index
    %491 = vector.load %arg5[%c0_118, %c0_119] : memref<1x128xf32, #tpu.memory_space<vmem>>, vector<1x128xf32>
    tpu.vector_store %arg5[%c0_118, %c0_119], %490 {strides = array<i32>} : memref<1x128xf32, #tpu.memory_space<vmem>>, vector<1x128xf32>,
    return
  }
  func.func @transform_0(%arg0: i32) -> (i32, i32, i32) {
    %c0_i32 = arith.constant 0 : i32
    %c0_i32_0 = arith.constant 0 : i32
    %c0_i32_1 = arith.constant 0 : i32
    return %c0_i32, %c0_i32_0, %arg0 : i32, i32, i32
  }
  func.func @transform_1(%arg0: i32) -> (i32, i32, i32) {
    %c0_i32 = arith.constant 0 : i32
    %c0_i32_0 = arith.constant 0 : i32
    %c0_i32_1 = arith.constant 0 : i32
    return %c0_i32, %c0_i32_0, %arg0 : i32, i32, i32
  }
  func.func @transform_2(%arg0: i32) -> (i32, i32, i32) {
    %c0_i32 = arith.constant 0 : i32
    %c0_i32_0 = arith.constant 0 : i32
    %c0_i32_1 = arith.constant 0 : i32
    return %c0_i32, %c0_i32_0, %arg0 : i32, i32, i32
  }
  func.func @transform_3(%arg0: i32) -> (i32, i32, i32) {
    %c0_i32 = arith.constant 0 : i32
    %c0_i32_0 = arith.constant 0 : i32
    %c0_i32_1 = arith.constant 0 : i32
    return %c0_i32, %c0_i32_0, %arg0 : i32, i32, i32
  }
  func.func @transform_4(%arg0: i32) -> (i32, i32) {
    %c0_i32 = arith.constant 0 : i32
    %c0_i32_0 = arith.constant 0 : i32
    return %c0_i32, %arg0 : i32, i32
  }
}

</mosaic_0001>

<bundles_post_ra>
// kernel: tpu_custom_call.1
= control target key start
LH: loop header
LB: loop body
LE: loop exit
PB: predicated region body
PF: predicated region fallthrough
CT: control target
= control target key end

     0   :  { %s8078_s0 = inlined_call_operand.hbm [shape: f32[8,16,256], index: 0, kind: input, shape index: {}]   ;;  %s8079_s1 = inlined_call_operand.hbm [shape: f32[8,16,256], index: 1, kind: input, shape index: {}]   ;;  %s8080_s2 = inlined_call_operand.hbm [shape: f32[8,32,256], index: 2, kind: input, shape index: {}]   ;;  %s8081_s3 = inlined_call_operand.hbm [shape: f32[8,32,256], index: 3, kind: input, shape index: {}]   ;;  %s8082_s4 = inlined_call_operand.hbm [shape: f32[1,256], index: 4, kind: output, shape index: {}]  }
   0x1   :  { %8265 = sst [smem:[#allocation71_spill]] %s8078_s0 }
   0x2   :  { %8266 = sst [smem:[#allocation72_spill]] %s8079_s1 }
   0x3   :  { %9 = vsyncpa [#allocation3], 0 }
   0x4   :  { %11 = vsyncpa [#allocation3 + $0x1], 0 }
   0x5   :  { %12 = vsyncpa [#allocation6], 0 }
   0x6   :  { %14 = vsyncpa [#allocation6 + $0x1], 0 }
   0x7   :  { %15 = vsyncpa [#allocation9], 0 }
   0x8   :  { %17 = vsyncpa [#allocation9 + $0x1], 0 }
   0x9   :  { %18 = vsyncpa [#allocation4], 0 }
   0xa   :  { %20 = vsyncpa [#allocation4 + $0x1], 0  ;;  %s4019_s15 = smov 0   ;;  %s4021_s16 = smov 0  }
   0xb   :  { %s4023_s17 = smov 0   ;;  %s4025_s18 = smov 0  }
   0xc LB: > { %s4040_s19 = sadd.s32 4294967295, %s3982_s18   ;;  %s3427_s20 = sadd.s32 4294967294, %s3982_s18   ;;  %s3982_s18 = sphi %s4025_s18, %s8776_s18   ;;  %s3978_s17 = sphi %s4023_s17, %s8775_s17   ;;  %s3974_s16 = sphi %s4021_s16, %s8774_s16   ;;  %s3970_s15 = sphi %s4019_s15, %s8773_s15  }
   0xd   : > { %s4044_s21 = sadd.s32 1, %s3982_s18   ;;  %s33_s22 = sadd.s32 1, %s3978_s17 }
   0xe   : > { %s30_s23 = ssub.s32 %s3982_s18, %s4044_s21  ;;  %p40_p0 = scmp.ne.s32.totalorder %s3978_s17, %s3974_s16 }
   0xf   : > { %p31_p1 = scmp.eq.s32.totalorder %s30_s23, 0  ;;  %p41_p2 = scmp.eq.s32.totalorder %s3982_s18, 0 }
  0x10   : > { %p46_p3 = scmp.ne.s32.totalorder %s3974_s16, %s3970_s15  ;;  %p47_p4 = scmp.eq.s32.totalorder %s4040_s19, 0 }
  0x11   : > { %s4056_s24 = scalar_select %p31_p1, %s3978_s17, %s33_s22  }
  0x12   : > { %p42_p5 = por %p41_p2, %p40_p0  ;;  %p4058_p6 = por %p47_p4, %p46_p3 }
  0x13   : > { %8267 = sst [smem:[#allocation15_spill]] %s4056_s24  ;;  %p148_p7 = scmp.eq.s32.totalorder %s4040_s19, 1 }
  0x14   : > { %s8268_s25 = scalar_select %p4058_p6, 1, 0 }
  0x15   : > { %p154_p8 = scmp.eq.s32.totalorder %s3427_s20, 1  ;;  %p3473_p10 = scmp.lt.s32.totalorder %s3982_s18, 2 }
  0x16   : > { %p4065_p11 = por %p148_p7, %p40_p0  ;;  %s4074_s28 = sand.u32 1, %s3978_s17  }
  0x17   : > { %p4069_p12 = por %p154_p8, %p46_p3  ;;  %s4077_s29 = sshll.u32 %s3982_s18, 7 }
  0x18   : > { %s8269_s26 = scalar_select %p4065_p11, 1, 0 }
  0x19   : > { %s8270_s27 = scalar_select %p4069_p12, 1, 0 }
  0x1a   : > { %s3430_s30 = sshll.u32 %s4074_s28, 7  ;;  %p4080_p13 = pnand %p3473_p10, %p42_p5 }
  0x1b   : > { %s194_s6 = sand.u32 1, %s3982_s18   ;;  %s8272_s1 = sld [smem:[#allocation72_spill]] }
  0x1c   : > { %s198_s10 = scalar_lea.vmem [#allocation5], %s3430_s30  ;;  %s4097_s12 = scalar_lea.sflag [#allocation6], %s194_s6 }
  0x1d   : > { %s204_s11 = sshll.u32 %s198_s10, 4  ;;  %p4103_p3 = pneg %p4080_p13  ;;  %s4094_s11 = int_to_ptr.vmem [resolvable:$true] %s204_s11 }
  0x21   : > { %s4089_s9 = scalar_lea.hbm %s8272_s1, %s4077_s29  ;;  %s3761_s23 = scalar_lea.hbm %s8272_s1, 4096 }
  0x22   : > { %s3756_s13 = scalar_lea.hbm %s4089_s9, 2048  ;;  %p3762_p7 = scmp.lt.u32.totalorder %s4089_s9, %s8272_s1 }
  0x23   : > { %p3757_p2 = scmp.ne.s32.totalorder %s4089_s9, %s3756_s13  ;;  %p3763_p8 = scmp.lt.u32.totalorder %s3761_s23, %s3756_s13 }
  0x24   : > { %p3765_p9 = scmp.lt.u32.totalorder %s3756_s13, %s4089_s9 }
  0x25   : > { %p3759_p4 = pnand %p4103_p3, %p3757_p2  ;;  %p3764_p10 = por %p3763_p8, %p3762_p7 }
  0x27   : > { %p3760_p5 = pneg %p3759_p4  ;;  %p3766_p0 = por %p3765_p9, %p3764_p10 }
  0x29   : > { %p3767_p1 = pnand %p3766_p0, %p3760_p5 }
  0x2b   : > { %3770 = shalt.err (!%p3767_p1)
}
  0x2c   : > { %s3771_s6 = scalar_lea.vmem %s4094_s11, 2048  ;;  %s3984_s10 = smov [#allocation5]  }
  0x2d   : > { %p3772_p2 = scmp.ne.s32.totalorder %s4094_s11, %s3771_s6  ;;  %s3776_s20 = sshll.u32 %s3984_s10, 4  ;;  %s3777_s20 = int_to_ptr.vmem [resolvable:$false] %s3776_s20 }
  0x2e   : > { %s3778_s22 = scalar_lea.vmem %s3777_s20, 4096  ;;  %p3779_p11 = scmp.lt.s32.totalorder %s4094_s11, %s3777_s20 }
  0x2f   : > { %p3774_p4 = pnand %p3772_p2, %p4103_p3  ;;  %p3780_p6 = scmp.lt.s32.totalorder %s3778_s22, %s3771_s6 }
  0x31   : > { %p3775_p12 = pneg %p3774_p4  ;;  %p3781_p7 = por %p3780_p6, %p3779_p11 }
  0x33   : > { %p3782_p8 = pnand %p3781_p7, %p3775_p12 }
  0x35   : > { %3785 = shalt.err (!%p3782_p8)
}
  0x36   : > { %s8085_s13 = smov 256   ;;  %s8087_s23 = smov 128  }
  0x37   : > { %s8089_s7 = smov 8   ;;  %p8274_p6 = scmp.lt.s32.totalorder %s3982_s18, 3 }
  0x38   : > { %3462 = dma.hbm_to_vmem [thread:$0]  (!%p4080_p13), %s4089_s9, 2048, %s4094_s11, %s4097_s12, %s8085_s13, %s8087_s23, %s8089_s7  }
  0x39   : > { %p8275_p9 = scmp.ge.s32.totalorder %s3982_s18, 1  ;;  %s8277_s0 = sld [smem:[#allocation71_spill]] }
  0x3a   : > { %s178_s22 = scalar_lea.vmem [#allocation2], %s3430_s30  ;;  %s3434_s24 = sshll.u32 %s4074_s28, 8 }
  0x3b   : > { %p4134_p11 = pnand %p8275_p9, %p8274_p6  ;;  %s184_s1 = sshll.u32 %s178_s22, 4  ;;  %s4147_s1 = int_to_ptr.vmem [resolvable:$true] %s184_s1 }
  0x3c   : > { %s175_s9 = scalar_lea.sflag [#allocation3], %s4074_s28 }
  0x3d   : > { %s8276_s8 = scalar_select %p4134_p11, 1, 0 }
  0x3f   : > { %s4142_s20 = scalar_lea.hbm %s8277_s0, %s4077_s29  ;;  %s3791_s10 = scalar_lea.hbm %s8277_s0, 4096 }
  0x40   : > { %s3786_s11 = scalar_lea.hbm %s4142_s20, 2048  ;;  %p3792_p5 = scmp.lt.u32.totalorder %s4142_s20, %s8277_s0 }
  0x41   : > { %p3787_p12 = scmp.ne.s32.totalorder %s4142_s20, %s3786_s11  ;;  %p3793_p10 = scmp.lt.u32.totalorder %s3791_s10, %s3786_s11 }
  0x42   : > { %p3795_p4 = scmp.lt.u32.totalorder %s3786_s11, %s4142_s20 }
  0x43   : > { %p3789_p0 = pnand %p3787_p12, %p4103_p3  ;;  %p3794_p2 = por %p3793_p10, %p3792_p5 }
  0x45   : > { %p3790_p1 = pneg %p3789_p0  ;;  %p3796_p7 = por %p3795_p4, %p3794_p2 }
  0x47   : > { %p3797_p8 = pnand %p3796_p7, %p3790_p1 }
  0x49   : > { %3800 = shalt.err (!%p3797_p8)
}
  0x4a   : > { %s3801_s30 = scalar_lea.vmem %s4147_s1, 2048  ;;  %s3988_s13 = smov [#allocation2]  }
  0x4b   : > { %p3802_p6 = scmp.ne.s32.totalorder %s4147_s1, %s3801_s30  ;;  %s3806_s22 = sshll.u32 %s3988_s13, 4  ;;  %s3807_s22 = int_to_ptr.vmem [resolvable:$false] %s3806_s22 }
  0x4c   : > { %s3808_s23 = scalar_lea.vmem %s3807_s22, 4096  ;;  %p3809_p0 = scmp.lt.s32.totalorder %s4147_s1, %s3807_s22 }
  0x4d   : > { %p3804_p9 = pnand %p3802_p6, %p4103_p3  ;;  %p3810_p11 = scmp.lt.s32.totalorder %s3808_s23, %s3801_s30 }
  0x4f   : > { %p3805_p12 = pneg %p3804_p9  ;;  %p3811_p5 = por %p3810_p11, %p3809_p0 }
  0x51   : > { %p3812_p10 = pnand %p3811_p5, %p3805_p12 }
  0x53   : > { %3815 = shalt.err (!%p3812_p10)
}
  0x54   : > { %s8278_s7 = smov 8   ;;  %s8279_s11 = smov 128  }
  0x55   : > { %s8280_s6 = smov 256   ;;  %s4180_s30 = scalar_lea.hbm %s8080_s2, %s4077_s29 }
  0x56   : > { %3459 = dma.hbm_to_vmem [thread:$0]  (!%p4080_p13), %s4142_s20, 2048, %s4147_s1, %s175_s9, %s8280_s6, %s8279_s11, %s8278_s7  }
  0x57   : > { %s218_s22 = scalar_lea.vmem [#allocation7], %s3434_s24  ;;  %s3816_s0 = scalar_lea.hbm %s4180_s30, 4096 }
  0x58   : > { %s224_s23 = sshll.u32 %s218_s22, 4  ;;  %p3817_p11 = scmp.ne.s32.totalorder %s4180_s30, %s3816_s0  ;;  %s4184_s23 = int_to_ptr.vmem [resolvable:$true] %s224_s23 }
  0x59   : > { %s3821_s9 = scalar_lea.hbm %s8080_s2, 8192  ;;  %p3822_p4 = scmp.lt.u32.totalorder %s4180_s30, %s8080_s2 }
  0x5a   : > { %p3819_p1 = pnand %p3817_p11, %p4103_p3  ;;  %p3823_p7 = scmp.lt.u32.totalorder %s3821_s9, %s3816_s0 }
  0x5b   : > { %p3825_p6 = scmp.lt.u32.totalorder %s3816_s0, %s4180_s30 }
  0x5c   : > { %p3820_p2 = pneg %p3819_p1  ;;  %p3824_p8 = por %p3823_p7, %p3822_p4 }
  0x5e   : > { %p3826_p9 = por %p3825_p6, %p3824_p8 }
  0x60   : > { %p3827_p12 = pnand %p3826_p9, %p3820_p2 }
  0x62   : > { %3830 = shalt.err (!%p3827_p12)
}
  0x63   : > { %s3831_s22 = scalar_lea.vmem %s4184_s23, 4096  ;;  %s3989_s1 = smov [#allocation7]  }
  0x64   : > { %p3832_p0 = scmp.ne.s32.totalorder %s4184_s23, %s3831_s22  ;;  %s3836_s20 = sshll.u32 %s3989_s1, 4  ;;  %s3837_s20 = int_to_ptr.vmem [resolvable:$false] %s3836_s20 }
  0x65   : > { %s3838_s10 = scalar_lea.vmem %s3837_s20, 8192  ;;  %p3839_p11 = scmp.lt.s32.totalorder %s4184_s23, %s3837_s20 }
  0x66   : > { %p3834_p5 = pnand %p3832_p0, %p4103_p3  ;;  %p3840_p1 = scmp.lt.s32.totalorder %s3838_s10, %s3831_s22 }
  0x68   : > { %p3835_p10 = pneg %p3834_p5  ;;  %p3841_p4 = por %p3840_p1, %p3839_p11 }
  0x6a   : > { %p3842_p7 = pnand %p3841_p4, %p3835_p10 }
  0x6c   : > { %3845 = shalt.err (!%p3842_p7)
}
  0x6d   : > { %3465 = dma.hbm_to_vmem [thread:$0]  (!%p4080_p13), %s4180_s30, 4096, %s4184_s23, %s4097_s12, %s8280_s6, %s8279_s11, %s8278_s7  }
  0x6e   : > { %s4215_s13 = scalar_lea.hbm %s8081_s3, %s4077_s29  ;;  %s238_s22 = scalar_lea.vmem [#allocation8], %s3434_s24 }
  0x6f   : > { %s244_s1 = sshll.u32 %s238_s22, 4  ;;  %s235_s20 = scalar_lea.sflag [#allocation9], %s4074_s28  ;;  %s4219_s1 = int_to_ptr.vmem [resolvable:$true] %s244_s1 }
  0x70   : > { %s3846_s10 = scalar_lea.hbm %s4215_s13, 4096  ;;  %s3851_s29 = scalar_lea.hbm %s8081_s3, 8192 }
  0x71   : > { %p3847_p2 = scmp.ne.s32.totalorder %s4215_s13, %s3846_s10  ;;  %p3852_p9 = scmp.lt.u32.totalorder %s4215_s13, %s8081_s3 }
  0x72   : > { %p3853_p12 = scmp.lt.u32.totalorder %s3851_s29, %s3846_s10  ;;  %p3855_p5 = scmp.lt.u32.totalorder %s3846_s10, %s4215_s13 }
  0x73   : > { %p3849_p8 = pnand %p3847_p2, %p4103_p3 }
  0x74   : > { %p3854_p0 = por %p3853_p12, %p3852_p9 }
  0x75   : > { %p3850_p6 = pneg %p3849_p8 }
  0x76   : > { %p3856_p10 = por %p3855_p5, %p3854_p0 }
  0x78   : > { %p3857_p11 = pnand %p3856_p10, %p3850_p6 }
  0x7a   : > { %3860 = shalt.err (!%p3857_p11)
}
  0x7b   : > { %s3861_s24 = scalar_lea.vmem %s4219_s1, 4096  ;;  %s3990_s9 = smov [#allocation8]  }
  0x7c   : > { %p3862_p1 = scmp.ne.s32.totalorder %s4219_s1, %s3861_s24  ;;  %s3866_s22 = sshll.u32 %s3990_s9, 4  ;;  %s3867_s22 = int_to_ptr.vmem [resolvable:$false] %s3866_s22 }
  0x7d   : > { %s3868_s12 = scalar_lea.vmem %s3867_s22, 8192  ;;  %p3869_p2 = scmp.lt.s32.totalorder %s4219_s1, %s3867_s22 }
  0x7e   : > { %p3864_p4 = pnand %p3862_p1, %p4103_p3  ;;  %p3870_p8 = scmp.lt.s32.totalorder %s3868_s12, %s3861_s24 }
  0x80   : > { %p3865_p7 = pneg %p3864_p4  ;;  %p3871_p9 = por %p3870_p8, %p3869_p2 }
  0x82   : > { %p3872_p12 = pnand %p3871_p9, %p3865_p7 }
  0x84   : > { %3875 = shalt.err (!%p3872_p12)
}
  0x85   : > { %3468 = dma.hbm_to_vmem [thread:$0]  (!%p4080_p13), %s4215_s13, 4096, %s4219_s1, %s235_s20, %s8280_s6, %s8279_s11, %s8278_s7  }
  0x86   : > { %p8281_p3 = scmp.ne.s32.totalorder %s8276_s8, 0 }
  0x88   : > { %256 = sbr.rel (%p8281_p3) target bundleno = 891 (0x37b), region = 36 }
  0x8f   : > { %s4251_s14 = sand.u32 1, %s3974_s16   ;;  %p8282_p6 = scmp.ne.s32.totalorder %s8268_s25, 0 }
  0x90   : > { %s3439_s10 = sshll.u32 %s4251_s14, 7  ;;  %s259_s30 = scalar_lea.sflag [#allocation3], %s4251_s14 }
  0x91   : > { %s4255_s5 = scalar_lea.vmem [#allocation2], %s3439_s10 }
  0x92   : > { %3921 = dma.done.wait (%p8282_p6), %s259_s30, 2048  }
  0x93   : > { %3923 = vsyncadd (%p8282_p6), %s259_s30, 4294965248  ;;  %s267_s28 = sand.u32 1, %s4040_s19   ;;  %s4262_s7 = scalar_lea.vmem [#allocation5], %s3439_s10 }
  0x94   : > { %s268_s8 = scalar_lea.sflag [#allocation6], %s267_s28 }
  0x95   : > { %3925 = dma.done.wait (%p8282_p6), %s268_s8, 6144  }
  0x96   : > { %3927 = vsyncadd (%p8282_p6), %s268_s8, 4294961152  ;;  %s3441_s11 = sshll.u32 %s4251_s14, 8  ;;  %s286_s13 = scalar_lea.sflag [#allocation9], %s4251_s14 }
  0x97   : > { %s4269_s6 = scalar_lea.vmem [#allocation7], %s3441_s11  ;;  %s4272_s1 = scalar_lea.vmem [#allocation8], %s3441_s11 }
  0x98   : > { %3929 = dma.done.wait (%p8282_p6), %s286_s13, 4096  }
  0x99   : > { %3931 = vsyncadd (%p8282_p6), %s286_s13, 4294963200  ;;  %v4279_v0 = vld [vmem:[%s4255_s5] sm:$0xff]  ;;  %v4282_v1 = vld [vmem:[%s4255_s5 + $0x8] sm:$0xff]  ;;  %v8092_v20 = vmov 0.0   ;;  %s3443_s25 = sshll.u32 %s4040_s19, 4  ;;  %s327_s20 = scalar_lea.vmem [#allocation10], %s4251_s14 }
  0x9a   : > { %v4285_v2 = vld [vmem:[%s4255_s5 + $0x10] sm:$0xff]  ;;  %v4288_v3 = vld [vmem:[%s4255_s5 + $0x18] sm:$0xff]  ;;  %v4291_v4 = vld [vmem:[%s4255_s5 + $0x20] sm:$0xff]  ;;  %s3295_s29 = sshll.u32 %s327_s20, 4  ;;  %s8034_s24 = scalar_lea.hbm %s8082_s4, %s3443_s25  ;;  %s8036_s29 = int_to_ptr.vmem [resolvable:$true] %s3295_s29 }
  0x9b   : > { %v4294_v5 = vld [vmem:[%s4262_s7] sm:$0xff]  ;;  %v4297_v6 = vld [vmem:[%s4262_s7 + $0x8] sm:$0xff]  ;;  %v4300_v7 = vld [vmem:[%s4262_s7 + $0x10] sm:$0xff]  ;;  %s3283_s9 = scalar_lea.sflag [#allocation4], %s4251_s14  ;;  %s3876_s22 = scalar_lea.vmem %s8036_s29, 16 }
  0x9c   : > { %v4303_v8 = vld [vmem:[%s4262_s7 + $0x18] sm:$0xff]  ;;  %vm424_vm0 = vcmp.eq.f32.partialorder %v4279_v0, %v4294_v5  ;;  %v4308_v9 = vld [vmem:[%s4255_s5 + $0x28] sm:$0xff]  ;;  %v4311_v10 = vld [vmem:[%s4262_s7 + $0x20] sm:$0xff]  ;;  %vm425_vm1 = vcmp.eq.f32.partialorder %v4282_v1, %v4297_v6  ;;  %vm426_vm2 = vcmp.eq.f32.partialorder %v4285_v2, %v4300_v7  ;;  %p3877_p13 = scmp.ne.s32.totalorder %s8036_s29, %s3876_s22  ;;  %p8769_p0 = scmp.ne.s32.totalorder %s8269_s26, 0 }
  0x9d   : > { %v4314_v11 = vld [vmem:[%s4262_s7 + $0x28] sm:$0xff]  ;;  %vm427_vm3 = vcmp.eq.f32.partialorder %v4288_v3, %v4303_v8  ;;  %v4323_v12 = vld [vmem:[%s4255_s5 + $0x30] sm:$0xff]  ;;  %v4326_v13 = vld [vmem:[%s4255_s5 + $0x38] sm:$0xff]  ;;  %vm428_vm4 = vcmp.eq.f32.partialorder %v4291_v4, %v4311_v10  ;;  %v440_v21 = vsel %vm424_vm0, 1.0, %v8092_v20  ;;  %v441_v26 = vsel %vm425_vm1, 1.0, %v8092_v20  ;;  %s3993_s19 = smov [#allocation10]  }
  0x9e   : > { %v4329_v14 = vld [vmem:[%s4255_s5 + $0x40] sm:$0xff]  ;;  %vm429_vm5 = vcmp.eq.f32.partialorder %v4308_v9, %v4314_v11  ;;  %v4336_v15 = vld [vmem:[%s4255_s5 + $0x48] sm:$0xff]  ;;  %v4339_v16 = vld [vmem:[%s4255_s5 + $0x50] sm:$0xff]  ;;  %v442_v27 = vsel %vm426_vm2, 1.0, %v8092_v20  ;;  %v443_v28 = vsel %vm427_vm3, 1.0, %v8092_v20  ;;  %v444_v32 = vsel %vm428_vm4, 1.0, %v8092_v20  ;;  %p3878_p5 = pnand %p3877_p13, %p8769_p0 }
  0x9f   : > { %v4342_v17 = vld [vmem:[%s4255_s5 + $0x58] sm:$0xff]  ;;  %v4345_v18 = vld [vmem:[%s4255_s5 + $0x60] sm:$0xff]  ;;  %v4348_v19 = vld [vmem:[%s4262_s7 + $0x30] sm:$0xff]  ;;  %v445_v33 = vsel %vm429_vm5, 1.0, %v8092_v20  ;;  %v456_v39 = vmin.f32 %v440_v21, %v441_v26  ;;  %v463_v40 = vmin.f32 %v442_v27, %v443_v28  ;;  %s3880_s12 = sshll.u32 %s3993_s19, 4  ;;  %s3881_s12 = int_to_ptr.vmem [resolvable:$false] %s3880_s12 }
  0xa0   : > { %v4355_v22 = vld [vmem:[%s4255_s5 + $0x68] sm:$0xff]  ;;  %v4358_v23 = vld [vmem:[%s4262_s7 + $0x38] sm:$0xff]  ;;  %v4361_v24 = vld [vmem:[%s4262_s7 + $0x40] sm:$0xff]  ;;  %vm430_vm6 = vcmp.eq.f32.partialorder %v4323_v12, %v4348_v19  ;;  %v470_v43 = vmin.f32 %v444_v32, %v445_v33  ;;  %p3879_p10 = pneg %p3878_p5  ;;  %s3882_s10 = scalar_lea.vmem %s3881_s12, 32 }
  0xa1   : > { %v4364_v25 = vld [vmem:[%s4262_s7 + $0x48] sm:$0xff]  ;;  %v4381_v29 = vld [vmem:[%s4262_s7 + $0x50] sm:$0xff]  ;;  %v4384_v30 = vld [vmem:[%s4262_s7 + $0x58] sm:$0xff]  ;;  %vm431_vm7 = vcmp.eq.f32.partialorder %v4326_v13, %v4358_v23  ;;  %vm432_vm8 = vcmp.eq.f32.partialorder %v4329_v14, %v4361_v24  ;;  %v446_v41 = vsel %vm430_vm6, 1.0, %v8092_v20  ;;  %v457_v52 = vrot.slane %v456_v39, 4  ;;  %p3883_p11 = scmp.lt.s32.totalorder %s8036_s29, %s3881_s12  ;;  %p3884_p1 = scmp.lt.s32.totalorder %s3882_s10, %s3876_s22 }
  0xa2   : > { %v4387_v31 = vld [vmem:[%s4262_s7 + $0x60] sm:$0xff]  ;;  %v4402_v34 = vld [vmem:[%s4255_s5 + $0x70] sm:$0xff]  ;;  %v4405_v35 = vld [vmem:[%s4262_s7 + $0x68] sm:$0xff]  ;;  %vm433_vm9 = vcmp.eq.f32.partialorder %v4336_v15, %v4364_v25  ;;  %vm434_vm10 = vcmp.eq.f32.partialorder %v4339_v16, %v4381_v29  ;;  %vm435_vm11 = vcmp.eq.f32.partialorder %v4342_v17, %v4384_v30  ;;  %v447_v42 = vsel %vm431_vm7, 1.0, %v8092_v20 }
  0xa3   : > { %v4408_v36 = vld [vmem:[%s4262_s7 + $0x70] sm:$0xff]  ;;  %vm436_vm12 = vcmp.eq.f32.partialorder %v4345_v18, %v4387_v31  ;;  %v4419_v37 = vld [vmem:[%s4255_s5 + $0x78] sm:$0xff]  ;;  %vm437_vm13 = vcmp.eq.f32.partialorder %v4355_v22, %v4405_v35  ;;  %v448_v44 = vsel %vm432_vm8, 1.0, %v8092_v20  ;;  %v449_v45 = vsel %vm433_vm9, 1.0, %v8092_v20  ;;  %p3885_p4 = por %p3884_p1, %p3883_p11 }
  0xa4   : > { %v4422_v38 = vld [vmem:[%s4262_s7 + $0x78] sm:$0xff]  ;;  %vm438_vm14 = vcmp.eq.f32.partialorder %v4402_v34, %v4408_v36  ;;  %v450_v46 = vsel %vm434_vm10, 1.0, %v8092_v20  ;;  %v451_v47 = vsel %vm435_vm11, 1.0, %v8092_v20  ;;  %v452_v48 = vsel %vm436_vm12, 1.0, %v8092_v20 }
  0xa5   : > { %8283 = vst [vmem:[#allocation16_spill] sm:$0xff] %v4422_v38  ;;  %vm439_vm15 = vcmp.eq.f32.partialorder %v4419_v37, %v4422_v38  ;;  %v453_v49 = vsel %vm437_vm13, 1.0, %v8092_v20  ;;  %v454_v50 = vsel %vm438_vm14, 1.0, %v8092_v20  ;;  %v464_v53 = vrot.slane %v463_v40, 4  ;;  %p3886_p7 = pnand %p3885_p4, %p3879_p10 }
  0xa6   : > { %v455_v51 = vsel %vm439_vm15, 1.0, %v8092_v20  ;;  %v477_v54 = vmin.f32 %v446_v41, %v447_v42  ;;  %v471_v55 = vrot.slane %v470_v43, 4  ;;  %v484_v56 = vmin.f32 %v448_v44, %v449_v45 }
  0xa7   : > { %v491_v57 = vmin.f32 %v450_v46, %v451_v47  ;;  %v498_v58 = vmin.f32 %v452_v48, %v453_v49  ;;  %v505_v59 = vmin.f32 %v454_v50, %v455_v51  ;;  %v458_v60 = vmin.f32 %v456_v39, %v457_v52 }
  0xa8   : > { %v465_v61 = vmin.f32 %v463_v40, %v464_v53  ;;  %v478_v62 = vrot.slane %v477_v54, 4  ;;  %v472_v63 = vmin.f32 %v470_v43, %v471_v55  ;;  %v485_v21 = vrot.slane %v484_v56, 4 }
  0xa9   : > { %v492_v26 = vrot.slane %v491_v57, 4  ;;  %v499_v27 = vrot.slane %v498_v58, 4  ;;  %v506_v28 = vrot.slane %v505_v59, 4  ;;  %v459_v32 = vrot.slane %v458_v60, 2 }
  0xaa   : > { %v466_v33 = vrot.slane %v465_v61, 2  ;;  %v479_v38 = vmin.f32 %v477_v54, %v478_v62  ;;  %v663_v20 = vmul.f32 %v4279_v0, %v4279_v0  ;;  %v473_v41 = vrot.slane %v472_v63, 2 }
  0xab   : > { %v664_v42 = vmul.f32 %v4282_v1, %v4282_v1  ;;  %v665_v39 = vmul.f32 %v4285_v2, %v4285_v2  ;;  %v666_v40 = vmul.f32 %v4288_v3, %v4288_v3  ;;  %v486_v43 = vmin.f32 %v484_v56, %v485_v21 }
  0xac   : > { %v493_v44 = vmin.f32 %v491_v57, %v492_v26  ;;  %v500_v45 = vmin.f32 %v498_v58, %v499_v27  ;;  %v507_v46 = vmin.f32 %v505_v59, %v506_v28  ;;  %v460_v47 = vmin.f32 %v458_v60, %v459_v32 }
  0xad   : > { %v467_v48 = vmin.f32 %v465_v61, %v466_v33  ;;  %v480_v49 = vrot.slane %v479_v38, 2  ;;  %v474_v50 = vmin.f32 %v472_v63, %v473_v41  ;;  %v667_v0 = vmul.f32 %v4291_v4, %v4291_v4  ;;  %v367_v41 = vld [vmem:[%s4269_s6 + $0x38] sm:$0xff] }
  0xae   : > { %v679_v51 = vadd.f32 %v664_v42, %v663_v20  ;;  %v686_v52 = vadd.f32 %v666_v40, %v665_v39  ;;  %v487_v1 = vrot.slane %v486_v43, 2  ;;  %v494_v53 = vrot.slane %v493_v44, 2  ;;  %v4504_v40 = vld [vmem:[%s4269_s6] sm:$0xff] }
  0xaf   : > { %v501_v54 = vrot.slane %v500_v45, 2  ;;  %v668_v2 = vmul.f32 %v4308_v9, %v4308_v9  ;;  %v508_v3 = vrot.slane %v507_v46, 2  ;;  %v669_v55 = vmul.f32 %v4323_v12, %v4323_v12 }
  0xb0   : > { %v670_v56 = vmul.f32 %v4326_v13, %v4326_v13  ;;  %v671_v57 = vmul.f32 %v4329_v14, %v4329_v14  ;;  %v461_v58 = vrot.slane %v460_v47, 1  ;;  %v468_v4 = vrot.slane %v467_v48, 1 }
  0xb1   : > { %v4467_v20 = vmin.f32 %v479_v38, %v480_v49  ;;  %v672_v59 = vmul.f32 %v4336_v15, %v4336_v15  ;;  %v475_v60 = vrot.slane %v474_v50, 1  ;;  %v673_v9 = vmul.f32 %v4339_v16, %v4339_v16  ;;  %v4517_v49 = vld [vmem:[%s4272_s1 + $0x8] sm:$0xff] }
  0xb2   : > { %v680_v61 = vrot.slane %v679_v51, 4  ;;  %v687_v62 = vrot.slane %v686_v52, 4  ;;  %v4473_v12 = vmin.f32 %v486_v43, %v487_v1  ;;  %v4475_v63 = vmin.f32 %v493_v44, %v494_v53  ;;  %v4525_v1 = vld [vmem:[%s4272_s1 + $0x10] sm:$0xff]  ;;  %v4528_v53 = vld [vmem:[%s4272_s1 + $0x18] sm:$0xff] }
  0xb3   : > { %8284 = vst [vmem:[#allocation17_spill] sm:$0xff] %v4467_v20  ;;  %v4477_v13 = vmin.f32 %v500_v45, %v501_v54  ;;  %v674_v14 = vmul.f32 %v4342_v17, %v4342_v17  ;;  %v4481_v38 = vmin.f32 %v507_v46, %v508_v3  ;;  %v675_v15 = vmul.f32 %v4345_v18, %v4345_v18 }
  0xb4   : > { %8285 = vst [vmem:[#allocation18_spill] sm:$0xff] %v4473_v12  ;;  %8286 = vst [vmem:[#allocation19_spill] sm:$0xff] %v4475_v63  ;;  %v676_v16 = vmul.f32 %v4355_v22, %v4355_v22  ;;  %v4489_v21 = vmul.f32 %v4402_v34, %v4402_v34  ;;  %v4491_v26 = vmin.f32 %v460_v47, %v461_v58  ;;  %v4511_v47 = vld [vmem:[%s4269_s6 + $0x8] sm:$0xff]  ;;  %v400_v34 = vld [vmem:[%s4272_s1 + $0x40] sm:$0xff] }
  0xb5   : > { %8287 = vst [vmem:[#allocation20_spill] sm:$0xff] %v4477_v13  ;;  %8288 = vst [vmem:[#allocation21_spill] sm:$0xff] %v4481_v38  ;;  %v4493_v27 = vmin.f32 %v467_v48, %v468_v4  ;;  %v678_v28 = vmul.f32 %v4419_v37, %v4419_v37  ;;  %v4498_v18 = vmin.f32 %v474_v50, %v475_v60  ;;  %v4507_v37 = vld [vmem:[%s4272_s1] sm:$0xff]  ;;  %v4514_v48 = vld [vmem:[%s4269_s6 + $0x10] sm:$0xff] }
  0xb6   : > { %8289 = vst [vmem:[#allocation22_spill] sm:$0xff] %v4491_v26  ;;  %v681_v32 = vadd.f32 %v680_v61, %v679_v51  ;;  %v688_v22 = vadd.f32 %v687_v62, %v686_v52  ;;  %v693_v33 = vadd.f32 %v668_v2, %v667_v0  ;;  %v700_v39 = vadd.f32 %v670_v56, %v669_v55  ;;  %v4522_v52 = vld [vmem:[%s4269_s6 + $0x18] sm:$0xff]  ;;  %v4533_v55 = vld [vmem:[%s4269_s6 + $0x20] sm:$0xff]  ;;  %v365_v60 = vld [vmem:[%s4269_s6 + $0x28] sm:$0xff] }
  0xb7   : > { %8290 = vst [vmem:[#allocation23_spill] sm:$0xff] %v4493_v27  ;;  %8291 = vst [vmem:[#allocation24_spill] sm:$0xff] %v4498_v18  ;;  %vm519_vm0 = vcmp.eq.f32.partialorder %v4504_v40, %v4507_v37  ;;  %v707_v0 = vadd.f32 %v672_v59, %v671_v57  ;;  %v714_v51 = vadd.f32 %v674_v14, %v673_v9  ;;  %v396_v56 = vld [vmem:[%s4272_s1 + $0x20] sm:$0xff]  ;;  %v366_v14 = vld [vmem:[%s4269_s6 + $0x30] sm:$0xff]  ;;  %v8292_v18 = vmov 0.0  }
  0xb8   : > { %v682_v44 = vrot.slane %v681_v32, 2  ;;  %v689_v45 = vrot.slane %v688_v22, 2  ;;  %v694_v46 = vrot.slane %v693_v33, 4  ;;  %v701_v50 = vrot.slane %v700_v39, 4 }
  0xb9   : > { %vm520_vm1 = vcmp.eq.f32.partialorder %v4511_v47, %v4517_v49  ;;  %vm521_vm2 = vcmp.eq.f32.partialorder %v4514_v48, %v4525_v1  ;;  %vm522_vm3 = vcmp.eq.f32.partialorder %v4522_v52, %v4528_v53  ;;  %v708_v58 = vrot.slane %v707_v0, 4 }
  0xba   : > { %v683_v54 = vadd.f32 %v682_v44, %v681_v32  ;;  %v690_v2 = vadd.f32 %v689_v45, %v688_v22  ;;  %v695_v3 = vadd.f32 %v694_v46, %v693_v33  ;;  %v702_v57 = vadd.f32 %v701_v50, %v700_v39  ;;  %v397_v32 = vld [vmem:[%s4272_s1 + $0x28] sm:$0xff]  ;;  %v398_v22 = vld [vmem:[%s4272_s1 + $0x30] sm:$0xff] }
  0xbb   : > { %v715_v4 = vrot.slane %v714_v51, 4  ;;  %v721_v59 = vadd.f32 %v676_v16, %v675_v15  ;;  %vm523_vm4 = vcmp.eq.f32.partialorder %v4533_v55, %v396_v56  ;;  %v709_v44 = vadd.f32 %v708_v58, %v707_v0  ;;  %v368_v58 = vld [vmem:[%s4269_s6 + $0x40] sm:$0xff] }
  0xbc   : > { %v684_v9 = vrot.slane %v683_v54, 1  ;;  %v691_v61 = vrot.slane %v690_v2, 1  ;;  %v696_v62 = vrot.slane %v695_v3, 2  ;;  %v703_v33 = vrot.slane %v702_v57, 2 }
  0xbd   : > { %v716_v45 = vadd.f32 %v715_v4, %v714_v51  ;;  %v722_v46 = vrot.slane %v721_v59, 4  ;;  %vm524_vm5 = vcmp.eq.f32.partialorder %v365_v60, %v397_v32  ;;  %vm525_vm6 = vcmp.eq.f32.partialorder %v366_v14, %v398_v22  ;;  %v399_v4 = vld [vmem:[%s4272_s1 + $0x38] sm:$0xff] }
  0xbe   : > { %v4545_v15 = vadd.f32 %v684_v9, %v683_v54  ;;  %v697_v16 = vadd.f32 %v696_v62, %v695_v3  ;;  %v704_v39 = vadd.f32 %v703_v33, %v702_v57  ;;  %v710_v50 = vrot.slane %v709_v44, 2 }
  0xbf   : > { %v717_v43 = vrot.slane %v716_v45, 2  ;;  %v723_v42 = vadd.f32 %v722_v46, %v721_v59  ;;  %v4548_v17 = vadd.f32 %v691_v61, %v690_v2  ;;  %v728_v51 = vadd.f32 %v678_v28, %v4489_v21  ;;  %v369_v2 = vld [vmem:[%s4269_s6 + $0x48] sm:$0xff] }
  0xc0   : > { %v698_v0 = vrot.slane %v697_v16, 1  ;;  %3512 = vrsqrt.f32 %v4545_v15  ;;  %v705_v54 = vrot.slane %v704_v39, 1  ;;  %v711_v9 = vadd.f32 %v710_v50, %v709_v44  ;;  %v401_v61 = vld [vmem:[%s4272_s1 + $0x48] sm:$0xff] }
  0xc1   : > { %v718_v3 = vadd.f32 %v717_v43, %v716_v45  ;;  %v724_v57 = vrot.slane %v723_v42, 2  ;;  %vm526_vm7 = vcmp.eq.f32.partialorder %v367_v41, %v399_v4  ;;  %vm527_vm8 = vcmp.eq.f32.partialorder %v368_v58, %v400_v34 }
  0xc2   : > { %v4555_v59 = vadd.f32 %v698_v0, %v697_v16  ;;  %v729_v62 = vrot.slane %v728_v51, 4  ;;  %v4559_v33 = vadd.f32 %v705_v54, %v704_v39  ;;  %v712_v46 = vrot.slane %v711_v9, 1 }
  0xc3   : > { %v719_v21 = vrot.slane %v718_v3, 1  ;;  %v725_v28 = vadd.f32 %v724_v57, %v723_v42  ;;  %vm528_vm9 = vcmp.eq.f32.partialorder %v369_v2, %v401_v61  ;;  %v4565_v44 = vsel %vm519_vm0, 1.0, %v8292_v18 }
  0xc4   : > { %8293 = vst [vmem:[#allocation25_spill] sm:$0xff] %v4565_v44  ;;  %v730_v43 = vadd.f32 %v729_v62, %v728_v51  ;;  %3514 = vrsqrt.f32 %v4548_v17  ;;  %v4572_v45 = vsel %vm520_vm1, 1.0, %v8292_v18  ;;  %v4574_v16 = vadd.f32 %v712_v46, %v711_v9 }
  0xc5   : > { %8294 = vst [vmem:[#allocation26_spill] sm:$0xff] %v4572_v45  ;;  %v4576_v39 = vadd.f32 %v719_v21, %v718_v3  ;;  %v726_v42 = vrot.slane %v725_v28, 1  ;;  %v4582_v40 = vsel %vm521_vm2, 1.0, %v8292_v18  ;;  %v4588_v37 = vsel %vm522_vm3, 1.0, %v8292_v18 }
  0xc6   : > { %8295 = vst [vmem:[#allocation27_spill] sm:$0xff] %v4582_v40  ;;  %8296 = vst [vmem:[#allocation28_spill] sm:$0xff] %v4588_v37  ;;  %v731_v47 = vrot.slane %v730_v43, 2  ;;  %3516 = vrsqrt.f32 %v4555_v59  ;;  %v4594_v49 = vsel %vm523_vm4, 1.0, %v8292_v18  ;;  %v4598_v50 = vsel %vm524_vm5, 1.0, %v8292_v18  ;;  %v3640_v37 = vld [vmem:[%s4262_s7 + $0x78] sm:$0xff] }
  0xc7   : > { %8297 = vst [vmem:[#allocation29_spill] sm:$0xff] %v4594_v49  ;;  %8298 = vst [vmem:[#allocation30_spill] sm:$0xff] %v4598_v50  ;;  %v4600_v48 = vadd.f32 %v726_v42, %v725_v28  ;;  %3518 = vrsqrt.f32 %v4559_v33  ;;  %v4605_v52 = vsel %vm525_vm6, 1.0, %v8292_v18  ;;  %v4609_v1 = vsel %vm526_vm7, 1.0, %v8292_v18 }
  0xc8   : > { %8299 = vst [vmem:[#allocation31_spill] sm:$0xff] %v4605_v52  ;;  %8300 = vst [vmem:[#allocation32_spill] sm:$0xff] %v4609_v1  ;;  %v732_v53 = vadd.f32 %v731_v47, %v730_v43  ;;  %3520 = vrsqrt.f32 %v4574_v16  ;;  %v4614_v55 = vsel %vm527_vm8, 1.0, %v8292_v18  ;;  %v4618_v56 = vsel %vm528_vm9, 1.0, %v8292_v18 }
  0xc9   : > { %8301 = vst [vmem:[#allocation33_spill] sm:$0xff] %v4614_v55  ;;  %8302 = vst [vmem:[#allocation34_spill] sm:$0xff] %v4618_v56  ;;  %vm737_vm10 = vcmp.eq.f32.partialorder %v4545_v15, inf  ;;  %3522 = vrsqrt.f32 %v4576_v39  ;;  %vm739_vm11 = vcmp.eq.f32.partialorder %v4545_v15, 0.0  ;;  %v740_v41 = vand.u32 2147483648, %v4545_v15 }
  0xca   : > { %v3513_v60 = vpop.eup %3512  ;;  %v733_v14 = vrot.slane %v732_v53, 1  ;;  %vm744_vm12 = vcmp.eq.f32.partialorder %v4548_v17, inf  ;;  %vm746_vm13 = vcmp.eq.f32.partialorder %v4548_v17, 0.0  ;;  %v747_v32 = vand.u32 2147483648, %v4548_v17 }
  0xcb   : > { %v736_v34 = vmul.f32 %v3513_v60, %v4545_v15  ;;  %3524 = vrsqrt.f32 %v4600_v48  ;;  %vm751_vm14 = vcmp.eq.f32.partialorder %v4555_v59, inf  ;;  %vm753_vm15 = vcmp.eq.f32.partialorder %v4555_v59, 0.0 }
  0xcc   : > { %v754_v22 = vand.u32 2147483648, %v4555_v59  ;;  %vm758_vm0 = vcmp.eq.f32.partialorder %v4559_v33, inf  ;;  %vm760_vm1 = vcmp.eq.f32.partialorder %v4559_v33, 0.0  ;;  %v761_v51 = vand.u32 2147483648, %v4559_v33 }
  0xcd   : > { %v738_v0 = vsel %vm737_vm10, %v4545_v15, %v736_v34  ;;  %vm765_vm2 = vcmp.eq.f32.partialorder %v4574_v16, inf  ;;  %v4637_v4 = vadd.f32 %v733_v14, %v732_v53  ;;  %vm767_vm3 = vcmp.eq.f32.partialorder %v4574_v16, 0.0 }
  0xce   : > { %v3515_v58 = vpop.eup %3514  ;;  %v768_v54 = vand.u32 2147483648, %v4574_v16  ;;  %vm772_vm4 = vcmp.eq.f32.partialorder %v4576_v39, inf  ;;  %v741_v9 = vsel %vm739_vm11, %v740_v41, %v738_v0  ;;  %vm774_vm5 = vcmp.eq.f32.partialorder %v4576_v39, 0.0 }
  0xcf   : > { %v743_v3 = vmul.f32 %v3515_v58, %v4548_v17  ;;  %v775_v57 = vand.u32 2147483648, %v4576_v39  ;;  %v782_v2 = vand.u32 2147483648, %v4600_v48  ;;  %v815_v61 = vmul.f32 %v4294_v5, %v4294_v5 }
  0xd0   : > { %v3517_v62 = vpop.eup %3516  ;;  %v816_v46 = vmul.f32 %v4297_v6, %v4297_v6  ;;  %v817_v21 = vmul.f32 %v4300_v7, %v4300_v7  ;;  %vm779_vm6 = vcmp.eq.f32.partialorder %v4600_v48, inf  ;;  %v818_v42 = vmul.f32 %v4303_v8, %v4303_v8 }
  0xd1   : > { %v3519_v15 = vpop.eup %3518  ;;  %v745_v28 = vsel %vm744_vm12, %v4548_v17, %v743_v3  ;;  %v750_v43 = vmul.f32 %v3517_v62, %v4555_v59  ;;  %v819_v5 = vmul.f32 %v4311_v10, %v4311_v10  ;;  %3526 = vrsqrt.f32 %v4637_v4 }
  0xd2   : > { %v3521_v47 = vpop.eup %3520  ;;  %v748_v6 = vsel %vm746_vm13, %v747_v32, %v745_v28  ;;  %v757_v7 = vmul.f32 %v3519_v15, %v4559_v33  ;;  %v791_v53 = vadd.f32 1e-08, %v741_v9  ;;  %v820_v8 = vmul.f32 %v4314_v11, %v4314_v11 }
  0xd3   : > { %v3523_v60 = vpop.eup %3522  ;;  %v752_v14 = vsel %vm751_vm14, %v4555_v59, %v750_v43  ;;  %v764_v41 = vmul.f32 %v3521_v47, %v4574_v16  ;;  %v821_v10 = vmul.f32 %v4348_v19, %v4348_v19  ;;  %vm781_vm7 = vcmp.eq.f32.partialorder %v4600_v48, 0.0 }
  0xd4   : > { %v755_v17 = vsel %vm753_vm15, %v754_v22, %v752_v14  ;;  %v759_v34 = vsel %vm758_vm0, %v4559_v33, %v757_v7  ;;  %v771_v32 = vmul.f32 %v3523_v60, %v4576_v39  ;;  %v822_v0 = vmul.f32 %v4358_v23, %v4358_v23  ;;  %v4723_v7 = vld [vmem:[%s4269_s6 + $0x50] sm:$0xff] }
  0xd5   : > { %v3525_v58 = vpop.eup %3524  ;;  %v766_v11 = vsel %vm765_vm2, %v4574_v16, %v764_v41  ;;  %v792_v19 = vadd.f32 1e-08, %v748_v6  ;;  %v823_v59 = vmul.f32 %v4361_v24, %v4361_v24  ;;  %v824_v22 = vmul.f32 %v4364_v25, %v4364_v25  ;;  %v8303_v6 = vld [vmem:[#allocation16_spill] sm:$0xff]  ;;  %v4726_v41 = vld [vmem:[%s4269_s6 + $0x58] sm:$0xff] }
  0xd6   : > { %v762_v9 = vsel %vm760_vm1, %v761_v51, %v759_v34  ;;  %v773_v3 = vsel %vm772_vm4, %v4576_v39, %v771_v32  ;;  %v793_v23 = vadd.f32 1e-08, %v755_v17  ;;  %3528 = vrcp.f32 %v791_v53 }
  0xd7   : > { %v769_v62 = vsel %vm767_vm3, %v768_v54, %v766_v11  ;;  %v825_v15 = vmul.f32 %v4381_v29, %v4381_v29  ;;  %v826_v24 = vmul.f32 %v4384_v30, %v4384_v30  ;;  %v827_v25 = vmul.f32 %v4387_v31, %v4387_v31  ;;  %v4738_v11 = vld [vmem:[%s4269_s6 + $0x68] sm:$0xff] }
  0xd8   : > { %v778_v33 = vmul.f32 %v3525_v58, %v4600_v48  ;;  %v828_v51 = vmul.f32 %v4405_v35, %v4405_v35  ;;  %v829_v28 = vmul.f32 %v4408_v36, %v4408_v36  ;;  %v831_v43 = vadd.f32 %v816_v46, %v815_v61  ;;  %v4735_v58 = vld [vmem:[%s4269_s6 + $0x60] sm:$0xff] }
  0xd9   : > { %v776_v16 = vsel %vm774_vm5, %v775_v57, %v773_v3  ;;  %v794_v54 = vadd.f32 1e-08, %v762_v9  ;;  %3530 = vrcp.f32 %v792_v19  ;;  %v838_v29 = vadd.f32 %v818_v42, %v817_v21  ;;  %v4741_v19 = vld [vmem:[%s4269_s6 + $0x70] sm:$0xff] }
  0xda   : > { %v4711_v30 = vadd.f32 1e-08, %v769_v62  ;;  %3532 = vrcp.f32 %v793_v23  ;;  %v832_v31 = vrot.slane %v831_v43, 4  ;;  %v845_v47 = vadd.f32 %v820_v8, %v819_v5  ;;  %v4729_v8 = vld [vmem:[%s4272_s1 + $0x50] sm:$0xff]  ;;  %v4754_v62 = vld [vmem:[%s4269_s6 + $0x78] sm:$0xff] }
  0xdb   : > { %v830_v35 = vmul.f32 %v8303_v6, %v8303_v6  ;;  %v839_v36 = vrot.slane %v838_v29, 4  ;;  %v852_v61 = vadd.f32 %v822_v0, %v821_v10  ;;  %v859_v46 = vadd.f32 %v824_v22, %v823_v59  ;;  %v4715_v39 = vpop.eup %3526  ;;  %v4732_v10 = vld [vmem:[%s4272_s1 + $0x58] sm:$0xff] }
  0xdc   : > { %v780_v57 = vsel %vm779_vm6, %v4600_v48, %v778_v33  ;;  %v4720_v21 = vadd.f32 1e-08, %v776_v16  ;;  %v833_v42 = vadd.f32 %v832_v31, %v831_v43  ;;  %v846_v5 = vrot.slane %v845_v47, 4  ;;  %v4763_v48 = vld [vmem:[%s4269_s6 + $0x88] sm:$0xff]  ;;  %v4769_v16 = vld [vmem:[%s4272_s1 + $0x70] sm:$0xff]  ;;  %v407_v6 = vld [vmem:[%s4272_s1 + $0x78] sm:$0xff] }
  0xdd   : > { %3534 = vrcp.f32 %v794_v54  ;;  %v840_v53 = vadd.f32 %v839_v36, %v838_v29  ;;  %v853_v60 = vrot.slane %v852_v61, 4  ;;  %v860_v14 = vrot.slane %v859_v46, 4  ;;  %v408_v36 = vld [vmem:[%s4272_s1 + $0x80] sm:$0xff] }
  0xde   : > { %v834_v17 = vrot.slane %v833_v42, 2  ;;  %v847_v34 = vadd.f32 %v846_v5, %v845_v47  ;;  %v866_v32 = vadd.f32 %v826_v24, %v825_v15  ;;  %v873_v0 = vadd.f32 %v828_v51, %v827_v25  ;;  %v4757_v15 = vld [vmem:[%s4269_s6 + $0x80] sm:$0xff] }
  0xdf   : > { %vm529_vm8 = vcmp.eq.f32.partialorder %v4723_v7, %v4729_v8  ;;  %vm530_vm9 = vcmp.eq.f32.partialorder %v4726_v41, %v4732_v10  ;;  %v783_v59 = vsel %vm781_vm7, %v782_v2, %v780_v57  ;;  %v841_v22 = vrot.slane %v840_v53, 2  ;;  %v4760_v24 = vld [vmem:[%s4272_s1 + $0x60] sm:$0xff]  ;;  %v4766_v2 = vld [vmem:[%s4272_s1 + $0x68] sm:$0xff] }
  0xe0   : > { %v854_v9 = vadd.f32 %v853_v60, %v852_v61  ;;  %v861_v3 = vadd.f32 %v860_v14, %v859_v46  ;;  %v4751_v23 = vpop.eup %3528  ;;  %v835_v25 = vadd.f32 %v834_v17, %v833_v42  ;;  %v848_v33 = vrot.slane %v847_v34, 2  ;;  %v409_v61 = vld [vmem:[%s4272_s1 + $0x88] sm:$0xff] }
  0xe1   : > { %v867_v51 = vrot.slane %v866_v32, 4  ;;  %v874_v43 = vrot.slane %v873_v0, 4  ;;  %vm531_vm10 = vcmp.eq.f32.partialorder %v4735_v58, %v4760_v24  ;;  %v842_v54 = vadd.f32 %v841_v22, %v840_v53  ;;  %v4876_v24 = vld [vmem:[%s4269_s6 + $0x90] sm:$0xff] }
  0xe2   : > { %v855_v29 = vrot.slane %v854_v9, 2  ;;  %v862_v31 = vrot.slane %v861_v3, 2  ;;  %v880_v47 = vadd.f32 %v830_v35, %v829_v28  ;;  %vm532_vm11 = vcmp.eq.f32.partialorder %v4738_v11, %v4766_v2 }
  0xe3   : > { %vm533_vm12 = vcmp.eq.f32.partialorder %v4741_v19, %v4769_v16  ;;  %v836_v46 = vrot.slane %v835_v25, 1  ;;  %v849_v57 = vadd.f32 %v848_v33, %v847_v34  ;;  %v868_v42 = vadd.f32 %v867_v51, %v866_v32  ;;  %v4780_v60 = vpop.eup %3530 }
  0xe4   : > { %v875_v5 = vadd.f32 %v874_v43, %v873_v0  ;;  %vm534_vm13 = vcmp.eq.f32.partialorder %v4754_v62, %v407_v6  ;;  %vm535_vm14 = vcmp.eq.f32.partialorder %v4757_v15, %v408_v36  ;;  %vm536_vm15 = vcmp.eq.f32.partialorder %v4763_v48, %v409_v61  ;;  %v4785_v17 = vpop.eup %3532  ;;  %v4885_v6 = vld [vmem:[%s4269_s6 + $0x98] sm:$0xff]  ;;  %v4888_v36 = vld [vmem:[%s4269_s6 + $0xa0] sm:$0xff] }
  0xe5   : > { %v843_v28 = vrot.slane %v842_v54, 1  ;;  %v856_v35 = vadd.f32 %v855_v29, %v854_v9  ;;  %v863_v53 = vadd.f32 %v862_v31, %v861_v3  ;;  %v881_v14 = vrot.slane %v880_v47, 4 }
  0xe6   : > { %v4787_v22 = vadd.f32 %v836_v46, %v835_v25  ;;  %v850_v27 = vrot.slane %v849_v57, 1  ;;  %v869_v34 = vrot.slane %v868_v42, 2  ;;  %v876_v32 = vrot.slane %v875_v5, 2 }
  0xe7   : > { %v4789_v0 = vadd.f32 %v843_v28, %v842_v54  ;;  %v857_v33 = vrot.slane %v856_v35, 1  ;;  %v864_v51 = vrot.slane %v863_v53, 1  ;;  %v882_v43 = vadd.f32 %v881_v14, %v880_v47  ;;  %v4794_v9 = vpop.eup %3534  ;;  %v4901_v14 = vld [vmem:[%s4272_s1 + $0x90] sm:$0xff] }
  0xe8   : > { %v4791_v26 = vadd.f32 %v850_v27, %v849_v57  ;;  %v870_v38 = vadd.f32 %v869_v34, %v868_v42  ;;  %v877_v13 = vadd.f32 %v876_v32, %v875_v5  ;;  %3536 = vrsqrt.f32 %v4787_v22  ;;  %v4904_v34 = vld [vmem:[%s4272_s1 + $0x98] sm:$0xff] }
  0xe9   : > { %v785_v3 = vmul.f32 %v4715_v39, %v4637_v4  ;;  %v797_v25 = vadd.f32 1e-08, %v783_v59  ;;  %3538 = vrcp.f32 %v4711_v30  ;;  %v883_v29 = vrot.slane %v882_v43, 2 }
  0xea   : > { %3540 = vrcp.f32 %v4720_v21  ;;  %v4800_v54 = vadd.f32 %v857_v33, %v856_v35  ;;  %v871_v31 = vrot.slane %v870_v38, 1  ;;  %v878_v27 = vrot.slane %v877_v13, 1  ;;  %v4895_v35 = vld [vmem:[%s4269_s6 + $0xa8] sm:$0xff] }
  0xeb   : > { %vm786_vm0 = vcmp.eq.f32.partialorder %v4637_v4, inf  ;;  %v4803_v47 = vadd.f32 %v864_v51, %v863_v53  ;;  %v884_v46 = vadd.f32 %v883_v29, %v882_v43  ;;  %3542 = vrsqrt.f32 %v4789_v0  ;;  %v4898_v53 = vld [vmem:[%s4269_s6 + $0xb0] sm:$0xff]  ;;  %v4913_v43 = vld [vmem:[%s4269_s6 + $0xb8] sm:$0xff] }
  0xec   : > { %v4810_v39 = vsel %vm529_vm8, 1.0, %v8292_v18  ;;  %v4816_v30 = vsel %vm530_vm9, 1.0, %v8292_v18  ;;  %v4818_v21 = vadd.f32 %v871_v31, %v870_v38  ;;  %3544 = vrsqrt.f32 %v4791_v26 }
  0xed   : > { %8304 = vst [vmem:[#allocation16_spill] sm:$0xff] %v4810_v39  ;;  %8305 = vst [vmem:[#allocation35_spill] sm:$0xff] %v4816_v30  ;;  %v789_v59 = vand.u32 2147483648, %v4637_v4  ;;  %3546 = vrcp.f32 %v797_v25  ;;  %v4822_v57 = vadd.f32 %v878_v27, %v877_v13  ;;  %v885_v42 = vrot.slane %v884_v46, 1  ;;  %v4919_v25 = vld [vmem:[%s4272_s1 + $0xa8] sm:$0xff]  ;;  %v3639_v30 = vld [vmem:[%s4262_s7 + $0x70] sm:$0xff] }
  0xee   : > { %v4828_v7 = vsel %vm531_vm10, 1.0, %v8292_v18  ;;  %v787_v41 = vsel %vm786_vm0, %v4637_v4, %v785_v3  ;;  %vm788_vm1 = vcmp.eq.f32.partialorder %v4637_v4, 0.0  ;;  %3548 = vrsqrt.f32 %v4800_v54  ;;  %v4916_v3 = vld [vmem:[%s4272_s1 + $0xa0] sm:$0xff] }
  0xef   : > { %8306 = vst [vmem:[#allocation36_spill] sm:$0xff] %v4828_v7  ;;  %v4837_v38 = vsel %vm532_vm11, 1.0, %v8292_v18  ;;  %v4843_v13 = vsel %vm533_vm12, 1.0, %v8292_v18  ;;  %v4845_v8 = vadd.f32 %v885_v42, %v884_v46  ;;  %3550 = vrsqrt.f32 %v4803_v47  ;;  %v4933_v46 = vld [vmem:[%s4272_s1 + $0xb0] sm:$0xff] }
  0xf0   : > { %8307 = vst [vmem:[#allocation37_spill] sm:$0xff] %v4837_v38  ;;  %8308 = vst [vmem:[#allocation38_spill] sm:$0xff] %v4843_v13  ;;  %v4851_v4 = vsel %vm534_vm13, 1.0, %v8292_v18  ;;  %v4856_v10 = vsel %vm535_vm14, 1.0, %v8292_v18  ;;  %v4861_v58 = vsel %vm536_vm15, 1.0, %v8292_v18  ;;  %3552 = vrsqrt.f32 %v4818_v21 }
  0xf1   : > { %8309 = vst [vmem:[#allocation39_spill] sm:$0xff] %v4851_v4  ;;  %8310 = vst [vmem:[#allocation40_spill] sm:$0xff] %v4856_v10  ;;  %v4864_v11 = vsel %vm788_vm1, %v789_v59, %v787_v41  ;;  %vm889_vm2 = vcmp.eq.f32.partialorder %v4787_v22, inf  ;;  %vm891_vm3 = vcmp.eq.f32.partialorder %v4787_v22, 0.0  ;;  %3554 = vrsqrt.f32 %v4822_v57  ;;  %v4936_v59 = vld [vmem:[%s4272_s1 + $0xb8] sm:$0xff] }
  0xf2   : > { %8311 = vst [vmem:[#allocation41_spill] sm:$0xff] %v4861_v58  ;;  %v3537_v19 = vpop.eup %3536  ;;  %v892_v62 = vand.u32 2147483648, %v4787_v22  ;;  %vm896_vm4 = vcmp.eq.f32.partialorder %v4789_v0, inf  ;;  %vm898_vm5 = vcmp.eq.f32.partialorder %v4789_v0, 0.0  ;;  %3556 = vrsqrt.f32 %v4845_v8 }
  0xf3   : > { %v4873_v15 = vpop.eup %3538  ;;  %v888_v48 = vmul.f32 %v3537_v19, %v4787_v22  ;;  %v899_v2 = vand.u32 2147483648, %v4789_v0  ;;  %vm903_vm6 = vcmp.eq.f32.partialorder %v4791_v26, inf  ;;  %vm905_vm7 = vcmp.eq.f32.partialorder %v4791_v26, 0.0 }
  0xf4   : > { %v4882_v16 = vpop.eup %3540  ;;  %v906_v61 = vand.u32 2147483648, %v4791_v26  ;;  %vm910_vm8 = vcmp.eq.f32.partialorder %v4800_v54, inf  ;;  %vm912_vm9 = vcmp.eq.f32.partialorder %v4800_v54, 0.0  ;;  %v913_v5 = vand.u32 2147483648, %v4800_v54 }
  0xf5   : > { %v3543_v28 = vpop.eup %3542  ;;  %v890_v32 = vsel %vm889_vm2, %v4787_v22, %v888_v48  ;;  %vm917_vm10 = vcmp.eq.f32.partialorder %v4803_v47, inf  ;;  %vm919_vm11 = vcmp.eq.f32.partialorder %v4803_v47, 0.0  ;;  %v920_v33 = vand.u32 2147483648, %v4803_v47 }
  0xf6   : > { %v3545_v51 = vpop.eup %3544  ;;  %v893_v29 = vsel %vm891_vm3, %v892_v62, %v890_v32  ;;  %v895_v31 = vmul.f32 %v3543_v28, %v4789_v0  ;;  %vm924_vm14 = vcmp.eq.f32.partialorder %v4818_v21, inf  ;;  %vm926_vm15 = vcmp.eq.f32.partialorder %v4818_v21, 0.0 }
  0xf7   : > { %v4930_v27 = vpop.eup %3546  ;;  %v902_v42 = vmul.f32 %v3545_v51, %v4791_v26  ;;  %v927_v22 = vand.u32 2147483648, %v4818_v21  ;;  %vm931_vm1 = vcmp.eq.f32.partialorder %v4822_v57, inf  ;;  %v943_v41 = vadd.f32 1e-08, %v893_v29 }
  0xf8   : > { %v3549_v19 = vpop.eup %3548  ;;  %vm540_vm2 = vcmp.eq.f32.partialorder %v4895_v35, %v4919_v25  ;;  %vm541_vm3 = vcmp.eq.f32.partialorder %v4898_v53, %v4933_v46  ;;  %vm542_vm13 = vcmp.eq.f32.partialorder %v4913_v43, %v4936_v59  ;;  %v897_v62 = vsel %vm896_vm4, %v4789_v0, %v895_v31  ;;  %v3614_v35 = vld [vmem:[%s4255_s5 + $0x10] sm:$0xff]  ;;  %v3616_v53 = vld [vmem:[%s4262_s7 + $0x8] sm:$0xff]  ;;  %v3618_v59 = vld [vmem:[%s4255_s5 + $0x20] sm:$0xff] }
  0xf9   : > { %vm933_vm0 = vcmp.eq.f32.partialorder %v4822_v57, 0.0  ;;  %v934_v48 = vand.u32 2147483648, %v4822_v57  ;;  %vm938_vm12 = vcmp.eq.f32.partialorder %v4845_v8, inf  ;;  %v3551_v28 = vpop.eup %3550  ;;  %v900_v32 = vsel %vm898_vm5, %v899_v2, %v897_v62 }
  0xfa   : > { %v904_v51 = vsel %vm903_vm6, %v4791_v26, %v902_v42  ;;  %v909_v29 = vmul.f32 %v3549_v19, %v4800_v54  ;;  %3558 = vrcp.f32 %v943_v41  ;;  %v3553_v63 = vpop.eup %3552  ;;  %v916_v20 = vmul.f32 %v3551_v28, %v4803_v47 }
  0xfb   : > { %v907_v31 = vsel %vm905_vm7, %v906_v61, %v904_v51  ;;  %vm940_vm4 = vcmp.eq.f32.partialorder %v4845_v8, 0.0  ;;  %v944_v12 = vadd.f32 1e-08, %v900_v32  ;;  %v3555_v4 = vpop.eup %3554  ;;  %v923_v2 = vmul.f32 %v3553_v63, %v4818_v21 }
  0xfc   : > { %v911_v0 = vsel %vm910_vm8, %v4800_v54, %v909_v29  ;;  %v941_v42 = vand.u32 2147483648, %v4845_v8  ;;  %v945_v19 = vadd.f32 1e-08, %v907_v31  ;;  %v3557_v41 = vpop.eup %3556  ;;  %v918_v61 = vsel %vm917_vm10, %v4803_v47, %v916_v20  ;;  %v3615_v31 = vld [vmem:[%s4262_s7] sm:$0xff] }
  0xfd   : > { %v914_v26 = vsel %vm912_vm9, %v913_v5, %v911_v0  ;;  %v930_v62 = vmul.f32 %v3555_v4, %v4822_v57  ;;  %3560 = vrcp.f32 %v944_v12  ;;  %v921_v28 = vsel %vm919_vm11, %v920_v33, %v918_v61 }
  0xfe   : > { %v925_v63 = vsel %vm924_vm14, %v4818_v21, %v923_v2  ;;  %v937_v32 = vmul.f32 %v3557_v41, %v4845_v8  ;;  %v946_v51 = vadd.f32 1e-08, %v914_v26  ;;  %v947_v5 = vadd.f32 1e-08, %v921_v28  ;;  %v3617_v2 = vld [vmem:[%s4255_s5 + $0x18] sm:$0xff]  ;;  %v3620_v26 = vld [vmem:[%s4255_s5 + $0x30] sm:$0xff] }
  0xff   : > { %v928_v54 = vsel %vm926_vm15, %v927_v22, %v925_v63  ;;  %v932_v20 = vsel %vm931_vm1, %v4822_v57, %v930_v62  ;;  %3562 = vrcp.f32 %v945_v19  ;;  %v798_v21 = vadd.f32 1e-08, %v4864_v11  ;;  %v3612_v11 = vld [vmem:[%s4255_s5] sm:$0xff]  ;;  %v3619_v19 = vld [vmem:[%s4255_s5 + $0x28] sm:$0xff]  ;;  %v3621_v28 = vld [vmem:[%s4255_s5 + $0x38] sm:$0xff] }
 0x100   : > { %v935_v12 = vsel %vm933_vm0, %v934_v48, %v932_v20  ;;  %v939_v47 = vsel %vm938_vm12, %v4845_v8, %v937_v32  ;;  %v948_v4 = vadd.f32 1e-08, %v928_v54  ;;  %3564 = vrcp.f32 %v946_v51  ;;  %v3622_v63 = vld [vmem:[%s4255_s5 + $0x40] sm:$0xff]  ;;  %v3623_v54 = vld [vmem:[%s4255_s5 + $0x48] sm:$0xff] }
 0x101   : > { %v942_v33 = vsel %vm940_vm4, %v941_v42, %v939_v47  ;;  %v949_v22 = vadd.f32 1e-08, %v935_v12  ;;  %3566 = vrcp.f32 %v947_v5  ;;  %vm8312_vm5 = vcmp.eq.f32.partialorder %v4876_v24, %v4901_v14  ;;  %v3624_v5 = vld [vmem:[%s4255_s5 + $0x50] sm:$0xff] }
 0x102   : > { %v4999_v57 = vsel %vm8312_vm5, 1.0, %v8292_v18  ;;  %vm8314_vm6 = vcmp.eq.f32.partialorder %v4885_v6, %v4904_v34  ;;  %v950_v29 = vadd.f32 1e-08, %v942_v33  ;;  %3568 = vrcp.f32 %v948_v4  ;;  %v3613_v6 = vld [vmem:[%s4255_s5 + $0x8] sm:$0xff]  ;;  %v3625_v12 = vld [vmem:[%s4262_s7 + $0x10] sm:$0xff]  ;;  %v3626_v4 = vld [vmem:[%s4262_s7 + $0x18] sm:$0xff] }
 0x103   : > { %8313 = vst [vmem:[#allocation42_spill] sm:$0xff] %v4999_v57  ;;  %v5005_v48 = vsel %vm8314_vm6, 1.0, %v8292_v18  ;;  %vm8316_vm7 = vcmp.eq.f32.partialorder %v4888_v36, %v4916_v3  ;;  %3570 = vrcp.f32 %v949_v22  ;;  %v5015_v24 = vmul.f32 %v3612_v11, %v4751_v23  ;;  %v3627_v22 = vld [vmem:[%s4255_s5 + $0x58] sm:$0xff] }
 0x104   : > { %8315 = vst [vmem:[#allocation43_spill] sm:$0xff] %v5005_v48  ;;  %v5011_v8 = vsel %vm8316_vm7, 1.0, %v8292_v18  ;;  %v5019_v14 = vmul.f32 %v3613_v6, %v4751_v23  ;;  %v3559_v34 = vpop.eup %3558  ;;  %v5025_v36 = vsel %vm540_vm2, 1.0, %v8292_v18  ;;  %v5031_v3 = vsel %vm541_vm3, 1.0, %v8292_v18 }
 0x105   : > { %8317 = vst [vmem:[#allocation44_spill] sm:$0xff] %v5011_v8  ;;  %8318 = vst [vmem:[#allocation45_spill] sm:$0xff] %v5025_v36  ;;  %v5037_v23 = vsel %vm542_vm13, 1.0, %v8292_v18  ;;  %3572 = vrcp.f32 %v950_v29  ;;  %v5041_v25 = vmul.f32 %v3614_v35, %v4780_v60  ;;  %v5044_v0 = vmul.f32 %v3615_v31, %v3559_v34  ;;  %v3629_v31 = vld [vmem:[%s4262_s7 + $0x20] sm:$0xff] }
 0x106   : > { %8319 = vst [vmem:[#allocation46_spill] sm:$0xff] %v5031_v3  ;;  %8320 = vst [vmem:[#allocation47_spill] sm:$0xff] %v5037_v23  ;;  %3574 = vrcp.f32 %v798_v21  ;;  %v5047_v46 = vmul.f32 %v3616_v53, %v3559_v34  ;;  %v5051_v43 = vmul.f32 %v3617_v2, %v4780_v60  ;;  %v5055_v42 = vmul.f32 %v3618_v59, %v4785_v17  ;;  %v3630_v2 = vld [vmem:[%s4262_s7 + $0x28] sm:$0xff] }
 0x107   : > { %v5059_v41 = vmul.f32 %v3619_v19, %v4785_v17  ;;  %v5063_v61 = vmul.f32 %v3620_v26, %v4794_v9  ;;  %v3561_v62 = vpop.eup %3560  ;;  %v5067_v60 = vmul.f32 %v3621_v28, %v4794_v9  ;;  %v5071_v32 = vmul.f32 %v3622_v63, %v4873_v15  ;;  %v3632_v63 = vld [vmem:[%s4262_s7 + $0x38] sm:$0xff]  ;;  %v3638_v23 = vld [vmem:[%s4262_s7 + $0x68] sm:$0xff] }
 0x108   : > { %8321 = vst [vmem:[#allocation48_spill] sm:$0xff] %v5047_v46  ;;  %v1001_v17 = vsub.f32 %v5015_v24, %v5044_v0  ;;  %v1002_v51 = vsub.f32 %v5019_v14, %v5047_v46  ;;  %v5079_v20 = vmul.f32 %v3623_v54, %v4873_v15  ;;  %v5083_v9 = vmul.f32 %v3624_v5, %v4882_v16  ;;  %v3628_v15 = vld [vmem:[%s4255_s5 + $0x60] sm:$0xff] }
 0x109   : > { %8322 = vst [vmem:[#allocation49_spill] sm:$0xff] %v5063_v61  ;;  %8323 = vst [vmem:[#allocation50_spill] sm:$0xff] %v5067_v60  ;;  %v5086_v47 = vmul.f32 %v3625_v12, %v3561_v62  ;;  %v5089_v21 = vmul.f32 %v3626_v4, %v3561_v62  ;;  %v3563_v33 = vpop.eup %3562  ;;  %v5093_v29 = vmul.f32 %v3627_v22, %v4882_v16  ;;  %v3631_v62 = vld [vmem:[%s4262_s7 + $0x30] sm:$0xff]  ;;  %v3633_v12 = vld [vmem:[%s4262_s7 + $0x40] sm:$0xff] }
 0x10a   : > { %8324 = vst [vmem:[#allocation51_spill] sm:$0xff] %v5071_v32  ;;  %8325 = vst [vmem:[#allocation52_spill] sm:$0xff] %v5079_v20  ;;  %v5097_v11 = vmul.f32 %v3628_v15, %v4930_v27  ;;  %v1017_v6 = vmul.f32 %v1001_v17, %v1001_v17  ;;  %v1018_v34 = vmul.f32 %v1002_v51, %v1002_v51  ;;  %v3565_v35 = vpop.eup %3564 }
 0x10b   : > { %8326 = vst [vmem:[#allocation53_spill] sm:$0xff] %v5083_v9  ;;  %8327 = vst [vmem:[#allocation54_spill] sm:$0xff] %v5093_v29  ;;  %v5100_v53 = vmul.f32 %v3629_v31, %v3563_v33  ;;  %v5103_v59 = vmul.f32 %v3630_v2, %v3563_v33  ;;  %v1003_v16 = vsub.f32 %v5015_v24, %v5086_v47  ;;  %v3567_v26 = vpop.eup %3566  ;;  %v3634_v33 = vld [vmem:[%s4262_s7 + $0x48] sm:$0xff]  ;;  %v3635_v2 = vld [vmem:[%s4262_s7 + $0x50] sm:$0xff] }
 0x10c   : > { %8328 = vst [vmem:[#allocation55_spill] sm:$0xff] %v5097_v11  ;;  %v5108_v28 = vmul.f32 %v3631_v62, %v3565_v35  ;;  %v5111_v17 = vmul.f32 %v3632_v63, %v3565_v35  ;;  %v1004_v51 = vsub.f32 %v5019_v14, %v5089_v21  ;;  %v1033_v54 = vadd.f32 %v1018_v34, %v1017_v6  ;;  %v3569_v5 = vpop.eup %3568  ;;  %v3636_v34 = vld [vmem:[%s4262_s7 + $0x58] sm:$0xff] }
 0x10d   : > { %v5116_v4 = vmul.f32 %v3633_v12, %v3567_v26  ;;  %v5119_v22 = vmul.f32 %v3634_v33, %v3567_v26  ;;  %v1005_v15 = vsub.f32 %v5015_v24, %v5100_v53  ;;  %v1006_v35 = vsub.f32 %v5019_v14, %v5103_v59  ;;  %v3571_v31 = vpop.eup %3570  ;;  %v3637_v33 = vld [vmem:[%s4262_s7 + $0x60] sm:$0xff] }
 0x10e   : > { %v5126_v6 = vmul.f32 %v3635_v2, %v3569_v5  ;;  %v5129_v62 = vmul.f32 %v3636_v34, %v3569_v5  ;;  %v1007_v63 = vsub.f32 %v5015_v24, %v5108_v28  ;;  %v1008_v26 = vsub.f32 %v5019_v14, %v5111_v17 }
 0x10f   : > { %v3573_v12 = vpop.eup %3572  ;;  %v5136_v19 = vmul.f32 %v3637_v33, %v3571_v31  ;;  %v5139_v48 = vmul.f32 %v3638_v23, %v3571_v31  ;;  %v1009_v2 = vsub.f32 %v5015_v24, %v5116_v4  ;;  %v1010_v5 = vsub.f32 %v5019_v14, %v5119_v22 }
 0x110   : > { %8329 = vst [vmem:[#allocation56_spill] sm:$0xff] %v5126_v6  ;;  %8330 = vst [vmem:[#allocation57_spill] sm:$0xff] %v5129_v62  ;;  %v5145_v34 = vpop.eup %3574  ;;  %v5148_v1 = vmul.f32 %v3639_v30, %v3573_v12  ;;  %v5151_v3 = vmul.f32 %v3640_v37, %v3573_v12  ;;  %v1011_v33 = vsub.f32 %v5015_v24, %v5126_v6 }
 0x111   : > { %8331 = vst [vmem:[#allocation58_spill] sm:$0xff] %v5136_v19  ;;  %8332 = vst [vmem:[#allocation59_spill] sm:$0xff] %v5139_v48  ;;  %v1012_v23 = vsub.f32 %v5019_v14, %v5129_v62  ;;  %v1013_v31 = vsub.f32 %v5015_v24, %v5136_v19  ;;  %v1014_v57 = vsub.f32 %v5019_v14, %v5139_v48 }
 0x112   : > { %8333 = vst [vmem:[#allocation60_spill] sm:$0xff] %v5148_v1  ;;  %8334 = vst [vmem:[#allocation61_spill] sm:$0xff] %v5151_v3  ;;  %v1019_v13 = vmul.f32 %v1003_v16, %v1003_v16  ;;  %v1020_v39 = vmul.f32 %v1004_v51, %v1004_v51  ;;  %v1015_v30 = vsub.f32 %v5015_v24, %v5148_v1  ;;  %v1034_v16 = vrot.slane %v1033_v54, 4 }
 0x113   : > { %v1016_v37 = vsub.f32 %v5019_v14, %v5151_v3  ;;  %v1021_v12 = vmul.f32 %v1005_v15, %v1005_v15  ;;  %v1022_v52 = vmul.f32 %v1006_v35, %v1006_v35  ;;  %v1023_v40 = vmul.f32 %v1007_v63, %v1007_v63 }
 0x114   : > { %v1024_v8 = vmul.f32 %v1008_v26, %v1008_v26  ;;  %v1025_v36 = vmul.f32 %v1009_v2, %v1009_v2  ;;  %v1026_v10 = vmul.f32 %v1010_v5, %v1010_v5  ;;  %v1027_v58 = vmul.f32 %v1011_v33, %v1011_v33 }
 0x115   : > { %v1028_v7 = vmul.f32 %v1012_v23, %v1012_v23  ;;  %v1029_v38 = vmul.f32 %v1013_v31, %v1013_v31  ;;  %v1030_v55 = vmul.f32 %v1014_v57, %v1014_v57  ;;  %v1031_v56 = vmul.f32 %v1015_v30, %v1015_v30 }
 0x116   : > { %v1032_v49 = vmul.f32 %v1016_v37, %v1016_v37  ;;  %v1040_v51 = vadd.f32 %v1020_v39, %v1019_v13  ;;  %v1047_v50 = vadd.f32 %v1022_v52, %v1021_v12  ;;  %v1054_v44 = vadd.f32 %v1024_v8, %v1023_v40 }
 0x117   : > { %v1061_v24 = vadd.f32 %v1026_v10, %v1025_v36  ;;  %v1068_v45 = vadd.f32 %v1028_v7, %v1027_v58  ;;  %v1035_v18 = vadd.f32 %v1034_v16, %v1033_v54  ;;  %v1075_v15 = vadd.f32 %v1030_v55, %v1029_v38  ;;  %v3641_v54 = vld [vmem:[%s4255_s5 + $0x68] sm:$0xff] }
 0x118   : > { %v1041_v14 = vrot.slane %v1040_v51, 4  ;;  %v1082_v35 = vadd.f32 %v1032_v49, %v1031_v56  ;;  %v1048_v63 = vrot.slane %v1047_v50, 4  ;;  %v1055_v26 = vrot.slane %v1054_v44, 4 }
 0x119   : > { %v1062_v2 = vrot.slane %v1061_v24, 4  ;;  %v1069_v5 = vrot.slane %v1068_v45, 4  ;;  %v1036_v33 = vrot.slane %v1035_v18, 2  ;;  %v1076_v31 = vrot.slane %v1075_v15, 4 }
 0x11a   : > { %v1042_v23 = vadd.f32 %v1041_v14, %v1040_v51  ;;  %v1083_v57 = vrot.slane %v1082_v35, 4  ;;  %v1049_v30 = vadd.f32 %v1048_v63, %v1047_v50  ;;  %v1056_v37 = vadd.f32 %v1055_v26, %v1054_v44  ;;  %v3642_v14 = vld [vmem:[%s4255_s5 + $0x70] sm:$0xff] }
 0x11b   : > { %v1063_v11 = vadd.f32 %v1062_v2, %v1061_v24  ;;  %v1070_v39 = vadd.f32 %v1069_v5, %v1068_v45  ;;  %v1037_v52 = vadd.f32 %v1036_v33, %v1035_v18  ;;  %v1077_v7 = vadd.f32 %v1076_v31, %v1075_v15 }
 0x11c   : > { %v1043_v40 = vrot.slane %v1042_v23, 2  ;;  %v1084_v13 = vadd.f32 %v1083_v57, %v1082_v35  ;;  %v1050_v10 = vrot.slane %v1049_v30, 2  ;;  %v1057_v55 = vrot.slane %v1056_v37, 2 }
 0x11d   : > { %v1064_v49 = vrot.slane %v1063_v11, 2  ;;  %v1071_v56 = vrot.slane %v1070_v39, 2  ;;  %v1078_v58 = vrot.slane %v1077_v7, 2  ;;  %v1098_v50 = vsub.f32 %v5041_v25, %v5044_v0 }
 0x11e   : > { %v1044_v38 = vadd.f32 %v1043_v40, %v1042_v23  ;;  %v1085_v8 = vrot.slane %v1084_v13, 2  ;;  %v1051_v44 = vadd.f32 %v1050_v10, %v1049_v30  ;;  %v1058_v36 = vadd.f32 %v1057_v55, %v1056_v37 }
 0x11f   : > { %v1065_v45 = vadd.f32 %v1064_v49, %v1063_v11  ;;  %v1099_v18 = vsub.f32 %v5051_v43, %v5047_v46  ;;  %v5171_v12 = vmul.f32 %v3641_v54, %v4930_v27  ;;  %v1038_v16 = vrot.slane %v1037_v52, 1  ;;  %v3643_v11 = vld [vmem:[%s4255_s5 + $0x78] sm:$0xff] }
 0x120   : > { %v1045_v51 = vrot.slane %v1044_v38, 1  ;;  %v5173_v24 = vadd.f32 %v1071_v56, %v1070_v39  ;;  %v5177_v15 = vmul.f32 %v3642_v14, %v5145_v34  ;;  %v1052_v35 = vrot.slane %v1051_v44, 1 }
 0x121   : > { %8335 = vst [vmem:[#allocation62_spill] sm:$0xff] %v5171_v12  ;;  %v5179_v63 = vadd.f32 %v1078_v58, %v1077_v7  ;;  %v5181_v26 = vadd.f32 %v1085_v8, %v1084_v13  ;;  %v5185_v2 = vmul.f32 %v3643_v11, %v5145_v34  ;;  %v8338_v5 = vlaneseq }
 0x122   : > { %8336 = vst [vmem:[#allocation63_spill] sm:$0xff] %v5177_v15  ;;  %v1059_v33 = vrot.slane %v1058_v36, 1  ;;  %v1066_v23 = vrot.slane %v1065_v45, 1  ;;  %v1114_v31 = vmul.f32 %v1098_v50, %v1098_v50  ;;  %v1115_v57 = vmul.f32 %v1099_v18, %v1099_v18 }
 0x123   : > { %8337 = vst [vmem:[#allocation64_spill] sm:$0xff] %v5185_v2  ;;  %v5188_v27 = vshrl.u32 %v8338_v5, 7  ;;  %v5192_v30 = vsub.f32 %v5055_v42, %v5044_v0  ;;  %v5196_v37 = vsub.f32 %v5059_v41, %v5047_v46  ;;  %v5198_v39 = vadd.f32 %v1038_v16, %v1037_v52 }
 0x124   : > { %v5200_v40 = vadd.f32 %v1045_v51, %v1044_v38  ;;  %v1100_v7 = vsub.f32 %v5041_v25, %v5086_v47  ;;  %v5205_v13 = vadd.f32 %v1052_v35, %v1051_v44  ;;  %v1101_v49 = vsub.f32 %v5051_v43, %v5089_v21 }
 0x125   : > { %8339 = vst [vmem:[#allocation65_spill] sm:$0xff] %v5188_v27  ;;  %v5211_v56 = vadd.f32 %v1059_v33, %v1058_v36  ;;  %v5213_v52 = vadd.f32 %v1066_v23, %v1065_v45  ;;  %v1102_v38 = vsub.f32 %v5041_v25, %v5100_v53  ;;  %v1103_v58 = vsub.f32 %v5051_v43, %v5103_v59 }
 0x126   : > { %v1104_v8 = vsub.f32 %v5041_v25, %v5108_v28  ;;  %v1105_v50 = vsub.f32 %v5051_v43, %v5111_v17  ;;  %v1106_v44 = vsub.f32 %v5041_v25, %v5116_v4  ;;  %v1107_v36 = vsub.f32 %v5051_v43, %v5119_v22 }
 0x127   : > { %v1108_v45 = vsub.f32 %v5041_v25, %v5126_v6  ;;  %v1109_v18 = vsub.f32 %v5051_v43, %v5129_v62  ;;  %v1110_v54 = vsub.f32 %v5041_v25, %v5136_v19  ;;  %v1111_v16 = vsub.f32 %v5051_v43, %v5139_v48 }
 0x128   : > { %v1112_v51 = vsub.f32 %v5041_v25, %v5148_v1  ;;  %v1113_v14 = vsub.f32 %v5051_v43, %v5151_v3  ;;  %v1116_v35 = vmul.f32 %v1100_v7, %v1100_v7  ;;  %v1117_v11 = vmul.f32 %v1101_v49, %v1101_v49 }
 0x129   : > { %v1118_v5 = vmul.f32 %v1102_v38, %v1102_v38  ;;  %v1119_v33 = vmul.f32 %v1103_v58, %v1103_v58  ;;  %v1120_v23 = vmul.f32 %v1104_v8, %v1104_v8  ;;  %v1121_v55 = vmul.f32 %v1105_v50, %v1105_v50 }
 0x12a   : > { %v1122_v10 = vmul.f32 %v1106_v44, %v1106_v44  ;;  %v1123_v34 = vmul.f32 %v1107_v36, %v1107_v36  ;;  %v1124_v2 = vmul.f32 %v1108_v45, %v1108_v45  ;;  %v1125_v15 = vmul.f32 %v1109_v18, %v1109_v18 }
 0x12b   : > { %v1126_v12 = vmul.f32 %v1110_v54, %v1110_v54  ;;  %v1127_v29 = vmul.f32 %v1111_v16, %v1111_v16  ;;  %v1128_v9 = vmul.f32 %v1112_v51, %v1112_v51  ;;  %v1129_v20 = vmul.f32 %v1113_v14, %v1113_v14 }
 0x12c   : > { %v1130_v32 = vadd.f32 %v1115_v57, %v1114_v31  ;;  %v1137_v60 = vadd.f32 %v1117_v11, %v1116_v35  ;;  %v1144_v25 = vadd.f32 %v1119_v33, %v1118_v5  ;;  %v1151_v46 = vadd.f32 %v1121_v55, %v1120_v23 }
 0x12d   : > { %vm8143_vm8 = vcmp.eq.s32.totalorder %v5188_v27, 0  ;;  %v1158_v43 = vadd.f32 %v1123_v34, %v1122_v10  ;;  %v1165_v7 = vadd.f32 %v1125_v15, %v1124_v2  ;;  %v1172_v49 = vadd.f32 %v1127_v29, %v1126_v12 }
 0x12e   : > { %v1179_v38 = vadd.f32 %v1129_v20, %v1128_v9  ;;  %v1131_v58 = vrot.slane %v1130_v32, 4  ;;  %v1138_v8 = vrot.slane %v1137_v60, 4  ;;  %v1145_v50 = vrot.slane %v1144_v25, 4 }
 0x12f   : > { %v1152_v44 = vrot.slane %v1151_v46, 4  ;;  %v1159_v36 = vrot.slane %v1158_v43, 4  ;;  %v1166_v45 = vrot.slane %v1165_v7, 4  ;;  %v1173_v18 = vrot.slane %v1172_v49, 4 }
 0x130   : > { %v1180_v54 = vrot.slane %v1179_v38, 4  ;;  %v1132_v16 = vadd.f32 %v1131_v58, %v1130_v32  ;;  %v1139_v51 = vadd.f32 %v1138_v8, %v1137_v60  ;;  %v1146_v31 = vadd.f32 %v1145_v50, %v1144_v25 }
 0x131   : > { %v1153_v57 = vadd.f32 %v1152_v44, %v1151_v46  ;;  %v1160_v14 = vadd.f32 %v1159_v36, %v1158_v43  ;;  %v1167_v55 = vadd.f32 %v1166_v45, %v1165_v7  ;;  %v1174_v35 = vadd.f32 %v1173_v18, %v1172_v49 }
 0x132   : > { %v1181_v11 = vadd.f32 %v1180_v54, %v1179_v38  ;;  %v1133_v34 = vrot.slane %v1132_v16, 2  ;;  %v1140_v15 = vrot.slane %v1139_v51, 2  ;;  %v1147_v29 = vrot.slane %v1146_v31, 2 }
 0x133   : > { %v1154_v20 = vrot.slane %v1153_v57, 2  ;;  %v1161_v9 = vrot.slane %v1160_v14, 2  ;;  %v1168_v12 = vrot.slane %v1167_v55, 2  ;;  %v1175_v2 = vrot.slane %v1174_v35, 2 }
 0x134   : > { %v1182_v10 = vrot.slane %v1181_v11, 2  ;;  %v1134_v5 = vadd.f32 %v1133_v34, %v1132_v16  ;;  %v1141_v33 = vadd.f32 %v1140_v15, %v1139_v51  ;;  %v1148_v23 = vadd.f32 %v1147_v29, %v1146_v31 }
 0x135   : > { %v1155_v61 = vadd.f32 %v1154_v20, %v1153_v57  ;;  %v8340_v60 = vrot.slane %v5173_v24, 1  ;;  %v8341_v32 = vrot.slane %v5179_v63, 1  ;;  %v8342_v43 = vrot.slane %v5181_v26, 1 }
 0x136   : > { %v1162_v49 = vadd.f32 %v1161_v9, %v1160_v14  ;;  %v1135_v38 = vrot.slane %v1134_v5, 1  ;;  %v5249_v58 = vadd.f32 %v1168_v12, %v1167_v55  ;;  %v5251_v8 = vadd.f32 %v1175_v2, %v1174_v35 }
 0x137   : > { %v1074_v46 = vadd.f32 %v8340_v60, %v5173_v24  ;;  %v1081_v25 = vadd.f32 %v8341_v32, %v5179_v63  ;;  %v1088_v7 = vadd.f32 %v8342_v43, %v5181_v26  ;;  %v5253_v50 = vadd.f32 %v1182_v10, %v1181_v11 }
 0x138   : > { %v1142_v44 = vrot.slane %v1141_v33, 1  ;;  %v1149_v36 = vrot.slane %v1148_v23, 1  ;;  %v1156_v45 = vrot.slane %v1155_v61, 1  ;;  %v1163_v24 = vrot.slane %v1162_v49, 1 }
 0x139   : > { %v5258_v63 = vsel %vm8143_vm8, %v5198_v39, 0.0  ;;  %v5263_v26 = vsel %vm8143_vm8, %v5200_v40, 0.0  ;;  %v5268_v18 = vsel %vm8143_vm8, %v5205_v13, 0.0  ;;  %v5273_v54 = vsel %vm8143_vm8, %v5211_v56, 0.0 }
 0x13a   : > { %v5278_v39 = vsel %vm8143_vm8, %v5213_v52, 0.0  ;;  %v5282_v16 = vsel %vm8143_vm8, %v1074_v46, 0.0  ;;  %v5286_v40 = vsel %vm8143_vm8, %v1081_v25, 0.0  ;;  %v5290_v13 = vsel %vm8143_vm8, %v1088_v7, 0.0 }
 0x13b   : > { %v5292_v51 = vadd.f32 %v1135_v38, %v1134_v5  ;;  %v5297_v57 = vadd.f32 %v1142_v44, %v1141_v33  ;;  %v5299_v14 = vadd.f32 %v1149_v36, %v1148_v23  ;;  %v5301_v55 = vadd.f32 %v1156_v45, %v1155_v61 }
 0x13c   : > { %v5303_v35 = vadd.f32 %v1163_v24, %v1162_v49  ;;  %v1197_v11 = vsub.f32 %v5055_v42, %v5086_v47  ;;  %v1198_v34 = vsub.f32 %v5059_v41, %v5089_v21  ;;  %v1199_v15 = vsub.f32 %v5055_v42, %v5100_v53 }
 0x13d   : > { %v1200_v29 = vsub.f32 %v5059_v41, %v5103_v59  ;;  %v1201_v20 = vsub.f32 %v5055_v42, %v5108_v28  ;;  %v1202_v61 = vsub.f32 %v5059_v41, %v5111_v17  ;;  %v1203_v9 = vsub.f32 %v5055_v42, %v5116_v4 }
 0x13e   : > { %v1204_v12 = vsub.f32 %v5059_v41, %v5119_v22  ;;  %v1205_v2 = vsub.f32 %v5055_v42, %v5126_v6  ;;  %v1206_v10 = vsub.f32 %v5059_v41, %v5129_v62  ;;  %v1207_v5 = vsub.f32 %v5055_v42, %v5136_v19 }
 0x13f   : > { %v1208_v33 = vsub.f32 %v5059_v41, %v5139_v48  ;;  %v1209_v23 = vsub.f32 %v5055_v42, %v5148_v1  ;;  %v1210_v60 = vsub.f32 %v5059_v41, %v5151_v3  ;;  %v1211_v46 = vmul.f32 %v5192_v30, %v5192_v30 }
 0x140   : > { %v1212_v32 = vmul.f32 %v5196_v37, %v5196_v37  ;;  %v1213_v25 = vmul.f32 %v1197_v11, %v1197_v11  ;;  %v1214_v43 = vmul.f32 %v1198_v34, %v1198_v34  ;;  %v1215_v7 = vmul.f32 %v1199_v15, %v1199_v15 }
 0x141   : > { %v1216_v49 = vmul.f32 %v1200_v29, %v1200_v29  ;;  %v1217_v38 = vmul.f32 %v1201_v20, %v1201_v20  ;;  %v1218_v44 = vmul.f32 %v1202_v61, %v1202_v61  ;;  %v1219_v36 = vmul.f32 %v1203_v9, %v1203_v9 }
 0x142   : > { %v1220_v45 = vmul.f32 %v1204_v12, %v1204_v12  ;;  %v1221_v24 = vmul.f32 %v1205_v2, %v1205_v2  ;;  %v1222_v52 = vmul.f32 %v1206_v10, %v1206_v10  ;;  %v1223_v42 = vmul.f32 %v1207_v5, %v1207_v5 }
 0x143   : > { %v1224_v31 = vmul.f32 %v1208_v33, %v1208_v33  ;;  %v1225_v56 = vmul.f32 %v1209_v23, %v1209_v23  ;;  %v1226_v41 = vmul.f32 %v1210_v60, %v1210_v60  ;;  %v1227_v3 = vadd.f32 %v1212_v32, %v1211_v46 }
 0x144   : > { %v1234_v1 = vadd.f32 %v1214_v43, %v1213_v25  ;;  %vm1186_vm9 = vcmp.eq.s32.totalorder %v5188_v27, 1  ;;  %v1241_v30 = vadd.f32 %v1216_v49, %v1215_v7  ;;  %v1248_v37 = vadd.f32 %v1218_v44, %v1217_v38 }
 0x145   : > { %v1255_v11 = vadd.f32 %v1220_v45, %v1219_v36  ;;  %v1262_v34 = vadd.f32 %v1222_v52, %v1221_v24  ;;  %v1228_v15 = vrot.slane %v1227_v3, 4  ;;  %v1269_v20 = vadd.f32 %v1224_v31, %v1223_v42 }
 0x146   : > { %v1235_v29 = vrot.slane %v1234_v1, 4  ;;  %v1276_v61 = vadd.f32 %v1226_v41, %v1225_v56  ;;  %v1242_v9 = vrot.slane %v1241_v30, 4  ;;  %v1249_v12 = vrot.slane %v1248_v37, 4 }
 0x147   : > { %v1256_v2 = vrot.slane %v1255_v11, 4  ;;  %v1263_v10 = vrot.slane %v1262_v34, 4  ;;  %v1229_v5 = vadd.f32 %v1228_v15, %v1227_v3  ;;  %v1270_v23 = vrot.slane %v1269_v20, 4 }
 0x148   : > { %v1236_v33 = vadd.f32 %v1235_v29, %v1234_v1  ;;  %v1277_v60 = vrot.slane %v1276_v61, 4  ;;  %v1243_v46 = vadd.f32 %v1242_v9, %v1241_v30  ;;  %v1250_v32 = vadd.f32 %v1249_v12, %v1248_v37 }
 0x149   : > { %v1257_v25 = vadd.f32 %v1256_v2, %v1255_v11  ;;  %v1264_v43 = vadd.f32 %v1263_v10, %v1262_v34  ;;  %v1230_v7 = vrot.slane %v1229_v5, 2  ;;  %v1271_v38 = vadd.f32 %v1270_v23, %v1269_v20 }
 0x14a   : > { %v1237_v49 = vrot.slane %v1236_v33, 2  ;;  %v1278_v52 = vadd.f32 %v1277_v60, %v1276_v61  ;;  %v1244_v44 = vrot.slane %v1243_v46, 2  ;;  %v1251_v36 = vrot.slane %v1250_v32, 2 }
 0x14b   : > { %v1258_v31 = vrot.slane %v1257_v25, 2  ;;  %v1265_v56 = vrot.slane %v1264_v43, 2  ;;  %v1231_v45 = vadd.f32 %v1230_v7, %v1229_v5  ;;  %v1272_v42 = vrot.slane %v1271_v38, 2 }
 0x14c   : > { %v1238_v24 = vadd.f32 %v1237_v49, %v1236_v33  ;;  %v1279_v41 = vrot.slane %v1278_v52, 2  ;;  %v8343_v1 = vrot.slane %v5249_v58, 1  ;;  %v1245_v30 = vadd.f32 %v1244_v44, %v1243_v46  ;;  %v8346_v46 = vld [vmem:[#allocation49_spill] sm:$0xff] }
 0x14d   : > { %v1252_v37 = vadd.f32 %v1251_v36, %v1250_v32  ;;  %v1259_v11 = vadd.f32 %v1258_v31, %v1257_v25  ;;  %v8344_v34 = vrot.slane %v5251_v8, 1  ;;  %v8345_v29 = vrot.slane %v5253_v50, 1  ;;  %v8347_v32 = vld [vmem:[#allocation48_spill] sm:$0xff]  ;;  %v8348_v25 = vld [vmem:[#allocation50_spill] sm:$0xff] }
 0x14e   : > { %v1171_v3 = vadd.f32 %v8343_v1, %v5249_v58  ;;  %v1232_v61 = vrot.slane %v1231_v45, 1  ;;  %v5347_v9 = vadd.f32 %v1265_v56, %v1264_v43  ;;  %v1239_v12 = vrot.slane %v1238_v24, 1  ;;  %v8349_v1 = vld [vmem:[#allocation60_spill] sm:$0xff] }
 0x14f   : > { %v1178_v15 = vadd.f32 %v8344_v34, %v5251_v8  ;;  %v1185_v20 = vadd.f32 %v8345_v29, %v5253_v50  ;;  %v1246_v2 = vrot.slane %v1245_v30, 1  ;;  %v5349_v10 = vadd.f32 %v1272_v42, %v1271_v38 }
 0x150   : > { %v5351_v5 = vadd.f32 %v1279_v41, %v1278_v52  ;;  %v5357_v58 = vsel %vm1186_vm9, %v5292_v51, %v5258_v63  ;;  %v5363_v8 = vsel %vm1186_vm9, %v5297_v57, %v5263_v26  ;;  %v1253_v50 = vrot.slane %v1252_v37, 1 }
 0x151   : > { %v1260_v33 = vrot.slane %v1259_v11, 1  ;;  %v5369_v23 = vsel %vm1186_vm9, %v5299_v14, %v5268_v18  ;;  %v5375_v63 = vsel %vm1186_vm9, %v5301_v55, %v5273_v54  ;;  %v5381_v26 = vsel %vm1186_vm9, %v5303_v35, %v5278_v39 }
 0x152   : > { %v5386_v51 = vsel %vm1186_vm9, %v1171_v3, %v5282_v16  ;;  %v5391_v18 = vsel %vm1186_vm9, %v1178_v15, %v5286_v40  ;;  %v5396_v54 = vsel %vm1186_vm9, %v1185_v20, %v5290_v13  ;;  %v5398_v57 = vadd.f32 %v1232_v61, %v1231_v45 }
 0x153   : > { %v5401_v14 = vadd.f32 %v1239_v12, %v1238_v24  ;;  %v5403_v55 = vadd.f32 %v1246_v2, %v1245_v30  ;;  %v5407_v60 = vadd.f32 %v1253_v50, %v1252_v37  ;;  %v5409_v40 = vadd.f32 %v1260_v33, %v1259_v11  ;;  %v8350_v30 = vld [vmem:[#allocation61_spill] sm:$0xff] }
 0x154   : > { %v1292_v13 = vsub.f32 %v8346_v46, %v5044_v0  ;;  %v1293_v43 = vsub.f32 %v8348_v25, %v8347_v32  ;;  %v1294_v7 = vsub.f32 %v8346_v46, %v5086_v47  ;;  %v1295_v49 = vsub.f32 %v8348_v25, %v5089_v21 }
 0x155   : > { %v1296_v38 = vsub.f32 %v8346_v46, %v5100_v53  ;;  %v1297_v52 = vsub.f32 %v8348_v25, %v5103_v59  ;;  %v1298_v44 = vsub.f32 %v8346_v46, %v5108_v28  ;;  %v1299_v36 = vsub.f32 %v8348_v25, %v5111_v17 }
 0x156   : > { %v1300_v31 = vsub.f32 %v8346_v46, %v5116_v4  ;;  %v1301_v56 = vsub.f32 %v8348_v25, %v5119_v22  ;;  %v1302_v45 = vsub.f32 %v8346_v46, %v5126_v6  ;;  %v1303_v24 = vsub.f32 %v8348_v25, %v5129_v62 }
 0x157   : > { %v1304_v42 = vsub.f32 %v8346_v46, %v5136_v19  ;;  %v1305_v41 = vsub.f32 %v8348_v25, %v5139_v48  ;;  %v1306_v3 = vsub.f32 %v8346_v46, %v8349_v1  ;;  %v1307_v37 = vsub.f32 %v8348_v25, %v8350_v30 }
 0x158   : > { %v1308_v11 = vmul.f32 %v1292_v13, %v1292_v13  ;;  %v1309_v34 = vmul.f32 %v1293_v43, %v1293_v43  ;;  %v1310_v15 = vmul.f32 %v1294_v7, %v1294_v7  ;;  %v1311_v29 = vmul.f32 %v1295_v49, %v1295_v49 }
 0x159   : > { %v1312_v20 = vmul.f32 %v1296_v38, %v1296_v38  ;;  %v1313_v61 = vmul.f32 %v1297_v52, %v1297_v52  ;;  %v1314_v12 = vmul.f32 %v1298_v44, %v1298_v44  ;;  %v1315_v2 = vmul.f32 %v1299_v36, %v1299_v36 }
 0x15a   : > { %v1316_v50 = vmul.f32 %v1300_v31, %v1300_v31  ;;  %v1317_v33 = vmul.f32 %v1301_v56, %v1301_v56  ;;  %v1318_v35 = vmul.f32 %v1302_v45, %v1302_v45  ;;  %v1319_v16 = vmul.f32 %v1303_v24, %v1303_v24 }
 0x15b   : > { %v1320_v39 = vmul.f32 %v1304_v42, %v1304_v42  ;;  %v1321_v48 = vmul.f32 %v1305_v41, %v1305_v41  ;;  %v1322_v19 = vmul.f32 %v1306_v3, %v1306_v3  ;;  %v1323_v62 = vmul.f32 %v1307_v37, %v1307_v37 }
 0x15c   : > { %v1324_v46 = vadd.f32 %v1309_v34, %v1308_v11  ;;  %v1331_v1 = vadd.f32 %v1311_v29, %v1310_v15  ;;  %vm1283_vm10 = vcmp.eq.s32.totalorder %v5188_v27, 2  ;;  %v1338_v13 = vadd.f32 %v1313_v61, %v1312_v20 }
 0x15d   : > { %v1345_v25 = vadd.f32 %v1315_v2, %v1314_v12  ;;  %v1352_v43 = vadd.f32 %v1317_v33, %v1316_v50  ;;  %v1359_v7 = vadd.f32 %v1319_v16, %v1318_v35  ;;  %v1366_v52 = vadd.f32 %v1321_v48, %v1320_v39 }
 0x15e   : > { %v1325_v49 = vrot.slane %v1324_v46, 4  ;;  %v1332_v38 = vrot.slane %v1331_v1, 4  ;;  %v1373_v44 = vadd.f32 %v1323_v62, %v1322_v19  ;;  %v1339_v36 = vrot.slane %v1338_v13, 4 }
 0x15f   : > { %v1346_v31 = vrot.slane %v1345_v25, 4  ;;  %v1353_v56 = vrot.slane %v1352_v43, 4  ;;  %v1360_v45 = vrot.slane %v1359_v7, 4  ;;  %v1367_v41 = vrot.slane %v1366_v52, 4 }
 0x160   : > { %v1326_v24 = vadd.f32 %v1325_v49, %v1324_v46  ;;  %v1333_v42 = vadd.f32 %v1332_v38, %v1331_v1  ;;  %v1374_v3 = vrot.slane %v1373_v44, 4  ;;  %v1340_v37 = vadd.f32 %v1339_v36, %v1338_v13 }
 0x161   : > { %v1347_v11 = vadd.f32 %v1346_v31, %v1345_v25  ;;  %v1354_v34 = vadd.f32 %v1353_v56, %v1352_v43  ;;  %v1361_v15 = vadd.f32 %v1360_v45, %v1359_v7  ;;  %v1368_v61 = vadd.f32 %v1367_v41, %v1366_v52 }
 0x162   : > { %v1327_v29 = vrot.slane %v1326_v24, 2  ;;  %v1334_v20 = vrot.slane %v1333_v42, 2  ;;  %v1375_v16 = vadd.f32 %v1374_v3, %v1373_v44  ;;  %v1341_v35 = vrot.slane %v1340_v37, 2  ;;  %v8354_v3 = vld [vmem:[#allocation51_spill] sm:$0xff] }
 0x163   : > { %v1348_v12 = vrot.slane %v1347_v11, 2  ;;  %v1355_v48 = vrot.slane %v1354_v34, 2  ;;  %v1362_v19 = vrot.slane %v1361_v15, 2  ;;  %v1369_v2 = vrot.slane %v1368_v61, 2 }
 0x164   : > { %v1328_v62 = vadd.f32 %v1327_v29, %v1326_v24  ;;  %v1335_v39 = vadd.f32 %v1334_v20, %v1333_v42  ;;  %v1376_v50 = vrot.slane %v1375_v16, 2  ;;  %v8351_v1 = vrot.slane %v5347_v9, 1 }
 0x165   : > { %v1342_v46 = vadd.f32 %v1341_v35, %v1340_v37  ;;  %v1349_v13 = vadd.f32 %v1348_v12, %v1347_v11  ;;  %v1356_v25 = vadd.f32 %v1355_v48, %v1354_v34  ;;  %v8352_v43 = vrot.slane %v5349_v10, 1  ;;  %v8355_v37 = vld [vmem:[#allocation52_spill] sm:$0xff] }
 0x166   : > { %v1268_v33 = vadd.f32 %v8351_v1, %v5347_v9  ;;  %v8353_v49 = vrot.slane %v5351_v5, 1  ;;  %v1329_v52 = vrot.slane %v1328_v62, 1  ;;  %v5453_v44 = vadd.f32 %v1362_v19, %v1361_v15  ;;  %v8356_v19 = vld [vmem:[#allocation57_spill] sm:$0xff] }
 0x167   : > { %v1275_v7 = vadd.f32 %v8352_v43, %v5349_v10  ;;  %v1336_v36 = vrot.slane %v1335_v39, 1  ;;  %v1343_v31 = vrot.slane %v1342_v46, 1  ;;  %v5455_v56 = vadd.f32 %v1369_v2, %v1368_v61 }
 0x168   : > { %v1282_v38 = vadd.f32 %v8353_v49, %v5351_v5  ;;  %v5457_v45 = vadd.f32 %v1376_v50, %v1375_v16  ;;  %v5463_v9 = vsel %vm1283_vm10, %v5398_v57, %v5357_v58  ;;  %v5469_v10 = vsel %vm1283_vm10, %v5401_v14, %v5363_v8  ;;  %v8358_v50 = vld [vmem:[#allocation59_spill] sm:$0xff] }
 0x169   : > { %v1350_v5 = vrot.slane %v1349_v13, 1  ;;  %v1357_v24 = vrot.slane %v1356_v25, 1  ;;  %v5475_v42 = vsel %vm1283_vm10, %v5403_v55, %v5369_v23  ;;  %v5481_v58 = vsel %vm1283_vm10, %v5407_v60, %v5375_v63 }
 0x16a   : > { %v5487_v8 = vsel %vm1283_vm10, %v5409_v40, %v5381_v26  ;;  %v5492_v57 = vsel %vm1283_vm10, %v1268_v33, %v5386_v51  ;;  %v5497_v23 = vsel %vm1283_vm10, %v1275_v7, %v5391_v18  ;;  %v5502_v63 = vsel %vm1283_vm10, %v1282_v38, %v5396_v54  ;;  %v8359_v33 = vld [vmem:[#allocation60_spill] sm:$0xff] }
 0x16b   : > { %v5504_v14 = vadd.f32 %v1329_v52, %v1328_v62  ;;  %v5507_v55 = vadd.f32 %v1336_v36, %v1335_v39  ;;  %v5509_v60 = vadd.f32 %v1343_v31, %v1342_v46  ;;  %v5513_v41 = vadd.f32 %v1350_v5, %v1349_v13  ;;  %v8357_v39 = vld [vmem:[#allocation58_spill] sm:$0xff] }
 0x16c   : > { %v5515_v18 = vadd.f32 %v1357_v24, %v1356_v25  ;;  %v1389_v54 = vsub.f32 %v8354_v3, %v5044_v0  ;;  %v1390_v11 = vsub.f32 %v8355_v37, %v8347_v32  ;;  %v1391_v34 = vsub.f32 %v8354_v3, %v5086_v47 }
 0x16d   : > { %v1392_v15 = vsub.f32 %v8355_v37, %v5089_v21  ;;  %v1393_v29 = vsub.f32 %v8354_v3, %v5100_v53  ;;  %v1394_v20 = vsub.f32 %v8355_v37, %v5103_v59  ;;  %v1395_v61 = vsub.f32 %v8354_v3, %v5108_v28 }
 0x16e   : > { %v1396_v16 = vsub.f32 %v8355_v37, %v5111_v17  ;;  %v1397_v35 = vsub.f32 %v8354_v3, %v5116_v4  ;;  %v1398_v12 = vsub.f32 %v8355_v37, %v5119_v22  ;;  %v1399_v48 = vsub.f32 %v8354_v3, %v5126_v6 }
 0x16f   : > { %v1400_v62 = vsub.f32 %v8355_v37, %v8356_v19  ;;  %v1401_v2 = vsub.f32 %v8354_v3, %v8357_v39  ;;  %v1402_v1 = vsub.f32 %v8355_v37, %v8358_v50  ;;  %v1403_v46 = vsub.f32 %v8354_v3, %v8359_v33 }
 0x170   : > { %v1404_v13 = vsub.f32 %v8355_v37, %v8350_v30  ;;  %v1405_v25 = vmul.f32 %v1389_v54, %v1389_v54  ;;  %v1406_v43 = vmul.f32 %v1390_v11, %v1390_v11  ;;  %v1407_v7 = vmul.f32 %v1391_v34, %v1391_v34 }
 0x171   : > { %v1408_v49 = vmul.f32 %v1392_v15, %v1392_v15  ;;  %v1409_v38 = vmul.f32 %v1393_v29, %v1393_v29  ;;  %v1410_v52 = vmul.f32 %v1394_v20, %v1394_v20  ;;  %v1411_v36 = vmul.f32 %v1395_v61, %v1395_v61 }
 0x172   : > { %v1412_v31 = vmul.f32 %v1396_v16, %v1396_v16  ;;  %v1413_v5 = vmul.f32 %v1397_v35, %v1397_v35  ;;  %v1414_v24 = vmul.f32 %v1398_v12, %v1398_v12  ;;  %v1415_v40 = vmul.f32 %v1399_v48, %v1399_v48 }
 0x173   : > { %v1416_v51 = vmul.f32 %v1400_v62, %v1400_v62  ;;  %v1417_v26 = vmul.f32 %v1401_v2, %v1401_v2  ;;  %v1418_v50 = vmul.f32 %v1402_v1, %v1402_v1  ;;  %v1419_v39 = vmul.f32 %v1403_v46, %v1403_v46 }
 0x174   : > { %v1420_v19 = vmul.f32 %v1404_v13, %v1404_v13  ;;  %v1421_v3 = vadd.f32 %v1406_v43, %v1405_v25  ;;  %v1428_v33 = vadd.f32 %v1408_v49, %v1407_v7  ;;  %vm1380_vm11 = vcmp.eq.s32.totalorder %v5188_v27, 3 }
 0x175   : > { %v1435_v54 = vadd.f32 %v1410_v52, %v1409_v38  ;;  %v1442_v37 = vadd.f32 %v1412_v31, %v1411_v36  ;;  %v1449_v11 = vadd.f32 %v1414_v24, %v1413_v5  ;;  %v1456_v34 = vadd.f32 %v1416_v51, %v1415_v40 }
 0x176   : > { %v1422_v15 = vrot.slane %v1421_v3, 4  ;;  %v1429_v29 = vrot.slane %v1428_v33, 4  ;;  %v1463_v20 = vadd.f32 %v1418_v50, %v1417_v26  ;;  %v1470_v61 = vadd.f32 %v1420_v19, %v1419_v39 }
 0x177   : > { %v1436_v16 = vrot.slane %v1435_v54, 4  ;;  %v1443_v35 = vrot.slane %v1442_v37, 4  ;;  %v1450_v12 = vrot.slane %v1449_v11, 4  ;;  %v1457_v48 = vrot.slane %v1456_v34, 4 }
 0x178   : > { %v1423_v62 = vadd.f32 %v1422_v15, %v1421_v3  ;;  %v1430_v2 = vadd.f32 %v1429_v29, %v1428_v33  ;;  %v1464_v1 = vrot.slane %v1463_v20, 4  ;;  %v1471_v46 = vrot.slane %v1470_v61, 4 }
 0x179   : > { %v1437_v13 = vadd.f32 %v1436_v16, %v1435_v54  ;;  %v1444_v25 = vadd.f32 %v1443_v35, %v1442_v37  ;;  %v1451_v43 = vadd.f32 %v1450_v12, %v1449_v11  ;;  %v1458_v7 = vadd.f32 %v1457_v48, %v1456_v34 }
 0x17a   : > { %v1424_v49 = vrot.slane %v1423_v62, 2  ;;  %v1431_v38 = vrot.slane %v1430_v2, 2  ;;  %v1465_v52 = vadd.f32 %v1464_v1, %v1463_v20  ;;  %v1472_v51 = vadd.f32 %v1471_v46, %v1470_v61  ;;  %v8363_v46 = vld [vmem:[#allocation53_spill] sm:$0xff] }
 0x17b   : > { %v1438_v40 = vrot.slane %v1437_v13, 2  ;;  %v1445_v36 = vrot.slane %v1444_v25, 2  ;;  %v1452_v26 = vrot.slane %v1451_v43, 2  ;;  %v1459_v19 = vrot.slane %v1458_v7, 2 }
 0x17c   : > { %v1425_v39 = vadd.f32 %v1424_v49, %v1423_v62  ;;  %v1432_v50 = vadd.f32 %v1431_v38, %v1430_v2  ;;  %v1466_v31 = vrot.slane %v1465_v52, 2  ;;  %v1473_v5 = vrot.slane %v1472_v51, 2 }
 0x17d   : > { %v8360_v33 = vrot.slane %v5453_v44, 1  ;;  %v1439_v3 = vadd.f32 %v1438_v40, %v1437_v13  ;;  %v1446_v54 = vadd.f32 %v1445_v36, %v1444_v25  ;;  %v1453_v37 = vadd.f32 %v1452_v26, %v1451_v43  ;;  %v8364_v13 = vld [vmem:[#allocation54_spill] sm:$0xff] }
 0x17e   : > { %v8361_v11 = vrot.slane %v5455_v56, 1  ;;  %v8362_v15 = vrot.slane %v5457_v45, 1  ;;  %v1426_v20 = vrot.slane %v1425_v39, 1  ;;  %v5559_v61 = vadd.f32 %v1459_v19, %v1458_v7  ;;  %v8365_v19 = vld [vmem:[#allocation57_spill] sm:$0xff] }
 0x17f   : > { %v1365_v24 = vadd.f32 %v8360_v33, %v5453_v44  ;;  %v1433_v16 = vrot.slane %v1432_v50, 1  ;;  %v1440_v35 = vrot.slane %v1439_v3, 1  ;;  %v5561_v12 = vadd.f32 %v1466_v31, %v1465_v52 }
 0x180   : > { %v1372_v34 = vadd.f32 %v8361_v11, %v5455_v56  ;;  %v1379_v29 = vadd.f32 %v8362_v15, %v5457_v45  ;;  %v5563_v48 = vadd.f32 %v1473_v5, %v1472_v51  ;;  %v5569_v44 = vsel %vm1380_vm11, %v5504_v14, %v5463_v9  ;;  %v8367_v5 = vld [vmem:[#allocation59_spill] sm:$0xff] }
 0x181   : > { %v5575_v56 = vsel %vm1380_vm11, %v5507_v55, %v5469_v10  ;;  %v1447_v45 = vrot.slane %v1446_v54, 1  ;;  %v1454_v62 = vrot.slane %v1453_v37, 1  ;;  %v5581_v2 = vsel %vm1380_vm11, %v5509_v60, %v5475_v42 }
 0x182   : > { %v5587_v9 = vsel %vm1380_vm11, %v5513_v41, %v5481_v58  ;;  %v5593_v10 = vsel %vm1380_vm11, %v5515_v18, %v5487_v8  ;;  %v5598_v14 = vsel %vm1380_vm11, %v1365_v24, %v5492_v57  ;;  %v5603_v42 = vsel %vm1380_vm11, %v1372_v34, %v5497_v23  ;;  %v8368_v24 = vld [vmem:[#allocation60_spill] sm:$0xff] }
 0x183   : > { %v5608_v58 = vsel %vm1380_vm11, %v1379_v29, %v5502_v63  ;;  %v5610_v55 = vadd.f32 %v1426_v20, %v1425_v39  ;;  %v5613_v60 = vadd.f32 %v1433_v16, %v1432_v50  ;;  %v5615_v41 = vadd.f32 %v1440_v35, %v1439_v3  ;;  %v8366_v50 = vld [vmem:[#allocation58_spill] sm:$0xff] }
 0x184   : > { %v5619_v1 = vadd.f32 %v1447_v45, %v1446_v54  ;;  %v5621_v23 = vadd.f32 %v1454_v62, %v1453_v37  ;;  %v1486_v63 = vsub.f32 %v8363_v46, %v5044_v0  ;;  %v1487_v25 = vsub.f32 %v8364_v13, %v8347_v32 }
 0x185   : > { %v1488_v43 = vsub.f32 %v8363_v46, %v5086_v47  ;;  %v1489_v7 = vsub.f32 %v8364_v13, %v5089_v21  ;;  %v1490_v49 = vsub.f32 %v8363_v46, %v5100_v53  ;;  %v1491_v38 = vsub.f32 %v8364_v13, %v5103_v59 }
 0x186   : > { %v1492_v52 = vsub.f32 %v8363_v46, %v5108_v28  ;;  %v1493_v51 = vsub.f32 %v8364_v13, %v5111_v17  ;;  %v1494_v40 = vsub.f32 %v8363_v46, %v5116_v4  ;;  %v1495_v36 = vsub.f32 %v8364_v13, %v5119_v22 }
 0x187   : > { %v1496_v26 = vsub.f32 %v8363_v46, %v5126_v6  ;;  %v1497_v39 = vsub.f32 %v8364_v13, %v8365_v19  ;;  %v1498_v31 = vsub.f32 %v8363_v46, %v8366_v50  ;;  %v1499_v33 = vsub.f32 %v8364_v13, %v8367_v5 }
 0x188   : > { %v1500_v3 = vsub.f32 %v8363_v46, %v8368_v24  ;;  %v1501_v54 = vsub.f32 %v8364_v13, %v8350_v30  ;;  %v1502_v37 = vmul.f32 %v1486_v63, %v1486_v63  ;;  %v1503_v11 = vmul.f32 %v1487_v25, %v1487_v25 }
 0x189   : > { %v1504_v34 = vmul.f32 %v1488_v43, %v1488_v43  ;;  %v1505_v15 = vmul.f32 %v1489_v7, %v1489_v7  ;;  %v1506_v29 = vmul.f32 %v1490_v49, %v1490_v49  ;;  %v1507_v20 = vmul.f32 %v1491_v38, %v1491_v38 }
 0x18a   : > { %v1508_v16 = vmul.f32 %v1492_v52, %v1492_v52  ;;  %v1509_v35 = vmul.f32 %v1493_v51, %v1493_v51  ;;  %v1510_v45 = vmul.f32 %v1494_v40, %v1494_v40  ;;  %v1511_v62 = vmul.f32 %v1495_v36, %v1495_v36 }
 0x18b   : > { %v1512_v18 = vmul.f32 %v1496_v26, %v1496_v26  ;;  %v1513_v57 = vmul.f32 %v1497_v39, %v1497_v39  ;;  %v1514_v8 = vmul.f32 %v1498_v31, %v1498_v31  ;;  %v1515_v5 = vmul.f32 %v1499_v33, %v1499_v33 }
 0x18c   : > { %v1516_v50 = vmul.f32 %v1500_v3, %v1500_v3  ;;  %v1517_v19 = vmul.f32 %v1501_v54, %v1501_v54  ;;  %v1518_v46 = vadd.f32 %v1503_v11, %v1502_v37  ;;  %v1525_v24 = vadd.f32 %v1505_v15, %v1504_v34 }
 0x18d   : > { %vm1477_vm12 = vcmp.eq.s32.totalorder %v5188_v27, 4  ;;  %v1532_v63 = vadd.f32 %v1507_v20, %v1506_v29  ;;  %v1539_v13 = vadd.f32 %v1509_v35, %v1508_v16  ;;  %v1546_v25 = vadd.f32 %v1511_v62, %v1510_v45 }
 0x18e   : > { %v1553_v43 = vadd.f32 %v1513_v57, %v1512_v18  ;;  %v1519_v7 = vrot.slane %v1518_v46, 4  ;;  %v1526_v49 = vrot.slane %v1525_v24, 4  ;;  %v1560_v38 = vadd.f32 %v1515_v5, %v1514_v8 }
 0x18f   : > { %v1567_v52 = vadd.f32 %v1517_v19, %v1516_v50  ;;  %v1533_v51 = vrot.slane %v1532_v63, 4  ;;  %v1540_v40 = vrot.slane %v1539_v13, 4  ;;  %v1547_v36 = vrot.slane %v1546_v25, 4 }
 0x190   : > { %v1554_v26 = vrot.slane %v1553_v43, 4  ;;  %v1520_v39 = vadd.f32 %v1519_v7, %v1518_v46  ;;  %v1527_v31 = vadd.f32 %v1526_v49, %v1525_v24  ;;  %v1561_v33 = vrot.slane %v1560_v38, 4 }
 0x191   : > { %v1568_v3 = vrot.slane %v1567_v52, 4  ;;  %v1534_v54 = vadd.f32 %v1533_v51, %v1532_v63  ;;  %v1541_v37 = vadd.f32 %v1540_v40, %v1539_v13  ;;  %v1548_v11 = vadd.f32 %v1547_v36, %v1546_v25 }
 0x192   : > { %v1555_v34 = vadd.f32 %v1554_v26, %v1553_v43  ;;  %v1521_v15 = vrot.slane %v1520_v39, 2  ;;  %v1528_v29 = vrot.slane %v1527_v31, 2  ;;  %v1562_v20 = vadd.f32 %v1561_v33, %v1560_v38 }
 0x193   : > { %v1569_v57 = vadd.f32 %v1568_v3, %v1567_v52  ;;  %v1535_v18 = vrot.slane %v1534_v54, 2  ;;  %v1542_v16 = vrot.slane %v1541_v37, 2  ;;  %v1549_v8 = vrot.slane %v1548_v11, 2 }
 0x194   : > { %v1556_v19 = vrot.slane %v1555_v34, 2  ;;  %v1522_v50 = vadd.f32 %v1521_v15, %v1520_v39  ;;  %v1529_v5 = vadd.f32 %v1528_v29, %v1527_v31  ;;  %v1563_v35 = vrot.slane %v1562_v20, 2 }
 0x195   : > { %v1570_v45 = vrot.slane %v1569_v57, 2  ;;  %v1536_v62 = vadd.f32 %v1535_v18, %v1534_v54  ;;  %v1543_v24 = vadd.f32 %v1542_v16, %v1541_v37  ;;  %v1550_v46 = vadd.f32 %v1549_v8, %v1548_v11  ;;  %v8372_v54 = vld [vmem:[#allocation55_spill] sm:$0xff]  ;;  %v8373_v37 = vld [vmem:[#allocation62_spill] sm:$0xff] }
 0x196   : > { %v1557_v7 = vadd.f32 %v1556_v19, %v1555_v34  ;;  %v8369_v63 = vrot.slane %v5559_v61, 1  ;;  %v8370_v25 = vrot.slane %v5561_v12, 1  ;;  %v8371_v49 = vrot.slane %v5563_v48, 1 }
 0x197   : > { %v1523_v52 = vrot.slane %v1522_v50, 1  ;;  %v1530_v51 = vrot.slane %v1529_v5, 1  ;;  %v1537_v40 = vrot.slane %v1536_v62, 1  ;;  %v5665_v36 = vadd.f32 %v1563_v35, %v1562_v20  ;;  %v8375_v35 = vld [vmem:[#allocation58_spill] sm:$0xff] }
 0x198   : > { %v1462_v13 = vadd.f32 %v8369_v63, %v5559_v61  ;;  %v1469_v43 = vadd.f32 %v8370_v25, %v5561_v12  ;;  %v1476_v38 = vadd.f32 %v8371_v49, %v5563_v48  ;;  %v5667_v26 = vadd.f32 %v1570_v45, %v1569_v57 }
 0x199   : > { %v5673_v61 = vsel %vm1477_vm12, %v5610_v55, %v5569_v44  ;;  %v1544_v39 = vrot.slane %v1543_v24, 1  ;;  %v1551_v31 = vrot.slane %v1550_v46, 1  ;;  %v1558_v12 = vrot.slane %v1557_v7, 1 }
 0x19a   : > { %v5679_v48 = vsel %vm1477_vm12, %v5613_v60, %v5575_v56  ;;  %v5685_v33 = vsel %vm1477_vm12, %v5615_v41, %v5581_v2  ;;  %v5691_v44 = vsel %vm1477_vm12, %v5619_v1, %v5587_v9  ;;  %v5697_v55 = vsel %vm1477_vm12, %v5621_v23, %v5593_v10 }
 0x19b   : > { %v5702_v56 = vsel %vm1477_vm12, %v1462_v13, %v5598_v14  ;;  %v5707_v2 = vsel %vm1477_vm12, %v1469_v43, %v5603_v42  ;;  %v5712_v9 = vsel %vm1477_vm12, %v1476_v38, %v5608_v58  ;;  %v5714_v60 = vadd.f32 %v1523_v52, %v1522_v50  ;;  %v8374_v50 = vld [vmem:[#allocation57_spill] sm:$0xff] }
 0x19c   : > { %v5716_v41 = vadd.f32 %v1530_v51, %v1529_v5  ;;  %v5718_v10 = vadd.f32 %v1537_v40, %v1536_v62  ;;  %v5722_v23 = vadd.f32 %v1544_v39, %v1543_v24  ;;  %v5724_v3 = vadd.f32 %v1551_v31, %v1550_v46  ;;  %v8376_v62 = vld [vmem:[#allocation59_spill] sm:$0xff]  ;;  %v8377_v46 = vld [vmem:[#allocation60_spill] sm:$0xff] }
 0x19d   : > { %v5726_v42 = vadd.f32 %v1558_v12, %v1557_v7  ;;  %v1583_v58 = vsub.f32 %v8372_v54, %v5044_v0  ;;  %v1584_v11 = vsub.f32 %v8373_v37, %v8347_v32  ;;  %v1585_v34 = vsub.f32 %v8372_v54, %v5086_v47 }
 0x19e   : > { %v1586_v15 = vsub.f32 %v8373_v37, %v5089_v21  ;;  %v1587_v29 = vsub.f32 %v8372_v54, %v5100_v53  ;;  %v1588_v20 = vsub.f32 %v8373_v37, %v5103_v59  ;;  %v1589_v57 = vsub.f32 %v8372_v54, %v5108_v28 }
 0x19f   : > { %v1590_v18 = vsub.f32 %v8373_v37, %v5111_v17  ;;  %v1591_v16 = vsub.f32 %v8372_v54, %v5116_v4  ;;  %v1592_v8 = vsub.f32 %v8373_v37, %v5119_v22  ;;  %v1593_v19 = vsub.f32 %v8372_v54, %v5126_v6 }
 0x1a0   : > { %v1594_v5 = vsub.f32 %v8373_v37, %v8374_v50  ;;  %v1595_v45 = vsub.f32 %v8372_v54, %v8375_v35  ;;  %v1596_v24 = vsub.f32 %v8373_v37, %v8376_v62  ;;  %v1597_v7 = vsub.f32 %v8372_v54, %v8377_v46 }
 0x1a1   : > { %v1598_v63 = vsub.f32 %v8373_v37, %v8350_v30  ;;  %v1599_v13 = vmul.f32 %v1583_v58, %v1583_v58  ;;  %v1600_v25 = vmul.f32 %v1584_v11, %v1584_v11  ;;  %v1601_v43 = vmul.f32 %v1585_v34, %v1585_v34 }
 0x1a2   : > { %v1602_v49 = vmul.f32 %v1586_v15, %v1586_v15  ;;  %v1603_v38 = vmul.f32 %v1587_v29, %v1587_v29  ;;  %v1604_v52 = vmul.f32 %v1588_v20, %v1588_v20  ;;  %v1605_v51 = vmul.f32 %v1589_v57, %v1589_v57 }
 0x1a3   : > { %v1606_v40 = vmul.f32 %v1590_v18, %v1590_v18  ;;  %v1607_v39 = vmul.f32 %v1591_v16, %v1591_v16  ;;  %v1608_v31 = vmul.f32 %v1592_v8, %v1592_v8  ;;  %v1609_v12 = vmul.f32 %v1593_v19, %v1593_v19 }
 0x1a4   : > { %v1610_v14 = vmul.f32 %v1594_v5, %v1594_v5  ;;  %v1611_v1 = vmul.f32 %v1595_v45, %v1595_v45  ;;  %v1612_v62 = vmul.f32 %v1596_v24, %v1596_v24  ;;  %v1613_v35 = vmul.f32 %v1597_v7, %v1597_v7 }
 0x1a5   : > { %v1614_v50 = vmul.f32 %v1598_v63, %v1598_v63  ;;  %v1615_v54 = vadd.f32 %v1600_v25, %v1599_v13  ;;  %v1622_v46 = vadd.f32 %v1602_v49, %v1601_v43  ;;  %v1629_v6 = vadd.f32 %v1604_v52, %v1603_v38 }
 0x1a6   : > { %v1636_v37 = vadd.f32 %v1606_v40, %v1605_v51  ;;  %v1643_v58 = vadd.f32 %v1608_v31, %v1607_v39  ;;  %v1650_v34 = vadd.f32 %v1610_v14, %v1609_v12  ;;  %v1657_v15 = vadd.f32 %v1612_v62, %v1611_v1 }
 0x1a7   : > { %v1616_v11 = vrot.slane %v1615_v54, 4  ;;  %v1664_v29 = vadd.f32 %v1614_v50, %v1613_v35  ;;  %v1623_v20 = vrot.slane %v1622_v46, 4  ;;  %v1630_v57 = vrot.slane %v1629_v6, 4 }
 0x1a8   : > { %v1637_v18 = vrot.slane %v1636_v37, 4  ;;  %v1644_v16 = vrot.slane %v1643_v58, 4  ;;  %v1651_v19 = vrot.slane %v1650_v34, 4  ;;  %v1658_v5 = vrot.slane %v1657_v15, 4 }
 0x1a9   : > { %v1617_v8 = vadd.f32 %v1616_v11, %v1615_v54  ;;  %v1665_v45 = vrot.slane %v1664_v29, 4  ;;  %v1624_v24 = vadd.f32 %v1623_v20, %v1622_v46  ;;  %v1631_v7 = vadd.f32 %v1630_v57, %v1629_v6 }
 0x1aa   : > { %v1638_v63 = vadd.f32 %v1637_v18, %v1636_v37  ;;  %v1645_v13 = vadd.f32 %v1644_v16, %v1643_v58  ;;  %v1652_v43 = vadd.f32 %v1651_v19, %v1650_v34  ;;  %v1659_v49 = vadd.f32 %v1658_v5, %v1657_v15 }
 0x1ab   : > { %v1618_v25 = vrot.slane %v1617_v8, 2  ;;  %v1666_v38 = vadd.f32 %v1665_v45, %v1664_v29  ;;  %v1625_v52 = vrot.slane %v1624_v24, 2  ;;  %v1632_v14 = vrot.slane %v1631_v7, 2  ;;  %v8381_v45 = vld [vmem:[#allocation64_spill] sm:$0xff] }
 0x1ac   : > { %v1639_v1 = vrot.slane %v1638_v63, 2  ;;  %v1646_v50 = vrot.slane %v1645_v13, 2  ;;  %v1653_v62 = vrot.slane %v1652_v43, 2  ;;  %v1660_v51 = vrot.slane %v1659_v49, 2 }
 0x1ad   : > { %v1619_v35 = vadd.f32 %v1618_v25, %v1617_v8  ;;  %v1667_v40 = vrot.slane %v1666_v38, 2  ;;  %v1626_v39 = vadd.f32 %v1625_v52, %v1624_v24  ;;  %v1633_v31 = vadd.f32 %v1632_v14, %v1631_v7  ;;  %v8384_v52 = vld [vmem:[#allocation58_spill] sm:$0xff]  ;;  %v8385_v14 = vld [vmem:[#allocation59_spill] sm:$0xff] }
 0x1ae   : > { %v1640_v12 = vadd.f32 %v1639_v1, %v1638_v63  ;;  %v1647_v54 = vadd.f32 %v1646_v50, %v1645_v13  ;;  %v8378_v6 = vrot.slane %v5665_v36, 1  ;;  %v8379_v37 = vrot.slane %v5667_v26, 1  ;;  %v8386_v1 = vld [vmem:[#allocation60_spill] sm:$0xff] }
 0x1af   : > { %vm1574_vm13 = vcmp.eq.s32.totalorder %v5188_v27, 5  ;;  %v1654_v11 = vadd.f32 %v1653_v62, %v1652_v43  ;;  %v1620_v34 = vrot.slane %v1619_v35, 1  ;;  %v1627_v15 = vrot.slane %v1626_v39, 1 }
 0x1b0   : > { %v1566_v46 = vadd.f32 %v8378_v6, %v5665_v36  ;;  %v1573_v58 = vadd.f32 %v8379_v37, %v5667_v26  ;;  %v5767_v29 = vadd.f32 %v1660_v51, %v1659_v49  ;;  %v5769_v20 = vadd.f32 %v1667_v40, %v1666_v38  ;;  %v8382_v49 = vld [vmem:[#allocation56_spill] sm:$0xff]  ;;  %v8383_v38 = vld [vmem:[#allocation57_spill] sm:$0xff] }
 0x1b1   : > { %v1634_v57 = vrot.slane %v1633_v31, 1  ;;  %v1641_v18 = vrot.slane %v1640_v12, 1  ;;  %v1648_v16 = vrot.slane %v1647_v54, 1  ;;  %v1655_v8 = vrot.slane %v1654_v11, 1 }
 0x1b2   : > { %v5775_v36 = vsel %vm1574_vm13, %v5714_v60, %v5673_v61  ;;  %v5781_v26 = vsel %vm1574_vm13, %v5716_v41, %v5679_v48  ;;  %v5787_v19 = vsel %vm1574_vm13, %v5718_v10, %v5685_v33  ;;  %v5793_v5 = vsel %vm1574_vm13, %v5722_v23, %v5691_v44 }
 0x1b3   : > { %v5799_v61 = vsel %vm1574_vm13, %v5724_v3, %v5697_v55  ;;  %v5805_v48 = vsel %vm1574_vm13, %v5726_v42, %v5702_v56  ;;  %v5810_v33 = vsel %vm1574_vm13, %v1566_v46, %v5707_v2  ;;  %v5815_v44 = vsel %vm1574_vm13, %v1573_v58, %v5712_v9  ;;  %v8380_v42 = vld [vmem:[#allocation63_spill] sm:$0xff] }
 0x1b4   : > { %v5817_v60 = vadd.f32 %v1620_v34, %v1619_v35  ;;  %v5819_v55 = vadd.f32 %v1627_v15, %v1626_v39  ;;  %v1662_v41 = vrot.slane %v5767_v29, 1  ;;  %v1669_v10 = vrot.slane %v5769_v20, 1 }
 0x1b5   : > { %v5823_v56 = vadd.f32 %v1634_v57, %v1633_v31  ;;  %v5825_v23 = vadd.f32 %v1641_v18, %v1640_v12  ;;  %v5827_v3 = vadd.f32 %v1648_v16, %v1647_v54  ;;  %v5829_v2 = vadd.f32 %v1655_v8, %v1654_v11 }
 0x1b6   : > { %v1680_v9 = vsub.f32 %v8380_v42, %v5044_v0  ;;  %v1681_v24 = vsub.f32 %v8381_v45, %v8347_v32  ;;  %v1682_v7 = vsub.f32 %v8380_v42, %v5086_v47  ;;  %v1683_v63 = vsub.f32 %v8381_v45, %v5089_v21 }
 0x1b7   : > { %v1684_v13 = vsub.f32 %v8380_v42, %v5100_v53  ;;  %v1685_v25 = vsub.f32 %v8381_v45, %v5103_v59  ;;  %v1686_v43 = vsub.f32 %v8380_v42, %v5108_v28  ;;  %v1687_v0 = vsub.f32 %v8381_v45, %v5111_v17 }
 0x1b8   : > { %v1688_v32 = vsub.f32 %v8380_v42, %v5116_v4  ;;  %v1689_v47 = vsub.f32 %v8381_v45, %v5119_v22  ;;  %v1690_v21 = vsub.f32 %v8380_v42, %v8382_v49  ;;  %v1691_v53 = vsub.f32 %v8381_v45, %v8383_v38 }
 0x1b9   : > { %v1692_v59 = vsub.f32 %v8380_v42, %v8384_v52  ;;  %v1693_v28 = vsub.f32 %v8381_v45, %v8385_v14  ;;  %v1694_v17 = vsub.f32 %v8380_v42, %v8386_v1  ;;  %v1695_v4 = vsub.f32 %v8381_v45, %v8350_v30  ;;  %v5871_v52 = vld [vmem:[%s4269_s6 + $0xc8] sm:$0xff]  ;;  %v5877_v14 = vld [vmem:[%s4269_s6 + $0xd8] sm:$0xff] }
 0x1ba   : > { %v1696_v50 = vmul.f32 %v1680_v9, %v1680_v9  ;;  %v1697_v22 = vmul.f32 %v1681_v24, %v1681_v24  ;;  %v1698_v35 = vmul.f32 %v1682_v7, %v1682_v7  ;;  %v1699_v62 = vmul.f32 %v1683_v63, %v1683_v63 }
 0x1bb   : > { %v1700_v51 = vmul.f32 %v1684_v13, %v1684_v13  ;;  %v1701_v40 = vmul.f32 %v1685_v25, %v1685_v25  ;;  %v1702_v39 = vmul.f32 %v1686_v43, %v1686_v43  ;;  %v1703_v31 = vmul.f32 %v1687_v0, %v1687_v0 }
 0x1bc   : > { %v1704_v12 = vmul.f32 %v1688_v32, %v1688_v32  ;;  %v1705_v54 = vmul.f32 %v1689_v47, %v1689_v47  ;;  %v1706_v6 = vmul.f32 %v1690_v21, %v1690_v21  ;;  %v1707_v46 = vmul.f32 %v1691_v53, %v1691_v53  ;;  %v5865_v32 = vld [vmem:[%s4269_s6 + $0xc0] sm:$0xff] }
 0x1bd   : > { %v1708_v37 = vmul.f32 %v1692_v59, %v1692_v59  ;;  %v1709_v58 = vmul.f32 %v1693_v28, %v1693_v28  ;;  %v1710_v11 = vmul.f32 %v1694_v17, %v1694_v17  ;;  %v1711_v34 = vmul.f32 %v1695_v4, %v1695_v4  ;;  %v5868_v47 = vld [vmem:[%s4272_s1 + $0xc0] sm:$0xff]  ;;  %v5874_v59 = vld [vmem:[%s4269_s6 + $0xd0] sm:$0xff] }
 0x1be   : > { %vm1671_vm14 = vcmp.eq.s32.totalorder %v5188_v27, 6  ;;  %v1712_v15 = vadd.f32 %v1697_v22, %v1696_v50  ;;  %v1719_v30 = vadd.f32 %v1699_v62, %v1698_v35  ;;  %v1726_v57 = vadd.f32 %v1701_v40, %v1700_v51  ;;  %v5882_v50 = vld [vmem:[%s4269_s6 + $0xe0] sm:$0xff]  ;;  %v5885_v22 = vld [vmem:[%s4272_s1 + $0xc8] sm:$0xff] }
 0x1bf   : > { %v1733_v18 = vadd.f32 %v1703_v31, %v1702_v39  ;;  %v1740_v16 = vadd.f32 %v1705_v54, %v1704_v12  ;;  %v1747_v8 = vadd.f32 %v1707_v46, %v1706_v6  ;;  %v1754_v42 = vadd.f32 %v1709_v58, %v1708_v37  ;;  %v418_v39 = vld [vmem:[%s4272_s1 + $0xd0] sm:$0xff]  ;;  %v419_v31 = vld [vmem:[%s4272_s1 + $0xd8] sm:$0xff]  ;;  %v389_v37 = vld [vmem:[%s4269_s6 + $0xe8] sm:$0xff] }
 0x1c0   : > { %v1761_v9 = vadd.f32 %v1711_v34, %v1710_v11  ;;  %v1713_v45 = vrot.slane %v1712_v15, 4  ;;  %v1720_v24 = vrot.slane %v1719_v30, 4  ;;  %v1727_v7 = vrot.slane %v1726_v57, 4  ;;  %v420_v58 = vld [vmem:[%s4272_s1 + $0xe0] sm:$0xff]  ;;  %v421_v11 = vld [vmem:[%s4272_s1 + $0xe8] sm:$0xff] }
 0x1c1   : > { %v1734_v63 = vrot.slane %v1733_v18, 4  ;;  %v1741_v13 = vrot.slane %v1740_v16, 4  ;;  %v1748_v25 = vrot.slane %v1747_v8, 4  ;;  %v1755_v43 = vrot.slane %v1754_v42, 4 }
 0x1c2   : > { %v1762_v0 = vrot.slane %v1761_v9, 4  ;;  %v1714_v49 = vadd.f32 %v1713_v45, %v1712_v15  ;;  %v1721_v21 = vadd.f32 %v1720_v24, %v1719_v30  ;;  %v1728_v38 = vadd.f32 %v1727_v7, %v1726_v57 }
 0x1c3   : > { %v1735_v53 = vadd.f32 %v1734_v63, %v1733_v18  ;;  %vm543_vm15 = vcmp.eq.f32.partialorder %v5865_v32, %v5868_v47  ;;  %v1742_v28 = vadd.f32 %v1741_v13, %v1740_v16  ;;  %v1749_v1 = vadd.f32 %v1748_v25, %v1747_v8  ;;  %v390_v18 = vld [vmem:[%s4269_s6 + $0xf0] sm:$0xff] }
 0x1c4   : > { %v1756_v17 = vadd.f32 %v1755_v43, %v1754_v42  ;;  %v1763_v4 = vadd.f32 %v1762_v0, %v1761_v9  ;;  %v1715_v35 = vrot.slane %v1714_v49, 2  ;;  %v1722_v62 = vrot.slane %v1721_v21, 2  ;;  %v422_v16 = vld [vmem:[%s4272_s1 + $0xf0] sm:$0xff] }
 0x1c5   : > { %v1729_v51 = vrot.slane %v1728_v38, 2  ;;  %v1736_v40 = vrot.slane %v1735_v53, 2  ;;  %vm544_vm0 = vcmp.eq.f32.partialorder %v5871_v52, %v5885_v22  ;;  %v1743_v12 = vrot.slane %v1742_v28, 2 }
 0x1c6   : > { %v1750_v54 = vrot.slane %v1749_v1, 2  ;;  %v1757_v6 = vrot.slane %v1756_v17, 2  ;;  %v1764_v46 = vrot.slane %v1763_v4, 2  ;;  %vm545_vm1 = vcmp.eq.f32.partialorder %v5874_v59, %v418_v39 }
 0x1c7   : > { %vm546_vm2 = vcmp.eq.f32.partialorder %v5877_v14, %v419_v31  ;;  %v1716_v34 = vadd.f32 %v1715_v35, %v1714_v49  ;;  %v1723_v15 = vadd.f32 %v1722_v62, %v1721_v21  ;;  %v1730_v30 = vadd.f32 %v1729_v51, %v1728_v38  ;;  %v8388_v31 = vld [vmem:[#allocation26_spill] sm:$0xff] }
 0x1c8   : > { %v1737_v57 = vadd.f32 %v1736_v40, %v1735_v53  ;;  %vm547_vm3 = vcmp.eq.f32.partialorder %v5882_v50, %v420_v58  ;;  %vm548_vm4 = vcmp.eq.f32.partialorder %v389_v37, %v421_v11  ;;  %v1744_v8 = vadd.f32 %v1743_v12, %v1742_v28  ;;  %v8391_v37 = vld [vmem:[#allocation29_spill] sm:$0xff]  ;;  %v8392_v11 = vld [vmem:[#allocation34_spill] sm:$0xff] }
 0x1c9   : > { %v1751_v42 = vadd.f32 %v1750_v54, %v1749_v1  ;;  %v1758_v9 = vadd.f32 %v1757_v6, %v1756_v17  ;;  %v1765_v45 = vadd.f32 %v1764_v46, %v1763_v4  ;;  %vm549_vm5 = vcmp.eq.f32.partialorder %v390_v18, %v422_v16  ;;  %v8389_v54 = vld [vmem:[#allocation25_spill] sm:$0xff]  ;;  %v8390_v46 = vld [vmem:[#allocation30_spill] sm:$0xff] }
 0x1ca   : > { %v1717_v24 = vrot.slane %v1716_v34, 1  ;;  %v1724_v7 = vrot.slane %v1723_v15, 1  ;;  %v1731_v63 = vrot.slane %v1730_v30, 1  ;;  %v1738_v13 = vrot.slane %v1737_v57, 1  ;;  %v8396_v16 = vld [vmem:[#allocation41_spill] sm:$0xff] }
 0x1cb   : > { %v1672_v25 = vsel %vm1671_vm14, %v5817_v60, %v5775_v36  ;;  %v1673_v43 = vsel %vm1671_vm14, %v5819_v55, %v5781_v26  ;;  %v1745_v0 = vrot.slane %v1744_v8, 1  ;;  %v1752_v49 = vrot.slane %v1751_v42, 1 }
 0x1cc   : > { %v1718_v21 = vadd.f32 %v1717_v24, %v1716_v34  ;;  %v1725_v38 = vadd.f32 %v1724_v7, %v1723_v15  ;;  %v1732_v53 = vadd.f32 %v1731_v63, %v1730_v30  ;;  %v1759_v28 = vrot.slane %v1758_v9, 1  ;;  %v8393_v34 = vld [vmem:[#allocation33_spill] sm:$0xff] }
 0x1cd   : > { %v1663_v1 = vadd.f32 %v1662_v41, %v5767_v29  ;;  %v1674_v36 = vsel %vm1671_vm14, %v5823_v56, %v5787_v19  ;;  %v1739_v60 = vadd.f32 %v1738_v13, %v1737_v57  ;;  %v1766_v17 = vrot.slane %v1765_v45, 1  ;;  %v8394_v30 = vld [vmem:[#allocation37_spill] sm:$0xff]  ;;  %v8395_v57 = vld [vmem:[#allocation36_spill] sm:$0xff] }
 0x1ce   : > { %v1670_v26 = vadd.f32 %v1669_v10, %v5769_v20  ;;  %v1675_v55 = vsel %vm1671_vm14, %v5825_v23, %v5793_v5  ;;  %v1746_v4 = vadd.f32 %v1745_v0, %v1744_v8  ;;  %vm1768_vm6 = vcmp.eq.s32.totalorder %v5188_v27, 7  ;;  %v8397_v8 = vld [vmem:[#allocation40_spill] sm:$0xff] }
 0x1cf   : > { %v1676_v29 = vsel %vm1671_vm14, %v5827_v3, %v5799_v61  ;;  %v1753_v19 = vadd.f32 %v1752_v49, %v1751_v42  ;;  %v5928_v41 = vsel %vm1768_vm6, %v1718_v21, %v1672_v25  ;;  %v5932_v20 = vsel %vm1768_vm6, %v1725_v38, %v1673_v43 }
 0x1d0   : > { %v8387_v10 = vmov 0.0   ;;  %v1677_v61 = vsel %vm1671_vm14, %v5829_v2, %v5805_v48  ;;  %v1760_v56 = vadd.f32 %v1759_v28, %v1758_v9  ;;  %v5946_v23 = vsel %vm1768_vm6, %v1732_v53, %v1674_v36  ;;  %v8398_v9 = vld [vmem:[#allocation45_spill] sm:$0xff] }
 0x1d1   : > { %v5938_v5 = vsel %vm543_vm15, 1.0, %v8387_v10  ;;  %v1678_v3 = vsel %vm1671_vm14, %v1663_v1, %v5810_v33  ;;  %v1767_v35 = vadd.f32 %v1766_v17, %v1765_v45  ;;  %v5953_v62 = vsel %vm1768_vm6, %v1739_v60, %v1675_v55  ;;  %v8399_v45 = vld [vmem:[#allocation44_spill] sm:$0xff] }
 0x1d2   : > { %3576 = vrsqrt.f32 %v5928_v41  ;;  %v5960_v48 = vsel %vm544_vm0, 1.0, %v8387_v10  ;;  %v1679_v2 = vsel %vm1671_vm14, %v1670_v26, %v5815_v44  ;;  %v5967_v33 = vsel %vm1768_vm6, %v1746_v4, %v1676_v29 }
 0x1d3   : > { %3578 = vrsqrt.f32 %v5932_v20  ;;  %v5973_v51 = vsel %vm545_vm1, 1.0, %v8387_v10  ;;  %v5978_v40 = vsel %vm546_vm2, 1.0, %v8387_v10  ;;  %v5982_v12 = vsel %vm1768_vm6, %v1753_v19, %v1677_v61 }
 0x1d4   : > { %3580 = vrsqrt.f32 %v5946_v23  ;;  %v5988_v44 = vsel %vm547_vm3, 1.0, %v8387_v10  ;;  %v5992_v59 = vsel %vm548_vm4, 1.0, %v8387_v10  ;;  %v5996_v14 = vsel %vm1768_vm6, %v1760_v56, %v1678_v3 }
 0x1d5   : > { %3582 = vrsqrt.f32 %v5953_v62  ;;  %v6001_v39 = vsel %vm549_vm5, 1.0, %v8387_v10  ;;  %v583_v6 = vmin.f32 %v8389_v54, %v8388_v31  ;;  %v6007_v50 = vsel %vm1768_vm6, %v1767_v35, %v1679_v2 }
 0x1d6   : > { %3584 = vrsqrt.f32 %v5967_v33  ;;  %v592_v58 = vmin.f32 %v8391_v37, %v8390_v46  ;;  %v601_v15 = vmin.f32 %v8393_v34, %v8392_v11  ;;  %v610_v18 = vmin.f32 %v8395_v57, %v8394_v30 }
 0x1d7   : > { %3586 = vrsqrt.f32 %v5982_v12  ;;  %v619_v42 = vmin.f32 %v8397_v8, %v8396_v16  ;;  %vm1779_vm7 = vcmp.eq.f32.partialorder %v5928_v41, inf  ;;  %vm1781_vm9 = vcmp.eq.f32.partialorder %v5928_v41, 0.0 }
 0x1d8   : > { %3588 = vrsqrt.f32 %v5996_v14  ;;  %v1782_v63 = vand.u32 2147483648, %v5928_v41  ;;  %vm1786_vm10 = vcmp.eq.f32.partialorder %v5932_v20, inf  ;;  %vm1788_vm11 = vcmp.eq.f32.partialorder %v5932_v20, 0.0 }
 0x1d9   : > { %3590 = vrsqrt.f32 %v6007_v50  ;;  %v1789_v13 = vand.u32 2147483648, %v5932_v20  ;;  %vm1793_vm12 = vcmp.eq.f32.partialorder %v5946_v23, inf  ;;  %vm1795_vm13 = vcmp.eq.f32.partialorder %v5946_v23, 0.0 }
 0x1da   : > { %v1796_v25 = vand.u32 2147483648, %v5946_v23  ;;  %vm1800_vm14 = vcmp.eq.f32.partialorder %v5953_v62, inf  ;;  %vm1802_vm15 = vcmp.eq.f32.partialorder %v5953_v62, 0.0  ;;  %v1803_v0 = vand.u32 2147483648, %v5953_v62 }
 0x1db   : > { %vm1807_vm0 = vcmp.eq.f32.partialorder %v5967_v33, inf  ;;  %vm1809_vm1 = vcmp.eq.f32.partialorder %v5967_v33, 0.0  ;;  %v1810_v49 = vand.u32 2147483648, %v5967_v33  ;;  %vm1814_vm2 = vcmp.eq.f32.partialorder %v5982_v12, inf }
 0x1dc   : > { %v3577_v43 = vpop.eup %3576  ;;  %vm1816_vm3 = vcmp.eq.f32.partialorder %v5982_v12, 0.0  ;;  %v1817_v53 = vand.u32 2147483648, %v5982_v12  ;;  %vm1821_vm4 = vcmp.eq.f32.partialorder %v5996_v14, inf  ;;  %vm1823_vm5 = vcmp.eq.f32.partialorder %v5996_v14, 0.0 }
 0x1dd   : > { %v3579_v21 = vpop.eup %3578  ;;  %v1778_v38 = vmul.f32 %v3577_v43, %v5928_v41  ;;  %v1824_v36 = vand.u32 2147483648, %v5996_v14  ;;  %vm1828_vm6 = vcmp.eq.f32.partialorder %v6007_v50, inf  ;;  %vm1830_vm8 = vcmp.eq.f32.partialorder %v6007_v50, 0.0 }
 0x1de   : > { %v3581_v28 = vpop.eup %3580  ;;  %v1785_v1 = vmul.f32 %v3579_v21, %v5932_v20  ;;  %v1831_v61 = vand.u32 2147483648, %v6007_v50  ;;  %v8406_v30 = vmin.f32 %v8399_v45, %v8398_v9 }
 0x1df   : > { %v3583_v60 = vpop.eup %3582  ;;  %v1780_v17 = vsel %vm1779_vm7, %v5928_v41, %v1778_v38  ;;  %v1792_v26 = vmul.f32 %v3581_v28, %v5946_v23 }
 0x1e0   : > { %v3585_v55 = vpop.eup %3584  ;;  %v6056_v4 = vsel %vm1781_vm9, %v1782_v63, %v1780_v17  ;;  %v1787_v29 = vsel %vm1786_vm10, %v5932_v20, %v1785_v1  ;;  %v1799_v19 = vmul.f32 %v3583_v60, %v5953_v62 }
 0x1e1   : > { %v3587_v56 = vpop.eup %3586  ;;  %v6065_v3 = vsel %vm1788_vm11, %v1789_v13, %v1787_v29  ;;  %v1794_v35 = vsel %vm1793_vm12, %v5946_v23, %v1792_v26  ;;  %v1806_v41 = vmul.f32 %v3585_v55, %v5967_v33  ;;  %v1833_v2 = vrot.slane %v6056_v4, 4 }
 0x1e2   : > { %v3589_v63 = vpop.eup %3588  ;;  %v6074_v43 = vsel %vm1795_vm13, %v1796_v25, %v1794_v35  ;;  %v1801_v21 = vsel %vm1800_vm14, %v5953_v62, %v1799_v19  ;;  %v1813_v20 = vmul.f32 %v3587_v56, %v5982_v12  ;;  %v1839_v13 = vrot.slane %v6065_v3, 4 }
 0x1e3   : > { %v3591_v38 = vpop.eup %3590  ;;  %v6083_v28 = vsel %vm1802_vm15, %v1803_v0, %v1801_v21  ;;  %v1808_v1 = vsel %vm1807_vm0, %v5967_v33, %v1806_v41  ;;  %v1820_v23 = vmul.f32 %v3589_v63, %v5996_v14  ;;  %v1834_v25 = vmax.f32 %v6056_v4, %v1833_v2  ;;  %v391_v63 = vld [vmem:[%s4269_s6 + $0xf8] sm:$0xff] }
 0x1e4   : > { %v6092_v60 = vsel %vm1809_vm1, %v1810_v49, %v1808_v1  ;;  %v1815_v17 = vsel %vm1814_vm2, %v5982_v12, %v1813_v20  ;;  %v1827_v62 = vmul.f32 %v3591_v38, %v6007_v50  ;;  %v1840_v0 = vmax.f32 %v6065_v3, %v1839_v13  ;;  %v8400_v38 = vld [vmem:[#allocation27_spill] sm:$0xff] }
 0x1e5   : > { %v6101_v26 = vsel %vm1816_vm3, %v1817_v53, %v1815_v17  ;;  %v1822_v33 = vsel %vm1821_vm4, %v5996_v14, %v1820_v23  ;;  %v1835_v49 = vrot.slane %v1834_v25, 2  ;;  %v1845_v55 = vrot.slane %v6074_v43, 4  ;;  %v423_v14 = vld [vmem:[%s4272_s1 + $0xf8] sm:$0xff] }
 0x1e6   : > { %v6109_v29 = vsel %vm1823_vm5, %v1824_v36, %v1822_v33  ;;  %v1829_v19 = vsel %vm1828_vm6, %v6007_v50, %v1827_v62  ;;  %v1841_v56 = vrot.slane %v1840_v0, 2  ;;  %v1851_v12 = vrot.slane %v6083_v28, 4 }
 0x1e7   : > { %v6117_v53 = vsel %vm1830_vm8, %v1831_v61, %v1829_v19  ;;  %v1836_v35 = vmax.f32 %v1834_v25, %v1835_v49  ;;  %v1846_v41 = vmax.f32 %v6074_v43, %v1845_v55  ;;  %v1857_v2 = vrot.slane %v6092_v60, 4  ;;  %v8401_v25 = vld [vmem:[#allocation31_spill] sm:$0xff] }
 0x1e8   : > { %v1842_v36 = vmax.f32 %v1840_v0, %v1841_v56  ;;  %v1852_v21 = vmax.f32 %v6083_v28, %v1851_v12  ;;  %v1863_v20 = vrot.slane %v6101_v26, 4  ;;  %v1869_v13 = vrot.slane %v6109_v29, 4 }
 0x1e9   : > { %vm550_vm7 = vcmp.eq.f32.partialorder %v391_v63, %v423_v14  ;;  %v584_v50 = vmin.f32 %v583_v6, %v8400_v38  ;;  %v1847_v61 = vrot.slane %v1846_v41, 2  ;;  %v1858_v1 = vmax.f32 %v6092_v60, %v1857_v2  ;;  %v8402_v2 = vld [vmem:[#allocation16_spill] sm:$0xff] }
 0x1ea   : > { %v1875_v23 = vrot.slane %v6117_v53, 4  ;;  %v593_v17 = vmin.f32 %v592_v58, %v8401_v25  ;;  %v1853_v62 = vrot.slane %v1852_v21, 2  ;;  %v1864_v0 = vmax.f32 %v6101_v26, %v1863_v20  ;;  %v8403_v25 = vld [vmem:[#allocation38_spill] sm:$0xff] }
 0x1eb   : > { %v1870_v33 = vmax.f32 %v6109_v29, %v1869_v13  ;;  %v1837_v49 = vrot.slane %v1836_v35, 1  ;;  %v1848_v55 = vmax.f32 %v1846_v41, %v1847_v61  ;;  %v1859_v19 = vrot.slane %v1858_v1, 2 }
 0x1ec   : > { %v1876_v31 = vmax.f32 %v6117_v53, %v1875_v23  ;;  %v1843_v54 = vrot.slane %v1842_v36, 1  ;;  %v1854_v6 = vmax.f32 %v1852_v21, %v1853_v62  ;;  %v1865_v56 = vrot.slane %v1864_v0, 2 }
 0x1ed   : > { %v1871_v12 = vrot.slane %v1870_v33, 2  ;;  %v602_v46 = vmin.f32 %v601_v15, %v8402_v2  ;;  %v1849_v37 = vrot.slane %v1848_v55, 1  ;;  %v1860_v58 = vmax.f32 %v1858_v1, %v1859_v19  ;;  %v8404_v1 = vld [vmem:[#allocation42_spill] sm:$0xff]  ;;  %v8411_v2 = vld [vmem:[#allocation39_spill] sm:$0xff] }
 0x1ee   : > { %v1877_v38 = vrot.slane %v1876_v31, 2  ;;  %v646_v20 = vmin.f32 %v5988_v44, %v5992_v59  ;;  %v1855_v13 = vrot.slane %v1854_v6, 1  ;;  %v1866_v41 = vmax.f32 %v1864_v0, %v1865_v56  ;;  %v8405_v19 = vld [vmem:[#allocation46_spill] sm:$0xff]  ;;  %v8410_v56 = vld [vmem:[#allocation35_spill] sm:$0xff] }
 0x1ef   : > { %v1872_v61 = vmax.f32 %v1870_v33, %v1871_v12  ;;  %v611_v21 = vmin.f32 %v610_v18, %v8403_v25  ;;  %v1838_v23 = vmax.f32 %v1836_v35, %v1837_v49  ;;  %v1861_v62 = vrot.slane %v1860_v58, 1 }
 0x1f0   : > { %v1878_v7 = vmax.f32 %v1876_v31, %v1877_v38  ;;  %v1844_v24 = vmax.f32 %v1842_v36, %v1843_v54  ;;  %v1850_v11 = vmax.f32 %v1848_v55, %v1849_v37  ;;  %v1867_v34 = vrot.slane %v1866_v41, 1  ;;  %v8408_v55 = vld [vmem:[#allocation28_spill] sm:$0xff]  ;;  %v8413_v38 = vld [vmem:[#allocation47_spill] sm:$0xff] }
 0x1f1   : > { %v1873_v15 = vrot.slane %v1872_v61, 1  ;;  %v620_v44 = vmin.f32 %v619_v42, %v8404_v1  ;;  %v1856_v59 = vmax.f32 %v1854_v6, %v1855_v13  ;;  %v1862_v0 = vmax.f32 %v1860_v58, %v1861_v62  ;;  %v8409_v54 = vld [vmem:[#allocation32_spill] sm:$0xff]  ;;  %v8412_v58 = vld [vmem:[#allocation43_spill] sm:$0xff]  ;;  %v8414_v13 = vld [vmem:[#allocation18_spill] sm:$0xff] }
 0x1f2   : > { %v1879_v33 = vrot.slane %v1878_v7, 1  ;;  %v629_v57 = vmin.f32 %v8406_v30, %v8405_v19  ;;  %v8407_v18 = vmin.f32 %v5938_v5, %v5960_v48  ;;  %v1868_v36 = vmax.f32 %v1866_v41, %v1867_v34 }
 0x1f3   : > { %v1874_v49 = vmax.f32 %v1872_v61, %v1873_v15  ;;  %v585_v31 = vmin.f32 %v584_v50, %v8408_v55  ;;  %v594_v16 = vmin.f32 %v593_v17, %v8409_v54  ;;  %v1881_v42 = vmax.f32 %v1838_v23, %v1862_v0  ;;  %v8428_v0 = vld [vmem:[#allocation21_spill] sm:$0xff] }
 0x1f4   : > { %v638_v35 = vmin.f32 %v8407_v18, %v5973_v51  ;;  %v1880_v8 = vmax.f32 %v1878_v7, %v1879_v33  ;;  %v582_v6 = vsel %vm550_vm7, 1.0, %v8387_v10  ;;  %v603_v12 = vmin.f32 %v602_v46, %v8410_v56  ;;  %v8417_v46 = vld [vmem:[#allocation17_spill] sm:$0xff] }
 0x1f5   : > { %v1882_v9 = vmax.f32 %v1844_v24, %v1868_v36  ;;  %v1883_v45 = vmax.f32 %v1850_v11, %v1874_v49  ;;  %v612_v37 = vmin.f32 %v611_v21, %v8411_v2  ;;  %v621_v5 = vmin.f32 %v620_v44, %v8412_v58  ;;  %v3684_v36 = vld [vmem:[%s4269_s6 + $0xa8] sm:$0xff] }
 0x1f6   : > { %v647_v48 = vmin.f32 %v646_v20, %v6001_v39  ;;  %v1884_v51 = vmax.f32 %v1856_v59, %v1880_v8  ;;  %v630_v50 = vmin.f32 %v629_v57, %v8413_v38  ;;  %v639_v17 = vmin.f32 %v638_v35, %v5978_v40  ;;  %v8420_v39 = vld [vmem:[#allocation19_spill] sm:$0xff]  ;;  %v8423_v40 = vld [vmem:[#allocation20_spill] sm:$0xff] }
 0x1f7   : > { %v1885_v7 = vmax.f32 %v1881_v42, %v1882_v9  ;;  %v8415_v41 = vrot.slane %v8414_v13, 1  ;;  %v586_v63 = vrot.slane %v585_v31, 4  ;;  %v595_v24 = vrot.slane %v594_v16, 4  ;;  %v3644_v9 = vld [vmem:[%s4269_s6] sm:$0xff]  ;;  %v3685_v42 = vld [vmem:[%s4272_s1 + $0xa8] sm:$0xff] }
 0x1f8   : > { %v1886_v14 = vmax.f32 %v1883_v45, %v1884_v51  ;;  %v8418_v61 = vrot.slane %v8417_v46, 1  ;;  %v8421_v20 = vrot.slane %v8420_v39, 1  ;;  %v8424_v23 = vrot.slane %v8423_v40, 1  ;;  %v3645_v45 = vld [vmem:[%s4269_s6 + $0x20] sm:$0xff] }
 0x1f9   : > { %v6174_v10 = vmin.f32 %v8414_v13, %v8415_v41  ;;  %v604_v11 = vrot.slane %v603_v12, 4  ;;  %v613_v34 = vrot.slane %v612_v37, 4  ;;  %v6191_v15 = vmin.f32 %v647_v48, %v582_v6  ;;  %v3648_v13 = vld [vmem:[%s4272_s1 + $0x8] sm:$0xff] }
 0x1fa   : > { %v6179_v25 = vmin.f32 %v8417_v46, %v8418_v61  ;;  %v6184_v21 = vmin.f32 %v8420_v39, %v8421_v20  ;;  %v6189_v62 = vmin.f32 %v8423_v40, %v8424_v23  ;;  %v1887_v1 = vmax.f32 %v1885_v7, %v1886_v14  ;;  %v3647_v7 = vld [vmem:[%s4269_s6 + $0x8] sm:$0xff]  ;;  %v3650_v14 = vld [vmem:[%s4272_s1 + $0x10] sm:$0xff]  ;;  %v3652_v61 = vld [vmem:[%s4269_s6 + $0x18] sm:$0xff] }
 0x1fb   : > { %8416 = vst [vmem:[#allocation49_spill] sm:$0xff] %v6174_v10  ;;  %8426 = vst [vmem:[#allocation51_spill] sm:$0xff] %v6191_v15  ;;  %v3992_v44 = vmov 1e+30   ;;  %vm8427_vm8 = vcmp.eq.s32.totalorder %v5188_v27, 0  ;;  %v8429_v33 = vrot.slane %v8428_v0, 1  ;;  %v6202_v49 = vmin.f32 %v585_v31, %v586_v63 }
 0x1fc   : > { %8419 = vst [vmem:[#allocation48_spill] sm:$0xff] %v6179_v25  ;;  %8422 = vst [vmem:[#allocation50_spill] sm:$0xff] %v6184_v21  ;;  %v1899_v59 = vsel %vm8427_vm8, 0.0, %v3992_v44  ;;  %v622_v30 = vrot.slane %v621_v5, 4  ;;  %v631_v57 = vrot.slane %v630_v50, 4  ;;  %v640_v18 = vrot.slane %v639_v17, 4 }
 0x1fd   : > { %8425 = vst [vmem:[#allocation61_spill] sm:$0xff] %v6189_v62  ;;  %v6198_v19 = vmin.f32 %v8428_v0, %v8429_v33  ;;  %8432 = vst [vmem:[#allocation53_spill] sm:$0xff] %v6202_v49  ;;  %v6204_v55 = vmin.f32 %v594_v16, %v595_v24  ;;  %v1888_v54 = vadd.f32 1e-08, %v1887_v1  ;;  %v6208_v6 = vmin.f32 %v603_v12, %v604_v11  ;;  %v3646_v16 = vld [vmem:[%s4272_s1] sm:$0xff]  ;;  %v3649_v24 = vld [vmem:[%s4269_s6 + $0x10] sm:$0xff] }
 0x1fe   : > { %v6210_v56 = vmin.f32 %v1899_v59, 1e+30  ;;  %v2568_v2 = vadd.f32 %v3645_v45, %v3644_v9  ;;  %v6214_v58 = vmin.f32 %v612_v37, %v613_v34  ;;  %v2417_v48 = vsub.f32 %v3644_v9, %v3646_v16  ;;  %v3653_v39 = vld [vmem:[%s4272_s1 + $0x18] sm:$0xff]  ;;  %v3654_v40 = vld [vmem:[%s4269_s6 + $0x28] sm:$0xff]  ;;  %v3656_v34 = vld [vmem:[%s4269_s6 + $0x40] sm:$0xff] }
 0x1ff   : > { %8430 = vst [vmem:[#allocation52_spill] sm:$0xff] %v6198_v19  ;;  %8433 = vst [vmem:[#allocation54_spill] sm:$0xff] %v6204_v55  ;;  %3592 = vrcp.f32 %v1888_v54  ;;  %v6218_v51 = vmin.f32 %v621_v5, %v622_v30  ;;  %v6220_v12 = vmin.f32 %v630_v50, %v631_v57  ;;  %v6222_v38 = vmin.f32 %v639_v17, %v640_v18  ;;  %v3651_v50 = vld [vmem:[%s4272_s1 + $0x20] sm:$0xff]  ;;  %v3655_v23 = vld [vmem:[%s4272_s1 + $0x28] sm:$0xff] }
 0x200   : > { %8435 = vst [vmem:[#allocation55_spill] sm:$0xff] %v6208_v6  ;;  %8436 = vst [vmem:[#allocation62_spill] sm:$0xff] %v6214_v58  ;;  %v2418_v37 = vsub.f32 %v3647_v7, %v3648_v13  ;;  %v2419_v5 = vsub.f32 %v3649_v24, %v3650_v14  ;;  %v2421_v46 = vsub.f32 %v3645_v45, %v3651_v50  ;;  %v3657_v44 = vld [vmem:[%s4269_s6 + $0x30] sm:$0xff]  ;;  %v3659_v33 = vld [vmem:[%s4272_s1 + $0x40] sm:$0xff] }
 0x201   : > { %8437 = vst [vmem:[#allocation63_spill] sm:$0xff] %v6218_v51  ;;  %8438 = vst [vmem:[#allocation64_spill] sm:$0xff] %v6220_v12  ;;  %v2420_v20 = vsub.f32 %v3652_v61, %v3653_v39  ;;  %v2422_v11 = vsub.f32 %v3654_v40, %v3655_v23  ;;  %v6237_v1 = vadd.f32 %v3656_v34, %v2568_v2  ;;  %v3658_v59 = vld [vmem:[%s4272_s1 + $0x30] sm:$0xff]  ;;  %v3660_v57 = vld [vmem:[%s4269_s6 + $0x48] sm:$0xff] }
 0x202   : > { %8439 = vst [vmem:[#allocation56_spill] sm:$0xff] %v6222_v38  ;;  %v2423_v0 = vsub.f32 %v3657_v44, %v3658_v59  ;;  %v2425_v30 = vsub.f32 %v3656_v34, %v3659_v33  ;;  %v3661_v18 = vld [vmem:[%s4272_s1 + $0x48] sm:$0xff]  ;;  %v6244_v9 = vmul.f32 %v2417_v48, %v2417_v48  ;;  %v3662_v45 = vld [vmem:[%s4269_s6 + $0x38] sm:$0xff]  ;;  %v3664_v7 = vld [vmem:[%s4269_s6 + $0x50] sm:$0xff]  ;;  %v6256_v39 = vmul.f32 %v2418_v37, %v2418_v37 }
 0x203   : > { %8440 = vst [vmem:[#allocation57_spill] sm:$0xff] %v6237_v1  ;;  %v2426_v54 = vsub.f32 %v3660_v57, %v3661_v18  ;;  %v3663_v16 = vld [vmem:[%s4272_s1 + $0x38] sm:$0xff]  ;;  %v3665_v13 = vld [vmem:[%s4272_s1 + $0x50] sm:$0xff]  ;;  %v3666_v14 = vld [vmem:[%s4269_s6 + $0x60] sm:$0xff]  ;;  %v6266_v33 = vmul.f32 %v2419_v5, %v2419_v5  ;;  %v6268_v57 = vmul.f32 %v2421_v46, %v2421_v46  ;;  %v6282_v5 = vmul.f32 %v2420_v20, %v2420_v20 }
 0x204   : > { %v2424_v2 = vsub.f32 %v3662_v45, %v3663_v16  ;;  %v6250_v24 = vsub.f32 %v3664_v7, %v3665_v13  ;;  %v3667_v50 = vld [vmem:[%s4272_s1 + $0x60] sm:$0xff]  ;;  %v3668_v48 = vld [vmem:[%s4269_s6 + $0x58] sm:$0xff]  ;;  %v3670_v34 = vld [vmem:[%s4269_s6 + $0x68] sm:$0xff]  ;;  %v6302_v63 = vsub.f32 %v3684_v36, %v3685_v42 }
 0x205   : > { %v6254_v61 = vsub.f32 %v3666_v14, %v3667_v50  ;;  %v3669_v40 = vld [vmem:[%s4272_s1 + $0x58] sm:$0xff]  ;;  %v3671_v44 = vld [vmem:[%s4272_s1 + $0x68] sm:$0xff]  ;;  %v3672_v18 = vld [vmem:[%s4269_s6 + $0x70] sm:$0xff] }
 0x206   : > { %v6260_v23 = vsub.f32 %v3668_v48, %v3669_v40  ;;  %v6264_v59 = vsub.f32 %v3670_v34, %v3671_v44  ;;  %v3673_v37 = vld [vmem:[%s4272_s1 + $0x70] sm:$0xff]  ;;  %v3674_v16 = vld [vmem:[%s4269_s6 + $0x80] sm:$0xff]  ;;  %v3676_v14 = vld [vmem:[%s4269_s6 + $0x88] sm:$0xff] }
 0x207   : > { %v6272_v45 = vsub.f32 %v3672_v18, %v3673_v37  ;;  %v3675_v7 = vld [vmem:[%s4272_s1 + $0x80] sm:$0xff]  ;;  %v3677_v50 = vld [vmem:[%s4272_s1 + $0x88] sm:$0xff]  ;;  %v3678_v46 = vld [vmem:[%s4269_s6 + $0x78] sm:$0xff] }
 0x208   : > { %v6276_v13 = vsub.f32 %v3674_v16, %v3675_v7  ;;  %v6280_v48 = vsub.f32 %v3676_v14, %v3677_v50  ;;  %v3679_v40 = vld [vmem:[%s4272_s1 + $0x78] sm:$0xff]  ;;  %v3680_v44 = vld [vmem:[%s4269_s6 + $0x90] sm:$0xff]  ;;  %v6292_v16 = vmul.f32 %v2422_v11, %v2422_v11  ;;  %v6294_v7 = vmul.f32 %v2423_v0, %v2423_v0  ;;  %v3682_v14 = vld [vmem:[%s4269_s6 + $0xa0] sm:$0xff] }
 0x209   : > { %v6286_v34 = vsub.f32 %v3678_v46, %v3679_v40  ;;  %v3681_v18 = vld [vmem:[%s4272_s1 + $0x90] sm:$0xff]  ;;  %v3683_v50 = vld [vmem:[%s4272_s1 + $0xa0] sm:$0xff]  ;;  %v6304_v46 = vmul.f32 %v2424_v2, %v2424_v2  ;;  %v6306_v40 = vmul.f32 %v2425_v30, %v2425_v30  ;;  %v3593_v41 = vpop.eup %3592  ;;  %vm8448_vm9 = vmmov %vm8427_vm8 }
 0x20a   : > { %v6290_v37 = vsub.f32 %v3680_v44, %v3681_v18  ;;  %v6298_v20 = vsub.f32 %v3682_v14, %v3683_v50  ;;  %v3686_v44 = vld [vmem:[%s4269_s6 + $0x98] sm:$0xff]  ;;  %v3688_v11 = vld [vmem:[%s4269_s6 + $0xb0] sm:$0xff]  ;;  %v6318_v14 = vsub.f32 %v5865_v32, %v5868_v47  ;;  %v6320_v50 = vmul.f32 %v2426_v54, %v2426_v54  ;;  %vm8449_vm10 = vmmov %vm8427_vm8 }
 0x20b   : > { %8441 = vst [vmem:[#allocation58_spill] sm:$0xff] %v6304_v46  ;;  %v3687_v18 = vld [vmem:[%s4272_s1 + $0x98] sm:$0xff]  ;;  %v3689_v0 = vld [vmem:[%s4272_s1 + $0xb0] sm:$0xff]  ;;  %v6323_v36 = vmul.f32 %v3593_v41, %v6056_v4  ;;  %v6326_v42 = vmul.f32 %v3593_v41, %v6065_v3  ;;  %v6329_v30 = vmul.f32 %v3593_v41, %v6074_v43  ;;  %v6332_v2 = vmul.f32 %v3593_v41, %v6083_v28  ;;  %vm8451_vm11 = vmmov %vm8427_vm8 }
 0x20c   : > { %v6310_v31 = vsub.f32 %v3686_v44, %v3687_v18  ;;  %v6314_v17 = vsub.f32 %v3688_v11, %v3689_v0  ;;  %8443 = vst [vmem:[#allocation60_spill] sm:$0xff] %v6318_v14  ;;  %v6335_v44 = vmul.f32 %v3593_v41, %v6092_v60  ;;  %v6338_v32 = vmul.f32 %v3593_v41, %v6101_v26  ;;  %vm8452_vm12 = vmmov %vm8427_vm8 }
 0x20d   : > { %v6341_v47 = vmul.f32 %v3593_v41, %v6109_v29  ;;  %v6344_v4 = vmul.f32 %v3593_v41, %v6117_v53  ;;  %v8446_v3 = vmin.f32 %v6210_v56, 1e+30  ;;  %v1905_v54 = vadd.f32 1e+30, %v6326_v42  ;;  %vm8453_vm13 = vmmov %vm8427_vm8 }
 0x20e   : > { %8442 = vst [vmem:[#allocation59_spill] sm:$0xff] %v6314_v17  ;;  %v1906_v28 = vadd.f32 1e+30, %v6329_v30  ;;  %v1907_v60 = vadd.f32 1e+30, %v6332_v2  ;;  %v6357_v53 = vsub.f32 %v5871_v52, %v5885_v22  ;;  %v6366_v52 = vmul.f32 %v6250_v24, %v6250_v24  ;;  %vm8454_vm14 = vmmov %vm8427_vm8 }
 0x20f   : > { %8444 = vst [vmem:[#allocation26_spill] sm:$0xff] %v6341_v47  ;;  %8445 = vst [vmem:[#allocation25_spill] sm:$0xff] %v6344_v4  ;;  %v1904_v43 = vadd.f32 %v8446_v3, %v6323_v36  ;;  %v1908_v18 = vadd.f32 1e+30, %v6335_v44  ;;  %v1909_v26 = vadd.f32 1e+30, %v6338_v32 }
 0x210   : > { %v1910_v29 = vadd.f32 1e+30, %v6341_v47  ;;  %8447 = vst [vmem:[#allocation30_spill] sm:$0xff] %v6357_v53  ;;  %v1911_v41 = vadd.f32 1e+30, %v6344_v4  ;;  %v1913_v0 = vrot.slane %v1905_v54, 7  ;;  %vm8455_vm15 = vmmov %vm8427_vm8 }
 0x211   : > { %v1912_v11 = vrot.slane %v1904_v43, 7  ;;  %v1914_v3 = vrot.slane %v1906_v28, 7  ;;  %v1915_v10 = vrot.slane %v1907_v60, 7  ;;  %v1916_v35 = vrot.slane %v1908_v18, 7  ;;  %8450 = vst [vmem:[#allocation29_spill] sm:$0xff] %v6366_v52  ;;  %vm8456_vm0 = vmmov %vm8427_vm8 }
 0x212   : > { %v1917_v21 = vrot.slane %v1909_v26, 7  ;;  %v1918_v8 = vrot.slane %v1910_v29, 7  ;;  %v1919_v25 = vrot.slane %v1911_v41, 7  ;;  %v1921_v62 = vsel %vm8449_vm10, 1e+30, %v1913_v0  ;;  %vm8457_vm1 = vmmov %vm8456_vm0 }
 0x213   : > { %v1920_v19 = vsel %vm8448_vm9, 1e+30, %v1912_v11  ;;  %v1922_v22 = vsel %vm8451_vm11, 1e+30, %v1914_v3  ;;  %v1923_v55 = vsel %vm8452_vm12, 1e+30, %v1915_v10  ;;  %v1929_v41 = vmin.f32 %v1904_v43, %v1921_v62  ;;  %vm8458_vm2 = vmmov %vm8456_vm0 }
 0x214   : > { %v1924_v49 = vsel %vm8453_vm13, 1e+30, %v1916_v35  ;;  %v1925_v11 = vsel %vm8454_vm14, 1e+30, %v1917_v21  ;;  %v1926_v0 = vsel %vm8455_vm15, 1e+30, %v1918_v8  ;;  %v1930_v38 = vmin.f32 %v1905_v54, %v1922_v22  ;;  %vm8459_vm3 = vmmov %vm8456_vm0 }
 0x215   : > { %v1927_v24 = vsel %vm8456_vm0, 1e+30, %v1919_v25  ;;  %v1928_v12 = vmin.f32 %v1920_v19, 1e+30  ;;  %v1931_v51 = vmin.f32 %v1906_v28, %v1923_v55  ;;  %v1932_v3 = vmin.f32 %v1907_v60, %v1924_v49  ;;  %vm8460_vm4 = vmmov %vm8456_vm0 }
 0x216   : > { %v1933_v58 = vmin.f32 %v1908_v18, %v1925_v11  ;;  %v1934_v15 = vmin.f32 %v1909_v26, %v1926_v0  ;;  %v1935_v10 = vmin.f32 %v1910_v29, %v1927_v24  ;;  %v1936_v1 = vmin.f32 %v1921_v62, 1e+30  ;;  %vm8461_vm5 = vmmov %vm8456_vm0 }
 0x217   : > { %v1937_v6 = vmin.f32 %v1922_v22, 1e+30  ;;  %v1938_v35 = vmin.f32 %v1923_v55, 1e+30  ;;  %v1939_v43 = vmin.f32 %v1924_v49, 1e+30  ;;  %v1942_v21 = vmin.f32 %v1928_v12, %v6210_v56  ;;  %vm8462_vm6 = vmmov %vm8456_vm0 }
 0x218   : > { %v1940_v53 = vmin.f32 %v1925_v11, 1e+30  ;;  %v1941_v14 = vmin.f32 %v1926_v0, 1e+30  ;;  %v1943_v17 = vmin.f32 %v1929_v41, %v1928_v12  ;;  %v1944_v8 = vmin.f32 %v1930_v38, %v1936_v1  ;;  %vm8463_vm7 = vmmov %vm8456_vm0 }
 0x219   : > { %v1945_v46 = vmin.f32 %v1931_v51, %v1937_v6  ;;  %v1946_v52 = vmin.f32 %v1932_v3, %v1938_v35  ;;  %v1947_v25 = vmin.f32 %v1933_v58, %v1939_v43  ;;  %v1950_v19 = vadd.f32 %v1942_v21, %v6323_v36  ;;  %vm8464_vm8 = vmmov %vm8456_vm0 }
 0x21a   : > { %v1948_v54 = vmin.f32 %v1934_v15, %v1940_v53  ;;  %v1949_v28 = vmin.f32 %v1935_v10, %v1941_v14  ;;  %v1951_v60 = vadd.f32 %v1943_v17, %v6326_v42  ;;  %v1952_v62 = vadd.f32 %v1944_v8, %v6329_v30  ;;  %vm8465_vm9 = vmmov %vm8456_vm0 }
 0x21b   : > { %v1953_v55 = vadd.f32 %v1945_v46, %v6332_v2  ;;  %v1954_v49 = vadd.f32 %v1946_v52, %v6335_v44  ;;  %v1955_v18 = vadd.f32 %v1947_v25, %v6338_v32  ;;  %v1958_v38 = vrot.slane %v1950_v19, 7  ;;  %vm8466_vm10 = vmmov %vm8456_vm0 }
 0x21c   : > { %v1956_v12 = vadd.f32 %v1948_v54, %v6341_v47  ;;  %v1957_v6 = vadd.f32 %v1949_v28, %v6344_v4  ;;  %v1959_v58 = vrot.slane %v1951_v60, 7  ;;  %v1960_v15 = vrot.slane %v1952_v62, 7  ;;  %vm8467_vm11 = vmmov %vm8456_vm0 }
 0x21d   : > { %v1961_v51 = vrot.slane %v1953_v55, 7  ;;  %v1962_v1 = vrot.slane %v1954_v49, 7  ;;  %v1963_v14 = vrot.slane %v1955_v18, 7  ;;  %v1966_v17 = vsel %vm8457_vm1, 1e+30, %v1958_v38  ;;  %vm8468_vm12 = vmmov %vm8456_vm0 }
 0x21e   : > { %v1964_v26 = vrot.slane %v1956_v12, 7  ;;  %v1965_v29 = vrot.slane %v1957_v6, 7  ;;  %v1967_v46 = vsel %vm8458_vm2, 1e+30, %v1959_v58  ;;  %v1968_v53 = vsel %vm8459_vm3, 1e+30, %v1960_v15  ;;  %vm8469_vm13 = vmmov %vm8456_vm0 }
 0x21f   : > { %v6397_v52 = vmul.f32 %v6260_v23, %v6260_v23  ;;  %v1969_v22 = vsel %vm8460_vm4, 1e+30, %v1961_v51  ;;  %v1970_v41 = vsel %vm8461_vm5, 1e+30, %v1962_v1  ;;  %v1971_v11 = vsel %vm8462_vm6, 1e+30, %v1963_v14  ;;  %vm8470_vm14 = vmmov %vm8456_vm0 }
 0x220   : > { %v1975_v0 = vmin.f32 %v1950_v19, %v1967_v46  ;;  %v1972_v24 = vsel %vm8463_vm7, 1e+30, %v1964_v26  ;;  %v1973_v3 = vsel %vm8464_vm8, 1e+30, %v1965_v29  ;;  %v1974_v10 = vmin.f32 %v1966_v17, 1e+30  ;;  %vm8471_vm15 = vmmov %vm8456_vm0 }
 0x221   : > { %v1976_v35 = vmin.f32 %v1951_v60, %v1968_v53  ;;  %v1977_v23 = vmin.f32 %v1952_v62, %v1969_v22  ;;  %v1978_v43 = vmin.f32 %v1953_v55, %v1970_v41  ;;  %v1979_v21 = vmin.f32 %v1954_v49, %v1971_v11  ;;  %vm8472_vm1 = vmmov %vm8456_vm0 }
 0x222   : > { %v1980_v8 = vmin.f32 %v1955_v18, %v1972_v24  ;;  %v1981_v25 = vmin.f32 %v1956_v12, %v1973_v3  ;;  %v1982_v54 = vmin.f32 %v1967_v46, 1e+30  ;;  %v1983_v28 = vmin.f32 %v1968_v53, 1e+30  ;;  %vm8473_vm2 = vmmov %vm8456_vm0 }
 0x223   : > { %v1984_v38 = vmin.f32 %v1969_v22, 1e+30  ;;  %v1985_v6 = vmin.f32 %v1970_v41, 1e+30  ;;  %v1986_v58 = vmin.f32 %v1971_v11, 1e+30  ;;  %v1988_v19 = vmin.f32 %v1974_v10, %v6210_v56  ;;  %vm8474_vm3 = vmmov %vm8456_vm0 }
 0x224   : > { %v1987_v15 = vmin.f32 %v1972_v24, 1e+30  ;;  %v1989_v51 = vmin.f32 %v1975_v0, %v1974_v10  ;;  %v1990_v1 = vmin.f32 %v1976_v35, %v1982_v54  ;;  %v1991_v14 = vmin.f32 %v1977_v23, %v1983_v28  ;;  %vm8475_vm4 = vmmov %vm8456_vm0 }
 0x225   : > { %v1992_v26 = vmin.f32 %v1978_v43, %v1984_v38  ;;  %v1993_v29 = vmin.f32 %v1979_v21, %v1985_v6  ;;  %v1994_v17 = vmin.f32 %v1980_v8, %v1986_v58  ;;  %v1996_v62 = vadd.f32 %v1988_v19, %v6323_v36  ;;  %vm8476_vm5 = vmmov %vm8456_vm0 }
 0x226   : > { %v1995_v60 = vmin.f32 %v1981_v25, %v1987_v15  ;;  %v1997_v55 = vadd.f32 %v1989_v51, %v6326_v42  ;;  %v1998_v49 = vadd.f32 %v1990_v1, %v6329_v30  ;;  %v1999_v18 = vadd.f32 %v1991_v14, %v6332_v2  ;;  %vm8477_vm6 = vmmov %vm8456_vm0 }
 0x227   : > { %v2000_v12 = vadd.f32 %v1992_v26, %v6335_v44  ;;  %v2001_v46 = vadd.f32 %v1993_v29, %v6338_v32  ;;  %v2002_v53 = vadd.f32 %v1994_v17, %v6341_v47  ;;  %v2004_v41 = vrot.slane %v1996_v62, 7  ;;  %vm8478_vm7 = vmmov %vm8456_vm0 }
 0x228   : > { %v2003_v22 = vadd.f32 %v1995_v60, %v6344_v4  ;;  %v2005_v11 = vrot.slane %v1997_v55, 7  ;;  %v2006_v0 = vrot.slane %v1998_v49, 7  ;;  %v2007_v24 = vrot.slane %v1999_v18, 7  ;;  %vm8479_vm8 = vmmov %vm8456_vm0 }
 0x229   : > { %v2008_v3 = vrot.slane %v2000_v12, 7  ;;  %v2009_v10 = vrot.slane %v2001_v46, 7  ;;  %v2010_v35 = vrot.slane %v2002_v53, 7  ;;  %v2012_v43 = vsel %vm8465_vm9, 1e+30, %v2004_v41  ;;  %vm8480_vm9 = vmmov %vm8456_vm0 }
 0x22a   : > { %v2011_v23 = vrot.slane %v2003_v22, 7  ;;  %v2013_v21 = vsel %vm8466_vm10, 1e+30, %v2005_v11  ;;  %v2014_v8 = vsel %vm8467_vm11, 1e+30, %v2006_v0  ;;  %v6428_v54 = vmul.f32 %v6254_v61, %v6254_v61  ;;  %vm8481_vm10 = vmmov %vm8456_vm0 }
 0x22b   : > { %v2015_v25 = vsel %vm8468_vm12, 1e+30, %v2007_v24  ;;  %v2016_v28 = vsel %vm8469_vm13, 1e+30, %v2008_v3  ;;  %v2017_v38 = vsel %vm8470_vm14, 1e+30, %v2009_v10  ;;  %v2021_v58 = vmin.f32 %v1996_v62, %v2013_v21  ;;  %vm8482_vm11 = vmmov %vm8456_vm0 }
 0x22c   : > { %v2018_v6 = vsel %vm8471_vm15, 1e+30, %v2010_v35  ;;  %v2019_v15 = vsel %vm8456_vm0, 1e+30, %v2011_v23  ;;  %v2020_v19 = vmin.f32 %v2012_v43, 1e+30  ;;  %v2022_v51 = vmin.f32 %v1997_v55, %v2014_v8  ;;  %vm8483_vm12 = vmmov %vm8456_vm0 }
 0x22d   : > { %v2023_v1 = vmin.f32 %v1998_v49, %v2015_v25  ;;  %v2024_v14 = vmin.f32 %v1999_v18, %v2016_v28  ;;  %v2025_v26 = vmin.f32 %v2000_v12, %v2017_v38  ;;  %v2026_v61 = vmin.f32 %v2001_v46, %v2018_v6  ;;  %vm8484_vm13 = vmmov %vm8456_vm0 }
 0x22e   : > { %v2027_v29 = vmin.f32 %v2002_v53, %v2019_v15  ;;  %v2028_v17 = vmin.f32 %v2013_v21, 1e+30  ;;  %v2029_v60 = vmin.f32 %v2014_v8, 1e+30  ;;  %v2030_v22 = vmin.f32 %v2015_v25, 1e+30  ;;  %vm8485_vm14 = vmmov %vm8456_vm0 }
 0x22f   : > { %v2034_v41 = vmin.f32 %v2020_v19, %v6210_v56  ;;  %v2031_v11 = vmin.f32 %v2016_v28, 1e+30  ;;  %v2032_v0 = vmin.f32 %v2017_v38, 1e+30  ;;  %v2033_v24 = vmin.f32 %v2018_v6, 1e+30  ;;  %vm8486_vm15 = vmmov %vm8456_vm0 }
 0x230   : > { %v2035_v3 = vmin.f32 %v2021_v58, %v2020_v19  ;;  %v2036_v62 = vmin.f32 %v2022_v51, %v2028_v17  ;;  %v2037_v10 = vmin.f32 %v2023_v1, %v2029_v60  ;;  %v2038_v35 = vmin.f32 %v2024_v14, %v2030_v22 }
 0x231   : > { %v2042_v23 = vadd.f32 %v2034_v41, %v6323_v36  ;;  %v2039_v55 = vmin.f32 %v2025_v26, %v2031_v11  ;;  %v2040_v49 = vmin.f32 %v2026_v61, %v2032_v0  ;;  %v2041_v18 = vmin.f32 %v2027_v29, %v2033_v24 }
 0x232   : > { %v2043_v12 = vadd.f32 %v2035_v3, %v6326_v42  ;;  %v2044_v46 = vadd.f32 %v2036_v62, %v6329_v30  ;;  %v2045_v53 = vadd.f32 %v2037_v10, %v6332_v2  ;;  %v2046_v43 = vadd.f32 %v2038_v35, %v6335_v44 }
 0x233   : > { %v2050_v21 = vrot.slane %v2042_v23, 7  ;;  %v2047_v8 = vadd.f32 %v2039_v55, %v6338_v32  ;;  %v2048_v25 = vadd.f32 %v2040_v49, %v6341_v47  ;;  %v2049_v28 = vadd.f32 %v2041_v18, %v6344_v4 }
 0x234   : > { %v2051_v38 = vrot.slane %v2043_v12, 7  ;;  %v2052_v6 = vrot.slane %v2044_v46, 7  ;;  %v2053_v58 = vrot.slane %v2045_v53, 7  ;;  %v2054_v15 = vrot.slane %v2046_v43, 7 }
 0x235   : > { %v2058_v19 = vsel %vm8472_vm1, 1e+30, %v2050_v21  ;;  %v2055_v51 = vrot.slane %v2047_v8, 7  ;;  %v2056_v1 = vrot.slane %v2048_v25, 7  ;;  %v2057_v14 = vrot.slane %v2049_v28, 7  ;;  %vm8487_vm1 = vmmov %vm8456_vm0 }
 0x236   : > { %v2059_v26 = vsel %vm8473_vm2, 1e+30, %v2051_v38  ;;  %v2060_v61 = vsel %vm8474_vm3, 1e+30, %v2052_v6  ;;  %v2061_v29 = vsel %vm8475_vm4, 1e+30, %v2053_v58  ;;  %vm8488_vm2 = vmmov %vm8456_vm0 }
 0x237   : > { %v2062_v17 = vsel %vm8476_vm5, 1e+30, %v2054_v15  ;;  %v2067_v60 = vmin.f32 %v2042_v23, %v2059_v26  ;;  %v2063_v22 = vsel %vm8477_vm6, 1e+30, %v2055_v51  ;;  %v2064_v41 = vsel %vm8478_vm7, 1e+30, %v2056_v1  ;;  %vm8489_vm3 = vmmov %vm8456_vm0 }
 0x238   : > { %v2065_v11 = vsel %vm8479_vm8, 1e+30, %v2057_v14  ;;  %v2068_v0 = vmin.f32 %v2043_v12, %v2060_v61  ;;  %v2066_v24 = vmin.f32 %v2058_v19, 1e+30  ;;  %v2069_v3 = vmin.f32 %v2044_v46, %v2061_v29  ;;  %vm8490_vm4 = vmmov %vm8456_vm0 }
 0x239   : > { %v2070_v62 = vmin.f32 %v2045_v53, %v2062_v17  ;;  %v2071_v10 = vmin.f32 %v2046_v43, %v2063_v22  ;;  %v2072_v35 = vmin.f32 %v2047_v8, %v2064_v41  ;;  %v2073_v55 = vmin.f32 %v2048_v25, %v2065_v11  ;;  %vm8493_vm5 = vmmov %vm8456_vm0 }
 0x23a   : > { %v2074_v49 = vmin.f32 %v2059_v26, 1e+30  ;;  %v2075_v18 = vmin.f32 %v2060_v61, 1e+30  ;;  %v2076_v21 = vmin.f32 %v2061_v29, 1e+30  ;;  %v2080_v38 = vmin.f32 %v2066_v24, %v6210_v56  ;;  %vm8494_vm6 = vmmov %vm8456_vm0 }
 0x23b   : > { %v2077_v23 = vmin.f32 %v2062_v17, 1e+30  ;;  %v2078_v28 = vmin.f32 %v2063_v22, 1e+30  ;;  %v2079_v6 = vmin.f32 %v2064_v41, 1e+30  ;;  %v2081_v58 = vmin.f32 %v2067_v60, %v2066_v24  ;;  %vm8495_vm7 = vmmov %vm8456_vm0 }
 0x23c   : > { %v2082_v15 = vmin.f32 %v2068_v0, %v2074_v49  ;;  %v2083_v51 = vmin.f32 %v2069_v3, %v2075_v18  ;;  %v2084_v1 = vmin.f32 %v2070_v62, %v2076_v21  ;;  %v2088_v46 = vadd.f32 %v2080_v38, %v6323_v36  ;;  %vm8496_vm8 = vmmov %vm8456_vm0 }
 0x23d   : > { %v2085_v14 = vmin.f32 %v2071_v10, %v2077_v23  ;;  %v2086_v12 = vmin.f32 %v2072_v35, %v2078_v28  ;;  %v2087_v53 = vmin.f32 %v2073_v55, %v2079_v6  ;;  %v2089_v43 = vadd.f32 %v2081_v58, %v6326_v42 }
 0x23e   : > { %v2090_v8 = vadd.f32 %v2082_v15, %v6329_v30  ;;  %v2091_v25 = vadd.f32 %v2083_v51, %v6332_v2  ;;  %v2092_v19 = vadd.f32 %v2084_v1, %v6335_v44  ;;  %v2096_v29 = vrot.slane %v2088_v46, 7 }
 0x23f   : > { %v2093_v26 = vadd.f32 %v2085_v14, %v6338_v32  ;;  %v2094_v61 = vadd.f32 %v2086_v12, %v6341_v47  ;;  %v2095_v17 = vadd.f32 %v2087_v53, %v6344_v4  ;;  %v2097_v60 = vrot.slane %v2089_v43, 7 }
 0x240   : > { %v2098_v22 = vrot.slane %v2090_v8, 7  ;;  %v2099_v41 = vrot.slane %v2091_v25, 7  ;;  %v2100_v11 = vrot.slane %v2092_v19, 7  ;;  %v2104_v3 = vsel %vm8480_vm9, 1e+30, %v2096_v29  ;;  %vm8497_vm9 = vmmov %vm8456_vm0 }
 0x241   : > { %v2101_v0 = vrot.slane %v2093_v26, 7  ;;  %v2102_v24 = vrot.slane %v2094_v61, 7  ;;  %v2103_v62 = vrot.slane %v2095_v17, 7  ;;  %v2105_v10 = vsel %vm8481_vm10, 1e+30, %v2097_v60  ;;  %vm8498_vm10 = vmmov %vm8456_vm0 }
 0x242   : > { %v2106_v35 = vsel %vm8482_vm11, 1e+30, %v2098_v22  ;;  %v6480_v55 = vmul.f32 %v6264_v59, %v6264_v59  ;;  %v2107_v49 = vsel %vm8483_vm12, 1e+30, %v2099_v41  ;;  %v2108_v18 = vsel %vm8484_vm13, 1e+30, %v2100_v11  ;;  %vm8499_vm11 = vmmov %vm8456_vm0 }
 0x243   : > { %v2109_v21 = vsel %vm8485_vm14, 1e+30, %v2101_v0  ;;  %v2113_v23 = vmin.f32 %v2088_v46, %v2105_v10  ;;  %v2110_v28 = vsel %vm8486_vm15, 1e+30, %v2102_v24  ;;  %v2111_v38 = vsel %vm8456_vm0, 1e+30, %v2103_v62  ;;  %vm8500_vm12 = vmmov %vm8456_vm0 }
 0x244   : > { %v2112_v6 = vmin.f32 %v2104_v3, 1e+30  ;;  %v2114_v58 = vmin.f32 %v2089_v43, %v2106_v35  ;;  %v2115_v59 = vmin.f32 %v2090_v8, %v2107_v49  ;;  %v2116_v15 = vmin.f32 %v2091_v25, %v2108_v18  ;;  %vm8501_vm13 = vmmov %vm8456_vm0 }
 0x245   : > { %v2117_v51 = vmin.f32 %v2092_v19, %v2109_v21  ;;  %v2118_v1 = vmin.f32 %v2093_v26, %v2110_v28  ;;  %v2119_v14 = vmin.f32 %v2094_v61, %v2111_v38  ;;  %v2120_v12 = vmin.f32 %v2105_v10, 1e+30  ;;  %vm8502_vm14 = vmmov %vm8456_vm0 }
 0x246   : > { %v2121_v53 = vmin.f32 %v2106_v35, 1e+30  ;;  %v2122_v29 = vmin.f32 %v2107_v49, 1e+30  ;;  %v2123_v17 = vmin.f32 %v2108_v18, 1e+30  ;;  %v2126_v46 = vmin.f32 %v2112_v6, %v6210_v56  ;;  %vm8503_vm15 = vmmov %vm8456_vm0 }
 0x247   : > { %v2124_v60 = vmin.f32 %v2109_v21, 1e+30  ;;  %v2125_v22 = vmin.f32 %v2110_v28, 1e+30  ;;  %v2127_v41 = vmin.f32 %v2113_v23, %v2112_v6  ;;  %v2128_v11 = vmin.f32 %v2114_v58, %v2120_v12  ;;  %v6510_v12 = vld [vmem:[%s4269_s6 + $0xb8] sm:$0xff] }
 0x248   : > { %v2129_v0 = vmin.f32 %v2115_v59, %v2121_v53  ;;  %v2130_v24 = vmin.f32 %v2116_v15, %v2122_v29  ;;  %v2131_v62 = vmin.f32 %v2117_v51, %v2123_v17  ;;  %v2134_v8 = vadd.f32 %v2126_v46, %v6323_v36  ;;  %8491 = vst [vmem:[#allocation34_spill] sm:$0xff] %v6510_v12  ;;  %v3691_v53 = vld [vmem:[%s4272_s1 + $0xb8] sm:$0xff] }
 0x249   : > { %v2132_v3 = vmin.f32 %v2118_v1, %v2124_v60  ;;  %v2133_v43 = vmin.f32 %v2119_v14, %v2125_v22  ;;  %v2135_v25 = vadd.f32 %v2127_v41, %v6326_v42  ;;  %v2136_v19 = vadd.f32 %v2128_v11, %v6329_v30 }
 0x24a   : > { %v2137_v26 = vadd.f32 %v2129_v0, %v6332_v2  ;;  %v2138_v61 = vadd.f32 %v2130_v24, %v6335_v44  ;;  %v2139_v10 = vadd.f32 %v2131_v62, %v6338_v32  ;;  %v2142_v18 = vrot.slane %v2134_v8, 7 }
 0x24b   : > { %v2140_v35 = vadd.f32 %v2132_v3, %v6341_v47  ;;  %v2141_v49 = vadd.f32 %v2133_v43, %v6344_v4  ;;  %v2143_v21 = vrot.slane %v2135_v25, 7  ;;  %v2144_v23 = vrot.slane %v2136_v19, 7 }
 0x24c   : > { %v2145_v28 = vrot.slane %v2137_v26, 7  ;;  %v2146_v38 = vrot.slane %v2138_v61, 7  ;;  %v2147_v6 = vrot.slane %v2139_v10, 7  ;;  %v2150_v15 = vsel %vm8487_vm1, 1e+30, %v2142_v18  ;;  %vm8504_vm1 = vmmov %vm8456_vm0 }
 0x24d   : > { %v2148_v58 = vrot.slane %v2140_v35, 7  ;;  %v2149_v59 = vrot.slane %v2141_v49, 7  ;;  %v2151_v51 = vsel %vm8488_vm2, 1e+30, %v2143_v21  ;;  %v2152_v1 = vsel %vm8489_vm3, 1e+30, %v2144_v23  ;;  %vm8505_vm2 = vmmov %vm8456_vm0 }
 0x24e   : > { %v2153_v14 = vsel %vm8490_vm4, 1e+30, %v2145_v28  ;;  %v6514_v29 = vsub.f32 %v6510_v12, %v3691_v53  ;;  %v2154_v17 = vsel %vm8493_vm5, 1e+30, %v2146_v38  ;;  %v2155_v60 = vsel %vm8494_vm6, 1e+30, %v2147_v6  ;;  %vm8506_vm3 = vmmov %vm8456_vm0 }
 0x24f   : > { %v2156_v22 = vsel %vm8495_vm7, 1e+30, %v2148_v58  ;;  %v2159_v46 = vmin.f32 %v2134_v8, %v2151_v51  ;;  %v2157_v41 = vsel %vm8496_vm8, 1e+30, %v2149_v59  ;;  %v2158_v11 = vmin.f32 %v2150_v15, 1e+30  ;;  %vm8508_vm4 = vmmov %vm8456_vm0 }
 0x250   : > { %8492 = vst [vmem:[#allocation33_spill] sm:$0xff] %v6514_v29  ;;  %v2160_v0 = vmin.f32 %v2135_v25, %v2152_v1  ;;  %v2161_v24 = vmin.f32 %v2136_v19, %v2153_v14  ;;  %v2162_v62 = vmin.f32 %v2137_v26, %v2154_v17  ;;  %v2163_v3 = vmin.f32 %v2138_v61, %v2155_v60  ;;  %vm8509_vm5 = vmmov %vm8456_vm0 }
 0x251   : > { %v2164_v43 = vmin.f32 %v2139_v10, %v2156_v22  ;;  %v2165_v49 = vmin.f32 %v2140_v35, %v2157_v41  ;;  %v2166_v18 = vmin.f32 %v2151_v51, 1e+30  ;;  %v2167_v21 = vmin.f32 %v2152_v1, 1e+30  ;;  %vm8510_vm6 = vmmov %vm8456_vm0 }
 0x252   : > { %v2168_v23 = vmin.f32 %v2153_v14, 1e+30  ;;  %v2172_v28 = vmin.f32 %v2158_v11, %v6210_v56  ;;  %v2169_v38 = vmin.f32 %v2154_v17, 1e+30  ;;  %v2170_v6 = vmin.f32 %v2155_v60, 1e+30  ;;  %vm8511_vm7 = vmmov %vm8456_vm0 }
 0x253   : > { %v2171_v53 = vmin.f32 %v2156_v22, 1e+30  ;;  %v2173_v58 = vmin.f32 %v2159_v46, %v2158_v11  ;;  %v2174_v8 = vmin.f32 %v2160_v0, %v2166_v18  ;;  %v2175_v12 = vmin.f32 %v2161_v24, %v2167_v21  ;;  %vm8512_vm8 = vmmov %vm8456_vm0 }
 0x254   : > { %v2176_v29 = vmin.f32 %v2162_v62, %v2168_v23  ;;  %v2180_v59 = vadd.f32 %v2172_v28, %v6323_v36  ;;  %v2177_v25 = vmin.f32 %v2163_v3, %v2169_v38  ;;  %v2178_v19 = vmin.f32 %v2164_v43, %v2170_v6 }
 0x255   : > { %v2179_v26 = vmin.f32 %v2165_v49, %v2171_v53  ;;  %v2181_v61 = vadd.f32 %v2173_v58, %v6326_v42  ;;  %v2182_v10 = vadd.f32 %v2174_v8, %v6329_v30  ;;  %v2183_v35 = vadd.f32 %v2175_v12, %v6332_v2 }
 0x256   : > { %v2184_v15 = vadd.f32 %v2176_v29, %v6335_v44  ;;  %v2188_v51 = vrot.slane %v2180_v59, 7  ;;  %v2185_v1 = vadd.f32 %v2177_v25, %v6338_v32  ;;  %v2186_v14 = vadd.f32 %v2178_v19, %v6341_v47 }
 0x257   : > { %v2187_v17 = vadd.f32 %v2179_v26, %v6344_v4  ;;  %v2189_v60 = vrot.slane %v2181_v61, 7  ;;  %v2190_v22 = vrot.slane %v2182_v10, 7  ;;  %v2191_v46 = vrot.slane %v2183_v35, 7 }
 0x258   : > { %v2192_v41 = vrot.slane %v2184_v15, 7  ;;  %v2196_v11 = vsel %vm8497_vm9, 1e+30, %v2188_v51  ;;  %v2193_v0 = vrot.slane %v2185_v1, 7  ;;  %v2194_v24 = vrot.slane %v2186_v14, 7  ;;  %vm8513_vm9 = vmmov %vm8456_vm0 }
 0x259   : > { %v2195_v62 = vrot.slane %v2187_v17, 7  ;;  %v2197_v12 = vsel %vm8498_vm10, 1e+30, %v2189_v60  ;;  %v2198_v29 = vsel %vm8499_vm11, 1e+30, %v2190_v22  ;;  %vm8514_vm10 = vmmov %vm8456_vm0 }
 0x25a   : > { %v2199_v3 = vsel %vm8500_vm12, 1e+30, %v2191_v46  ;;  %v2200_v43 = vsel %vm8501_vm13, 1e+30, %v2192_v41  ;;  %v2205_v49 = vmin.f32 %v2180_v59, %v2197_v12  ;;  %v2201_v18 = vsel %vm8502_vm14, 1e+30, %v2193_v0  ;;  %vm8515_vm11 = vmmov %vm8456_vm0 }
 0x25b   : > { %v2202_v21 = vsel %vm8503_vm15, 1e+30, %v2194_v24  ;;  %v2203_v23 = vsel %vm8456_vm0, 1e+30, %v2195_v62  ;;  %v2206_v28 = vmin.f32 %v2181_v61, %v2198_v29  ;;  %v2204_v38 = vmin.f32 %v2196_v11, 1e+30  ;;  %vm8516_vm12 = vmmov %vm8456_vm0 }
 0x25c   : > { %v2207_v6 = vmin.f32 %v2182_v10, %v2199_v3  ;;  %v2208_v53 = vmin.f32 %v2183_v35, %v2200_v43  ;;  %v2209_v58 = vmin.f32 %v2184_v15, %v2201_v18  ;;  %v2210_v8 = vmin.f32 %v2185_v1, %v2202_v21  ;;  %vm8517_vm13 = vmmov %vm8456_vm0 }
 0x25d   : > { %v2211_v25 = vmin.f32 %v2186_v14, %v2203_v23  ;;  %v2212_v19 = vmin.f32 %v2197_v12, 1e+30  ;;  %v2213_v26 = vmin.f32 %v2198_v29, 1e+30  ;;  %v2214_v51 = vmin.f32 %v2199_v3, 1e+30  ;;  %vm8518_vm14 = vmmov %vm8456_vm0 }
 0x25e   : > { %v2215_v59 = vmin.f32 %v2200_v43, 1e+30  ;;  %v2216_v17 = vmin.f32 %v2201_v18, 1e+30  ;;  %v2218_v60 = vmin.f32 %v2204_v38, %v6210_v56  ;;  %v2217_v22 = vmin.f32 %v2202_v21, 1e+30  ;;  %vm8519_vm15 = vmmov %vm8456_vm0 }
 0x25f   : > { %v2219_v46 = vmin.f32 %v2205_v49, %v2204_v38  ;;  %v2220_v41 = vmin.f32 %v2206_v28, %v2212_v19  ;;  %v2221_v0 = vmin.f32 %v2207_v6, %v2213_v26  ;;  %v2222_v24 = vmin.f32 %v2208_v53, %v2214_v51 }
 0x260   : > { %v2223_v62 = vmin.f32 %v2209_v58, %v2215_v59  ;;  %v2224_v61 = vmin.f32 %v2210_v8, %v2216_v17  ;;  %v2226_v10 = vadd.f32 %v2218_v60, %v6323_v36  ;;  %v2225_v35 = vmin.f32 %v2211_v25, %v2217_v22  ;;  %v6565_v58 = vld [vmem:[%s4269_s6 + $0xd0] sm:$0xff] }
 0x261   : > { %v2227_v15 = vadd.f32 %v2219_v46, %v6326_v42  ;;  %v2228_v1 = vadd.f32 %v2220_v41, %v6329_v30  ;;  %v2229_v14 = vadd.f32 %v2221_v0, %v6332_v2  ;;  %v2230_v11 = vadd.f32 %v2222_v24, %v6335_v44  ;;  %8507 = vst [vmem:[#allocation37_spill] sm:$0xff] %v6565_v58  ;;  %v3693_v8 = vld [vmem:[%s4272_s1 + $0xd0] sm:$0xff] }
 0x262   : > { %v2231_v56 = vadd.f32 %v2223_v62, %v6338_v32  ;;  %v2232_v12 = vadd.f32 %v2224_v61, %v6341_v47  ;;  %v2234_v29 = vrot.slane %v2226_v10, 7  ;;  %v2233_v3 = vadd.f32 %v2225_v35, %v6344_v4 }
 0x263   : > { %v2235_v43 = vrot.slane %v2227_v15, 7  ;;  %v2236_v36 = vrot.slane %v2228_v1, 7  ;;  %v2237_v49 = vrot.slane %v2229_v14, 7  ;;  %v2238_v18 = vrot.slane %v2230_v11, 7 }
 0x264   : > { %v2239_v21 = vrot.slane %v2231_v56, 7  ;;  %v2240_v23 = vrot.slane %v2232_v12, 7  ;;  %v2242_v28 = vsel %vm8504_vm1, 1e+30, %v2234_v29  ;;  %v2241_v38 = vrot.slane %v2233_v3, 7  ;;  %vm8520_vm1 = vmmov %vm8456_vm0 }
 0x265   : > { %v2243_v6 = vsel %vm8505_vm2, 1e+30, %v2235_v43  ;;  %v2244_v53 = vsel %vm8506_vm3, 1e+30, %v2236_v36  ;;  %v6569_v25 = vsub.f32 %v6565_v58, %v3693_v8  ;;  %v2245_v19 = vsel %vm8508_vm4, 1e+30, %v2237_v49  ;;  %vm8521_vm2 = vmmov %vm8456_vm0 }
 0x266   : > { %v2246_v26 = vsel %vm8509_vm5, 1e+30, %v2238_v18  ;;  %v2247_v51 = vsel %vm8510_vm6, 1e+30, %v2239_v21  ;;  %v2250_v59 = vmin.f32 %v2226_v10, %v2243_v6  ;;  %v2248_v17 = vsel %vm8511_vm7, 1e+30, %v2240_v23  ;;  %vm8522_vm3 = vmmov %vm8456_vm0 }
 0x267   : > { %v2249_v60 = vsel %vm8512_vm8, 1e+30, %v2241_v38  ;;  %v2251_v22 = vmin.f32 %v2227_v15, %v2244_v53  ;;  %v2252_v46 = vmin.f32 %v2228_v1, %v2245_v19  ;;  %v2253_v41 = vmin.f32 %v2229_v14, %v2246_v26  ;;  %vm8524_vm4 = vmmov %vm8456_vm0 }
 0x268   : > { %v2254_v0 = vmin.f32 %v2230_v11, %v2247_v51  ;;  %v2255_v24 = vmin.f32 %v2231_v56, %v2248_v17  ;;  %v6583_v62 = vmul.f32 %v6272_v45, %v6272_v45  ;;  %v2256_v61 = vmin.f32 %v2232_v12, %v2249_v60  ;;  %vm8525_vm5 = vmmov %vm8456_vm0 }
 0x269   : > { %v2257_v35 = vmin.f32 %v2242_v28, 1e+30  ;;  %v2258_v29 = vmin.f32 %v2243_v6, 1e+30  ;;  %v2259_v3 = vmin.f32 %v2244_v53, 1e+30  ;;  %v6587_v49 = vmul.f32 %v6286_v34, %v6286_v34  ;;  %vm8530_vm6 = vmmov %vm8456_vm0 }
 0x26a   : > { %v2260_v10 = vmin.f32 %v2245_v19, 1e+30  ;;  %v2261_v43 = vmin.f32 %v2246_v26, 1e+30  ;;  %v2262_v36 = vmin.f32 %v2247_v51, 1e+30  ;;  %v6591_v45 = vmul.f32 %v6276_v13, %v6276_v13  ;;  %vm8531_vm7 = vmmov %vm8456_vm0 }
 0x26b   : > { %v2263_v15 = vmin.f32 %v2248_v17, 1e+30  ;;  %v2264_v1 = vmin.f32 %v2250_v59, %v2257_v35  ;;  %v2265_v14 = vmin.f32 %v2251_v22, %v2258_v29  ;;  %v2266_v11 = vmin.f32 %v2252_v46, %v2259_v3  ;;  %vm8532_vm8 = vmmov %vm8456_vm0 }
 0x26c   : > { %v2267_v56 = vmin.f32 %v2253_v41, %v2260_v10  ;;  %v2268_v18 = vmin.f32 %v2254_v0, %v2261_v43  ;;  %v2269_v21 = vmin.f32 %v2255_v24, %v2262_v36  ;;  %v6601_v8 = vmul.f32 %v6280_v48, %v6280_v48 }
 0x26d   : > { %v2270_v12 = vmin.f32 %v2256_v61, %v2263_v15  ;;  %v2271_v23 = vadd.f32 %v2264_v1, %v6326_v42  ;;  %v2272_v28 = vadd.f32 %v2265_v14, %v6329_v30  ;;  %v2273_v38 = vadd.f32 %v2266_v11, %v6332_v2 }
 0x26e   : > { %v2274_v34 = vadd.f32 %v2267_v56, %v6335_v44  ;;  %v2275_v6 = vadd.f32 %v2268_v18, %v6338_v32  ;;  %v2276_v53 = vadd.f32 %v2269_v21, %v6341_v47  ;;  %v6606_v60 = vmul.f32 %v6290_v37, %v6290_v37 }
 0x26f   : > { %v2277_v13 = vadd.f32 %v2270_v12, %v6344_v4  ;;  %v2278_v19 = vrot.slane %v2271_v23, 7  ;;  %v2279_v26 = vrot.slane %v2272_v28, 7  ;;  %v2280_v51 = vrot.slane %v2273_v38, 7 }
 0x270   : > { %v2281_v42 = vrot.slane %v2274_v34, 7  ;;  %v2282_v59 = vrot.slane %v2275_v6, 7  ;;  %v2283_v17 = vrot.slane %v2276_v53, 7  ;;  %v2481_v41 = vadd.f32 %v6256_v39, %v6244_v9 }
 0x271   : > { %v2284_v22 = vrot.slane %v2277_v13, 7  ;;  %v2285_v46 = vsel %vm8513_vm9, 1e+30, %v2278_v19  ;;  %v2286_v48 = vsel %vm8514_vm10, 1e+30, %v2279_v26  ;;  %v6626_v11 = vmul.f32 %v6310_v31, %v6310_v31  ;;  %vm8533_vm9 = vmmov %vm8456_vm0 }
 0x272   : > { %v2287_v0 = vsel %vm8515_vm11, 1e+30, %v2280_v51  ;;  %v2288_v24 = vsel %vm8516_vm12, 1e+30, %v2281_v42  ;;  %v2289_v37 = vsel %vm8517_vm13, 1e+30, %v2282_v59  ;;  %v2292_v61 = vmin.f32 %v2271_v23, %v2286_v48  ;;  %vm8534_vm10 = vmmov %vm8456_vm0 }
 0x273   : > { %v2290_v35 = vsel %vm8518_vm14, 1e+30, %v2283_v17  ;;  %v2291_v29 = vsel %vm8519_vm15, 1e+30, %v2284_v22  ;;  %v2293_v3 = vmin.f32 %v2272_v28, %v2287_v0  ;;  %v2294_v10 = vmin.f32 %v2273_v38, %v2288_v24  ;;  %vm8547_vm11 = vmmov %vm8456_vm0 }
 0x274   : > { %v2295_v43 = vmin.f32 %v2274_v34, %v2289_v37  ;;  %v2296_v9 = vmin.f32 %v2275_v6, %v2290_v35  ;;  %v2297_v39 = vmin.f32 %v2276_v53, %v2291_v29  ;;  %v2298_v36 = vmin.f32 %v2285_v46, 1e+30  ;;  %vm8548_vm12 = vmmov %vm8456_vm0 }
 0x275   : > { %v2299_v15 = vmin.f32 %v2286_v48, 1e+30  ;;  %v2300_v1 = vmin.f32 %v2287_v0, 1e+30  ;;  %v2301_v14 = vmin.f32 %v2288_v24, 1e+30  ;;  %v6630_v12 = vmul.f32 %v6298_v20, %v6298_v20  ;;  %vm8549_vm13 = vmmov %vm8456_vm0 }
 0x276   : > { %v2302_v56 = vmin.f32 %v2289_v37, 1e+30  ;;  %v2303_v18 = vmin.f32 %v2290_v35, 1e+30  ;;  %v2304_v21 = vmin.f32 %v2292_v61, %v2298_v36  ;;  %v2482_v34 = vadd.f32 %v2481_v41, %v6266_v33  ;;  %v8523_v24 = vld [vmem:[#allocation29_spill] sm:$0xff]  ;;  %vm8550_vm14 = vmmov %vm8456_vm0 }
 0x277   : > { %v2305_v23 = vmin.f32 %v2293_v3, %v2299_v15  ;;  %v2306_v28 = vmin.f32 %v2294_v10, %v2300_v1  ;;  %v2307_v38 = vmin.f32 %v2295_v43, %v2301_v14  ;;  %v2490_v31 = vadd.f32 %v6292_v16, %v6268_v57  ;;  %v8526_v15 = vld [vmem:[#allocation58_spill] sm:$0xff]  ;;  %vm8569_vm15 = vmmov %vm8456_vm0 }
 0x278   : > { %v2308_v6 = vmin.f32 %v2296_v9, %v2302_v56  ;;  %v2309_v53 = vmin.f32 %v2297_v39, %v2303_v18  ;;  %v2310_v13 = vadd.f32 %v2304_v21, %v6329_v30  ;;  %v2499_v20 = vadd.f32 %v6320_v50, %v6306_v40  ;;  %v8527_v18 = vld [vmem:[#allocation59_spill] sm:$0xff] }
 0x279   : > { %v2311_v19 = vadd.f32 %v2305_v23, %v6332_v2  ;;  %v2312_v26 = vadd.f32 %v2306_v28, %v6335_v44  ;;  %v2313_v51 = vadd.f32 %v2307_v38, %v6338_v32  ;;  %v6645_v30 = vmul.f32 %v6302_v63, %v6302_v63  ;;  %v8528_v23 = vld [vmem:[#allocation60_spill] sm:$0xff] }
 0x27a   : > { %v2314_v42 = vadd.f32 %v2308_v6, %v6341_v47  ;;  %v2315_v33 = vadd.f32 %v2309_v53, %v6344_v4  ;;  %v2316_v59 = vrot.slane %v2310_v13, 7  ;;  %v2483_v22 = vadd.f32 %v2482_v34, %v6282_v5 }
 0x27b   : > { %v2317_v17 = vrot.slane %v2311_v19, 7  ;;  %v2318_v57 = vrot.slane %v2312_v26, 7  ;;  %v2319_v16 = vrot.slane %v2313_v51, 7  ;;  %v2491_v40 = vadd.f32 %v2490_v31, %v6294_v7 }
 0x27c   : > { %v2320_v46 = vrot.slane %v2314_v42, 7  ;;  %v2321_v48 = vrot.slane %v2315_v33, 7  ;;  %v2322_v41 = vsel %vm8456_vm0, 1e+30, %v2316_v59  ;;  %v2500_v37 = vadd.f32 %v2499_v20, %v8523_v24 }
 0x27d   : > { %v2323_v50 = vsel %vm8520_vm1, 1e+30, %v2317_v17  ;;  %v2324_v0 = vsel %vm8521_vm2, 1e+30, %v2318_v57  ;;  %v2325_v63 = vsel %vm8522_vm3, 1e+30, %v2319_v16  ;;  %v2492_v1 = vadd.f32 %v2491_v40, %v8526_v15  ;;  %vm8577_vm1 = vmmov %vm8456_vm0 }
 0x27e   : > { %v2326_v5 = vsel %vm8524_vm4, 1e+30, %v2320_v46  ;;  %v2327_v61 = vsel %vm8525_vm5, 1e+30, %v2321_v48  ;;  %v2328_v35 = vmin.f32 %v2310_v13, %v2323_v50  ;;  %v2329_v29 = vmin.f32 %v2311_v19, %v2324_v0  ;;  %v8529_v57 = vld [vmem:[#allocation30_spill] sm:$0xff]  ;;  %vm8708_vm2 = vmmov %vm8456_vm0 }
 0x27f   : > { %v2330_v7 = vmin.f32 %v2312_v26, %v2325_v63  ;;  %v2331_v3 = vmin.f32 %v2313_v51, %v2326_v5  ;;  %v2332_v10 = vmin.f32 %v2314_v42, %v2327_v61  ;;  %v2333_v43 = vmin.f32 %v2322_v41, 1e+30  ;;  %vm8710_vm3 = vmmov %vm8456_vm0 }
 0x280   : > { %v2334_v9 = vmin.f32 %v2323_v50, 1e+30  ;;  %v2335_v39 = vmin.f32 %v2324_v0, 1e+30  ;;  %v2336_v36 = vmin.f32 %v2325_v63, 1e+30  ;;  %v2471_v21 = vmul.f32 %v8527_v18, %v8527_v18 }
 0x281   : > { %v2337_v14 = vmin.f32 %v2326_v5, 1e+30  ;;  %v2338_v56 = vmin.f32 %v2328_v35, %v2333_v43  ;;  %v2473_v28 = vmul.f32 %v8528_v23, %v8528_v23  ;;  %v2484_v53 = vrot.slane %v2483_v22, 4  ;;  %v6701_v18 = vld [vmem:[%s4269_s6 + $0xd8] sm:$0xff] }
 0x282   : > { %v2339_v38 = vmin.f32 %v2329_v29, %v2334_v9  ;;  %v2340_v34 = vmin.f32 %v2330_v7, %v2335_v39  ;;  %v2341_v6 = vmin.f32 %v2331_v3, %v2336_v36  ;;  %v2501_v19 = vadd.f32 %v2500_v37, %v6397_v52  ;;  %v8535_v9 = vld [vmem:[#allocation55_spill] sm:$0xff]  ;;  %v6834_v39 = vld [vmem:[%s4269_s6 + $0x90] sm:$0xff] }
 0x283   : > { %v2342_v13 = vmin.f32 %v2332_v10, %v2337_v14  ;;  %v2343_v31 = vadd.f32 %v2338_v56, %v6332_v2  ;;  %v2508_v26 = vadd.f32 %v6480_v55, %v6428_v54  ;;  %v2493_v33 = vrot.slane %v2492_v1, 4  ;;  %v8536_v14 = vld [vmem:[#allocation57_spill] sm:$0xff]  ;;  %v6704_v23 = vld [vmem:[%s4272_s1 + $0xd8] sm:$0xff] }
 0x284   : > { %v2344_v51 = vadd.f32 %v2339_v38, %v6335_v44  ;;  %v2345_v20 = vadd.f32 %v2340_v34, %v6338_v32  ;;  %v2346_v42 = vadd.f32 %v2341_v6, %v6341_v47  ;;  %v2474_v16 = vmul.f32 %v8529_v57, %v8529_v57  ;;  %8537 = vst [vmem:[#allocation36_spill] sm:$0xff] %v6704_v23 }
 0x285   : > { %v2347_v59 = vadd.f32 %v2342_v13, %v6344_v4  ;;  %v2348_v17 = vrot.slane %v2343_v31, 7  ;;  %v2517_v2 = vadd.f32 %v6601_v8, %v6591_v45  ;;  %v2485_v54 = vadd.f32 %v2484_v53, %v2483_v22 }
 0x286   : > { %v2349_v52 = vrot.slane %v2344_v51, 7  ;;  %v2350_v46 = vrot.slane %v2345_v20, 7  ;;  %v2351_v48 = vrot.slane %v2346_v42, 7  ;;  %v2502_v40 = vrot.slane %v2501_v19, 4 }
 0x287   : > { %v2352_v55 = vrot.slane %v2347_v59, 7  ;;  %v2353_v41 = vsel %vm8530_vm6, 1e+30, %v2348_v17  ;;  %v2509_v50 = vadd.f32 %v2508_v26, %v6583_v62  ;;  %v2494_v8 = vadd.f32 %v2493_v33, %v2492_v1  ;;  %v6696_v1 = vld [vmem:[%s4269_s6 + $0x60] sm:$0xff] }
 0x288   : > { %v2354_v0 = vsel %vm8531_vm7, 1e+30, %v2349_v52  ;;  %v2355_v63 = vsel %vm8532_vm8, 1e+30, %v2350_v46  ;;  %v2356_v45 = vsel %vm8533_vm9, 1e+30, %v2351_v48  ;;  %v2518_v10 = vadd.f32 %v2517_v2, %v6606_v60 }
 0x289   : > { %v2357_v22 = vsel %vm8534_vm10, 1e+30, %v2352_v55  ;;  %v2358_v24 = vmin.f32 %v2343_v31, %v2354_v0  ;;  %v2359_v37 = vmin.f32 %v2344_v51, %v2355_v63  ;;  %v2360_v5 = vmin.f32 %v2345_v20, %v2356_v45  ;;  %v8538_v60 = vld [vmem:[#allocation33_spill] sm:$0xff]  ;;  %v6725_v2 = vld [vmem:[%s4269_s6 + $0x80] sm:$0xff] }
 0x28a   : > { %v2361_v62 = vmin.f32 %v2346_v42, %v2357_v22  ;;  %v2362_v61 = vmin.f32 %v2353_v41, 1e+30  ;;  %v2363_v35 = vmin.f32 %v2354_v0, 1e+30  ;;  %v2364_v29 = vmin.f32 %v2355_v63, 1e+30 }
 0x28b   : > { %v2365_v7 = vmin.f32 %v2356_v45, 1e+30  ;;  %v2510_v3 = vadd.f32 %v2509_v50, %v6587_v49  ;;  %v2526_v43 = vadd.f32 %v6645_v30, %v6630_v12  ;;  %v2570_v56 = vadd.f32 %v6696_v1, %v8536_v14  ;;  %v8539_v42 = vld [vmem:[#allocation51_spill] sm:$0xff]  ;;  %v6747_v22 = vld [vmem:[%s4272_s1 + $0xe8] sm:$0xff] }
 0x28c   : > { %v2366_v36 = vmin.f32 %v2358_v24, %v2362_v61  ;;  %v2367_v15 = vmin.f32 %v2359_v37, %v2363_v35  ;;  %v2444_v49 = vsub.f32 %v6701_v18, %v6704_v23  ;;  %v2472_v12 = vmul.f32 %v8538_v60, %v8538_v60  ;;  %8544 = vst [vmem:[#allocation45_spill] sm:$0xff] %v6747_v22  ;;  %v6752_v37 = vld [vmem:[%s4269_s6 + $0xa0] sm:$0xff]  ;;  %v6761_v61 = vld [vmem:[%s4272_s1 + $0xf0] sm:$0xff]  ;;  %v6814_v52 = vld [vmem:[%s4269_s6 + $0x88] sm:$0xff] }
 0x28d   : > { %v2486_v30 = vrot.slane %v2485_v54, 2  ;;  %v2495_v38 = vrot.slane %v2494_v8, 2  ;;  %v2368_v34 = vmin.f32 %v2360_v5, %v2364_v29  ;;  %v2369_v6 = vmin.f32 %v2361_v62, %v2365_v7  ;;  %v6758_v62 = vld [vmem:[%s4269_s6 + $0xf0] sm:$0xff]  ;;  %8545 = vst [vmem:[#allocation44_spill] sm:$0xff] %v6761_v61  ;;  %v6766_v29 = vld [vmem:[%s4269_s6 + $0xf8] sm:$0xff] }
 0x28e   : > { %v2475_v53 = vmul.f32 %v6569_v25, %v6569_v25  ;;  %v2503_v13 = vadd.f32 %v2502_v40, %v2501_v19  ;;  %v2511_v31 = vrot.slane %v2510_v3, 4  ;;  %v2519_v26 = vadd.f32 %v2518_v10, %v6626_v11  ;;  %v8542_v19 = vld [vmem:[#allocation62_spill] sm:$0xff]  ;;  %v6730_v11 = vld [vmem:[%s4269_s6 + $0xe0] sm:$0xff] }
 0x28f   : > { %v2527_v51 = vadd.f32 %v2526_v43, %v2471_v21  ;;  %v2535_v20 = vadd.f32 %v2474_v16, %v2473_v28  ;;  %v8540_v33 = vrot.slane %v8539_v42, 4  ;;  %v6719_v17 = vadd.f32 %v2366_v36, %v6335_v44  ;;  %v6733_v21 = vld [vmem:[%s4272_s1 + $0xe0] sm:$0xff]  ;;  %v6769_v7 = vld [vmem:[%s4272_s1 + $0xf8] sm:$0xff]  ;;  %v6842_v23 = vld [vmem:[%s4269_s6 + $0xb0] sm:$0xff] }
 0x290   : > { %v6722_v57 = vadd.f32 %v2367_v15, %v6338_v32  ;;  %v2571_v25 = vadd.f32 %v6725_v2, %v2570_v56  ;;  %8543 = vst [vmem:[#allocation40_spill] sm:$0xff] %v6733_v21  ;;  %v2445_v28 = vsub.f32 %v6730_v11, %v6733_v21  ;;  %v2487_v44 = vadd.f32 %v2486_v30, %v2485_v54 }
 0x291   : > { %v6716_v59 = vmin.f32 %v8539_v42, %v8540_v33  ;;  %v2496_v16 = vadd.f32 %v2495_v38, %v2494_v8  ;;  %v6738_v46 = vadd.f32 %v2368_v34, %v6341_v47  ;;  %v2373_v48 = vadd.f32 %v2369_v6, %v6344_v4  ;;  %v6744_v8 = vld [vmem:[%s4269_s6 + $0xe8] sm:$0xff]  ;;  %8546 = vst [vmem:[#allocation27_spill] sm:$0xff] %v6769_v7 }
 0x292   : > { %v2476_v55 = vmul.f32 %v2444_v49, %v2444_v49  ;;  %v2504_v41 = vrot.slane %v2503_v13, 2  ;;  %v2512_v40 = vadd.f32 %v2511_v31, %v2510_v3  ;;  %v2520_v50 = vrot.slane %v2519_v26, 4  ;;  %v6779_v6 = vld [vmem:[%s4269_s6 + $0x8] sm:$0xff]  ;;  %8552 = vst [vmem:[#allocation16_spill] sm:$0xff] %v6842_v23 }
 0x293   : > { %8541 = vst [vmem:[#allocation41_spill] sm:$0xff] %v6716_v59  ;;  %v2528_v0 = vadd.f32 %v2527_v51, %v2472_v12  ;;  %v2536_v63 = vadd.f32 %v2535_v20, %v2475_v53  ;;  %v2374_v45 = vrot.slane %v6719_v17, 7  ;;  %v2375_v54 = vrot.slane %v6722_v57, 7  ;;  %v6782_v53 = vld [vmem:[%s4269_s6 + $0x28] sm:$0xff] }
 0x294   : > { %v2446_v24 = vsub.f32 %v6744_v8, %v6747_v22  ;;  %v6755_v5 = vadd.f32 %v6752_v37, %v2571_v25  ;;  %v2447_v35 = vsub.f32 %v6758_v62, %v6761_v61  ;;  %v2448_v3 = vsub.f32 %v6766_v29, %v6769_v7  ;;  %v6838_v7 = vld [vmem:[%s4269_s6 + $0x58] sm:$0xff] }
 0x295   : > { %v2488_v10 = vrot.slane %v2487_v44, 1  ;;  %v2497_v43 = vrot.slane %v2496_v16, 1  ;;  %v2376_v36 = vrot.slane %v6738_v46, 7  ;;  %v2377_v15 = vrot.slane %v2373_v48, 7  ;;  %v6846_v61 = vld [vmem:[%s4269_s6 + $0x78] sm:$0xff] }
 0x296   : > { %v2477_v14 = vmul.f32 %v2445_v28, %v2445_v28  ;;  %v2505_v56 = vadd.f32 %v2504_v41, %v2503_v13  ;;  %v2513_v49 = vrot.slane %v2512_v40, 2  ;;  %v2521_v60 = vadd.f32 %v2520_v50, %v2519_v26  ;;  %v6787_v13 = vld [vmem:[%s4269_s6 + $0x10] sm:$0xff]  ;;  %v8553_v22 = vld [vmem:[#allocation63_spill] sm:$0xff] }
 0x297   : > { %v2529_v12 = vrot.slane %v2528_v0, 4  ;;  %v2537_v30 = vadd.f32 %v2536_v63, %v2476_v55  ;;  %v2378_v38 = vsel %vm8547_vm11, 1e+30, %v2374_v45  ;;  %v2379_v34 = vsel %vm8548_vm12, 1e+30, %v2375_v54  ;;  %v6790_v26 = vld [vmem:[%s4269_s6 + $0x30] sm:$0xff] }
 0x298   : > { %v2575_v31 = vadd.f32 %v6782_v53, %v6779_v6  ;;  %v2582_v51 = vadd.f32 %v6790_v26, %v6787_v13  ;;  %v2478_v20 = vmul.f32 %v2446_v24, %v2446_v24  ;;  %v2479_v42 = vmul.f32 %v2447_v35, %v2447_v35  ;;  %v6799_v55 = vld [vmem:[%s4269_s6 + $0x48] sm:$0xff]  ;;  %v6803_v50 = vld [vmem:[%s4269_s6 + $0x50] sm:$0xff] }
 0x299   : > { %v2489_v33 = vadd.f32 %v2488_v10, %v2487_v44  ;;  %v2498_v25 = vadd.f32 %v2497_v43, %v2496_v16  ;;  %v2380_v28 = vsel %vm8549_vm13, 1e+30, %v2376_v36  ;;  %v2381_v48 = vsel %vm8550_vm14, 1e+30, %v2377_v15  ;;  %v6808_v43 = vld [vmem:[%s4269_s6 + $0x68] sm:$0xff] }
 0x29a   : > { %v2576_v41 = vadd.f32 %v6799_v55, %v2575_v31  ;;  %v2583_v63 = vadd.f32 %v6803_v50, %v2582_v51  ;;  %v2382_v45 = vmin.f32 %v6719_v17, %v2379_v34  ;;  %v2385_v44 = vmin.f32 %v2378_v38, 1e+30 }
 0x29b   : > { %v2506_v16 = vrot.slane %v2505_v56, 1  ;;  %v2522_v54 = vrot.slane %v2521_v60, 2  ;;  %v2514_v24 = vadd.f32 %v2513_v49, %v2512_v40  ;;  %v2530_v35 = vadd.f32 %v2529_v12, %v2528_v0  ;;  %v6818_v0 = vld [vmem:[%s4269_s6 + $0x70] sm:$0xff]  ;;  %v6822_v12 = vld [vmem:[%s4269_s6 + $0x18] sm:$0xff] }
 0x29c   : > { %v2538_v10 = vrot.slane %v2537_v30, 4  ;;  %v2577_v36 = vadd.f32 %v6808_v43, %v2576_v41  ;;  %v2383_v15 = vmin.f32 %v6722_v57, %v2380_v28  ;;  %v2384_v31 = vmin.f32 %v6738_v46, %v2381_v48  ;;  %v6825_v41 = vld [vmem:[%s4269_s6 + $0x38] sm:$0xff]  ;;  %v6830_v48 = vld [vmem:[%s4269_s6 + $0xa8] sm:$0xff] }
 0x29d   : > { %v2386_v51 = vmin.f32 %v2379_v34, 1e+30  ;;  %v2544_v17 = vadd.f32 %v2478_v20, %v2477_v14  ;;  %v2387_v38 = vmin.f32 %v2380_v28, 1e+30  ;;  %v2584_v49 = vadd.f32 %v6818_v0, %v2583_v63  ;;  %8551 = vst [vmem:[#allocation31_spill] sm:$0xff] %v6830_v48 }
 0x29e   : > { %v2578_v40 = vadd.f32 %v6814_v52, %v2577_v36  ;;  %v2589_v57 = vadd.f32 %v6825_v41, %v6822_v12  ;;  %v2388_v46 = vmin.f32 %v2382_v45, %v2385_v44  ;;  %v2480_v14 = vmul.f32 %v2448_v3, %v2448_v3 }
 0x29f   : > { %v2507_v34 = vadd.f32 %v2506_v16, %v2505_v56  ;;  %v2523_v20 = vadd.f32 %v2522_v54, %v2521_v60  ;;  %v2515_v28 = vrot.slane %v2514_v24, 1  ;;  %v2585_v63 = vadd.f32 %v6834_v39, %v2584_v49 }
 0x2a0   : > { %v2579_v36 = vadd.f32 %v6830_v48, %v2578_v40  ;;  %v2590_v45 = vadd.f32 %v6838_v7, %v2589_v57  ;;  %v2531_v3 = vrot.slane %v2530_v35, 2  ;;  %v2539_v44 = vadd.f32 %v2538_v10, %v2537_v30  ;;  %v6854_v57 = vld [vmem:[%s4269_s6 + $0xc0] sm:$0xff] }
 0x2a1   : > { %v2545_v56 = vadd.f32 %v2544_v17, %v2479_v42  ;;  %v2553_v60 = vadd.f32 %v2498_v25, %v2489_v33  ;;  %v2389_v16 = vmin.f32 %v2383_v15, %v2386_v51  ;;  %v2390_v54 = vmin.f32 %v2384_v31, %v2387_v38  ;;  %v6859_v42 = vld [vmem:[%s4269_s6 + $0xc8] sm:$0xff]  ;;  %v6865_v51 = vld [vmem:[%s4269_s6 + $0x98] sm:$0xff] }
 0x2a2   : > { %v2586_v40 = vadd.f32 %v6842_v23, %v2585_v63  ;;  %v2591_v49 = vadd.f32 %v6846_v61, %v2590_v45  ;;  %v624_v21 = vrot.slane %v8553_v22, 2  ;;  %v6851_v48 = vadd.f32 %v2388_v46, %v6338_v32  ;;  %8555 = vst [vmem:[#allocation42_spill] sm:$0xff] %v6859_v42 }
 0x2a3   : > { %v2573_v30 = vadd.f32 %v6854_v57, %v6755_v5  ;;  %v2580_v33 = vadd.f32 %v6859_v42, %v2579_v36  ;;  %v2524_v15 = vrot.slane %v2523_v20, 1  ;;  %v2516_v32 = vadd.f32 %v2515_v28, %v2514_v24  ;;  %v8558_v36 = vld [vmem:[#allocation34_spill] sm:$0xff]  ;;  %v8560_v24 = vld [vmem:[#allocation53_spill] sm:$0xff] }
 0x2a4   : > { %8554 = vst [vmem:[#allocation38_spill] sm:$0xff] %v6851_v48  ;;  %v2587_v31 = vadd.f32 %v6565_v58, %v2586_v40  ;;  %v2592_v17 = vadd.f32 %v6865_v51, %v2591_v49  ;;  %v2532_v38 = vadd.f32 %v2531_v3, %v2530_v35  ;;  %v2540_v46 = vrot.slane %v2539_v44, 2  ;;  %v8563_v28 = vld [vmem:[#allocation54_spill] sm:$0xff] }
 0x2a5   : > { %v2546_v63 = vadd.f32 %v2545_v56, %v2480_v14  ;;  %v6869_v45 = vadd.f32 %v2389_v16, %v6341_v47  ;;  %v2393_v5 = vadd.f32 %v2390_v54, %v6344_v4  ;;  %v2554_v23 = vadd.f32 %v2553_v60, %v2507_v34 }
 0x2a6   : > { %v2593_v42 = vadd.f32 %v8558_v36, %v2592_v17  ;;  %v2394_v40 = vrot.slane %v6851_v48, 7  ;;  %v2574_v58 = vadd.f32 %v6730_v11, %v2573_v30  ;;  %v2581_v49 = vadd.f32 %v6744_v8, %v2580_v33 }
 0x2a7   : > { %8557 = vst [vmem:[#allocation46_spill] sm:$0xff] %v6869_v45  ;;  %v8561_v35 = vrot.slane %v8560_v24, 2  ;;  %v8564_v3 = vrot.slane %v8563_v28, 2  ;;  %v2588_v34 = vadd.f32 %v6758_v62, %v2587_v31  ;;  %v2525_v16 = vadd.f32 %v2524_v15, %v2523_v20 }
 0x2a8   : > { %v2594_v60 = vadd.f32 %v6701_v18, %v2593_v42  ;;  %v2533_v54 = vrot.slane %v2532_v38, 1  ;;  %v6889_v17 = vadd.f32 %v2540_v46, %v2539_v44  ;;  %v2547_v30 = vrot.slane %v2546_v63, 4 }
 0x2a9   : > { %v6880_v14 = vmin.f32 %v8560_v24, %v8561_v35  ;;  %v6885_v56 = vmin.f32 %v8563_v28, %v8564_v3  ;;  %v2395_v33 = vrot.slane %v6869_v45, 7  ;;  %v2396_v25 = vrot.slane %v2393_v5, 7 }
 0x2aa   : > { %8566 = vst [vmem:[#allocation35_spill] sm:$0xff] %v6889_v17  ;;  %v2555_v4 = vadd.f32 %v2554_v23, %v2516_v32  ;;  %v2595_v24 = vadd.f32 %v6766_v29, %v2594_v60  ;;  %v8567_v35 = vrot.slane %v8535_v9, 2  ;;  %v6900_v42 = vsel %vm8569_vm15, 1e+30, %v2394_v40 }
 0x2ab   : > { %8562 = vst [vmem:[#allocation28_spill] sm:$0xff] %v6880_v14  ;;  %8565 = vst [vmem:[#allocation32_spill] sm:$0xff] %v6885_v56  ;;  %v2596_v20 = vmul.f32 0.125, %v2574_v58  ;;  %v6902_v44 = vmul.f32 0.125, %v2581_v49  ;;  %v8571_v15 = vrot.slane %v8542_v19, 2  ;;  %v6910_v31 = vmin.f32 %v8553_v22, %v624_v21  ;;  %v8584_v14 = vld [vmem:[#allocation37_spill] sm:$0xff] }
 0x2ac   : > { %v6896_v28 = vmin.f32 %v8535_v9, %v8567_v35  ;;  %8570 = vst [vmem:[#allocation43_spill] sm:$0xff] %v6900_v42  ;;  %v6913_v32 = vmul.f32 0.125, %v2588_v34  ;;  %v6915_v46 = vadd.f32 %v2533_v54, %v2532_v38  ;;  %v6918_v5 = vadd.f32 %v2547_v30, %v2546_v63  ;;  %v3726_v38 = vld [vmem:[%s4269_s6] sm:$0xff] }
 0x2ad   : > { %v6907_v23 = vmin.f32 %v8542_v19, %v8571_v15  ;;  %8573 = vst [vmem:[#allocation18_spill] sm:$0xff] %v6910_v31  ;;  %v6920_v40 = vmul.f32 0.125, %v2595_v24  ;;  %v6924_v19 = vsel %vm8456_vm0, 1e+30, %v2395_v33  ;;  %v6928_v21 = vsel %vm8577_vm1, 1e+30, %v2396_v25 }
 0x2ae   : > { %8568 = vst [vmem:[#allocation39_spill] sm:$0xff] %v6896_v28  ;;  %8574 = vst [vmem:[#allocation17_spill] sm:$0xff] %v6915_v46  ;;  %v6931_v49 = vadd.f32 %v2555_v4, %v2525_v16  ;;  %v6934_v3 = vsub.f32 %v3726_v38, %v2596_v20  ;;  %v6938_v63 = vsub.f32 %v6779_v6, %v6902_v44  ;;  %v3727_v34 = vld [vmem:[%s4269_s6 + $0x20] sm:$0xff]  ;;  %v8583_v31 = vld [vmem:[#allocation42_spill] sm:$0xff] }
 0x2af   : > { %8572 = vst [vmem:[#allocation47_spill] sm:$0xff] %v6907_v23  ;;  %8575 = vst [vmem:[#allocation19_spill] sm:$0xff] %v6918_v5  ;;  %v6941_v60 = vsub.f32 %v3727_v34, %v2596_v20  ;;  %v3728_v54 = vld [vmem:[%s4269_s6 + $0x40] sm:$0xff]  ;;  %v6948_v25 = vsub.f32 %v6787_v13, %v6913_v32  ;;  %v6952_v4 = vsub.f32 %v6782_v53, %v6902_v44 }
 0x2b0   : > { %8576 = vst [vmem:[#allocation20_spill] sm:$0xff] %v6924_v19  ;;  %8578 = vst [vmem:[#allocation21_spill] sm:$0xff] %v6928_v21  ;;  %v6944_v30 = vsub.f32 %v3728_v54, %v2596_v20  ;;  %v6956_v16 = vsub.f32 %v6790_v26, %v6913_v32  ;;  %v6960_v6 = vsub.f32 %v6799_v55, %v6902_v44 }
 0x2b1   : > { %8579 = vst [vmem:[#allocation29_spill] sm:$0xff] %v6931_v49  ;;  %v6964_v33 = vsub.f32 %v6822_v12, %v6920_v40  ;;  %v6968_v13 = vsub.f32 %v6825_v41, %v6920_v40  ;;  %v6972_v53 = vsub.f32 %v6803_v50, %v6913_v32  ;;  %v6976_v26 = vsub.f32 %v6838_v7, %v6920_v40 }
 0x2b2   : > { %v6983_v12 = vsub.f32 %v6696_v1, %v2596_v20  ;;  %v6986_v41 = vsub.f32 %v6725_v2, %v2596_v20  ;;  %v6990_v50 = vsub.f32 %v6808_v43, %v6902_v44  ;;  %v6994_v7 = vsub.f32 %v6818_v0, %v6913_v32 }
 0x2b3   : > { %v6997_v35 = vsub.f32 %v6752_v37, %v2596_v20  ;;  %v2632_v15 = vmul.f32 %v6941_v60, %v6934_v3  ;;  %v7003_v1 = vsub.f32 %v6846_v61, %v6920_v40  ;;  %v2633_v2 = vmul.f32 %v6952_v4, %v6938_v63 }
 0x2b4   : > { %v2634_v43 = vmul.f32 %v6956_v16, %v6948_v25  ;;  %v2636_v0 = vmul.f32 %v6944_v30, %v6941_v60  ;;  %v2635_v37 = vmul.f32 %v6968_v13, %v6964_v33  ;;  %v2637_v38 = vmul.f32 %v6960_v6, %v6952_v4 }
 0x2b5   : > { %v2638_v34 = vmul.f32 %v6972_v53, %v6956_v16  ;;  %v2639_v61 = vmul.f32 %v6976_v26, %v6968_v13  ;;  %v7021_v54 = vsub.f32 %v6814_v52, %v6902_v44  ;;  %v7024_v9 = vsub.f32 %v6854_v57, %v2596_v20  ;;  %v8581_v52 = vld [vmem:[#allocation31_spill] sm:$0xff]  ;;  %v8582_v57 = vld [vmem:[#allocation16_spill] sm:$0xff] }
 0x2b6   : > { %v7027_v24 = vsub.f32 %v6730_v11, %v2596_v20  ;;  %v2640_v55 = vmul.f32 %v6983_v12, %v6944_v30  ;;  %v7033_v22 = vsub.f32 %v6834_v39, %v6913_v32  ;;  %v7037_v58 = vsub.f32 %v6865_v51, %v6920_v40 }
 0x2b7   : > { %v7041_v27 = vsub.f32 %v8581_v52, %v6902_v44  ;;  %v7045_v23 = vsub.f32 %v8582_v57, %v6913_v32  ;;  %v2641_v11 = vmul.f32 %v6990_v50, %v6960_v6  ;;  %v2642_v20 = vmul.f32 %v6994_v7, %v6972_v53 }
 0x2b8   : > { %8580 = vst [vmem:[#allocation58_spill] sm:$0xff] %v7027_v24  ;;  %v2643_v39 = vmul.f32 %v7003_v1, %v6976_v26  ;;  %v2660_v28 = vadd.f32 %v2636_v0, %v2632_v15  ;;  %v2644_v51 = vmul.f32 %v6986_v41, %v6983_v12  ;;  %v2666_v47 = vadd.f32 %v2637_v38, %v2633_v2 }
 0x2b9   : > { %v2672_v52 = vadd.f32 %v2638_v34, %v2634_v43  ;;  %v2678_v59 = vadd.f32 %v2639_v61, %v2635_v37  ;;  %v7057_v57 = vsub.f32 %v8558_v36, %v6920_v40  ;;  %v7061_v56 = vsub.f32 %v8583_v31, %v6902_v44 }
 0x2ba   : > { %v7065_v49 = vsub.f32 %v8584_v14, %v6913_v32  ;;  %v2661_v46 = vadd.f32 %v2660_v28, %v2640_v55  ;;  %v7069_v15 = vsub.f32 %v6701_v18, %v6920_v40  ;;  %v7073_v2 = vsub.f32 %v6744_v8, %v6902_v44 }
 0x2bb   : > { %v2645_v36 = vmul.f32 %v7021_v54, %v6990_v50  ;;  %v2646_v31 = vmul.f32 %v7033_v22, %v6994_v7  ;;  %v2647_v43 = vmul.f32 %v7037_v58, %v7003_v1  ;;  %v2667_v14 = vadd.f32 %v2666_v47, %v2641_v11 }
 0x2bc   : > { %8585 = vst [vmem:[#allocation59_spill] sm:$0xff] %v7073_v2  ;;  %v2673_v0 = vadd.f32 %v2672_v52, %v2642_v20  ;;  %v2679_v28 = vadd.f32 %v2678_v59, %v2643_v39  ;;  %v7083_v18 = vsub.f32 %v6758_v62, %v6913_v32  ;;  %v7087_v8 = vsub.f32 %v6766_v29, %v6920_v40 }
 0x2bd   : > { %v2648_v44 = vmul.f32 %v6997_v35, %v6986_v41  ;;  %v2662_v55 = vadd.f32 %v2661_v46, %v2644_v51  ;;  %v2649_v37 = vmul.f32 %v7041_v27, %v7021_v54  ;;  %v2650_v47 = vmul.f32 %v7045_v23, %v7033_v22 }
 0x2be   : > { %8586 = vst [vmem:[#allocation60_spill] sm:$0xff] %v7083_v18  ;;  %8587 = vst [vmem:[#allocation30_spill] sm:$0xff] %v7087_v8  ;;  %v2651_v59 = vmul.f32 %v7057_v57, %v7037_v58  ;;  %v2652_v62 = vmul.f32 %v7024_v9, %v6997_v35  ;;  %v2653_v29 = vmul.f32 %v7061_v56, %v7041_v27 }
 0x2bf   : > { %v2654_v32 = vmul.f32 %v7065_v49, %v7045_v23  ;;  %v2655_v46 = vmul.f32 %v7069_v15, %v7057_v57  ;;  %v2684_v40 = vmul.f32 %v6944_v30, %v6934_v3  ;;  %v2668_v38 = vadd.f32 %v2667_v14, %v2645_v36 }
 0x2c0   : > { %v2674_v34 = vadd.f32 %v2673_v0, %v2646_v31  ;;  %v2680_v61 = vadd.f32 %v2679_v28, %v2647_v43  ;;  %v2688_v11 = vmul.f32 %v6983_v12, %v6941_v60  ;;  %v2656_v20 = vmul.f32 %v7027_v24, %v7024_v9 }
 0x2c1   : > { %v2663_v39 = vadd.f32 %v2662_v55, %v2648_v44  ;;  %v2685_v51 = vmul.f32 %v6960_v6, %v6938_v63  ;;  %v2689_v52 = vmul.f32 %v6990_v50, %v6952_v4  ;;  %v2686_v21 = vmul.f32 %v6972_v53, %v6948_v25 }
 0x2c2   : > { %v2687_v36 = vmul.f32 %v6976_v26, %v6964_v33  ;;  %v2690_v31 = vmul.f32 %v6994_v7, %v6956_v16  ;;  %v2691_v43 = vmul.f32 %v7003_v1, %v6968_v13  ;;  %v2657_v14 = vmul.f32 %v7073_v2, %v7061_v56 }
 0x2c3   : > { %v2658_v0 = vmul.f32 %v7083_v18, %v7065_v49  ;;  %v2659_v28 = vmul.f32 %v7087_v8, %v7069_v15  ;;  %v2692_v44 = vmul.f32 %v6986_v41, %v6944_v30  ;;  %v2669_v55 = vadd.f32 %v2668_v38, %v2649_v37 }
 0x2c4   : > { %v2675_v45 = vadd.f32 %v2674_v34, %v2650_v47  ;;  %v2681_v48 = vadd.f32 %v2680_v61, %v2651_v59  ;;  %v2708_v42 = vadd.f32 %v2688_v11, %v2684_v40  ;;  %v2664_v17 = vadd.f32 %v2663_v39, %v2652_v62 }
 0x2c5   : > { %v2693_v10 = vmul.f32 %v7021_v54, %v6960_v6  ;;  %v2694_v5 = vmul.f32 %v7033_v22, %v6972_v53  ;;  %v2713_v19 = vadd.f32 %v2689_v52, %v2685_v51  ;;  %v2695_v18 = vmul.f32 %v7037_v58, %v6976_v26 }
 0x2c6   : > { %v2696_v8 = vmul.f32 %v6997_v35, %v6983_v12  ;;  %v2718_v2 = vadd.f32 %v2690_v31, %v2686_v21  ;;  %v2723_v24 = vadd.f32 %v2691_v43, %v2687_v36  ;;  %v2697_v37 = vmul.f32 %v7041_v27, %v6990_v50 }
 0x2c7   : > { %v2698_v47 = vmul.f32 %v7045_v23, %v6994_v7  ;;  %v2699_v59 = vmul.f32 %v7057_v57, %v7003_v1  ;;  %v2709_v62 = vadd.f32 %v2708_v42, %v2692_v44  ;;  %v2670_v40 = vadd.f32 %v2669_v55, %v2653_v29 }
 0x2c8   : > { %v2676_v38 = vadd.f32 %v2675_v45, %v2654_v32  ;;  %v2682_v34 = vadd.f32 %v2681_v48, %v2655_v46  ;;  %v2700_v61 = vmul.f32 %v7024_v9, %v6986_v41  ;;  %v7147_v11 = vadd.f32 %v2664_v17, %v2656_v20 }
 0x2c9   : > { %v2701_v21 = vmul.f32 %v7061_v56, %v7021_v54  ;;  %v2702_v39 = vmul.f32 %v7065_v49, %v7033_v22  ;;  %v2714_v51 = vadd.f32 %v2713_v19, %v2693_v10  ;;  %v2719_v52 = vadd.f32 %v2718_v2, %v2694_v5 }
 0x2ca   : > { %8588 = vst [vmem:[#allocation55_spill] sm:$0xff] %v7147_v11  ;;  %v2724_v36 = vadd.f32 %v2723_v24, %v2695_v18  ;;  %v2728_v42 = vmul.f32 %v6983_v12, %v6934_v3  ;;  %v2732_v48 = vmul.f32 %v6986_v41, %v6941_v60  ;;  %v2703_v45 = vmul.f32 %v7069_v15, %v7037_v58 }
 0x2cb   : > { %v2710_v17 = vadd.f32 %v2709_v62, %v2696_v8  ;;  %v2729_v29 = vmul.f32 %v6990_v50, %v6938_v63  ;;  %v2733_v32 = vmul.f32 %v7021_v54, %v6952_v4  ;;  %v7163_v46 = vadd.f32 %v2670_v40, %v2657_v14  ;;  %v8593_v62 = vld [vmem:[#allocation59_spill] sm:$0xff] }
 0x2cc   : > { %v7165_v10 = vadd.f32 %v2676_v38, %v2658_v0  ;;  %v7167_v5 = vadd.f32 %v2682_v34, %v2659_v28  ;;  %v2730_v19 = vmul.f32 %v6994_v7, %v6948_v25  ;;  %v2715_v24 = vadd.f32 %v2714_v51, %v2697_v37  ;;  %v8592_v0 = vld [vmem:[#allocation58_spill] sm:$0xff]  ;;  %v8594_v38 = vld [vmem:[#allocation60_spill] sm:$0xff] }
 0x2cd   : > { %8589 = vst [vmem:[#allocation57_spill] sm:$0xff] %v7163_v46  ;;  %v2731_v2 = vmul.f32 %v7003_v1, %v6964_v33  ;;  %v2734_v18 = vmul.f32 %v7033_v22, %v6956_v16  ;;  %v2735_v8 = vmul.f32 %v7037_v58, %v6968_v13  ;;  %v2720_v20 = vadd.f32 %v2719_v52, %v2698_v47  ;;  %v8595_v47 = vld [vmem:[#allocation30_spill] sm:$0xff] }
 0x2ce   : > { %8590 = vst [vmem:[#allocation33_spill] sm:$0xff] %v7165_v10  ;;  %8591 = vst [vmem:[#allocation51_spill] sm:$0xff] %v7167_v5  ;;  %v2725_v31 = vadd.f32 %v2724_v36, %v2699_v59  ;;  %v2736_v43 = vmul.f32 %v6997_v35, %v6944_v30  ;;  %v2748_v14 = vadd.f32 %v2732_v48, %v2728_v42 }
 0x2cf   : > { %v2704_v28 = vmul.f32 %v8592_v0, %v6997_v35  ;;  %v2711_v44 = vadd.f32 %v2710_v17, %v2700_v61  ;;  %v2737_v55 = vmul.f32 %v7041_v27, %v6960_v6  ;;  %v2752_v37 = vadd.f32 %v2733_v32, %v2729_v29 }
 0x2d0   : > { %v2705_v40 = vmul.f32 %v8593_v62, %v7041_v27  ;;  %v2706_v34 = vmul.f32 %v8594_v38, %v7045_v23  ;;  %v2707_v59 = vmul.f32 %v8595_v47, %v7057_v57  ;;  %v2738_v51 = vmul.f32 %v7045_v23, %v6972_v53 }
 0x2d1   : > { %v2716_v52 = vadd.f32 %v2715_v24, %v2701_v21  ;;  %v2739_v61 = vmul.f32 %v7057_v57, %v6976_v26  ;;  %v2756_v36 = vadd.f32 %v2734_v18, %v2730_v19  ;;  %v2760_v42 = vadd.f32 %v2735_v8, %v2731_v2 }
 0x2d2   : > { %v2721_v48 = vadd.f32 %v2720_v20, %v2702_v39  ;;  %v2726_v17 = vadd.f32 %v2725_v31, %v2703_v45  ;;  %v2740_v29 = vmul.f32 %v7024_v9, %v6983_v12  ;;  %v2749_v32 = vadd.f32 %v2748_v14, %v2736_v43 }
 0x2d3   : > { %v7195_v5 = vadd.f32 %v2711_v44, %v2704_v28  ;;  %v2741_v10 = vmul.f32 %v7061_v56, %v6990_v50  ;;  %v2742_v46 = vmul.f32 %v7065_v49, %v6994_v7  ;;  %v2753_v21 = vadd.f32 %v2752_v37, %v2737_v55 }
 0x2d4   : > { %v2764_v24 = vmul.f32 %v6986_v41, %v6934_v3  ;;  %v2765_v39 = vmul.f32 %v7021_v54, %v6938_v63  ;;  %v2768_v45 = vmul.f32 %v6997_v35, %v6941_v60  ;;  %v2769_v19 = vmul.f32 %v7041_v27, %v6952_v4 }
 0x2d5   : > { %8596 = vst [vmem:[#allocation62_spill] sm:$0xff] %v7195_v5  ;;  %v7209_v2 = vadd.f32 %v2716_v52, %v2705_v40  ;;  %v2743_v18 = vmul.f32 %v7069_v15, %v7003_v1  ;;  %v2757_v8 = vadd.f32 %v2756_v36, %v2738_v51  ;;  %v2761_v20 = vadd.f32 %v2760_v42, %v2739_v61 }
 0x2d6   : > { %v2744_v31 = vmul.f32 %v8592_v0, %v6986_v41  ;;  %v2745_v43 = vmul.f32 %v8593_v62, %v7021_v54  ;;  %v2750_v14 = vadd.f32 %v2749_v32, %v2740_v29  ;;  %v2766_v28 = vmul.f32 %v7033_v22, %v6948_v25 }
 0x2d7   : > { %8597 = vst [vmem:[#allocation63_spill] sm:$0xff] %v7209_v2  ;;  %v2754_v44 = vadd.f32 %v2753_v21, %v2741_v10  ;;  %v2767_v55 = vmul.f32 %v7037_v58, %v6964_v33  ;;  %v2770_v37 = vmul.f32 %v7045_v23, %v6956_v16  ;;  %v2771_v40 = vmul.f32 %v7057_v57, %v6968_v13 }
 0x2d8   : > { %v2772_v41 = vmul.f32 %v7024_v9, %v6944_v30  ;;  %v2773_v54 = vmul.f32 %v7061_v56, %v6960_v6  ;;  %v2780_v51 = vadd.f32 %v2768_v45, %v2764_v24  ;;  %v2783_v52 = vadd.f32 %v2769_v19, %v2765_v39 }
 0x2d9   : > { %v2746_v10 = vmul.f32 %v8594_v38, %v7033_v22  ;;  %v2747_v61 = vmul.f32 %v8595_v47, %v7037_v58  ;;  %v2758_v36 = vadd.f32 %v2757_v8, %v2742_v46  ;;  %v2762_v42 = vadd.f32 %v2761_v20, %v2743_v18 }
 0x2da   : > { %v7233_v29 = vadd.f32 %v2721_v48, %v2706_v34  ;;  %v7235_v32 = vadd.f32 %v2726_v17, %v2707_v59  ;;  %v7237_v21 = vadd.f32 %v2750_v14, %v2744_v31  ;;  %v2774_v2 = vmul.f32 %v7065_v49, %v6972_v53  ;;  %v7318_v14 = vld [vmem:[%s4272_s1 + $0x10] sm:$0xff] }
 0x2db   : > { %v7241_v11 = vadd.f32 %v2754_v44, %v2745_v43  ;;  %v2775_v24 = vmul.f32 %v7069_v15, %v6976_v26  ;;  %v2786_v22 = vadd.f32 %v2770_v37, %v2766_v28  ;;  %v2789_v39 = vadd.f32 %v2771_v40, %v2767_v55  ;;  %v7310_v43 = vld [vmem:[%s4272_s1 + $0x8] sm:$0xff]  ;;  %v7321_v28 = vld [vmem:[%s4272_s1 + $0x30] sm:$0xff] }
 0x2dc   : > { %8598 = vst [vmem:[#allocation34_spill] sm:$0xff] %v7233_v29  ;;  %8599 = vst [vmem:[#allocation53_spill] sm:$0xff] %v7235_v32  ;;  %v2776_v58 = vmul.f32 %v8592_v0, %v6983_v12  ;;  %v2777_v46 = vmul.f32 %v8593_v62, %v6990_v50  ;;  %v2781_v34 = vadd.f32 %v2780_v51, %v2772_v41  ;;  %v8613_v37 = vld [vmem:[#allocation57_spill] sm:$0xff]  ;;  %v7330_v41 = vld [vmem:[%s4272_s1 + $0x18] sm:$0xff] }
 0x2dd   : > { %8600 = vst [vmem:[#allocation54_spill] sm:$0xff] %v7237_v21  ;;  %8601 = vst [vmem:[#allocation31_spill] sm:$0xff] %v7241_v11  ;;  %v2784_v59 = vadd.f32 %v2783_v52, %v2773_v54  ;;  %v7249_v48 = vadd.f32 %v2758_v36, %v2746_v10  ;;  %v7251_v17 = vadd.f32 %v2762_v42, %v2747_v61  ;;  %v8614_v40 = vld [vmem:[#allocation33_spill] sm:$0xff]  ;;  %v7333_v54 = vld [vmem:[%s4272_s1 + $0x38] sm:$0xff] }
 0x2de   : > { %v2792_v45 = vmul.f32 %v6997_v35, %v6934_v3  ;;  %v2796_v19 = vmul.f32 %v7024_v9, %v6941_v60  ;;  %v2793_v18 = vmul.f32 %v7041_v27, %v6938_v63  ;;  %v2794_v12 = vmul.f32 %v7045_v23, %v6948_v25  ;;  %v8612_v55 = vld [vmem:[#allocation63_spill] sm:$0xff]  ;;  %v7344_v36 = vld [vmem:[%s4272_s1 + $0x48] sm:$0xff] }
 0x2df   : > { %8602 = vst [vmem:[#allocation16_spill] sm:$0xff] %v7249_v48  ;;  %8603 = vst [vmem:[#allocation42_spill] sm:$0xff] %v7251_v17  ;;  %v2797_v50 = vmul.f32 %v7061_v56, %v6952_v4  ;;  %v2798_v8 = vmul.f32 %v7065_v49, %v6956_v16  ;;  %v2778_v20 = vmul.f32 %v8594_v38, %v6994_v7  ;;  %v8615_v52 = vld [vmem:[#allocation51_spill] sm:$0xff] }
 0x2e0   : > { %v2779_v3 = vmul.f32 %v8595_v47, %v7003_v1  ;;  %v2787_v9 = vadd.f32 %v2786_v22, %v2774_v2  ;;  %v2790_v60 = vadd.f32 %v2789_v39, %v2775_v24  ;;  %v7269_v27 = vadd.f32 %v2781_v34, %v2776_v58  ;;  %v7306_v2 = vld [vmem:[%s4272_s1 + $0x40] sm:$0xff]  ;;  %v7348_v24 = vld [vmem:[%s4272_s1 + $0x50] sm:$0xff]  ;;  %v7352_v39 = vld [vmem:[%s4272_s1 + $0x58] sm:$0xff] }
 0x2e1   : > { %v7271_v63 = vadd.f32 %v2784_v59, %v2777_v46  ;;  %v2795_v56 = vmul.f32 %v7057_v57, %v6964_v33  ;;  %v2799_v23 = vmul.f32 %v7069_v15, %v6968_v13  ;;  %v2800_v49 = vmul.f32 %v8592_v0, %v6944_v30  ;;  %v7288_v13 = vld [vmem:[%s4272_s1] sm:$0xff] }
 0x2e2   : > { %8604 = vst [vmem:[#allocation37_spill] sm:$0xff] %v7269_v27  ;;  %v2801_v25 = vmul.f32 %v8593_v62, %v6960_v6  ;;  %v2802_v4 = vmul.f32 %v8594_v38, %v6972_v53  ;;  %v2804_v16 = vadd.f32 %v2796_v19, %v2792_v45  ;;  %v2806_v7 = vadd.f32 %v2797_v50, %v2793_v18  ;;  %v7291_v30 = vld [vmem:[%s4272_s1 + $0x20] sm:$0xff]  ;;  %v7362_v45 = vld [vmem:[%s4272_s1 + $0x68] sm:$0xff]  ;;  %v7366_v18 = vld [vmem:[%s4272_s1 + $0x70] sm:$0xff] }
 0x2e3   : > { %8605 = vst [vmem:[#allocation58_spill] sm:$0xff] %v7271_v63  ;;  %v2808_v35 = vadd.f32 %v2798_v8, %v2794_v12  ;;  %v7283_v1 = vadd.f32 %v2787_v9, %v2778_v20  ;;  %v7285_v33 = vadd.f32 %v2790_v60, %v2779_v3  ;;  %v2876_v6 = vadd.f32 %v7291_v30, %v7288_v13  ;;  %v8611_v38 = vld [vmem:[#allocation55_spill] sm:$0xff]  ;;  %v7378_v9 = vld [vmem:[%s4272_s1 + $0x88] sm:$0xff] }
 0x2e4   : > { %v2803_v53 = vmul.f32 %v8595_v47, %v6976_v26  ;;  %v7297_v57 = vadd.f32 %v2804_v16, %v2800_v49  ;;  %v2810_v15 = vadd.f32 %v2799_v23, %v2795_v56  ;;  %v7299_v0 = vadd.f32 %v2806_v7, %v2801_v25  ;;  %v7313_v26 = vld [vmem:[%s4272_s1 + $0x28] sm:$0xff]  ;;  %v7340_v10 = vld [vmem:[%s4272_s1 + $0x60] sm:$0xff]  ;;  %v7370_v50 = vld [vmem:[%s4272_s1 + $0x78] sm:$0xff] }
 0x2e5   : > { %8606 = vst [vmem:[#allocation59_spill] sm:$0xff] %v7283_v1  ;;  %8607 = vst [vmem:[#allocation60_spill] sm:$0xff] %v7285_v33  ;;  %v7301_v62 = vadd.f32 %v2808_v35, %v2802_v4  ;;  %3964 = vmaxabs.init.f32.vacc1 %v8611_v38, %v7195_v5  ;;  %v2877_v31 = vadd.f32 %v7306_v2, %v2876_v6  ;;  %v7358_v34 = vld [vmem:[%s4272_s1 + $0x80] sm:$0xff]  ;;  %v7382_v56 = vld [vmem:[%s4272_s1 + $0x90] sm:$0xff] }
 0x2e6   : > { %8608 = vst [vmem:[#allocation30_spill] sm:$0xff] %v7297_v57  ;;  %8609 = vst [vmem:[#allocation66_spill] sm:$0xff] %v7299_v0  ;;  %v2883_v47 = vadd.f32 %v7313_v26, %v7310_v43  ;;  %v2890_v44 = vadd.f32 %v7321_v28, %v7318_v14  ;;  %3960 = vmaxabs.init.f32.vacc3 %v8613_v37, %v8612_v55  ;;  %v7374_v20 = vld [vmem:[%s4272_s1 + $0xa0] sm:$0xff]  ;;  %v7388_v49 = vld [vmem:[%s4272_s1 + $0x98] sm:$0xff] }
 0x2e7   : > { %8610 = vst [vmem:[#allocation67_spill] sm:$0xff] %v7301_v62  ;;  %3956 = vmaxabs.init.f32.vacc0 %v8614_v40, %v7233_v29  ;;  %v2897_v51 = vadd.f32 %v7333_v54, %v7330_v41  ;;  %3952 = vmaxabs.init.f32.vacc2 %v8615_v52, %v7235_v32  ;;  %v2878_v61 = vadd.f32 %v7340_v10, %v2877_v31  ;;  %v7392_v4 = vld [vmem:[%s4272_s1 + $0xc0] sm:$0xff]  ;;  %v7396_v7 = vld [vmem:[%s4272_s1 + $0xa8] sm:$0xff]  ;;  %v7400_v6 = vld [vmem:[%s4272_s1 + $0xb0] sm:$0xff] }
 0x2e8   : > { %v2884_v42 = vadd.f32 %v7344_v36, %v2883_v47  ;;  %v2891_v22 = vadd.f32 %v7348_v24, %v2890_v44  ;;  %v7355_v46 = vadd.f32 %v2810_v15, %v2803_v53  ;;  %3965 = vmaxabs.f32.vacc1 %v7237_v21, %v7269_v27  ;;  %v8617_v15 = vld [vmem:[#allocation20_spill] sm:$0xff]  ;;  %v8626_v32 = vld [vmem:[#allocation35_spill] sm:$0xff]  ;;  %v8633_v29 = vld [vmem:[#allocation21_spill] sm:$0xff] }
 0x2e9   : > { %v2898_v58 = vadd.f32 %v7352_v39, %v2897_v51  ;;  %v2879_v59 = vadd.f32 %v7358_v34, %v2878_v61  ;;  %v2403_v31 = vmin.f32 %v8617_v15, 1e+30  ;;  %3961 = vmaxabs.f32.vacc3 %v7241_v11, %v7271_v63  ;;  %v7409_v47 = vld [vmem:[%s4272_s1 + $0xc8] sm:$0xff]  ;;  %v7413_v51 = vld [vmem:[%s4272_s1 + $0xd0] sm:$0xff] }
 0x2ea   : > { %8616 = vst [vmem:[#allocation68_spill] sm:$0xff] %v7355_v46  ;;  %v2885_v19 = vadd.f32 %v7362_v45, %v2884_v42  ;;  %v2892_v12 = vadd.f32 %v7366_v18, %v2891_v22  ;;  %3957 = vmaxabs.f32.vacc0 %v7249_v48, %v7283_v1  ;;  %v7417_v42 = vld [vmem:[%s4272_s1 + $0xb8] sm:$0xff]  ;;  %3953 = vmaxabs.f32.vacc2 %v7251_v17, %v7285_v33  ;;  %v8638_v55 = vld [vmem:[#allocation44_spill] sm:$0xff]  ;;  %v8644_v37 = vld [vmem:[#allocation41_spill] sm:$0xff] }
 0x2eb   : > { %v2899_v8 = vadd.f32 %v7370_v50, %v2898_v58  ;;  %v2880_v3 = vadd.f32 %v7374_v20, %v2879_v59  ;;  %v8618_v58 = vld [vmem:[#allocation19_spill] sm:$0xff]  ;;  %3966 = vmaxabs.f32.vacc1 %v7297_v57, %v7297_v57  ;;  %v8630_v1 = vld [vmem:[#allocation38_spill] sm:$0xff]  ;;  %3962 = vmaxabs.f32.vacc3 %v7299_v0, %v7299_v0 }
 0x2ec   : > { %v2886_v60 = vadd.f32 %v7378_v9, %v2885_v19  ;;  %v2893_v23 = vadd.f32 %v7382_v56, %v2892_v12  ;;  %v2549_v59 = vrot.slane %v8618_v58, 2  ;;  %v8619_v19 = vld [vmem:[#allocation40_spill] sm:$0xff]  ;;  %v8628_v17 = vld [vmem:[#allocation43_spill] sm:$0xff]  ;;  %v8631_v48 = vmin.f32 %v8630_v1, %v8617_v15 }
 0x2ed   : > { %v2900_v25 = vadd.f32 %v7388_v49, %v2899_v8  ;;  %v2881_v16 = vadd.f32 %v7392_v4, %v2880_v3  ;;  %v8620_v8 = vld [vmem:[#allocation64_spill] sm:$0xff]  ;;  %v3967_v33 = vmovacc.low.even.vacc1  ;;  %3958 = vmaxabs.f32.vacc0 %v7301_v62, %v7301_v62 }
 0x2ee   : > { %v2887_v35 = vadd.f32 %v7396_v7, %v2886_v60  ;;  %v2894_v53 = vadd.f32 %v7400_v6, %v2893_v23  ;;  %v8621_v3 = vrot.slane %v8620_v8, 2  ;;  %v8623_v23 = vld [vmem:[#allocation56_spill] sm:$0xff]  ;;  %3954 = vmaxabs.f32.vacc2 %v7355_v46, %v7355_v46 }
 0x2ef   : > { %v2901_v22 = vadd.f32 %v7417_v42, %v2900_v25  ;;  %v2882_v12 = vadd.f32 %v8619_v19, %v2881_v16  ;;  %v8627_v25 = vrot.slane %v8626_v32, 1  ;;  %v8629_v16 = vmin.f32 %v8628_v17, 1e+30  ;;  %v8637_v17 = vld [vmem:[#allocation45_spill] sm:$0xff] }
 0x2f0   : > { %v2888_v44 = vadd.f32 %v7409_v47, %v2887_v35  ;;  %v2895_v61 = vadd.f32 %v7413_v51, %v2894_v53  ;;  %v7427_v60 = vmin.f32 %v8620_v8, %v8621_v3  ;;  %v8624_v35 = vrot.slane %v8623_v23, 2  ;;  %v8632_v3 = vld [vmem:[#allocation46_spill] sm:$0xff] }
 0x2f1   : > { %v2543_v52 = vadd.f32 %v8627_v25, %v8626_v32  ;;  %v2404_v8 = vmin.f32 %v8631_v48, %v8629_v16  ;;  %v8634_v40 = vmin.f32 %v8632_v3, %v8633_v29  ;;  %v3963_v32 = vmovacc.low.even.vacc3  ;;  %v8639_v48 = vld [vmem:[#allocation36_spill] sm:$0xff] }
 0x2f2   : > { %8622 = vst [vmem:[#allocation20_spill] sm:$0xff] %v7427_v60  ;;  %v7432_v53 = vmin.f32 %v8623_v23, %v8624_v35  ;;  %v8635_v23 = vld [vmem:[#allocation17_spill] sm:$0xff]  ;;  %v3959_v25 = vmovacc.low.even.vacc0  ;;  %v2889_v57 = vadd.f32 %v8637_v17, %v2888_v44  ;;  %v2896_v1 = vadd.f32 %v8638_v55, %v2895_v61 }
 0x2f3   : > { %v2405_v63 = vmin.f32 %v8634_v40, %v2403_v31  ;;  %v8636_v35 = vld [vmem:[#allocation29_spill] sm:$0xff]  ;;  %v2902_v15 = vadd.f32 %v8639_v48, %v2901_v22  ;;  %v7458_v40 = vadd.f32 %v2549_v59, %v8618_v58  ;;  %v3955_v31 = vmovacc.low.even.vacc2  ;;  %v8647_v22 = vld [vmem:[#allocation26_spill] sm:$0xff] }
 0x2f4   : > { %8625 = vst [vmem:[#allocation19_spill] sm:$0xff] %v7432_v53  ;;  %v2557_v11 = vadd.f32 %v8636_v35, %v8635_v23  ;;  %v2904_v3 = vmul.f32 0.125, %v2882_v12  ;;  %v8645_v44 = vrot.slane %v8644_v37, 2  ;;  %3594 = vrcp.f32 %v3967_v33  ;;  %v8649_v58 = vld [vmem:[#allocation25_spill] sm:$0xff]  ;;  %v8652_v12 = vld [vmem:[#allocation27_spill] sm:$0xff] }
 0x2f5   : > { %8641 = vst [vmem:[#allocation40_spill] sm:$0xff] %v7458_v40  ;;  %v7470_v29 = vadd.f32 %v2404_v8, %v8647_v22  ;;  %v7473_v59 = vadd.f32 %v2405_v63, %v8649_v58  ;;  %3596 = vrcp.f32 %v3963_v32  ;;  %v2903_v35 = vadd.f32 %v8652_v12, %v2902_v15 }
 0x2f6   : > { %v7467_v61 = vmin.f32 %v8644_v37, %v8645_v44  ;;  %v7475_v27 = vadd.f32 %v2557_v11, %v2543_v52  ;;  %3598 = vrcp.f32 %v3959_v25  ;;  %v2905_v46 = vmul.f32 0.125, %v2889_v57 }
 0x2f7   : > { %8648 = vst [vmem:[#allocation56_spill] sm:$0xff] %v7470_v29  ;;  %8650 = vst [vmem:[#allocation35_spill] sm:$0xff] %v7473_v59  ;;  %v2906_v0 = vmul.f32 0.125, %v2896_v1  ;;  %3600 = vrcp.f32 %v3955_v31  ;;  %v7480_v37 = vsub.f32 %v7288_v13, %v2904_v3  ;;  %v7483_v33 = vsub.f32 %v7291_v30, %v2904_v3 }
 0x2f8   : > { %8646 = vst [vmem:[#allocation64_spill] sm:$0xff] %v7467_v61  ;;  %8651 = vst [vmem:[#allocation43_spill] sm:$0xff] %v7475_v27  ;;  %v2907_v8 = vmul.f32 0.125, %v2903_v35  ;;  %v7486_v63 = vsub.f32 %v7306_v2, %v2904_v3  ;;  %v7489_v11 = vsub.f32 %v7340_v10, %v2904_v3  ;;  %v7492_v52 = vsub.f32 %v7358_v34, %v2904_v3 }
 0x2f9   : > { %v7495_v57 = vsub.f32 %v7310_v43, %v2905_v46  ;;  %v7498_v32 = vsub.f32 %v7318_v14, %v2906_v0  ;;  %v7501_v13 = vsub.f32 %v7313_v26, %v2905_v46  ;;  %v7504_v30 = vsub.f32 %v7321_v28, %v2906_v0 }
 0x2fa   : > { %8653 = vst [vmem:[#allocation38_spill] sm:$0xff] %v7486_v63  ;;  %v7507_v2 = vsub.f32 %v7330_v41, %v2907_v8  ;;  %v7510_v10 = vsub.f32 %v7344_v36, %v2905_v46  ;;  %v7513_v34 = vsub.f32 %v7348_v24, %v2906_v0  ;;  %v7516_v43 = vsub.f32 %v7362_v45, %v2905_v46 }
 0x2fb   : > { %v7519_v14 = vsub.f32 %v7333_v54, %v2907_v8  ;;  %v7522_v26 = vsub.f32 %v7352_v39, %v2907_v8  ;;  %v7525_v28 = vsub.f32 %v7366_v18, %v2906_v0  ;;  %v7528_v41 = vsub.f32 %v7370_v50, %v2907_v8 }
 0x2fc   : > { %v7531_v36 = vsub.f32 %v7378_v9, %v2905_v46  ;;  %v7534_v24 = vsub.f32 %v7382_v56, %v2906_v0  ;;  %v7537_v45 = vsub.f32 %v7388_v49, %v2907_v8  ;;  %v7540_v54 = vsub.f32 %v7374_v20, %v2904_v3 }
 0x2fd   : > { %v7543_v39 = vsub.f32 %v7396_v7, %v2905_v46  ;;  %v7546_v18 = vsub.f32 %v7400_v6, %v2906_v0  ;;  %v7549_v50 = vsub.f32 %v7417_v42, %v2907_v8  ;;  %v7552_v9 = vsub.f32 %v7392_v4, %v2904_v3 }
 0x2fe   : > { %8654 = vst [vmem:[#allocation46_spill] sm:$0xff] %v7540_v54  ;;  %v7554_v56 = vpop.eup %3594  ;;  %v7557_v49 = vsub.f32 %v7409_v47, %v2905_v46  ;;  %v7560_v20 = vsub.f32 %v7413_v51, %v2906_v0  ;;  %v7563_v7 = vsub.f32 %v8639_v48, %v2907_v8  ;;  %v7566_v6 = vsub.f32 %v8619_v19, %v2904_v3 }
 0x2ff   : > { %8655 = vst [vmem:[#allocation21_spill] sm:$0xff] %v7543_v39  ;;  %8656 = vst [vmem:[#allocation17_spill] sm:$0xff] %v7546_v18  ;;  %v7568_v25 = vpop.eup %3596  ;;  %v7571_v42 = vsub.f32 %v8637_v17, %v2905_v46  ;;  %v7574_v4 = vsub.f32 %v8638_v55, %v2906_v0  ;;  %v7577_v47 = vsub.f32 %v8652_v12, %v2907_v8 }
 0x300   : > { %8657 = vst [vmem:[#allocation29_spill] sm:$0xff] %v7549_v50  ;;  %8658 = vst [vmem:[#allocation45_spill] sm:$0xff] %v7552_v9  ;;  %v2940_v51 = vmul.f32 %v7483_v33, %v7480_v37  ;;  %v7581_v1 = vpop.eup %3598  ;;  %v2941_v19 = vmul.f32 %v7501_v13, %v7495_v57  ;;  %v2942_v48 = vmul.f32 %v7504_v30, %v7498_v32 }
 0x301   : > { %8659 = vst [vmem:[#allocation44_spill] sm:$0xff] %v7554_v56  ;;  %8660 = vst [vmem:[#allocation36_spill] sm:$0xff] %v7557_v49  ;;  %v2943_v46 = vmul.f32 %v7519_v14, %v7507_v2  ;;  %v2944_v0 = vmul.f32 %v7486_v63, %v7483_v33  ;;  %v7591_v55 = vpop.eup %3600  ;;  %v2945_v17 = vmul.f32 %v7510_v10, %v7501_v13 }
 0x302   : > { %8661 = vst [vmem:[#allocation41_spill] sm:$0xff] %v7560_v20  ;;  %8662 = vst [vmem:[#allocation26_spill] sm:$0xff] %v7566_v6  ;;  %v2946_v15 = vmul.f32 %v7513_v34, %v7504_v30  ;;  %v2947_v31 = vmul.f32 %v7522_v26, %v7519_v14  ;;  %v2948_v3 = vmul.f32 %v7489_v11, %v7486_v63 }
 0x303   : > { %8663 = vst [vmem:[#allocation27_spill] sm:$0xff] %v7568_v25  ;;  %8664 = vst [vmem:[#allocation69_spill] sm:$0xff] %v7581_v1  ;;  %v2949_v35 = vmul.f32 %v7516_v43, %v7510_v10  ;;  %v2950_v44 = vmul.f32 %v7525_v28, %v7513_v34  ;;  %v2951_v22 = vmul.f32 %v7528_v41, %v7522_v26 }
 0x304   : > { %8665 = vst [vmem:[#allocation70_spill] sm:$0xff] %v7591_v55  ;;  %v2952_v12 = vmul.f32 %v7492_v52, %v7489_v11  ;;  %v2953_v8 = vmul.f32 %v7531_v36, %v7516_v43  ;;  %v2954_v21 = vmul.f32 %v7534_v24, %v7525_v28  ;;  %v2955_v58 = vmul.f32 %v7537_v45, %v7528_v41 }
 0x305   : > { %v2956_v55 = vmul.f32 %v7540_v54, %v7492_v52  ;;  %v2957_v1 = vmul.f32 %v7543_v39, %v7531_v36  ;;  %v2958_v25 = vmul.f32 %v7546_v18, %v7534_v24  ;;  %v2959_v5 = vmul.f32 %v7549_v50, %v7537_v45 }
 0x306   : > { %v2960_v56 = vmul.f32 %v7552_v9, %v7540_v54  ;;  %v2961_v38 = vmul.f32 %v7557_v49, %v7543_v39  ;;  %v2962_v23 = vmul.f32 %v7560_v20, %v7546_v18  ;;  %v2963_v27 = vmul.f32 %v7563_v7, %v7549_v50 }
 0x307   : > { %v2964_v62 = vmul.f32 %v7566_v6, %v7552_v9  ;;  %v2968_v16 = vadd.f32 %v2944_v0, %v2940_v51  ;;  %v2974_v61 = vadd.f32 %v2945_v17, %v2941_v19  ;;  %v2980_v53 = vadd.f32 %v2946_v15, %v2942_v48 }
 0x308   : > { %v2986_v60 = vadd.f32 %v2947_v31, %v2943_v46  ;;  %v2965_v59 = vmul.f32 %v7571_v42, %v7557_v49  ;;  %v2966_v29 = vmul.f32 %v7574_v4, %v7560_v20  ;;  %v2967_v40 = vmul.f32 %v7577_v47, %v7563_v7 }
 0x309   : > { %v2992_v18 = vmul.f32 %v7486_v63, %v7480_v37  ;;  %v2969_v50 = vadd.f32 %v2968_v16, %v2948_v3  ;;  %v2975_v39 = vadd.f32 %v2974_v61, %v2949_v35  ;;  %v2981_v54 = vadd.f32 %v2980_v53, %v2950_v44 }
 0x30a   : > { %v2987_v6 = vadd.f32 %v2986_v60, %v2951_v22  ;;  %v2993_v51 = vmul.f32 %v7510_v10, %v7495_v57  ;;  %v2994_v19 = vmul.f32 %v7513_v34, %v7498_v32  ;;  %v2995_v48 = vmul.f32 %v7522_v26, %v7507_v2 }
 0x30b   : > { %v2996_v46 = vmul.f32 %v7489_v11, %v7483_v33  ;;  %v2970_v0 = vadd.f32 %v2969_v50, %v2952_v12  ;;  %v2976_v17 = vadd.f32 %v2975_v39, %v2953_v8  ;;  %v2982_v15 = vadd.f32 %v2981_v54, %v2954_v21  ;;  %v8666_v39 = vld [vmem:[#allocation46_spill] sm:$0xff] }
 0x30c   : > { %v2988_v31 = vadd.f32 %v2987_v6, %v2955_v58  ;;  %v2997_v53 = vmul.f32 %v7516_v43, %v7501_v13  ;;  %v2998_v60 = vmul.f32 %v7525_v28, %v7504_v30  ;;  %v2999_v16 = vmul.f32 %v7528_v41, %v7519_v14 }
 0x30d   : > { %v3000_v61 = vmul.f32 %v7492_v52, %v7486_v63  ;;  %v2971_v3 = vadd.f32 %v2970_v0, %v2956_v55  ;;  %v2977_v35 = vadd.f32 %v2976_v17, %v2957_v1  ;;  %v2983_v44 = vadd.f32 %v2982_v15, %v2958_v25  ;;  %v8667_v1 = vld [vmem:[#allocation21_spill] sm:$0xff] }
 0x30e   : > { %v2989_v22 = vadd.f32 %v2988_v31, %v2959_v5  ;;  %v3001_v21 = vmul.f32 %v7531_v36, %v7510_v10  ;;  %v3002_v58 = vmul.f32 %v7534_v24, %v7513_v34  ;;  %v3003_v54 = vmul.f32 %v7537_v45, %v7522_v26  ;;  %v8668_v5 = vld [vmem:[#allocation17_spill] sm:$0xff] }
 0x30f   : > { %v3004_v50 = vmul.f32 %v8666_v39, %v7489_v11  ;;  %v2972_v6 = vadd.f32 %v2971_v3, %v2960_v56  ;;  %v2978_v12 = vadd.f32 %v2977_v35, %v2961_v38  ;;  %v2984_v8 = vadd.f32 %v2983_v44, %v2962_v23  ;;  %v8669_v0 = vld [vmem:[#allocation29_spill] sm:$0xff]  ;;  %v8674_v44 = vld [vmem:[#allocation26_spill] sm:$0xff] }
 0x310   : > { %v2990_v63 = vadd.f32 %v2989_v22, %v2963_v27  ;;  %v3005_v25 = vmul.f32 %v8667_v1, %v7516_v43  ;;  %v3006_v55 = vmul.f32 %v8668_v5, %v7525_v28  ;;  %v3007_v17 = vmul.f32 %v8669_v0, %v7528_v41 }
 0x311   : > { %v3008_v15 = vmul.f32 %v7552_v9, %v7492_v52  ;;  %v7673_v31 = vadd.f32 %v2972_v6, %v2964_v62  ;;  %v3009_v56 = vmul.f32 %v7557_v49, %v7531_v36  ;;  %v3010_v27 = vmul.f32 %v7560_v20, %v7534_v24 }
 0x312   : > { %v3011_v38 = vmul.f32 %v7563_v7, %v7537_v45  ;;  %v7681_v23 = vadd.f32 %v2978_v12, %v2965_v59  ;;  %v7683_v3 = vadd.f32 %v2984_v8, %v2966_v29  ;;  %v7685_v35 = vadd.f32 %v2990_v63, %v2967_v40 }
 0x313   : > { %8670 = vst [vmem:[#allocation46_spill] sm:$0xff] %v7673_v31  ;;  %v3012_v22 = vmul.f32 %v8674_v44, %v8666_v39  ;;  %v3016_v62 = vadd.f32 %v2996_v46, %v2992_v18  ;;  %v3021_v6 = vadd.f32 %v2997_v53, %v2993_v51  ;;  %v3026_v31 = vadd.f32 %v2998_v60, %v2994_v19 }
 0x314   : > { %8671 = vst [vmem:[#allocation21_spill] sm:$0xff] %v7681_v23  ;;  %8672 = vst [vmem:[#allocation17_spill] sm:$0xff] %v7683_v3  ;;  %v3031_v9 = vadd.f32 %v2999_v16, %v2995_v48  ;;  %v3013_v49 = vmul.f32 %v7571_v42, %v8667_v1  ;;  %v3014_v20 = vmul.f32 %v7574_v4, %v8668_v5 }
 0x315   : > { %8673 = vst [vmem:[#allocation29_spill] sm:$0xff] %v7685_v35  ;;  %v3015_v59 = vmul.f32 %v7577_v47, %v8669_v0  ;;  %v3036_v29 = vmul.f32 %v7489_v11, %v7480_v37  ;;  %v3017_v40 = vadd.f32 %v3016_v62, %v3000_v61  ;;  %v3022_v63 = vadd.f32 %v3021_v6, %v3001_v21 }
 0x316   : > { %v3027_v12 = vadd.f32 %v3026_v31, %v3002_v58  ;;  %v3032_v8 = vadd.f32 %v3031_v9, %v3003_v54  ;;  %v3037_v18 = vmul.f32 %v7516_v43, %v7495_v57  ;;  %v3038_v51 = vmul.f32 %v7525_v28, %v7498_v32  ;;  %v8675_v58 = vld [vmem:[#allocation38_spill] sm:$0xff] }
 0x317   : > { %v3039_v19 = vmul.f32 %v7528_v41, %v7507_v2  ;;  %v3040_v48 = vmul.f32 %v7492_v52, %v7483_v33  ;;  %v3018_v46 = vadd.f32 %v3017_v40, %v3004_v50  ;;  %v3023_v53 = vadd.f32 %v3022_v63, %v3005_v25  ;;  %v8676_v40 = vld [vmem:[#allocation45_spill] sm:$0xff] }
 0x318   : > { %v3028_v60 = vadd.f32 %v3027_v12, %v3006_v55  ;;  %v3033_v16 = vadd.f32 %v3032_v8, %v3007_v17  ;;  %v3041_v61 = vmul.f32 %v7531_v36, %v7501_v13  ;;  %v3042_v9 = vmul.f32 %v7534_v24, %v7504_v30  ;;  %v8678_v8 = vld [vmem:[#allocation36_spill] sm:$0xff] }
 0x319   : > { %v3043_v21 = vmul.f32 %v7537_v45, %v7519_v14  ;;  %v3044_v54 = vmul.f32 %v8666_v39, %v8675_v58  ;;  %v3019_v31 = vadd.f32 %v3018_v46, %v3008_v15  ;;  %v3024_v62 = vadd.f32 %v3023_v53, %v3009_v56  ;;  %v8679_v56 = vld [vmem:[#allocation41_spill] sm:$0xff] }
 0x31a   : > { %v3029_v6 = vadd.f32 %v3028_v60, %v3010_v27  ;;  %v3045_v50 = vmul.f32 %v8667_v1, %v7510_v10  ;;  %v3034_v25 = vadd.f32 %v3033_v16, %v3011_v38  ;;  %v3046_v55 = vmul.f32 %v8668_v5, %v7513_v34 }
 0x31b   : > { %v3047_v17 = vmul.f32 %v8669_v0, %v7522_v26  ;;  %v3048_v63 = vmul.f32 %v8676_v40, %v7489_v11  ;;  %v7721_v12 = vadd.f32 %v3019_v31, %v3012_v22  ;;  %v3049_v15 = vmul.f32 %v8678_v8, %v7516_v43 }
 0x31c   : > { %v3050_v27 = vmul.f32 %v8679_v56, %v7525_v28  ;;  %v3051_v38 = vmul.f32 %v7563_v7, %v7528_v41  ;;  %v7729_v46 = vadd.f32 %v3024_v62, %v3013_v49  ;;  %v7731_v53 = vadd.f32 %v3029_v6, %v3014_v20 }
 0x31d   : > { %8677 = vst [vmem:[#allocation26_spill] sm:$0xff] %v7721_v12  ;;  %v3052_v60 = vmul.f32 %v8674_v44, %v7492_v52  ;;  %v3053_v22 = vmul.f32 %v7571_v42, %v7531_v36  ;;  %v3056_v16 = vadd.f32 %v3040_v48, %v3036_v29  ;;  %v3060_v31 = vadd.f32 %v3041_v61, %v3037_v18 }
 0x31e   : > { %8680 = vst [vmem:[#allocation38_spill] sm:$0xff] %v7729_v46  ;;  %8681 = vst [vmem:[#allocation45_spill] sm:$0xff] %v7731_v53  ;;  %v3064_v35 = vadd.f32 %v3042_v9, %v3038_v51  ;;  %v3068_v3 = vadd.f32 %v3043_v21, %v3039_v19  ;;  %v3054_v23 = vmul.f32 %v7574_v4, %v7534_v24 }
 0x31f   : > { %v3072_v12 = vmul.f32 %v7492_v52, %v7480_v37  ;;  %v3073_v49 = vmul.f32 %v7531_v36, %v7495_v57  ;;  %v3074_v20 = vmul.f32 %v7534_v24, %v7498_v32  ;;  %v3057_v62 = vadd.f32 %v3056_v16, %v3044_v54 }
 0x320   : > { %v3061_v6 = vadd.f32 %v3060_v31, %v3045_v50  ;;  %v3065_v53 = vadd.f32 %v3064_v35, %v3046_v55  ;;  %v3069_v46 = vadd.f32 %v3068_v3, %v3047_v17  ;;  %v3075_v29 = vmul.f32 %v7537_v45, %v7507_v2 }
 0x321   : > { %v3076_v18 = vmul.f32 %v8666_v39, %v7483_v33  ;;  %v3077_v51 = vmul.f32 %v8667_v1, %v7501_v13  ;;  %v3078_v52 = vmul.f32 %v8668_v5, %v7504_v30  ;;  %v3058_v36 = vadd.f32 %v3057_v62, %v3048_v63  ;;  %v8689_v62 = vld [vmem:[#allocation40_spill] sm:$0xff] }
 0x322   : > { %v3062_v19 = vadd.f32 %v3061_v6, %v3049_v15  ;;  %v3066_v48 = vadd.f32 %v3065_v53, %v3050_v27  ;;  %v3079_v24 = vmul.f32 %v8669_v0, %v7519_v14  ;;  %v7755_v35 = vadd.f32 %v3034_v25, %v3015_v59 }
 0x323   : > { %v3055_v3 = vmul.f32 %v7577_v47, %v7537_v45  ;;  %v3070_v61 = vadd.f32 %v3069_v46, %v3051_v38  ;;  %v3080_v9 = vmul.f32 %v8676_v40, %v8675_v58  ;;  %v7761_v21 = vadd.f32 %v3058_v36, %v3052_v60 }
 0x324   : > { %v3081_v54 = vmul.f32 %v8678_v8, %v7510_v10  ;;  %v3082_v50 = vmul.f32 %v8679_v56, %v7513_v34  ;;  %v3083_v55 = vmul.f32 %v7563_v7, %v7522_v26  ;;  %v7769_v59 = vadd.f32 %v3062_v19, %v3053_v22 }
 0x325   : > { %v7771_v25 = vadd.f32 %v3066_v48, %v3054_v23  ;;  %v3084_v45 = vmul.f32 %v8674_v44, %v7489_v11  ;;  %v3085_v17 = vmul.f32 %v7571_v42, %v7516_v43  ;;  %v3088_v63 = vadd.f32 %v3076_v18, %v3072_v12  ;;  %v8686_v31 = vld [vmem:[#allocation45_spill] sm:$0xff]  ;;  %v8691_v18 = vld [vmem:[#allocation56_spill] sm:$0xff] }
 0x326   : > { %v3091_v15 = vadd.f32 %v3077_v51, %v3073_v49  ;;  %v3094_v27 = vadd.f32 %v3078_v52, %v3074_v20  ;;  %v3097_v38 = vadd.f32 %v3079_v24, %v3075_v29  ;;  %v3086_v46 = vmul.f32 %v7574_v4, %v7525_v28  ;;  %v8687_v49 = vld [vmem:[#allocation17_spill] sm:$0xff]  ;;  %v8692_v52 = vld [vmem:[#allocation35_spill] sm:$0xff] }
 0x327   : > { %v3100_v53 = vmul.f32 %v8666_v39, %v7480_v37  ;;  %v3101_v23 = vmul.f32 %v8667_v1, %v7495_v57  ;;  %v3102_v60 = vmul.f32 %v8668_v5, %v7498_v32  ;;  %v3089_v11 = vadd.f32 %v3088_v63, %v3080_v9  ;;  %v8688_v20 = vld [vmem:[#allocation29_spill] sm:$0xff]  ;;  %v8693_v24 = vld [vmem:[#allocation39_spill] sm:$0xff] }
 0x328   : > { %v3092_v22 = vadd.f32 %v3091_v15, %v3081_v54  ;;  %v3095_v16 = vadd.f32 %v3094_v27, %v3082_v50  ;;  %v3103_v43 = vmul.f32 %v8669_v0, %v7507_v2  ;;  %v3104_v12 = vmul.f32 %v8676_v40, %v7483_v33  ;;  %v8697_v15 = vld [vmem:[#allocation64_spill] sm:$0xff] }
 0x329   : > { %v3105_v28 = vmul.f32 %v8678_v8, %v7501_v13  ;;  %v3106_v37 = vmul.f32 %v8679_v56, %v7504_v30  ;;  %v3107_v57 = vmul.f32 %v7563_v7, %v7519_v14  ;;  %v7795_v39 = vadd.f32 %v3070_v61, %v3055_v3  ;;  %v8694_v61 = vld [vmem:[#allocation47_spill] sm:$0xff] }
 0x32a   : > { %v3087_v32 = vmul.f32 %v7577_v47, %v7528_v41  ;;  %v7799_v1 = vadd.f32 %v3089_v11, %v3084_v45  ;;  %v3098_v2 = vadd.f32 %v3097_v38, %v3083_v55  ;;  %v3108_v33 = vmul.f32 %v8674_v44, %v8675_v58  ;;  %v8695_v55 = vld [vmem:[#allocation20_spill] sm:$0xff] }
 0x32b   : > { %v3109_v13 = vmul.f32 %v7571_v42, %v7510_v10  ;;  %v3110_v30 = vmul.f32 %v7574_v4, %v7513_v34  ;;  %v3111_v14 = vmul.f32 %v7577_v47, %v7522_v26  ;;  %v3112_v7 = vadd.f32 %v3104_v12, %v3100_v53  ;;  %v8682_v42 = vld [vmem:[#allocation26_spill] sm:$0xff]  ;;  %v8685_v47 = vld [vmem:[#allocation21_spill] sm:$0xff]  ;;  %v8698_v38 = vld [vmem:[#allocation28_spill] sm:$0xff] }
 0x32c   : > { %v3114_v5 = vadd.f32 %v3105_v28, %v3101_v23  ;;  %v3116_v0 = vadd.f32 %v3106_v37, %v3102_v60  ;;  %v3118_v40 = vadd.f32 %v3107_v57, %v3103_v43  ;;  %v7809_v41 = vadd.f32 %v3092_v22, %v3085_v17  ;;  %v8683_v26 = vld [vmem:[#allocation46_spill] sm:$0xff]  ;;  %v8696_v17 = vld [vmem:[#allocation19_spill] sm:$0xff] }
 0x32d   : > { %v7811_v8 = vadd.f32 %v3095_v16, %v3086_v46  ;;  %v7813_v56 = vadd.f32 %v3098_v2, %v3087_v32  ;;  %v7815_v44 = vadd.f32 %v3112_v7, %v3108_v33  ;;  %3948 = vmaxabs.init.f32.vacc1 %v8683_v26, %v8682_v42  ;;  %v8684_v4 = vld [vmem:[#allocation38_spill] sm:$0xff]  ;;  %v8704_v22 = vld [vmem:[#allocation43_spill] sm:$0xff] }
 0x32e   : > { %v7817_v58 = vadd.f32 %v3114_v5, %v3109_v13  ;;  %v7819_v10 = vadd.f32 %v3116_v0, %v3110_v30  ;;  %v7821_v34 = vadd.f32 %v3118_v40, %v3111_v14  ;;  %3944 = vmaxabs.init.f32.vacc3 %v8685_v47, %v8684_v4  ;;  %v8701_v23 = vld [vmem:[#allocation18_spill] sm:$0xff]  ;;  %v8714_v30 = vld [vmem:[#allocation32_spill] sm:$0xff] }
 0x32f   : > { %3940 = vmaxabs.init.f32.vacc0 %v8687_v49, %v8686_v31  ;;  %3936 = vmaxabs.init.f32.vacc2 %v8688_v20, %v7755_v35  ;;  %3949 = vmaxabs.f32.vacc1 %v7761_v21, %v7799_v1  ;;  %v8690_v6 = vrot.slane %v8689_v62, 1  ;;  %v8738_v28 = vld [vmem:[#allocation42_spill] sm:$0xff] }
 0x330   : > { %3945 = vmaxabs.f32.vacc3 %v7769_v59, %v7809_v41  ;;  %v2408_v51 = vrot.slane %v8691_v18, 7  ;;  %v2409_v36 = vrot.slane %v8692_v52, 7  ;;  %v608_v3 = vrot.slane %v8693_v24, 1  ;;  %v8740_v52 = vld [vmem:[#allocation30_spill] sm:$0xff] }
 0x331   : > { %v2552_v29 = vadd.f32 %v8690_v6, %v8689_v62  ;;  %3941 = vmaxabs.f32.vacc0 %v7771_v25, %v7811_v8  ;;  %3937 = vmaxabs.f32.vacc2 %v7795_v39, %v7813_v56  ;;  %3950 = vmaxabs.f32.vacc1 %v7815_v44, %v7815_v44 }
 0x332   : > { %3946 = vmaxabs.f32.vacc3 %v7817_v58, %v7817_v58  ;;  %v617_v9 = vrot.slane %v8694_v61, 1  ;;  %v635_v45 = vrot.slane %v8695_v55, 1  ;;  %v644_v63 = vrot.slane %v8696_v17, 1 }
 0x333   : > { %v3951_v19 = vmovacc.low.even.vacc1  ;;  %3942 = vmaxabs.f32.vacc0 %v7819_v10, %v7819_v10  ;;  %3938 = vmaxabs.f32.vacc2 %v7821_v34, %v7821_v34  ;;  %v653_v27 = vrot.slane %v8697_v15, 1 }
 0x334   : > { %v3947_v48 = vmovacc.low.even.vacc3  ;;  %v8699_v46 = vrot.slane %v8698_v38, 1  ;;  %v8702_v60 = vrot.slane %v8701_v23, 1  ;;  %v7868_v16 = vadd.f32 %v8704_v22, %v2552_v29  ;;  %v8731_v22 = vld [vmem:[#allocation69_spill] sm:$0xff] }
 0x335   : > { %v3943_v54 = vmovacc.low.even.vacc0  ;;  %v3939_v50 = vmovacc.low.even.vacc2  ;;  %3602 = vrcp.f32 %v3951_v19  ;;  %v7874_v57 = vsel %vm8708_vm2, 1e+30, %v2408_v51  ;;  %v8721_v19 = vld [vmem:[#allocation44_spill] sm:$0xff]  ;;  %v8737_v29 = vld [vmem:[#allocation53_spill] sm:$0xff] }
 0x336   : > { %v7860_v53 = vmin.f32 %v8698_v38, %v8699_v46  ;;  %v7865_v11 = vmin.f32 %v8701_v23, %v8702_v60  ;;  %3604 = vrcp.f32 %v3947_v48  ;;  %8709 = vst [vmem:[#allocation26_spill] sm:$0xff] %v7874_v57  ;;  %v7878_v32 = vsel %vm8710_vm3, 1e+30, %v2409_v36  ;;  %v8720_v36 = vld [vmem:[#allocation55_spill] sm:$0xff]  ;;  %v8729_v46 = vld [vmem:[#allocation58_spill] sm:$0xff]  ;;  %v8730_v60 = vld [vmem:[#allocation33_spill] sm:$0xff] }
 0x337   : > { %8711 = vst [vmem:[#allocation46_spill] sm:$0xff] %v7878_v32  ;;  %3606 = vrcp.f32 %v3943_v54  ;;  %v8715_v14 = vrot.slane %v8714_v30, 1  ;;  %v7888_v5 = vmin.f32 %v8693_v24, %v608_v3  ;;  %v7891_v0 = vmin.f32 %v8694_v61, %v617_v9  ;;  %v8722_v24 = vld [vmem:[#allocation62_spill] sm:$0xff]  ;;  %v8724_v54 = vld [vmem:[#allocation37_spill] sm:$0xff] }
 0x338   : > { %8700 = vst [vmem:[#allocation36_spill] sm:$0xff] %v7860_v53  ;;  %8703 = vst [vmem:[#allocation41_spill] sm:$0xff] %v7865_v11  ;;  %3608 = vrcp.f32 %v3939_v50  ;;  %v7894_v40 = vmin.f32 %v8695_v55, %v635_v45  ;;  %v7897_v62 = vmin.f32 %v8696_v17, %v644_v63  ;;  %v7900_v6 = vmin.f32 %v8697_v15, %v653_v27  ;;  %v8723_v61 = vld [vmem:[#allocation54_spill] sm:$0xff]  ;;  %v8725_v55 = vld [vmem:[#allocation57_spill] sm:$0xff] }
 0x339   : > { %v7885_v7 = vmin.f32 %v8714_v30, %v8715_v14  ;;  %8716 = vst [vmem:[#allocation38_spill] sm:$0xff] %v7888_v5  ;;  %8717 = vst [vmem:[#allocation21_spill] sm:$0xff] %v7891_v0  ;;  %3610 = vrsqrt.f32 %v7868_v16  ;;  %v2856_v48 = vmul.f32 %v8721_v19, %v8720_v36  ;;  %v2860_v3 = vmul.f32 %v8721_v19, %v8722_v24  ;;  %v8726_v45 = vld [vmem:[#allocation27_spill] sm:$0xff]  ;;  %v8732_v30 = vld [vmem:[#allocation34_spill] sm:$0xff] }
 0x33a   : > { %8718 = vst [vmem:[#allocation45_spill] sm:$0xff] %v7897_v62  ;;  %8719 = vst [vmem:[#allocation17_spill] sm:$0xff] %v7900_v6  ;;  %v7914_v9 = vmul.f32 %v8721_v19, %v8723_v61  ;;  %v7918_v50 = vmul.f32 %v8721_v19, %v8724_v54  ;;  %v2857_v17 = vmul.f32 %v8726_v45, %v8725_v55  ;;  %v8727_v63 = vld [vmem:[#allocation63_spill] sm:$0xff]  ;;  %v8733_v36 = vld [vmem:[#allocation16_spill] sm:$0xff]  ;;  %vm2562_vm4 = vcmp.eq.f32.partialorder %v7868_v16, inf }
 0x33b   : > { %v2861_v15 = vmul.f32 %v8726_v45, %v8727_v63  ;;  %v8728_v27 = vld [vmem:[#allocation31_spill] sm:$0xff]  ;;  %v7928_v23 = vmul.f32 %v8726_v45, %v8729_v46  ;;  %v2858_v37 = vmul.f32 %v8731_v22, %v8730_v60  ;;  %v2862_v14 = vmul.f32 %v8731_v22, %v8732_v30  ;;  %v8736_v63 = vld [vmem:[#allocation70_spill] sm:$0xff]  ;;  %v8739_v60 = vld [vmem:[#allocation60_spill] sm:$0xff] }
 0x33c   : > { %v2865_v38 = vmul.f32 %v8726_v45, %v8728_v27  ;;  %v2866_v24 = vmul.f32 %v8731_v22, %v8733_v36  ;;  %v8734_v61 = vld [vmem:[#allocation59_spill] sm:$0xff]  ;;  %v2863_v46 = vmul.f32 %v8736_v63, %v8737_v29  ;;  %v2867_v13 = vmul.f32 %v8736_v63, %v8738_v28  ;;  %v8743_v29 = vld [vmem:[#allocation68_spill] sm:$0xff] }
 0x33d   : > { %v7938_v54 = vmul.f32 %v8731_v22, %v8734_v61  ;;  %v8735_v55 = vld [vmem:[#allocation51_spill] sm:$0xff]  ;;  %v7948_v51 = vmul.f32 %v8736_v63, %v8739_v60  ;;  %v7952_v36 = vmul.f32 %v8721_v19, %v8740_v52  ;;  %v8741_v61 = vld [vmem:[#allocation66_spill] sm:$0xff]  ;;  %v7964_v28 = vmul.f32 %v8736_v63, %v8743_v29 }
 0x33e   : > { %v2859_v27 = vmul.f32 %v8736_v63, %v8735_v55  ;;  %v7956_v11 = vmul.f32 %v8726_v45, %v8741_v61  ;;  %v8742_v55 = vld [vmem:[#allocation67_spill] sm:$0xff]  ;;  %vm2564_vm5 = vcmp.eq.f32.partialorder %v7868_v16, 0.0 }
 0x33f   : > { %v3603_v30 = vpop.eup %3602  ;;  %v7960_v53 = vmul.f32 %v8731_v22, %v8742_v55 }
 0x340   : > { %v3605_v43 = vpop.eup %3604  ;;  %v3164_v60 = vmul.f32 %v3603_v30, %v8683_v26  ;;  %v3168_v12 = vmul.f32 %v3603_v30, %v8682_v42  ;;  %v3172_v52 = vmul.f32 %v3603_v30, %v7761_v21  ;;  %v3176_v19 = vmul.f32 %v3603_v30, %v7799_v1 }
 0x341   : > { %v3607_v2 = vpop.eup %3606  ;;  %v3165_v45 = vmul.f32 %v3605_v43, %v8685_v47  ;;  %v3169_v61 = vmul.f32 %v3605_v43, %v8684_v4  ;;  %v3173_v22 = vmul.f32 %v3605_v43, %v7769_v59  ;;  %v3177_v55 = vmul.f32 %v3605_v43, %v7809_v41 }
 0x342   : > { %v3609_v63 = vpop.eup %3608  ;;  %v3166_v29 = vmul.f32 %v3607_v2, %v8687_v49  ;;  %v3170_v26 = vmul.f32 %v3607_v2, %v8686_v31  ;;  %v3174_v42 = vmul.f32 %v3607_v2, %v7771_v25  ;;  %v3178_v21 = vmul.f32 %v3607_v2, %v7811_v8 }
 0x343   : > { %v3167_v1 = vmul.f32 %v3609_v63, %v8688_v20  ;;  %v3171_v33 = vmul.f32 %v3609_v63, %v7755_v35  ;;  %v3175_v47 = vmul.f32 %v3609_v63, %v7795_v39  ;;  %v3179_v4 = vmul.f32 %v3609_v63, %v7813_v56  ;;  %v3611_v59 = vpop.eup %3610 }
 0x344   : > { %v3180_v41 = vmul.f32 %v3603_v30, %v7815_v44  ;;  %v3181_v0 = vmul.f32 %v3605_v43, %v7817_v58  ;;  %v3182_v49 = vmul.f32 %v3607_v2, %v7819_v10  ;;  %v3183_v31 = vmul.f32 %v3609_v63, %v7821_v34 }
 0x345   : > { %v3184_v25 = vsub.f32 %v2856_v48, %v3164_v60  ;;  %v3185_v6 = vsub.f32 %v2857_v17, %v3165_v45  ;;  %v3186_v8 = vsub.f32 %v2858_v37, %v3166_v29  ;;  %v3187_v5 = vsub.f32 %v2859_v27, %v3167_v1 }
 0x346   : > { %v3202_v20 = vsub.f32 %v2860_v3, %v3168_v12  ;;  %v3203_v62 = vsub.f32 %v2861_v15, %v3169_v61  ;;  %v3204_v35 = vsub.f32 %v2862_v14, %v3170_v26  ;;  %v3205_v32 = vsub.f32 %v2863_v46, %v3171_v33 }
 0x347   : > { %v3188_v39 = vand.u32 2147483647, %v3184_v25  ;;  %v3189_v18 = vand.u32 2147483647, %v3185_v6  ;;  %v3190_v56 = vand.u32 2147483647, %v3186_v8  ;;  %v3220_v57 = vsub.f32 %v7914_v9, %v3172_v52 }
 0x348   : > { %v3191_v44 = vand.u32 2147483647, %v3187_v5  ;;  %v3206_v30 = vand.u32 2147483647, %v3202_v20  ;;  %v3207_v58 = vand.u32 2147483647, %v3203_v62  ;;  %v3221_v43 = vsub.f32 %v2865_v38, %v3173_v22 }
 0x349   : > { %v3192_v10 = vadd.f32 %v3189_v18, %v3188_v39  ;;  %v3208_v2 = vand.u32 2147483647, %v3204_v35  ;;  %v3209_v34 = vand.u32 2147483647, %v3205_v32  ;;  %v3222_v48 = vsub.f32 %v2866_v24, %v3174_v42  ;;  %v8747_v25 = vld [vmem:[#allocation46_spill] sm:$0xff] }
 0x34a   : > { %v3210_v17 = vadd.f32 %v3207_v58, %v3206_v30  ;;  %v3223_v37 = vsub.f32 %v2867_v13, %v3175_v47  ;;  %v3224_v27 = vand.u32 2147483647, %v3220_v57  ;;  %v3225_v12 = vand.u32 2147483647, %v3221_v43 }
 0x34b   : > { %v3193_v3 = vadd.f32 %v3192_v10, %v3190_v56  ;;  %v3226_v15 = vand.u32 2147483647, %v3222_v48  ;;  %v3238_v33 = vsub.f32 %v7918_v50, %v3176_v19  ;;  %v3239_v6 = vsub.f32 %v7928_v23, %v3177_v55  ;;  %v8749_v10 = vld [vmem:[#allocation45_spill] sm:$0xff] }
 0x34c   : > { %v3211_v14 = vadd.f32 %v3210_v17, %v3208_v2  ;;  %v3227_v9 = vand.u32 2147483647, %v3223_v37  ;;  %v3228_v5 = vadd.f32 %v3225_v12, %v3224_v27  ;;  %v3240_v62 = vsub.f32 %v7938_v54, %v3178_v21  ;;  %v8750_v2 = vld [vmem:[#allocation38_spill] sm:$0xff]  ;;  %v8751_v48 = vld [vmem:[#allocation17_spill] sm:$0xff] }
 0x34d   : > { %v3194_v38 = vadd.f32 %v3193_v3, %v3191_v44  ;;  %v3241_v18 = vsub.f32 %v7948_v51, %v3179_v4  ;;  %v3242_v32 = vand.u32 2147483647, %v3238_v33  ;;  %v3243_v24 = vand.u32 2147483647, %v3239_v6  ;;  %v8752_v17 = vld [vmem:[#allocation21_spill] sm:$0xff] }
 0x34e   : > { %v3212_v46 = vadd.f32 %v3211_v14, %v3209_v34  ;;  %v3229_v13 = vadd.f32 %v3228_v5, %v3226_v15  ;;  %v3244_v57 = vand.u32 2147483647, %v3240_v62  ;;  %v3256_v60 = vsub.f32 %v7952_v36, %v3180_v41  ;;  %v8753_v3 = vld [vmem:[#allocation25_spill] sm:$0xff] }
 0x34f   : > { %v3195_v52 = vrot.slane %v3194_v38, 4  ;;  %v3245_v45 = vand.u32 2147483647, %v3241_v18  ;;  %v3246_v50 = vadd.f32 %v3243_v24, %v3242_v32  ;;  %v3257_v23 = vsub.f32 %v7956_v11, %v3181_v0  ;;  %v8755_v18 = vld [vmem:[#allocation50_spill] sm:$0xff] }
 0x350   : > { %v3213_v19 = vrot.slane %v3212_v46, 4  ;;  %v3230_v61 = vadd.f32 %v3229_v13, %v3227_v9  ;;  %v3258_v22 = vsub.f32 %v7960_v53, %v3182_v49  ;;  %v3259_v54 = vsub.f32 %v7964_v28, %v3183_v31  ;;  %v8744_v28 = vld [vmem:[#allocation26_spill] sm:$0xff]  ;;  %v8746_v31 = vld [vmem:[#allocation56_spill] sm:$0xff] }
 0x351   : > { %v3196_v55 = vadd.f32 %v3195_v52, %v3194_v38  ;;  %v3247_v51 = vadd.f32 %v3246_v50, %v3244_v57  ;;  %v3260_v63 = vand.u32 2147483647, %v3256_v60  ;;  %v3261_v29 = vand.u32 2147483647, %v3257_v23  ;;  %v8754_v38 = vld [vmem:[#allocation23_spill] sm:$0xff]  ;;  %v8757_v24 = vld [vmem:[#allocation22_spill] sm:$0xff] }
 0x352   : > { %v2561_v26 = vmul.f32 %v3611_v59, %v7868_v16  ;;  %v3214_v42 = vadd.f32 %v3213_v19, %v3212_v46  ;;  %v3231_v21 = vrot.slane %v3230_v61, 4  ;;  %v3262_v36 = vand.u32 2147483647, %v3258_v22  ;;  %v8758_v46 = vld [vmem:[#allocation49_spill] sm:$0xff]  ;;  %v8760_v60 = vld [vmem:[#allocation48_spill] sm:$0xff] }
 0x353   : > { %v3197_v1 = vrot.slane %v3196_v55, 2  ;;  %v3248_v47 = vadd.f32 %v3247_v51, %v3245_v45  ;;  %v3263_v4 = vand.u32 2147483647, %v3259_v54  ;;  %v3264_v41 = vadd.f32 %v3261_v29, %v3260_v63  ;;  %v8761_v52 = vld [vmem:[#allocation52_spill] sm:$0xff]  ;;  %v8764_v23 = vld [vmem:[#allocation61_spill] sm:$0xff] }
 0x354   : > { %v656_v11 = vmin.f32 %v7885_v7, %v7894_v40  ;;  %v3215_v53 = vrot.slane %v3214_v42, 2  ;;  %v3232_v0 = vadd.f32 %v3231_v21, %v3230_v61  ;;  %v8745_v49 = vmin.f32 %v8744_v28, 1e+30  ;;  %v8763_v50 = vld [vmem:[#allocation24_spill] sm:$0xff] }
 0x355   : > { %v8748_v8 = vmin.f32 %v8746_v31, %v8747_v25  ;;  %v3198_v20 = vadd.f32 %v3197_v1, %v3196_v55  ;;  %v3249_v35 = vrot.slane %v3248_v47, 4  ;;  %v3265_v39 = vadd.f32 %v3264_v41, %v3262_v36  ;;  %v8767_v55 = vld [vmem:[#allocation41_spill] sm:$0xff] }
 0x356   : > { %v2565_v56 = vand.u32 2147483648, %v7868_v16  ;;  %v3216_v44 = vadd.f32 %v3215_v53, %v3214_v42  ;;  %v3233_v30 = vrot.slane %v3232_v0, 2  ;;  %v2563_v7 = vsel %vm2562_vm4, %v7868_v16, %v2561_v26  ;;  %v8766_v16 = vld [vmem:[#allocation36_spill] sm:$0xff] }
 0x357   : > { %v2414_v59 = vmin.f32 %v8748_v8, %v8745_v49  ;;  %v3199_v40 = vrot.slane %v3198_v20, 1  ;;  %v3250_v58 = vadd.f32 %v3249_v35, %v3248_v47  ;;  %v3266_v43 = vadd.f32 %v3265_v39, %v3263_v4 }
 0x358   : > { %v657_v34 = vmin.f32 %v8750_v2, %v8749_v10  ;;  %v658_v37 = vmin.f32 %v8752_v17, %v8751_v48  ;;  %v3217_v27 = vrot.slane %v3216_v44, 1  ;;  %v3234_v12 = vadd.f32 %v3233_v30, %v3232_v0 }
 0x359   : > { %v2415_v15 = vadd.f32 %v2414_v59, %v8753_v3  ;;  %v3200_v33 = vadd.f32 %v3199_v40, %v3198_v20  ;;  %v3251_v6 = vrot.slane %v3250_v58, 2  ;;  %v3267_v14 = vrot.slane %v3266_v43, 4 }
 0x35a   : > { %v2566_v9 = vsel %vm2564_vm5, %v2565_v56, %v2563_v7  ;;  %v3218_v5 = vadd.f32 %v3217_v27, %v3216_v44  ;;  %v3235_v62 = vrot.slane %v3234_v12, 1  ;;  %v8756_v32 = vmin.f32 %v8754_v38, %v8755_v18 }
 0x35b   : > { %v8759_v13 = vmin.f32 %v8757_v24, %v8758_v46  ;;  %v8762_v45 = vmin.f32 %v8760_v60, %v8761_v52  ;;  %v8765_v19 = vmin.f32 %v8763_v50, %v8764_v23  ;;  %v3252_v22 = vadd.f32 %v3251_v6, %v3250_v58 }
 0x35c   : > { %v3268_v54 = vadd.f32 %v3267_v14, %v3266_v43  ;;  %v8768_v51 = vmin.f32 %v8766_v16, %v8767_v55  ;;  %v660_v29 = vmin.f32 %v657_v34, %v658_v37  ;;  %v3219_v26 = vadd.f32 %v3218_v5, %v3200_v33 }
 0x35d   : > { %v516_v57 = vmin.f32 %v8759_v13, %v8756_v32  ;;  %v517_v61 = vmin.f32 %v8765_v19, %v8762_v45  ;;  %v3236_v42 = vadd.f32 %v3235_v62, %v3234_v12  ;;  %v2416_v21 = vand.u32 2147483647, %v2415_v15 }
 0x35e   : > { %v659_v63 = vmin.f32 %v8768_v51, %v656_v11  ;;  %v2567_v36 = vmul.f32 0.125, %v2566_v9  ;;  %v3253_v1 = vrot.slane %v3252_v22, 1  ;;  %v3269_v47 = vrot.slane %v3268_v54, 2 }
 0x35f   : > { %v3237_v4 = vadd.f32 %v3236_v42, %v3219_v26  ;;  %v518_v0 = vmin.f32 %v516_v57, %v517_v61  ;;  %v3274_v25 = vmul.f32 0.4, %v2416_v21 }
 0x360   : > { %v3254_v41 = vadd.f32 %v3253_v1, %v3252_v22  ;;  %v3270_v53 = vadd.f32 %v3269_v47, %v3268_v54  ;;  %v661_v28 = vmin.f32 %v659_v63, %v660_v29  ;;  %v3275_v8 = vmul.f32 0.4, %v2567_v36 }
 0x362   : > { %v3255_v49 = vadd.f32 %v3254_v41, %v3237_v4  ;;  %v3271_v31 = vrot.slane %v3270_v53, 1  ;;  %v662_v59 = vmul.f32 %v661_v28, %v518_v0  ;;  %v3276_v35 = vadd.f32 %v3275_v8, %v3274_v25 }
 0x364   : > { %v3272_v11 = vadd.f32 %v3271_v31, %v3270_v53  ;;  %vm3279_vm6 = vcmp.gt.f32.partialorder %v662_v59, 0.5 }
 0x366   : > { %v3273_v20 = vadd.f32 %v3272_v11, %v3255_v49 }
 0x368   : > { %v3277_v39 = vmul.f32 0.2, %v3273_v20 }
 0x36a   : > { %v3278_v56 = vadd.f32 %v3277_v39, %v3276_v35 }
 0x36c   : > { %v3280_v44 = vsel %vm3279_vm6, 0.0, %v3278_v56 }
 0x36d   : > { %3281 = vst [vmem:[%s327_s20 - $0x7] sm:$0x80] %v3280_v44 }
 0x36e   : > { %3889 = shalt.err (!%p3886_p7)
}
 0x36f   : > { %s3890_s14 = scalar_lea.hbm %s8034_s24, 16  ;;  %s3894_s28 = scalar_lea.hbm %s8082_s4, 32 }
 0x370   : > { %p3891_p2 = scmp.ne.s32.totalorder %s8034_s24, %s3890_s14  ;;  %p3895_p12 = scmp.lt.u32.totalorder %s8034_s24, %s8082_s4 }
 0x371   : > { %p3896_p3 = scmp.lt.u32.totalorder %s3894_s28, %s3890_s14  ;;  %p3898_p13 = scmp.lt.u32.totalorder %s3890_s14, %s8034_s24 }
 0x372   : > { %p3892_p8 = pnand %p3891_p2, %p8769_p0 }
 0x373   : > { %p3897_p6 = por %p3896_p3, %p3895_p12 }
 0x374   : > { %p3893_p9 = pneg %p3892_p8 }
 0x375   : > { %p3899_p5 = por %p3898_p13, %p3897_p6 }
 0x377   : > { %p3900_p10 = pnand %p3899_p5, %p3893_p9 }
 0x379   : > { %3903 = shalt.err (!%p3900_p10)
}
 0x37a   : > { %3454 = dma.vmem_to_hbm [thread:$0]  (%p8769_p0), %s8036_s29, 16, %s8034_s24, %s3283_s9  }
 0x37b PF: > { %s3307_s11 = sand.u32 1, %s3970_s15   ;;  %p8770_p11 = scmp.ne.s32.totalorder %s8270_s27, 0 }
 0x37c   : > { %p8771_p1 = scmp.ge.s32.totalorder %s3982_s18, 2  ;;  %s3308_s6 = scalar_lea.sflag [#allocation4], %s3307_s11 }
 0x37e   : > { %p3470_p4 = pnand %p8771_p1, %p8770_p11 }
 0x380   : > { %3933 = dma.done.wait (!%p3470_p4), %s3308_s6, 16  }
 0x381   : > { %3935 = vsyncadd (!%p3470_p4), %s3308_s6, 4294967280  ;;  %s8772_s13 = sld [smem:[#allocation15_spill]]  ;;  %p23_p7 = scmp.ge.s32.totalorder %s4044_s21, 4  }
 0x382   : > { %s8773_s15 = smov %s3974_s16  ;;  %s8774_s16 = smov %s3978_s17 }
 0x383   : > { %s8776_s18 = smov %s4044_s21  ;;  %25 = sbr.rel (!%p23_p7) target bundleno = 12 (0xc), region = 118 }
 0x387   : > { %s8775_s17 = smov %s8772_s13 }
 0x38a   :  { %3312 = vsyncpa [#allocation3], 1 }
 0x38b   :  { %3314 = vsyncpa [#allocation3 + $0x1], 1 }
 0x38c   :  { %3315 = vsyncpa [#allocation6], 1 }
 0x38d   :  { %3317 = vsyncpa [#allocation6 + $0x1], 1 }
 0x38e   :  { %3318 = vsyncpa [#allocation9], 1 }
 0x38f   :  { %3320 = vsyncpa [#allocation9 + $0x1], 1 }
 0x390   :  { %3321 = vsyncpa [#allocation4], 1 }
 0x391   :  { %3323 = vsyncpa [#allocation4 + $0x1], 1 }

</bundles_post_ra>
